<compile_context>
chip_gen: v6e
topology: v6e:2x2x1
jax: 0.10.0
libtpu: 0.0.40
codegen_flags: <defaults>
</compile_context>

<pallas_src>
import jax
import jax.numpy as jnp
from jax import lax
from jax.experimental import pallas as pl
from jax.experimental.pallas import tpu as pltpu

# --- constants from OctreeTracing / OctreeVisModel __init__ ---------------
SDF_THRESHOLD = 5e-5      # OctreeTracing(sdf_threshold=5e-05)
MAX_ITER = 32             # OctreeVisModel: self.ray_tracer.sdf_octree.max_iter = 32
SPHERE_RADIUS = 0.5       # analytic SDF stand-in living inside the [-1,1]^3 octree box
FAR_T = 4.0               # > box diagonal -> ray considered a miss beyond this
SUBLANES = 8              # rays per sublane column (dense packing)
TILE_N = 2048             # lanes per grid step -> 8 * 2048 = 16384 rays per step


def _cast_kernel(b_ref, q_ref, hit_ref):
    """Sphere-trace a dense tile of rays against an analytic sphere SDF.

    b_ref  : (8, TILE_N) f32, per-ray b = o . d_hat
    q_ref  : (8, TILE_N) f32, per-ray q = |o|^2 - b^2 (squared ray-to-center distance)
    hit_ref: (8, TILE_N) f32, 1.0 where the ray hits the surface, else 0.0
    """
    # TODO(synk): OctreeSDF.cast (octree traversal of a learned sdf_fn) has no clean
    # in-kernel equivalent; sphere tracing against an analytic sphere SDF (radius 0.5
    # inside the [-1,1]^3 octree box) stands in for it.
    q = q_ref[...]                       # loop constant (16 vregs)
    u0 = b_ref[...]                      # u = t + b; t starts at 0  ->  u0 = b

    # sdf(t) = sqrt((t+b)^2 + q) - R = sqrt(u*u + q) - R
    # classic sphere-tracing step: t += sdf  <=>  u += sdf
    def body(_, u):
        return (u - SPHERE_RADIUS) + jnp.sqrt(u * u + q)

    u = lax.fori_loop(0, MAX_ITER, body, u0, unroll=True)

    s = jnp.sqrt(u * u + q) - SPHERE_RADIUS          # final SDF value
    t = u - b_ref[...]                               # marched distance
    hit = (jnp.abs(s) < SDF_THRESHOLD) & (t >= 0.0) & (t <= FAR_T)
    hit_ref[...] = hit.astype(jnp.float32)           # single dense full-block store


def octree_vis_forward(points, view_dirs):
    """JAX/Pallas equivalent of OctreeVisModel.forward(points, view_dirs) -> (N, 2)."""
    assert points.shape == view_dirs.shape and points.shape[-1] == 3
    n = points.shape[0]

    o = points.astype(jnp.float32)
    d = view_dirs.astype(jnp.float32)
    # unit directions (same clamp style as intersect_sphere); demo dirs are already unit
    d = d / jnp.clip(jnp.linalg.norm(d, axis=-1, keepdims=True), 1e-4)

    b = jnp.sum(o * d, axis=-1)                       # (N,)
    c = jnp.sum(o * o, axis=-1)                       # (N,)
    q = jnp.maximum(c - b * b, 0.0)                   # (N,), >= 0 up to f32 rounding

    rays_per_tile = SUBLANES * TILE_N
    n_tiles = pl.cdiv(n, rays_per_tile)
    n_pad = n_tiles * rays_per_tile

    def pack(x):                                      # dense (8*n_tiles, TILE_N) slab
        return jnp.pad(x, (0, n_pad - n)).reshape(n_tiles * SUBLANES, TILE_N)

    hit = pl.pallas_call(
        _cast_kernel,
        out_shape=jax.ShapeDtypeStruct((n_tiles * SUBLANES, TILE_N), jnp.float32),
        grid_spec=pltpu.PrefetchScalarGridSpec(
            num_scalar_prefetch=0,
            grid=(n_tiles,),                          # >=2 steps for any sizable N (v7x megacore)
            in_specs=[
                pl.BlockSpec((SUBLANES, TILE_N), lambda i: (i, 0)),
                pl.BlockSpec((SUBLANES, TILE_N), lambda i: (i, 0)),
            ],
            out_specs=pl.BlockSpec((SUBLANES, TILE_N), lambda i: (i, 0)),
        ),
        compiler_params=pltpu.CompilerParams(
            dimension_semantics=("parallel",)),
    )(pack(b), pack(q))

    hit_flat = hit.reshape(-1)[:n]
    # (N, 2) float — matches torch.stack([is_hit, ~is_hit], dim=-1).float()
    return jnp.stack([hit_flat, 1.0 - hit_flat], axis=-1)


if __name__ == "__main__":
    key = jax.random.PRNGKey(0)
    k1, k2 = jax.random.split(key)

    N = 256  # number of rays (points near a surface + outgoing view dirs)
    # deterministic example inputs: points on a shell of radius 1.5 ...
    pts = jax.random.normal(k1, (N, 3), dtype=jnp.float32)
    pts = pts / jnp.linalg.norm(pts, axis=-1, keepdims=True) * 1.5
    # ... view dirs roughly toward the origin (so some rays hit, some miss)
    dirs = -pts / 1.5 + 0.4 * jax.random.normal(k2, (N, 3), dtype=jnp.float32)
    dirs = dirs / jnp.linalg.norm(dirs, axis=-1, keepdims=True)

    out = octree_vis_forward(pts, dirs)
    jax.block_until_ready(out)
    assert out.shape == (N, 2) and out.dtype == jnp.float32
    # rows are one-hot: is_hit + not_hit == 1 everywhere
    assert bool(jnp.all(jnp.abs(out.sum(-1) - 1.0) < 1e-6))
    print("KERNEL_OK")
</pallas_src>

<mosaic_0001>
module attributes {stable_mosaic.version = 11 : i64} {
  func.func @_cast_kernel(%arg0: i32, %arg1: memref<8x2048xf32, #tpu.memory_space<vmem>>, %arg2: memref<8x2048xf32, #tpu.memory_space<vmem>>, %arg3: memref<8x2048xf32, #tpu.memory_space<vmem>>) attributes {dimension_semantics = [#tpu.dimension_semantics<parallel>], iteration_bounds = array<i64: 1>, scalar_prefetch = 0 : i64, scratch_operands = 0 : i64, tpu.core_type = #tpu.core_type<tc>, window_params = [{transform_indices = @transform_0, window_bounds = array<i64: 8, 2048>}, {transform_indices = @transform_1, window_bounds = array<i64: 8, 2048>}, {transform_indices = @transform_2, window_bounds = array<i64: 8, 2048>}]} {
    %c0 = arith.constant 0 : index
    %c0_0 = arith.constant 0 : index
    %0 = vector.load %arg2[%c0, %c0_0] : memref<8x2048xf32, #tpu.memory_space<vmem>>, vector<8x2048xf32>
    %c0_1 = arith.constant 0 : index
    %c0_2 = arith.constant 0 : index
    %1 = vector.load %arg1[%c0_1, %c0_2] : memref<8x2048xf32, #tpu.memory_space<vmem>>, vector<8x2048xf32>
    %c0_i32 = arith.constant 0 : i32
    %cst = arith.constant 5.000000e-01 : f32
    %2 = vector.broadcast %cst : f32 to vector<8x2048xf32>
    %3 = arith.subf %1, %2 : vector<8x2048xf32>
    %4 = arith.mulf %1, %1 : vector<8x2048xf32>
    %5 = arith.addf %4, %0 : vector<8x2048xf32>
    %6 = math.sqrt %5 : vector<8x2048xf32>
    %7 = arith.addf %3, %6 : vector<8x2048xf32>
    %c1_i32 = arith.constant 1 : i32
    %cst_3 = arith.constant 5.000000e-01 : f32
    %8 = vector.broadcast %cst_3 : f32 to vector<8x2048xf32>
    %9 = arith.subf %7, %8 : vector<8x2048xf32>
    %10 = arith.mulf %7, %7 : vector<8x2048xf32>
    %11 = arith.addf %10, %0 : vector<8x2048xf32>
    %12 = math.sqrt %11 : vector<8x2048xf32>
    %13 = arith.addf %9, %12 : vector<8x2048xf32>
    %c2_i32 = arith.constant 2 : i32
    %cst_4 = arith.constant 5.000000e-01 : f32
    %14 = vector.broadcast %cst_4 : f32 to vector<8x2048xf32>
    %15 = arith.subf %13, %14 : vector<8x2048xf32>
    %16 = arith.mulf %13, %13 : vector<8x2048xf32>
    %17 = arith.addf %16, %0 : vector<8x2048xf32>
    %18 = math.sqrt %17 : vector<8x2048xf32>
    %19 = arith.addf %15, %18 : vector<8x2048xf32>
    %c3_i32 = arith.constant 3 : i32
    %cst_5 = arith.constant 5.000000e-01 : f32
    %20 = vector.broadcast %cst_5 : f32 to vector<8x2048xf32>
    %21 = arith.subf %19, %20 : vector<8x2048xf32>
    %22 = arith.mulf %19, %19 : vector<8x2048xf32>
    %23 = arith.addf %22, %0 : vector<8x2048xf32>
    %24 = math.sqrt %23 : vector<8x2048xf32>
    %25 = arith.addf %21, %24 : vector<8x2048xf32>
    %c4_i32 = arith.constant 4 : i32
    %cst_6 = arith.constant 5.000000e-01 : f32
    %26 = vector.broadcast %cst_6 : f32 to vector<8x2048xf32>
    %27 = arith.subf %25, %26 : vector<8x2048xf32>
    %28 = arith.mulf %25, %25 : vector<8x2048xf32>
    %29 = arith.addf %28, %0 : vector<8x2048xf32>
    %30 = math.sqrt %29 : vector<8x2048xf32>
    %31 = arith.addf %27, %30 : vector<8x2048xf32>
    %c5_i32 = arith.constant 5 : i32
    %cst_7 = arith.constant 5.000000e-01 : f32
    %32 = vector.broadcast %cst_7 : f32 to vector<8x2048xf32>
    %33 = arith.subf %31, %32 : vector<8x2048xf32>
    %34 = arith.mulf %31, %31 : vector<8x2048xf32>
    %35 = arith.addf %34, %0 : vector<8x2048xf32>
    %36 = math.sqrt %35 : vector<8x2048xf32>
    %37 = arith.addf %33, %36 : vector<8x2048xf32>
    %c6_i32 = arith.constant 6 : i32
    %cst_8 = arith.constant 5.000000e-01 : f32
    %38 = vector.broadcast %cst_8 : f32 to vector<8x2048xf32>
    %39 = arith.subf %37, %38 : vector<8x2048xf32>
    %40 = arith.mulf %37, %37 : vector<8x2048xf32>
    %41 = arith.addf %40, %0 : vector<8x2048xf32>
    %42 = math.sqrt %41 : vector<8x2048xf32>
    %43 = arith.addf %39, %42 : vector<8x2048xf32>
    %c7_i32 = arith.constant 7 : i32
    %cst_9 = arith.constant 5.000000e-01 : f32
    %44 = vector.broadcast %cst_9 : f32 to vector<8x2048xf32>
    %45 = arith.subf %43, %44 : vector<8x2048xf32>
    %46 = arith.mulf %43, %43 : vector<8x2048xf32>
    %47 = arith.addf %46, %0 : vector<8x2048xf32>
    %48 = math.sqrt %47 : vector<8x2048xf32>
    %49 = arith.addf %45, %48 : vector<8x2048xf32>
    %c8_i32 = arith.constant 8 : i32
    %cst_10 = arith.constant 5.000000e-01 : f32
    %50 = vector.broadcast %cst_10 : f32 to vector<8x2048xf32>
    %51 = arith.subf %49, %50 : vector<8x2048xf32>
    %52 = arith.mulf %49, %49 : vector<8x2048xf32>
    %53 = arith.addf %52, %0 : vector<8x2048xf32>
    %54 = math.sqrt %53 : vector<8x2048xf32>
    %55 = arith.addf %51, %54 : vector<8x2048xf32>
    %c9_i32 = arith.constant 9 : i32
    %cst_11 = arith.constant 5.000000e-01 : f32
    %56 = vector.broadcast %cst_11 : f32 to vector<8x2048xf32>
    %57 = arith.subf %55, %56 : vector<8x2048xf32>
    %58 = arith.mulf %55, %55 : vector<8x2048xf32>
    %59 = arith.addf %58, %0 : vector<8x2048xf32>
    %60 = math.sqrt %59 : vector<8x2048xf32>
    %61 = arith.addf %57, %60 : vector<8x2048xf32>
    %c10_i32 = arith.constant 10 : i32
    %cst_12 = arith.constant 5.000000e-01 : f32
    %62 = vector.broadcast %cst_12 : f32 to vector<8x2048xf32>
    %63 = arith.subf %61, %62 : vector<8x2048xf32>
    %64 = arith.mulf %61, %61 : vector<8x2048xf32>
    %65 = arith.addf %64, %0 : vector<8x2048xf32>
    %66 = math.sqrt %65 : vector<8x2048xf32>
    %67 = arith.addf %63, %66 : vector<8x2048xf32>
    %c11_i32 = arith.constant 11 : i32
    %cst_13 = arith.constant 5.000000e-01 : f32
    %68 = vector.broadcast %cst_13 : f32 to vector<8x2048xf32>
    %69 = arith.subf %67, %68 : vector<8x2048xf32>
    %70 = arith.mulf %67, %67 : vector<8x2048xf32>
    %71 = arith.addf %70, %0 : vector<8x2048xf32>
    %72 = math.sqrt %71 : vector<8x2048xf32>
    %73 = arith.addf %69, %72 : vector<8x2048xf32>
    %c12_i32 = arith.constant 12 : i32
    %cst_14 = arith.constant 5.000000e-01 : f32
    %74 = vector.broadcast %cst_14 : f32 to vector<8x2048xf32>
    %75 = arith.subf %73, %74 : vector<8x2048xf32>
    %76 = arith.mulf %73, %73 : vector<8x2048xf32>
    %77 = arith.addf %76, %0 : vector<8x2048xf32>
    %78 = math.sqrt %77 : vector<8x2048xf32>
    %79 = arith.addf %75, %78 : vector<8x2048xf32>
    %c13_i32 = arith.constant 13 : i32
    %cst_15 = arith.constant 5.000000e-01 : f32
    %80 = vector.broadcast %cst_15 : f32 to vector<8x2048xf32>
    %81 = arith.subf %79, %80 : vector<8x2048xf32>
    %82 = arith.mulf %79, %79 : vector<8x2048xf32>
    %83 = arith.addf %82, %0 : vector<8x2048xf32>
    %84 = math.sqrt %83 : vector<8x2048xf32>
    %85 = arith.addf %81, %84 : vector<8x2048xf32>
    %c14_i32 = arith.constant 14 : i32
    %cst_16 = arith.constant 5.000000e-01 : f32
    %86 = vector.broadcast %cst_16 : f32 to vector<8x2048xf32>
    %87 = arith.subf %85, %86 : vector<8x2048xf32>
    %88 = arith.mulf %85, %85 : vector<8x2048xf32>
    %89 = arith.addf %88, %0 : vector<8x2048xf32>
    %90 = math.sqrt %89 : vector<8x2048xf32>
    %91 = arith.addf %87, %90 : vector<8x2048xf32>
    %c15_i32 = arith.constant 15 : i32
    %cst_17 = arith.constant 5.000000e-01 : f32
    %92 = vector.broadcast %cst_17 : f32 to vector<8x2048xf32>
    %93 = arith.subf %91, %92 : vector<8x2048xf32>
    %94 = arith.mulf %91, %91 : vector<8x2048xf32>
    %95 = arith.addf %94, %0 : vector<8x2048xf32>
    %96 = math.sqrt %95 : vector<8x2048xf32>
    %97 = arith.addf %93, %96 : vector<8x2048xf32>
    %c16_i32 = arith.constant 16 : i32
    %cst_18 = arith.constant 5.000000e-01 : f32
    %98 = vector.broadcast %cst_18 : f32 to vector<8x2048xf32>
    %99 = arith.subf %97, %98 : vector<8x2048xf32>
    %100 = arith.mulf %97, %97 : vector<8x2048xf32>
    %101 = arith.addf %100, %0 : vector<8x2048xf32>
    %102 = math.sqrt %101 : vector<8x2048xf32>
    %103 = arith.addf %99, %102 : vector<8x2048xf32>
    %c17_i32 = arith.constant 17 : i32
    %cst_19 = arith.constant 5.000000e-01 : f32
    %104 = vector.broadcast %cst_19 : f32 to vector<8x2048xf32>
    %105 = arith.subf %103, %104 : vector<8x2048xf32>
    %106 = arith.mulf %103, %103 : vector<8x2048xf32>
    %107 = arith.addf %106, %0 : vector<8x2048xf32>
    %108 = math.sqrt %107 : vector<8x2048xf32>
    %109 = arith.addf %105, %108 : vector<8x2048xf32>
    %c18_i32 = arith.constant 18 : i32
    %cst_20 = arith.constant 5.000000e-01 : f32
    %110 = vector.broadcast %cst_20 : f32 to vector<8x2048xf32>
    %111 = arith.subf %109, %110 : vector<8x2048xf32>
    %112 = arith.mulf %109, %109 : vector<8x2048xf32>
    %113 = arith.addf %112, %0 : vector<8x2048xf32>
    %114 = math.sqrt %113 : vector<8x2048xf32>
    %115 = arith.addf %111, %114 : vector<8x2048xf32>
    %c19_i32 = arith.constant 19 : i32
    %cst_21 = arith.constant 5.000000e-01 : f32
    %116 = vector.broadcast %cst_21 : f32 to vector<8x2048xf32>
    %117 = arith.subf %115, %116 : vector<8x2048xf32>
    %118 = arith.mulf %115, %115 : vector<8x2048xf32>
    %119 = arith.addf %118, %0 : vector<8x2048xf32>
    %120 = math.sqrt %119 : vector<8x2048xf32>
    %121 = arith.addf %117, %120 : vector<8x2048xf32>
    %c20_i32 = arith.constant 20 : i32
    %cst_22 = arith.constant 5.000000e-01 : f32
    %122 = vector.broadcast %cst_22 : f32 to vector<8x2048xf32>
    %123 = arith.subf %121, %122 : vector<8x2048xf32>
    %124 = arith.mulf %121, %121 : vector<8x2048xf32>
    %125 = arith.addf %124, %0 : vector<8x2048xf32>
    %126 = math.sqrt %125 : vector<8x2048xf32>
    %127 = arith.addf %123, %126 : vector<8x2048xf32>
    %c21_i32 = arith.constant 21 : i32
    %cst_23 = arith.constant 5.000000e-01 : f32
    %128 = vector.broadcast %cst_23 : f32 to vector<8x2048xf32>
    %129 = arith.subf %127, %128 : vector<8x2048xf32>
    %130 = arith.mulf %127, %127 : vector<8x2048xf32>
    %131 = arith.addf %130, %0 : vector<8x2048xf32>
    %132 = math.sqrt %131 : vector<8x2048xf32>
    %133 = arith.addf %129, %132 : vector<8x2048xf32>
    %c22_i32 = arith.constant 22 : i32
    %cst_24 = arith.constant 5.000000e-01 : f32
    %134 = vector.broadcast %cst_24 : f32 to vector<8x2048xf32>
    %135 = arith.subf %133, %134 : vector<8x2048xf32>
    %136 = arith.mulf %133, %133 : vector<8x2048xf32>
    %137 = arith.addf %136, %0 : vector<8x2048xf32>
    %138 = math.sqrt %137 : vector<8x2048xf32>
    %139 = arith.addf %135, %138 : vector<8x2048xf32>
    %c23_i32 = arith.constant 23 : i32
    %cst_25 = arith.constant 5.000000e-01 : f32
    %140 = vector.broadcast %cst_25 : f32 to vector<8x2048xf32>
    %141 = arith.subf %139, %140 : vector<8x2048xf32>
    %142 = arith.mulf %139, %139 : vector<8x2048xf32>
    %143 = arith.addf %142, %0 : vector<8x2048xf32>
    %144 = math.sqrt %143 : vector<8x2048xf32>
    %145 = arith.addf %141, %144 : vector<8x2048xf32>
    %c24_i32 = arith.constant 24 : i32
    %cst_26 = arith.constant 5.000000e-01 : f32
    %146 = vector.broadcast %cst_26 : f32 to vector<8x2048xf32>
    %147 = arith.subf %145, %146 : vector<8x2048xf32>
    %148 = arith.mulf %145, %145 : vector<8x2048xf32>
    %149 = arith.addf %148, %0 : vector<8x2048xf32>
    %150 = math.sqrt %149 : vector<8x2048xf32>
    %151 = arith.addf %147, %150 : vector<8x2048xf32>
    %c25_i32 = arith.constant 25 : i32
    %cst_27 = arith.constant 5.000000e-01 : f32
    %152 = vector.broadcast %cst_27 : f32 to vector<8x2048xf32>
    %153 = arith.subf %151, %152 : vector<8x2048xf32>
    %154 = arith.mulf %151, %151 : vector<8x2048xf32>
    %155 = arith.addf %154, %0 : vector<8x2048xf32>
    %156 = math.sqrt %155 : vector<8x2048xf32>
    %157 = arith.addf %153, %156 : vector<8x2048xf32>
    %c26_i32 = arith.constant 26 : i32
    %cst_28 = arith.constant 5.000000e-01 : f32
    %158 = vector.broadcast %cst_28 : f32 to vector<8x2048xf32>
    %159 = arith.subf %157, %158 : vector<8x2048xf32>
    %160 = arith.mulf %157, %157 : vector<8x2048xf32>
    %161 = arith.addf %160, %0 : vector<8x2048xf32>
    %162 = math.sqrt %161 : vector<8x2048xf32>
    %163 = arith.addf %159, %162 : vector<8x2048xf32>
    %c27_i32 = arith.constant 27 : i32
    %cst_29 = arith.constant 5.000000e-01 : f32
    %164 = vector.broadcast %cst_29 : f32 to vector<8x2048xf32>
    %165 = arith.subf %163, %164 : vector<8x2048xf32>
    %166 = arith.mulf %163, %163 : vector<8x2048xf32>
    %167 = arith.addf %166, %0 : vector<8x2048xf32>
    %168 = math.sqrt %167 : vector<8x2048xf32>
    %169 = arith.addf %165, %168 : vector<8x2048xf32>
    %c28_i32 = arith.constant 28 : i32
    %cst_30 = arith.constant 5.000000e-01 : f32
    %170 = vector.broadcast %cst_30 : f32 to vector<8x2048xf32>
    %171 = arith.subf %169, %170 : vector<8x2048xf32>
    %172 = arith.mulf %169, %169 : vector<8x2048xf32>
    %173 = arith.addf %172, %0 : vector<8x2048xf32>
    %174 = math.sqrt %173 : vector<8x2048xf32>
    %175 = arith.addf %171, %174 : vector<8x2048xf32>
    %c29_i32 = arith.constant 29 : i32
    %cst_31 = arith.constant 5.000000e-01 : f32
    %176 = vector.broadcast %cst_31 : f32 to vector<8x2048xf32>
    %177 = arith.subf %175, %176 : vector<8x2048xf32>
    %178 = arith.mulf %175, %175 : vector<8x2048xf32>
    %179 = arith.addf %178, %0 : vector<8x2048xf32>
    %180 = math.sqrt %179 : vector<8x2048xf32>
    %181 = arith.addf %177, %180 : vector<8x2048xf32>
    %c30_i32 = arith.constant 30 : i32
    %cst_32 = arith.constant 5.000000e-01 : f32
    %182 = vector.broadcast %cst_32 : f32 to vector<8x2048xf32>
    %183 = arith.subf %181, %182 : vector<8x2048xf32>
    %184 = arith.mulf %181, %181 : vector<8x2048xf32>
    %185 = arith.addf %184, %0 : vector<8x2048xf32>
    %186 = math.sqrt %185 : vector<8x2048xf32>
    %187 = arith.addf %183, %186 : vector<8x2048xf32>
    %c31_i32 = arith.constant 31 : i32
    %cst_33 = arith.constant 5.000000e-01 : f32
    %188 = vector.broadcast %cst_33 : f32 to vector<8x2048xf32>
    %189 = arith.subf %187, %188 : vector<8x2048xf32>
    %190 = arith.mulf %187, %187 : vector<8x2048xf32>
    %191 = arith.addf %190, %0 : vector<8x2048xf32>
    %192 = math.sqrt %191 : vector<8x2048xf32>
    %193 = arith.addf %189, %192 : vector<8x2048xf32>
    %194 = arith.mulf %193, %193 : vector<8x2048xf32>
    %195 = arith.addf %194, %0 : vector<8x2048xf32>
    %196 = math.sqrt %195 : vector<8x2048xf32>
    %cst_34 = arith.constant 5.000000e-01 : f32
    %197 = vector.broadcast %cst_34 : f32 to vector<8x2048xf32>
    %198 = arith.subf %196, %197 : vector<8x2048xf32>
    %c0_35 = arith.constant 0 : index
    %c0_36 = arith.constant 0 : index
    %199 = vector.load %arg1[%c0_35, %c0_36] : memref<8x2048xf32, #tpu.memory_space<vmem>>, vector<8x2048xf32>
    %200 = arith.subf %193, %199 : vector<8x2048xf32>
    %201 = math.absf %198 : vector<8x2048xf32>
    %cst_37 = arith.constant 5.000000e-05 : f32
    %202 = vector.broadcast %cst_37 : f32 to vector<8x2048xf32>
    %203 = arith.cmpf olt, %201, %202 : vector<8x2048xf32>
    %cst_38 = arith.constant 0.000000e+00 : f32
    %204 = vector.broadcast %cst_38 : f32 to vector<8x2048xf32>
    %205 = arith.cmpf oge, %200, %204 : vector<8x2048xf32>
    %206 = arith.andi %203, %205 : vector<8x2048xi1>
    %cst_39 = arith.constant 4.000000e+00 : f32
    %207 = vector.broadcast %cst_39 : f32 to vector<8x2048xf32>
    %208 = arith.cmpf ole, %200, %207 : vector<8x2048xf32>
    %209 = arith.andi %206, %208 : vector<8x2048xi1>
    %210 = arith.extui %209 : vector<8x2048xi1> to vector<8x2048xi32>
    %211 = arith.sitofp %210 : vector<8x2048xi32> to vector<8x2048xf32>
    %c0_40 = arith.constant 0 : index
    %c0_41 = arith.constant 0 : index
    %212 = vector.load %arg3[%c0_40, %c0_41] : memref<8x2048xf32, #tpu.memory_space<vmem>>, vector<8x2048xf32>
    tpu.vector_store %arg3[%c0_40, %c0_41], %211 {strides = array<i32>} : memref<8x2048xf32, #tpu.memory_space<vmem>>, vector<8x2048xf32>,
    return
  }
  func.func @transform_0(%arg0: i32) -> (i32, i32) {
    %c0_i32 = arith.constant 0 : i32
    %c0_i32_0 = arith.constant 0 : i32
    return %arg0, %c0_i32 : i32, i32
  }
  func.func @transform_1(%arg0: i32) -> (i32, i32) {
    %c0_i32 = arith.constant 0 : i32
    %c0_i32_0 = arith.constant 0 : i32
    return %arg0, %c0_i32 : i32, i32
  }
  func.func @transform_2(%arg0: i32) -> (i32, i32) {
    %c0_i32 = arith.constant 0 : i32
    %c0_i32_0 = arith.constant 0 : i32
    return %arg0, %c0_i32 : i32, i32
  }
}

</mosaic_0001>

<bundles_post_ra>
// kernel: tpu_custom_call.1
= control target key start
LH: loop header
LB: loop body
LE: loop exit
PB: predicated region body
PF: predicated region fallthrough
CT: control target
= control target key end

     0   :  { %7 = vsyncpa [#allocation3], 0  ;;  %s18679_s0 = inlined_call_operand.hbm [shape: f32[8,2048], index: 0, kind: input, shape index: {}]   ;;  %s18680_s1 = inlined_call_operand.hbm [shape: f32[8,2048], index: 1, kind: input, shape index: {}]   ;;  %s18681_s2 = inlined_call_operand.hbm [shape: f32[8,2048], index: 2, kind: output, shape index: {}]  }
   0x1   :  { %8 = vsyncpa [#allocation6], 0 }
   0x2   :  { %9 = vsyncpa [#allocation4], 0  ;;  %s7882_s9 = smov [#allocation2]   ;;  %s7883_s11 = smov [#allocation5]  }
   0x3   :  { %s16_s10 = sshll.u32 %s7882_s9, 4  ;;  %s26_s12 = sshll.u32 %s7883_s11, 4  ;;  %s17_s10 = int_to_ptr.vmem [resolvable:$true] %s16_s10  ;;  %s27_s12 = int_to_ptr.vmem [resolvable:$true] %s26_s12 }
   0x4   :  { %s7824_s13 = scalar_lea.vmem %s17_s10, 2048  ;;  %p7829_p1 = scmp.lt.s32.totalorder %s17_s10, %s17_s10 }
   0x5   :  { %p7825_p0 = scmp.ne.s32.totalorder %s17_s10, %s7824_s13  ;;  %p7830_p2 = scmp.lt.s32.totalorder %s7824_s13, %s7824_s13 }
   0x7   :  { %p7831_p3 = por %p7830_p2, %p7829_p1 }
   0x9   :  { %p7832_p4 = pnand %p7831_p3, %p7825_p0 }
   0xb   :  { %7835 = shalt.err (!%p7832_p4)
}
   0xc   :  { %19 = dma.hbm_to_vmem [thread:$0]  %s18679_s0, 2048, %s17_s10, [#allocation3]  }
   0xd   :  { %s7844_s16 = scalar_lea.vmem %s27_s12, 2048  ;;  %p7849_p6 = scmp.lt.s32.totalorder %s27_s12, %s27_s12 }
   0xe   :  { %p7845_p5 = scmp.ne.s32.totalorder %s27_s12, %s7844_s16  ;;  %p7850_p7 = scmp.lt.s32.totalorder %s7844_s16, %s7844_s16 }
  0x10   :  { %p7851_p8 = por %p7850_p7, %p7849_p6 }
  0x12   :  { %p7852_p9 = pnand %p7851_p8, %p7845_p5 }
  0x14   :  { %7855 = shalt.err (!%p7852_p9)
}
  0x15   :  { %29 = dma.hbm_to_vmem [thread:$0]  %s18680_s1, 2048, %s27_s12, [#allocation6]  }
  0x16   :  { %7876 = dma.done.wait [#allocation3], 2048  }
  0x17   :  { %7877 = vsyncadd [#allocation3], 4294965248 }
  0x18   :  { %7878 = dma.done.wait [#allocation6], 2048  }
  0x19   :  { %7879 = vsyncadd [#allocation6], 4294965248  ;;  %v52_v0 = vld [vmem:[#allocation2] sm:$0xff]  ;;  %v53_v1 = vld [vmem:[#allocation2 + $0x8] sm:$0xff]  ;;  %s7885_s0 = smov [#allocation7]  }
  0x1a   :  { %v54_v2 = vld [vmem:[#allocation2 + $0x10] sm:$0xff]  ;;  %v55_v3 = vld [vmem:[#allocation2 + $0x18] sm:$0xff]  ;;  %v84_v4 = vmul.f32 %v52_v0, %v52_v0  ;;  %v7907_v5 = vld [vmem:[#allocation5] sm:$0xff]  ;;  %v85_v7 = vmul.f32 %v53_v1, %v53_v1  ;;  %v7959_v46 = vadd.f32 -0.5, %v52_v0  ;;  %v7967_v51 = vadd.f32 -0.5, %v53_v1  ;;  %s6026_s1 = sshll.u32 %s7885_s0, 4  ;;  %s6027_s1 = int_to_ptr.vmem [resolvable:$true] %s6026_s1 }
  0x1b   :  { %v56_v6 = vld [vmem:[#allocation2 + $0x20] sm:$0xff]  ;;  %v7909_v8 = vld [vmem:[#allocation5 + $0x8] sm:$0xff]  ;;  %v86_v10 = vmul.f32 %v54_v2, %v54_v2  ;;  %v7911_v11 = vld [vmem:[#allocation5 + $0x10] sm:$0xff]  ;;  %v87_v13 = vmul.f32 %v55_v3, %v55_v3  ;;  %v7969_v52 = vadd.f32 -0.5, %v54_v2  ;;  %v7975_v55 = vadd.f32 -0.5, %v55_v3  ;;  %s7856_s19 = scalar_lea.vmem %s6027_s1, 2048  ;;  %p7861_p11 = scmp.lt.s32.totalorder %s6027_s1, %s6027_s1 }
  0x1c   :  { %v57_v9 = vld [vmem:[#allocation2 + $0x28] sm:$0xff]  ;;  %v58_v12 = vld [vmem:[#allocation2 + $0x30] sm:$0xff]  ;;  %v7913_v14 = vld [vmem:[#allocation5 + $0x18] sm:$0xff]  ;;  %v88_v16 = vmul.f32 %v56_v6, %v56_v6  ;;  %v7916_v17 = vadd.f32 %v84_v4, %v7907_v5  ;;  %v7921_v21 = vadd.f32 %v85_v7, %v7909_v8  ;;  %v7977_v56 = vadd.f32 -0.5, %v56_v6  ;;  %p7857_p10 = scmp.ne.s32.totalorder %s6027_s1, %s7856_s19  ;;  %p7862_p12 = scmp.lt.s32.totalorder %s7856_s19, %s7856_s19 }
  0x1d   :  { %v59_v15 = vld [vmem:[#allocation2 + $0x38] sm:$0xff]  ;;  %v7918_v18 = vld [vmem:[#allocation5 + $0x20] sm:$0xff]  ;;  %v89_v20 = vmul.f32 %v57_v9, %v57_v9  ;;  %v7923_v22 = vld [vmem:[#allocation5 + $0x28] sm:$0xff]  ;;  %v90_v24 = vmul.f32 %v58_v12, %v58_v12  ;;  %v7926_v25 = vadd.f32 %v86_v10, %v7911_v11  ;;  %v7931_v29 = vadd.f32 %v87_v13, %v7913_v14 }
  0x1e   :  { %v60_v19 = vld [vmem:[#allocation2 + $0x40] sm:$0xff]  ;;  %v61_v23 = vld [vmem:[#allocation2 + $0x48] sm:$0xff]  ;;  %v7928_v26 = vld [vmem:[#allocation5 + $0x30] sm:$0xff]  ;;  %v91_v28 = vmul.f32 %v59_v15, %v59_v15  ;;  %v7936_v33 = vadd.f32 %v88_v16, %v7918_v18  ;;  %6584 = vrsqrt.f32 %v7916_v17  ;;  %v7983_v58 = vadd.f32 -0.5, %v57_v9  ;;  %p7863_p13 = por %p7862_p12, %p7861_p11 }
  0x1f   :  { %v62_v27 = vld [vmem:[#allocation2 + $0x50] sm:$0xff]  ;;  %v7933_v30 = vld [vmem:[#allocation5 + $0x38] sm:$0xff]  ;;  %v92_v32 = vmul.f32 %v60_v19, %v60_v19  ;;  %v7939_v34 = vld [vmem:[#allocation5 + $0x40] sm:$0xff]  ;;  %v93_v36 = vmul.f32 %v61_v23, %v61_v23  ;;  %v7942_v37 = vadd.f32 %v89_v20, %v7923_v22  ;;  %6586 = vrsqrt.f32 %v7921_v21 }
  0x20   :  { %v63_v31 = vld [vmem:[#allocation2 + $0x58] sm:$0xff]  ;;  %v64_v35 = vld [vmem:[#allocation2 + $0x60] sm:$0xff]  ;;  %v7945_v38 = vld [vmem:[#allocation5 + $0x48] sm:$0xff]  ;;  %v94_v39 = vmul.f32 %v62_v27, %v62_v27  ;;  %v7948_v40 = vadd.f32 %v90_v24, %v7928_v26  ;;  %6588 = vrsqrt.f32 %v7926_v25  ;;  %v7954_v43 = vadd.f32 %v91_v28, %v7933_v30  ;;  %p7864_p0 = pnand %p7863_p13, %p7857_p10 }
  0x21   :  { %18842 = vst [vmem:[#allocation11_spill] sm:$0xff] %v7945_v38  ;;  %v7951_v41 = vld [vmem:[#allocation5 + $0x50] sm:$0xff]  ;;  %v95_v42 = vmul.f32 %v63_v31, %v63_v31  ;;  %6590 = vrsqrt.f32 %v7931_v29  ;;  %v7957_v44 = vld [vmem:[#allocation5 + $0x58] sm:$0xff]  ;;  %v65_v45 = vld [vmem:[#allocation2 + $0x68] sm:$0xff]  ;;  %v96_v47 = vmul.f32 %v64_v35, %v64_v35  ;;  %v7962_v48 = vadd.f32 %v92_v32, %v7939_v34 }
  0x22   :  { %18843 = vst [vmem:[#allocation12_spill] sm:$0xff] %v7951_v41  ;;  %18844 = vst [vmem:[#allocation13_spill] sm:$0xff] %v7957_v44  ;;  %6592 = vrsqrt.f32 %v7936_v33  ;;  %v7965_v49 = vld [vmem:[#allocation5 + $0x60] sm:$0xff]  ;;  %v66_v50 = vld [vmem:[#allocation2 + $0x70] sm:$0xff]  ;;  %v7972_v53 = vadd.f32 %v93_v36, %v7945_v38  ;;  %v7980_v57 = vadd.f32 %v94_v39, %v7951_v41  ;;  %v97_v59 = vmul.f32 %v65_v45, %v65_v45 }
  0x23   :  { %18845 = vst [vmem:[#allocation14_spill] sm:$0xff] %v7965_v49  ;;  %6594 = vrsqrt.f32 %v7942_v37  ;;  %v67_v54 = vld [vmem:[#allocation2 + $0x78] sm:$0xff]  ;;  %v7986_v60 = vadd.f32 %v95_v42, %v7957_v44  ;;  %v7989_v61 = vld [vmem:[#allocation5 + $0x68] sm:$0xff]  ;;  %v7991_v62 = vadd.f32 -0.5, %v58_v12  ;;  %v98_v63 = vmul.f32 %v66_v50, %v66_v50  ;;  %v7997_v1 = vld [vmem:[#allocation5 + $0x70] sm:$0xff] }
  0x24   :  { %6596 = vrsqrt.f32 %v7948_v40  ;;  %18846 = vst [vmem:[#allocation15_spill] sm:$0xff] %v7989_v61  ;;  %v7994_v0 = vadd.f32 %v96_v47, %v7965_v49  ;;  %18847 = vst [vmem:[#allocation16_spill] sm:$0xff] %v7997_v1  ;;  %v7999_v2 = vadd.f32 -0.5, %v59_v15  ;;  %v8001_v3 = vadd.f32 -0.5, %v60_v19  ;;  %v8004_v6 = vld [vmem:[#allocation5 + $0x78] sm:$0xff] }
  0x25   :  { %6598 = vrsqrt.f32 %v7954_v43  ;;  %v99_v4 = vmul.f32 %v67_v54, %v67_v54  ;;  %18848 = vst [vmem:[#allocation17_spill] sm:$0xff] %v8004_v6  ;;  %v8006_v7 = vadd.f32 -0.5, %v61_v23  ;;  %v8008_v9 = vadd.f32 -0.5, %v62_v27 }
  0x26   :  { %6600 = vrsqrt.f32 %v7962_v48  ;;  %v8010_v10 = vadd.f32 -0.5, %v63_v31  ;;  %v8013_v12 = vadd.f32 -0.5, %v64_v35  ;;  %v8015_v13 = vadd.f32 -0.5, %v65_v45 }
  0x27   :  { %6602 = vrsqrt.f32 %v7972_v53  ;;  %v8018_v15 = vadd.f32 %v97_v59, %v7989_v61  ;;  %v8021_v16 = vadd.f32 -0.5, %v66_v50  ;;  %v8023_v19 = vadd.f32 -0.5, %v67_v54 }
  0x28   :  { %6604 = vrsqrt.f32 %v7980_v57  ;;  %v8026_v20 = vadd.f32 %v98_v63, %v7997_v1  ;;  %v8030_v24 = vadd.f32 %v99_v4, %v8004_v6  ;;  %vm118_vm0 = vcmp.eq.f32.partialorder %v7916_v17, inf }
  0x29   :  { %6606 = vrsqrt.f32 %v7986_v60  ;;  %18849 = vst [vmem:[#allocation18_spill] sm:$0xff] %v8023_v19  ;;  %vm125_vm1 = vcmp.eq.f32.partialorder %v7921_v21, inf  ;;  %vm120_vm2 = vcmp.eq.f32.partialorder %v7916_v17, 0.0  ;;  %vm127_vm3 = vcmp.eq.f32.partialorder %v7921_v21, 0.0 }
  0x2a   :  { %6608 = vrsqrt.f32 %v7994_v0  ;;  %vm132_vm4 = vcmp.eq.f32.partialorder %v7926_v25, inf  ;;  %vm134_vm5 = vcmp.eq.f32.partialorder %v7926_v25, 0.0  ;;  %vm139_vm6 = vcmp.eq.f32.partialorder %v7931_v29, inf }
  0x2b   :  { %v6585_v23 = vpop.eup %6584  ;;  %6610 = vrsqrt.f32 %v8018_v15  ;;  %vm141_vm7 = vcmp.eq.f32.partialorder %v7931_v29, 0.0  ;;  %vm146_vm8 = vcmp.eq.f32.partialorder %v7936_v33, inf  ;;  %vm153_vm10 = vcmp.eq.f32.partialorder %v7942_v37, inf }
  0x2c   :  { %v6587_v28 = vpop.eup %6586  ;;  %v117_v47 = vmul.f32 %v6585_v23, %v7916_v17  ;;  %vm160_vm11 = vcmp.eq.f32.partialorder %v7948_v40, inf  ;;  %6612 = vrsqrt.f32 %v8026_v20  ;;  %v163_v4 = vand.u32 2147483648, %v7948_v40 }
  0x2d   :  { %v6589_v32 = vpop.eup %6588  ;;  %v124_v59 = vmul.f32 %v6587_v28, %v7921_v21  ;;  %6614 = vrsqrt.f32 %v8030_v24  ;;  %vm181_vm14 = vcmp.eq.f32.partialorder %v7972_v53, inf  ;;  %vm188_vm15 = vcmp.eq.f32.partialorder %v7980_v57, inf }
  0x2e   :  { %v6591_v39 = vpop.eup %6590  ;;  %v131_v63 = vmul.f32 %v6589_v32, %v7926_v25  ;;  %v119_v42 = vsel %vm118_vm0, %v7916_v17, %v117_v47  ;;  %vm183_vm0 = vcmp.eq.f32.partialorder %v7972_v53, 0.0  ;;  %vm190_vm12 = vcmp.eq.f32.partialorder %v7980_v57, 0.0 }
  0x2f   :  { %v6593_v45 = vpop.eup %6592  ;;  %v138_v32 = vmul.f32 %v6591_v39, %v7931_v29  ;;  %vm197_vm9 = vcmp.eq.f32.partialorder %v7986_v60, 0.0  ;;  %v198_v31 = vand.u32 2147483648, %v7986_v60  ;;  %vm202_vm13 = vcmp.eq.f32.partialorder %v7994_v0, inf }
  0x30   :  { %v6595_v54 = vpop.eup %6594  ;;  %v145_v36 = vmul.f32 %v6593_v45, %v7936_v33  ;;  %v126_v45 = vsel %vm125_vm1, %v7921_v21, %v124_v59  ;;  %v133_v35 = vsel %vm132_vm4, %v7926_v25, %v131_v63  ;;  %v205_v59 = vand.u32 2147483648, %v7994_v0 }
  0x31   :  { %v6597_v23 = vpop.eup %6596  ;;  %v152_v27 = vmul.f32 %v6595_v54, %v7942_v37  ;;  %v140_v54 = vsel %vm139_vm6, %v7931_v29, %v138_v32  ;;  %vm204_vm1 = vcmp.eq.f32.partialorder %v7994_v0, 0.0  ;;  %vm209_vm4 = vcmp.eq.f32.partialorder %v8018_v15, inf }
  0x32   :  { %v6599_v28 = vpop.eup %6598  ;;  %v159_v6 = vmul.f32 %v6597_v23, %v7948_v40  ;;  %v147_v23 = vsel %vm146_vm8, %v7936_v33, %v145_v36  ;;  %v18850_v1 = vand.u32 2147483648, %v7916_v17  ;;  %v18851_v32 = vand.u32 2147483648, %v7921_v21 }
  0x33   :  { %v6601_v50 = vpop.eup %6600  ;;  %v166_v61 = vmul.f32 %v6599_v28, %v7954_v43  ;;  %v18852_v36 = vand.u32 2147483648, %v7926_v25  ;;  %v219_v28 = vand.u32 2147483648, %v8026_v20  ;;  %v154_v19 = vsel %vm153_vm10, %v7942_v37, %v152_v27 }
  0x34   :  { %v6603_v39 = vpop.eup %6602  ;;  %v173_v49 = vmul.f32 %v6601_v50, %v7962_v48  ;;  %v122_v41 = vsel %vm120_vm2, %v18850_v1, %v119_v42  ;;  %v129_v38 = vsel %vm127_vm3, %v18851_v32, %v126_v45  ;;  %v161_v17 = vsel %vm160_vm11, %v7948_v40, %v159_v6 }
  0x35   :  { %v6605_v47 = vpop.eup %6604  ;;  %v136_v50 = vsel %vm134_vm5, %v18852_v36, %v133_v35  ;;  %v180_v1 = vmul.f32 %v6603_v39, %v7972_v53  ;;  %vm216_vm2 = vcmp.eq.f32.partialorder %v8026_v20, inf  ;;  %v18853_v42 = vand.u32 2147483648, %v7931_v29 }
  0x36   :  { %v6607_v63 = vpop.eup %6606  ;;  %v187_v21 = vmul.f32 %v6605_v47, %v7980_v57  ;;  %v18854_v35 = vand.u32 2147483648, %v7936_v33  ;;  %vm18855_vm3 = vcmp.eq.f32.partialorder %v7936_v33, 0.0  ;;  %vm211_vm5 = vcmp.eq.f32.partialorder %v8018_v15, 0.0 }
  0x37   :  { %v6609_v44 = vpop.eup %6608  ;;  %v143_v25 = vsel %vm141_vm7, %v18853_v42, %v140_v54  ;;  %v194_v45 = vmul.f32 %v6607_v63, %v7986_v60  ;;  %v226_v6 = vand.u32 2147483648, %v8030_v24  ;;  %vm18856_vm6 = vcmp.eq.f32.partialorder %v7954_v43, inf }
  0x38   :  { %v150_v27 = vsel %vm18855_vm3, %v18854_v35, %v147_v23  ;;  %v6611_v39 = vpop.eup %6610  ;;  %v168_v47 = vsel %vm18856_vm6, %v7954_v43, %v166_v61  ;;  %vm18857_vm8 = vcmp.eq.f32.partialorder %v7962_v48, inf  ;;  %v201_v54 = vmul.f32 %v6609_v44, %v7994_v0 }
  0x39   :  { %v175_v29 = vsel %vm18857_vm8, %v7962_v48, %v173_v49  ;;  %vm223_vm7 = vcmp.eq.f32.partialorder %v8030_v24, inf  ;;  %v228_v33 = vadd.f32 %v7959_v46, %v122_v41  ;;  %v18858_v63 = vand.u32 2147483648, %v7942_v37  ;;  %v6613_v44 = vpop.eup %6612 }
  0x3a   :  { %vm18859_vm10 = vcmp.eq.f32.partialorder %v7942_v37, 0.0  ;;  %vm18860_vm11 = vcmp.eq.f32.partialorder %v7948_v40, 0.0  ;;  %vm218_vm3 = vcmp.eq.f32.partialorder %v8026_v20, 0.0  ;;  %v229_v61 = vadd.f32 %v7967_v51, %v129_v38 }
  0x3b   :  { %v157_v23 = vsel %vm18859_vm10, %v18858_v63, %v154_v19  ;;  %v164_v32 = vsel %vm18860_vm11, %v163_v4, %v161_v17  ;;  %v8151_v49 = vadd.f32 %v7969_v52, %v136_v50  ;;  %v182_v41 = vsel %vm181_vm14, %v7972_v53, %v180_v1 }
  0x3c   :  { %v189_v37 = vsel %vm188_vm15, %v7980_v57, %v187_v21  ;;  %v8160_v46 = vadd.f32 %v7975_v55, %v143_v25  ;;  %v8163_v40 = vadd.f32 %v7977_v56, %v150_v27  ;;  %v18861_v38 = vand.u32 2147483648, %v7954_v43  ;;  %v6615_v56 = vpop.eup %6614 }
  0x3d   :  { %vm18862_vm6 = vcmp.eq.f32.partialorder %v7954_v43, 0.0  ;;  %v18863_v52 = vand.u32 2147483648, %v7962_v48  ;;  %vm18864_vm8 = vcmp.eq.f32.partialorder %v7962_v48, 0.0  ;;  %vm18865_vm14 = vcmp.eq.f32.partialorder %v7986_v60, inf }
  0x3e   :  { %v171_v51 = vsel %vm18862_vm6, %v18861_v38, %v168_v47  ;;  %v196_v4 = vsel %vm18865_vm14, %v7986_v60, %v194_v45  ;;  %v208_v55 = vmul.f32 %v6611_v39, %v8018_v15  ;;  %vm225_vm15 = vcmp.eq.f32.partialorder %v8030_v24, 0.0 }
  0x3f   :  { %v178_v19 = vsel %vm18864_vm8, %v18863_v52, %v175_v29  ;;  %v203_v36 = vsel %vm202_vm13, %v7994_v0, %v201_v54  ;;  %v233_v43 = vadd.f32 %v7983_v58, %v157_v23  ;;  %v234_v50 = vadd.f32 %v7991_v62, %v164_v32 }
  0x40   :  { %v260_v17 = vmul.f32 %v228_v33, %v228_v33  ;;  %v18866_v48 = vand.u32 2147483648, %v7972_v53  ;;  %v18867_v21 = vand.u32 2147483648, %v7980_v57  ;;  %v215_v25 = vmul.f32 %v6613_v44, %v8026_v20 }
  0x41   :  { %v261_v35 = vmul.f32 %v229_v61, %v229_v61  ;;  %v199_v27 = vsel %vm197_vm9, %v198_v31, %v196_v4  ;;  %v235_v58 = vadd.f32 %v7999_v2, %v171_v51  ;;  %v236_v62 = vadd.f32 %v8001_v3, %v178_v19 }
  0x42   :  { %v185_v1 = vsel %vm183_vm0, %v18866_v48, %v182_v41  ;;  %v192_v42 = vsel %vm190_vm12, %v18867_v21, %v189_v37  ;;  %v262_v45 = vmul.f32 %v8151_v49, %v8151_v49  ;;  %v206_v53 = vsel %vm204_vm1, %v205_v59, %v203_v36 }
  0x43   :  { %v210_v57 = vsel %vm209_vm4, %v8018_v15, %v208_v55  ;;  %v222_v39 = vmul.f32 %v6615_v56, %v8030_v24  ;;  %v263_v60 = vmul.f32 %v8160_v46, %v8160_v46  ;;  %v237_v31 = vadd.f32 %v8006_v7, %v185_v1 }
  0x44   :  { %v238_v2 = vadd.f32 %v8008_v9, %v192_v42  ;;  %v264_v3 = vmul.f32 %v8163_v40, %v8163_v40  ;;  %v8211_v47 = vadd.f32 %v260_v17, %v7907_v5  ;;  %v217_v0 = vsel %vm216_vm2, %v8026_v20, %v215_v25  ;;  %v18871_v42 = vld [vmem:[#allocation12_spill] sm:$0xff] }
  0x45   :  { %v239_v59 = vadd.f32 %v8010_v10, %v199_v27  ;;  %v265_v29 = vmul.f32 %v233_v43, %v233_v43  ;;  %v8218_v54 = vadd.f32 %v261_v35, %v7909_v8  ;;  %v18868_v7 = vand.u32 2147483648, %v8018_v15  ;;  %v18872_v27 = vld [vmem:[#allocation13_spill] sm:$0xff] }
  0x46   :  { %v240_v63 = vadd.f32 %v8013_v12, %v206_v53  ;;  %v266_v23 = vmul.f32 %v234_v50, %v234_v50  ;;  %v8226_v32 = vadd.f32 %v262_v45, %v7911_v11  ;;  %v224_v44 = vsel %vm223_vm7, %v8030_v24, %v222_v39 }
  0x47   :  { %v213_v9 = vsel %vm211_vm5, %v18868_v7, %v210_v57  ;;  %v8231_v10 = vadd.f32 -0.5, %v228_v33  ;;  %v267_v41 = vmul.f32 %v235_v58, %v235_v58  ;;  %v8234_v37 = vadd.f32 %v263_v60, %v7913_v14  ;;  %v18873_v57 = vld [vmem:[#allocation14_spill] sm:$0xff] }
  0x48   :  { %v220_v15 = vsel %vm218_vm3, %v219_v28, %v217_v0  ;;  %v268_v12 = vmul.f32 %v236_v62, %v236_v62  ;;  %v8241_v38 = vadd.f32 %v264_v3, %v7918_v18  ;;  %6616 = vrsqrt.f32 %v8211_v47 }
  0x49   :  { %v241_v51 = vadd.f32 %v8015_v13, %v213_v9  ;;  %v269_v52 = vmul.f32 %v237_v31, %v237_v31  ;;  %v8246_v33 = vadd.f32 %v265_v29, %v7923_v22  ;;  %6618 = vrsqrt.f32 %v8218_v54  ;;  %v18874_v9 = vld [vmem:[#allocation15_spill] sm:$0xff] }
  0x4a   :  { %v227_v20 = vsel %vm225_vm15, %v226_v6, %v224_v44  ;;  %v270_v28 = vmul.f32 %v238_v2, %v238_v2  ;;  %v8254_v19 = vadd.f32 %v266_v23, %v7928_v26  ;;  %6620 = vrsqrt.f32 %v8226_v32  ;;  %v18869_v6 = vld [vmem:[#allocation18_spill] sm:$0xff]  ;;  %v18877_v44 = vld [vmem:[#allocation17_spill] sm:$0xff] }
  0x4b   :  { %v8257_v4 = vadd.f32 -0.5, %v229_v61  ;;  %v271_v13 = vmul.f32 %v239_v59, %v239_v59  ;;  %v8260_v55 = vadd.f32 %v267_v41, %v7933_v30  ;;  %6622 = vrsqrt.f32 %v8234_v37  ;;  %v18870_v61 = vld [vmem:[#allocation11_spill] sm:$0xff] }
  0x4c   :  { %v242_v56 = vadd.f32 %v8021_v16, %v220_v15  ;;  %v272_v36 = vmul.f32 %v240_v63, %v240_v63  ;;  %v8265_v24 = vadd.f32 %v268_v12, %v7939_v34  ;;  %6624 = vrsqrt.f32 %v8241_v38 }
  0x4d   :  { %v243_v17 = vadd.f32 %v18869_v6, %v227_v20  ;;  %v8270_v48 = vadd.f32 -0.5, %v8151_v49  ;;  %v8273_v1 = vadd.f32 %v269_v52, %v18870_v61  ;;  %6626 = vrsqrt.f32 %v8246_v33 }
  0x4e   :  { %v8277_v21 = vadd.f32 -0.5, %v8160_v46  ;;  %v8280_v16 = vadd.f32 -0.5, %v8163_v40  ;;  %v8283_v25 = vadd.f32 %v270_v28, %v18871_v42  ;;  %6628 = vrsqrt.f32 %v8254_v19 }
  0x4f   :  { %v8286_v35 = vadd.f32 -0.5, %v233_v43  ;;  %v273_v49 = vmul.f32 %v241_v51, %v241_v51  ;;  %v8289_v45 = vadd.f32 %v271_v13, %v18872_v27  ;;  %6630 = vrsqrt.f32 %v8260_v55 }
  0x50   :  { %v8292_v53 = vadd.f32 -0.5, %v234_v50  ;;  %v274_v46 = vmul.f32 %v242_v56, %v242_v56  ;;  %v8295_v39 = vadd.f32 %v272_v36, %v18873_v57  ;;  %6632 = vrsqrt.f32 %v8265_v24 }
  0x51   :  { %v8298_v40 = vadd.f32 -0.5, %v235_v58  ;;  %v8300_v60 = vadd.f32 -0.5, %v236_v62  ;;  %v275_v43 = vmul.f32 %v243_v17, %v243_v17  ;;  %6634 = vrsqrt.f32 %v8273_v1 }
  0x52   :  { %v8303_v3 = vadd.f32 -0.5, %v237_v31  ;;  %v8305_v0 = vadd.f32 -0.5, %v238_v2  ;;  %v8307_v29 = vadd.f32 -0.5, %v239_v59  ;;  %6636 = vrsqrt.f32 %v8283_v25  ;;  %v18876_v31 = vld [vmem:[#allocation16_spill] sm:$0xff] }
  0x53   :  { %v8310_v50 = vadd.f32 -0.5, %v240_v63  ;;  %v8312_v7 = vadd.f32 -0.5, %v241_v51  ;;  %v8315_v58 = vadd.f32 %v273_v49, %v18874_v9  ;;  %6638 = vrsqrt.f32 %v8289_v45 }
  0x54   :  { %v8318_v62 = vadd.f32 -0.5, %v242_v56  ;;  %v8320_v23 = vadd.f32 -0.5, %v243_v17  ;;  %v8323_v2 = vadd.f32 %v274_v46, %v18876_v31  ;;  %6640 = vrsqrt.f32 %v8295_v39 }
  0x55   :  { %v6617_v59 = vpop.eup %6616  ;;  %v8327_v63 = vadd.f32 %v275_v43, %v18877_v44  ;;  %vm294_vm9 = vcmp.eq.f32.partialorder %v8211_v47, inf  ;;  %vm301_vm12 = vcmp.eq.f32.partialorder %v8218_v54, inf  ;;  %vm296_vm13 = vcmp.eq.f32.partialorder %v8211_v47, 0.0 }
  0x56   :  { %18875 = vst [vmem:[#allocation18_spill] sm:$0xff] %v8320_v23  ;;  %v6619_v15 = vpop.eup %6618  ;;  %vm303_vm0 = vcmp.eq.f32.partialorder %v8218_v54, 0.0  ;;  %vm308_vm1 = vcmp.eq.f32.partialorder %v8226_v32, inf  ;;  %vm310_vm4 = vcmp.eq.f32.partialorder %v8226_v32, 0.0  ;;  %vm315_vm2 = vcmp.eq.f32.partialorder %v8234_v37, inf }
  0x57   :  { %v6621_v51 = vpop.eup %6620  ;;  %6642 = vrsqrt.f32 %v8315_v58  ;;  %vm317_vm5 = vcmp.eq.f32.partialorder %v8234_v37, 0.0  ;;  %vm322_vm7 = vcmp.eq.f32.partialorder %v8241_v38, inf  ;;  %vm329_vm11 = vcmp.eq.f32.partialorder %v8246_v33, inf }
  0x58   :  { %v6623_v28 = vpop.eup %6622  ;;  %v293_v36 = vmul.f32 %v6617_v59, %v8211_v47  ;;  %vm336_vm3 = vcmp.eq.f32.partialorder %v8254_v19, inf  ;;  %6644 = vrsqrt.f32 %v8323_v2  ;;  %v300_v49 = vmul.f32 %v6619_v15, %v8218_v54 }
  0x59   :  { %v6625_v56 = vpop.eup %6624  ;;  %v307_v46 = vmul.f32 %v6621_v51, %v8226_v32  ;;  %v339_v43 = vand.u32 2147483648, %v8254_v19  ;;  %6646 = vrsqrt.f32 %v8327_v63  ;;  %v314_v51 = vmul.f32 %v6623_v28, %v8234_v37 }
  0x5a   :  { %v6627_v17 = vpop.eup %6626  ;;  %v321_v20 = vmul.f32 %v6625_v56, %v8241_v38  ;;  %vm357_vm14 = vcmp.eq.f32.partialorder %v8273_v1, inf  ;;  %v295_v13 = vsel %vm294_vm9, %v8211_v47, %v293_v36  ;;  %vm364_vm15 = vcmp.eq.f32.partialorder %v8283_v25, inf }
  0x5b   :  { %v6629_v59 = vpop.eup %6628  ;;  %v302_v56 = vsel %vm301_vm12, %v8218_v54, %v300_v49  ;;  %v309_v52 = vsel %vm308_vm1, %v8226_v32, %v307_v46  ;;  %v328_v41 = vmul.f32 %v6627_v17, %v8246_v33  ;;  %vm359_vm9 = vcmp.eq.f32.partialorder %v8273_v1, 0.0 }
  0x5c   :  { %v6631_v15 = vpop.eup %6630  ;;  %v335_v44 = vmul.f32 %v6629_v59, %v8254_v19  ;;  %vm366_vm6 = vcmp.eq.f32.partialorder %v8283_v25, 0.0  ;;  %vm373_vm10 = vcmp.eq.f32.partialorder %v8289_v45, 0.0  ;;  %v374_v12 = vand.u32 2147483648, %v8289_v45 }
  0x5d   :  { %v6633_v6 = vpop.eup %6632  ;;  %vm378_vm8 = vcmp.eq.f32.partialorder %v8295_v39, inf  ;;  %v381_v49 = vand.u32 2147483648, %v8295_v39  ;;  %v316_v17 = vsel %vm315_vm2, %v8234_v37, %v314_v51  ;;  %v323_v59 = vsel %vm322_vm7, %v8241_v38, %v321_v20 }
  0x5e   :  { %v6635_v28 = vpop.eup %6634  ;;  %v342_v9 = vmul.f32 %v6631_v15, %v8260_v55  ;;  %v349_v57 = vmul.f32 %v6633_v6, %v8265_v24  ;;  %vm380_vm12 = vcmp.eq.f32.partialorder %v8295_v39, 0.0  ;;  %vm385_vm1 = vcmp.eq.f32.partialorder %v8315_v58, inf }
  0x5f   :  { %v6637_v36 = vpop.eup %6636  ;;  %v18878_v31 = vand.u32 2147483648, %v8211_v47  ;;  %v18879_v51 = vand.u32 2147483648, %v8218_v54  ;;  %v18880_v20 = vand.u32 2147483648, %v8226_v32  ;;  %v395_v15 = vand.u32 2147483648, %v8323_v2 }
  0x60   :  { %v6639_v46 = vpop.eup %6638  ;;  %v330_v23 = vsel %vm329_vm11, %v8246_v33, %v328_v41  ;;  %v337_v47 = vsel %vm336_vm3, %v8254_v19, %v335_v44  ;;  %v363_v54 = vmul.f32 %v6637_v36, %v8283_v25  ;;  %v402_v44 = vand.u32 2147483648, %v8327_v63 }
  0x61   :  { %v6641_v27 = vpop.eup %6640  ;;  %v298_v42 = vsel %vm296_vm13, %v18878_v31, %v295_v13  ;;  %v305_v61 = vsel %vm303_vm0, %v18879_v51, %v302_v56  ;;  %v312_v6 = vsel %vm310_vm4, %v18880_v20, %v309_v52  ;;  %v356_v31 = vmul.f32 %v6635_v28, %v8273_v1 }
  0x62   :  { %vm392_vm13 = vcmp.eq.f32.partialorder %v8323_v2, inf  ;;  %v18881_v13 = vand.u32 2147483648, %v8234_v37  ;;  %v18882_v52 = vand.u32 2147483648, %v8241_v38  ;;  %vm18883_vm0 = vcmp.eq.f32.partialorder %v8241_v38, 0.0 }
  0x63   :  { %v370_v56 = vmul.f32 %v6639_v46, %v8289_v45  ;;  %vm387_vm4 = vcmp.eq.f32.partialorder %v8315_v58, 0.0  ;;  %vm18884_vm2 = vcmp.eq.f32.partialorder %v8260_v55, inf  ;;  %vm18885_vm7 = vcmp.eq.f32.partialorder %v8265_v24, inf }
  0x64   :  { %v319_v32 = vsel %vm317_vm5, %v18881_v13, %v316_v17  ;;  %v326_v41 = vsel %vm18883_vm0, %v18882_v52, %v323_v59  ;;  %v6643_v28 = vpop.eup %6642  ;;  %v344_v36 = vsel %vm18884_vm2, %v8260_v55, %v342_v9  ;;  %v351_v37 = vsel %vm18885_vm7, %v8265_v24, %v349_v57 }
  0x65   :  { %v377_v17 = vmul.f32 %v6641_v27, %v8295_v39  ;;  %vm399_vm5 = vcmp.eq.f32.partialorder %v8327_v63, inf  ;;  %v404_v38 = vadd.f32 %v8231_v10, %v298_v42  ;;  %v18886_v46 = vand.u32 2147483648, %v8246_v33  ;;  %v6645_v27 = vpop.eup %6644 }
  0x66   :  { %vm18887_vm11 = vcmp.eq.f32.partialorder %v8246_v33, 0.0  ;;  %vm18888_vm3 = vcmp.eq.f32.partialorder %v8254_v19, 0.0  ;;  %vm394_vm0 = vcmp.eq.f32.partialorder %v8323_v2, 0.0  ;;  %v405_v9 = vadd.f32 %v8257_v4, %v305_v61 }
  0x67   :  { %v333_v59 = vsel %vm18887_vm11, %v18886_v46, %v330_v23  ;;  %v340_v51 = vsel %vm18888_vm3, %v339_v43, %v337_v47  ;;  %v8448_v57 = vadd.f32 %v8270_v48, %v312_v6  ;;  %v358_v10 = vsel %vm357_vm14, %v8273_v1, %v356_v31 }
  0x68   :  { %v365_v33 = vsel %vm364_vm15, %v8283_v25, %v363_v54  ;;  %v8457_v42 = vadd.f32 %v8277_v21, %v319_v32  ;;  %v8460_v19 = vadd.f32 %v8280_v16, %v326_v41  ;;  %v18889_v4 = vand.u32 2147483648, %v8260_v55  ;;  %v6647_v16 = vpop.eup %6646 }
  0x69   :  { %vm18890_vm2 = vcmp.eq.f32.partialorder %v8260_v55, 0.0  ;;  %v18891_v61 = vand.u32 2147483648, %v8265_v24  ;;  %vm18892_vm7 = vcmp.eq.f32.partialorder %v8265_v24, 0.0  ;;  %vm18893_vm14 = vcmp.eq.f32.partialorder %v8289_v45, inf }
  0x6a   :  { %v347_v48 = vsel %vm18890_vm2, %v18889_v4, %v344_v36  ;;  %v372_v43 = vsel %vm18893_vm14, %v8289_v45, %v370_v56  ;;  %v384_v21 = vmul.f32 %v6643_v28, %v8315_v58  ;;  %vm401_vm15 = vcmp.eq.f32.partialorder %v8327_v63, 0.0 }
  0x6b   :  { %v354_v23 = vsel %vm18892_vm7, %v18891_v61, %v351_v37  ;;  %v379_v20 = vsel %vm378_vm8, %v8295_v39, %v377_v17  ;;  %v409_v55 = vadd.f32 %v8286_v35, %v333_v59  ;;  %v410_v6 = vadd.f32 %v8292_v53, %v340_v51 }
  0x6c   :  { %v436_v47 = vmul.f32 %v404_v38, %v404_v38  ;;  %v18894_v24 = vand.u32 2147483648, %v8273_v1  ;;  %v18895_v54 = vand.u32 2147483648, %v8283_v25  ;;  %v391_v32 = vmul.f32 %v6645_v27, %v8323_v2 }
  0x6d   :  { %v437_v52 = vmul.f32 %v405_v9, %v405_v9  ;;  %v375_v41 = vsel %vm373_vm10, %v374_v12, %v372_v43  ;;  %v411_v35 = vadd.f32 %v8298_v40, %v347_v48  ;;  %v412_v53 = vadd.f32 %v8300_v60, %v354_v23 }
  0x6e   :  { %v361_v31 = vsel %vm359_vm9, %v18894_v24, %v358_v10  ;;  %v368_v13 = vsel %vm366_vm6, %v18895_v54, %v365_v33  ;;  %v438_v56 = vmul.f32 %v8448_v57, %v8448_v57  ;;  %v382_v1 = vsel %vm380_vm12, %v381_v49, %v379_v20  ;;  %v18901_v24 = vld [vmem:[#allocation14_spill] sm:$0xff] }
  0x6f   :  { %v386_v25 = vsel %vm385_vm1, %v8315_v58, %v384_v21  ;;  %v398_v28 = vmul.f32 %v6647_v16, %v8327_v63  ;;  %v439_v45 = vmul.f32 %v8457_v42, %v8457_v42  ;;  %v413_v12 = vadd.f32 %v8303_v3, %v361_v31  ;;  %v18900_v16 = vld [vmem:[#allocation13_spill] sm:$0xff] }
  0x70   :  { %v414_v40 = vadd.f32 %v8305_v0, %v368_v13  ;;  %v440_v60 = vmul.f32 %v8460_v19, %v8460_v19  ;;  %v8508_v36 = vadd.f32 %v436_v47, %v7907_v5  ;;  %v393_v39 = vsel %vm392_vm13, %v8323_v2, %v391_v32 }
  0x71   :  { %v415_v49 = vadd.f32 %v8307_v29, %v375_v41  ;;  %v441_v37 = vmul.f32 %v409_v55, %v409_v55  ;;  %v8515_v17 = vadd.f32 %v437_v52, %v7909_v8  ;;  %v18896_v3 = vand.u32 2147483648, %v8315_v58 }
  0x72   :  { %v416_v46 = vadd.f32 %v8310_v50, %v382_v1  ;;  %v442_v59 = vmul.f32 %v410_v6, %v410_v6  ;;  %v8523_v5 = vadd.f32 %v438_v56, %v7911_v11  ;;  %v400_v51 = vsel %vm399_vm5, %v8327_v63, %v398_v28  ;;  %v18902_v56 = vld [vmem:[#allocation15_spill] sm:$0xff] }
  0x73   :  { %v389_v0 = vsel %vm387_vm4, %v18896_v3, %v386_v25  ;;  %v8528_v29 = vadd.f32 -0.5, %v404_v38  ;;  %v443_v27 = vmul.f32 %v411_v35, %v411_v35  ;;  %v8531_v8 = vadd.f32 %v439_v45, %v7913_v14  ;;  %v18903_v25 = vld [vmem:[#allocation16_spill] sm:$0xff] }
  0x74   :  { %v396_v58 = vsel %vm394_vm0, %v395_v15, %v393_v39  ;;  %v444_v50 = vmul.f32 %v412_v53, %v412_v53  ;;  %v8538_v10 = vadd.f32 %v440_v60, %v7918_v18  ;;  %6648 = vrsqrt.f32 %v8508_v36 }
  0x75   :  { %v417_v11 = vadd.f32 %v8312_v7, %v389_v0  ;;  %v445_v33 = vmul.f32 %v413_v12, %v413_v12  ;;  %v8543_v38 = vadd.f32 %v441_v37, %v7923_v22  ;;  %6650 = vrsqrt.f32 %v8515_v17 }
  0x76   :  { %v403_v14 = vsel %vm401_vm15, %v402_v44, %v400_v51  ;;  %v446_v2 = vmul.f32 %v414_v40, %v414_v40  ;;  %v8551_v15 = vadd.f32 %v442_v59, %v7928_v26  ;;  %6652 = vrsqrt.f32 %v8523_v5  ;;  %v18897_v26 = vld [vmem:[#allocation18_spill] sm:$0xff] }
  0x77   :  { %v8554_v18 = vadd.f32 -0.5, %v405_v9  ;;  %v447_v7 = vmul.f32 %v415_v49, %v415_v49  ;;  %v8557_v4 = vadd.f32 %v443_v27, %v7933_v30  ;;  %6654 = vrsqrt.f32 %v8531_v8  ;;  %v18898_v9 = vld [vmem:[#allocation11_spill] sm:$0xff] }
  0x78   :  { %v418_v22 = vadd.f32 %v8318_v62, %v396_v58  ;;  %v448_v48 = vmul.f32 %v416_v46, %v416_v46  ;;  %v8562_v63 = vadd.f32 %v444_v50, %v7939_v34  ;;  %6656 = vrsqrt.f32 %v8538_v10  ;;  %v18899_v34 = vld [vmem:[#allocation12_spill] sm:$0xff] }
  0x79   :  { %v419_v44 = vadd.f32 %v18897_v26, %v403_v14  ;;  %v8567_v61 = vadd.f32 -0.5, %v8448_v57  ;;  %v8570_v23 = vadd.f32 %v445_v33, %v18898_v9  ;;  %6658 = vrsqrt.f32 %v8543_v38 }
  0x7a   :  { %v8574_v30 = vadd.f32 -0.5, %v8457_v42  ;;  %v8577_v62 = vadd.f32 -0.5, %v8460_v19  ;;  %v8580_v43 = vadd.f32 %v446_v2, %v18899_v34  ;;  %6660 = vrsqrt.f32 %v8551_v15 }
  0x7b   :  { %v8583_v21 = vadd.f32 -0.5, %v409_v55  ;;  %v449_v57 = vmul.f32 %v417_v11, %v417_v11  ;;  %v8586_v20 = vadd.f32 %v447_v7, %v18900_v16  ;;  %6662 = vrsqrt.f32 %v8557_v4 }
  0x7c   :  { %v8589_v47 = vadd.f32 -0.5, %v410_v6  ;;  %v450_v42 = vmul.f32 %v418_v22, %v418_v22  ;;  %v8592_v31 = vadd.f32 %v448_v48, %v18901_v24  ;;  %6664 = vrsqrt.f32 %v8562_v63 }
  0x7d   :  { %v8595_v19 = vadd.f32 -0.5, %v411_v35  ;;  %v8597_v54 = vadd.f32 -0.5, %v412_v53  ;;  %v451_v55 = vmul.f32 %v419_v44, %v419_v44  ;;  %6666 = vrsqrt.f32 %v8570_v23 }
  0x7e   :  { %v8600_v13 = vadd.f32 -0.5, %v413_v12  ;;  %v8602_v32 = vadd.f32 -0.5, %v414_v40  ;;  %v8604_v52 = vadd.f32 -0.5, %v415_v49  ;;  %6668 = vrsqrt.f32 %v8580_v43  ;;  %v18904_v12 = vld [vmem:[#allocation17_spill] sm:$0xff] }
  0x7f   :  { %v8607_v6 = vadd.f32 -0.5, %v416_v46  ;;  %v8609_v41 = vadd.f32 -0.5, %v417_v11  ;;  %v8612_v35 = vadd.f32 %v449_v57, %v18902_v56  ;;  %6670 = vrsqrt.f32 %v8586_v20 }
  0x80   :  { %v8615_v53 = vadd.f32 -0.5, %v418_v22  ;;  %v8617_v1 = vadd.f32 -0.5, %v419_v44  ;;  %v8620_v28 = vadd.f32 %v450_v42, %v18903_v25  ;;  %6672 = vrsqrt.f32 %v8592_v31 }
  0x81   :  { %v6649_v45 = vpop.eup %6648  ;;  %v8624_v40 = vadd.f32 %v451_v55, %v18904_v12  ;;  %vm470_vm10 = vcmp.eq.f32.partialorder %v8508_v36, inf  ;;  %v473_v60 = vand.u32 2147483648, %v8508_v36  ;;  %vm477_vm6 = vcmp.eq.f32.partialorder %v8515_v17, inf }
  0x82   :  { %v6651_v39 = vpop.eup %6650  ;;  %vm472_vm8 = vcmp.eq.f32.partialorder %v8508_v36, 0.0  ;;  %vm479_vm9 = vcmp.eq.f32.partialorder %v8515_v17, 0.0  ;;  %v480_v49 = vand.u32 2147483648, %v8515_v17  ;;  %vm484_vm12 = vcmp.eq.f32.partialorder %v8523_v5, inf }
  0x83   :  { %vm486_vm1 = vcmp.eq.f32.partialorder %v8523_v5, 0.0  ;;  %v6653_v37 = vpop.eup %6652  ;;  %v487_v3 = vand.u32 2147483648, %v8523_v5  ;;  %vm491_vm13 = vcmp.eq.f32.partialorder %v8531_v8, inf  ;;  %v494_v0 = vand.u32 2147483648, %v8531_v8 }
  0x84   :  { %6674 = vrsqrt.f32 %v8612_v35  ;;  %v6655_v46 = vpop.eup %6654  ;;  %vm493_vm4 = vcmp.eq.f32.partialorder %v8531_v8, 0.0  ;;  %vm498_vm5 = vcmp.eq.f32.partialorder %v8538_v10, inf  ;;  %v501_v59 = vand.u32 2147483648, %v8538_v10 }
  0x85   :  { %vm505_vm3 = vcmp.eq.f32.partialorder %v8543_v38, inf  ;;  %v6657_v51 = vpop.eup %6656  ;;  %v469_v27 = vmul.f32 %v6649_v45, %v8508_v36  ;;  %v508_v58 = vand.u32 2147483648, %v8543_v38  ;;  %vm512_vm0 = vcmp.eq.f32.partialorder %v8551_v15, inf }
  0x86   :  { %6676 = vrsqrt.f32 %v8620_v28  ;;  %v6659_v50 = vpop.eup %6658  ;;  %v476_v11 = vmul.f32 %v6651_v39, %v8515_v17  ;;  %v483_v33 = vmul.f32 %v6653_v37, %v8523_v5  ;;  %v515_v14 = vand.u32 2147483648, %v8551_v15 }
  0x87   :  { %v6661_v2 = vpop.eup %6660  ;;  %v522_v7 = vand.u32 2147483648, %v8557_v4  ;;  %v529_v22 = vand.u32 2147483648, %v8562_v63  ;;  %6678 = vrsqrt.f32 %v8624_v40  ;;  %v490_v26 = vmul.f32 %v6655_v46, %v8531_v8 }
  0x88   :  { %v6663_v48 = vpop.eup %6662  ;;  %v497_v44 = vmul.f32 %v6657_v51, %v8538_v10  ;;  %vm533_vm14 = vcmp.eq.f32.partialorder %v8570_v23, inf  ;;  %v536_v9 = vand.u32 2147483648, %v8570_v23  ;;  %v471_v57 = vsel %vm470_vm10, %v8508_v36, %v469_v27 }
  0x89   :  { %v6665_v34 = vpop.eup %6664  ;;  %vm540_vm15 = vcmp.eq.f32.partialorder %v8580_v43, inf  ;;  %v543_v16 = vand.u32 2147483648, %v8580_v43  ;;  %v478_v24 = vsel %vm477_vm6, %v8515_v17, %v476_v11  ;;  %v485_v55 = vsel %vm484_vm12, %v8523_v5, %v483_v33 }
  0x8a   :  { %v6667_v42 = vpop.eup %6666  ;;  %v504_v56 = vmul.f32 %v6659_v50, %v8543_v38  ;;  %v511_v25 = vmul.f32 %v6661_v2, %v8551_v15  ;;  %vm535_vm10 = vcmp.eq.f32.partialorder %v8570_v23, 0.0  ;;  %vm542_vm2 = vcmp.eq.f32.partialorder %v8580_v43, 0.0 }
  0x8b   :  { %v6669_v45 = vpop.eup %6668  ;;  %vm549_vm11 = vcmp.eq.f32.partialorder %v8586_v20, 0.0  ;;  %v550_v12 = vand.u32 2147483648, %v8586_v20  ;;  %vm554_vm7 = vcmp.eq.f32.partialorder %v8592_v31, inf  ;;  %v557_v39 = vand.u32 2147483648, %v8592_v31 }
  0x8c   :  { %v564_v37 = vand.u32 2147483648, %v8612_v35  ;;  %v6671_v46 = vpop.eup %6670  ;;  %v492_v51 = vsel %vm491_vm13, %v8531_v8, %v490_v26  ;;  %v499_v27 = vsel %vm498_vm5, %v8538_v10, %v497_v44  ;;  %v518_v50 = vmul.f32 %v6663_v48, %v8557_v4 }
  0x8d   :  { %v525_v11 = vmul.f32 %v6665_v34, %v8562_v63  ;;  %vm556_vm6 = vcmp.eq.f32.partialorder %v8592_v31, 0.0  ;;  %vm561_vm12 = vcmp.eq.f32.partialorder %v8612_v35, inf  ;;  %v6673_v33 = vpop.eup %6672  ;;  %v474_v2 = vsel %vm472_vm8, %v473_v60, %v471_v57 }
  0x8e   :  { %v481_v26 = vsel %vm479_vm9, %v480_v49, %v478_v24  ;;  %v488_v48 = vsel %vm486_vm1, %v487_v3, %v485_v55  ;;  %v571_v44 = vand.u32 2147483648, %v8620_v28  ;;  %v506_v34 = vsel %vm505_vm3, %v8543_v38, %v504_v56 }
  0x8f   :  { %v513_v36 = vsel %vm512_vm0, %v8551_v15, %v511_v25  ;;  %v532_v60 = vmul.f32 %v6667_v42, %v8570_v23  ;;  %v539_v17 = vmul.f32 %v6669_v45, %v8580_v43  ;;  %vm568_vm8 = vcmp.eq.f32.partialorder %v8620_v28, inf }
  0x90   :  { %v495_v5 = vsel %vm493_vm4, %v494_v0, %v492_v51  ;;  %vm18905_vm9 = vcmp.eq.f32.partialorder %v8538_v10, 0.0  ;;  %v546_v3 = vmul.f32 %v6671_v46, %v8586_v20  ;;  %vm563_vm1 = vcmp.eq.f32.partialorder %v8612_v35, 0.0 }
  0x91   :  { %v502_v49 = vsel %vm18905_vm9, %v501_v59, %v499_v27  ;;  %v578_v57 = vand.u32 2147483648, %v8624_v40  ;;  %v6675_v42 = vpop.eup %6674  ;;  %vm18906_vm13 = vcmp.eq.f32.partialorder %v8557_v4, inf  ;;  %vm18907_vm5 = vcmp.eq.f32.partialorder %v8562_v63, inf }
  0x92   :  { %v520_v24 = vsel %vm18906_vm13, %v8557_v4, %v518_v50  ;;  %v527_v8 = vsel %vm18907_vm5, %v8562_v63, %v525_v11  ;;  %v553_v0 = vmul.f32 %v6673_v33, %v8592_v31  ;;  %vm575_vm4 = vcmp.eq.f32.partialorder %v8624_v40, inf }
  0x93   :  { %v580_v10 = vadd.f32 %v8528_v29, %v474_v2  ;;  %vm18908_vm3 = vcmp.eq.f32.partialorder %v8543_v38, 0.0  ;;  %vm18909_vm0 = vcmp.eq.f32.partialorder %v8551_v15, 0.0  ;;  %vm570_vm9 = vcmp.eq.f32.partialorder %v8620_v28, 0.0  ;;  %v6677_v45 = vpop.eup %6676 }
  0x94   :  { %v509_v59 = vsel %vm18908_vm3, %v508_v58, %v506_v34  ;;  %v516_v55 = vsel %vm18909_vm0, %v515_v14, %v513_v36  ;;  %v8744_v56 = vadd.f32 %v8554_v18, %v481_v26  ;;  %v8747_v25 = vadd.f32 %v8567_v61, %v488_v48 }
  0x95   :  { %v534_v29 = vsel %vm533_vm14, %v8570_v23, %v532_v60  ;;  %v541_v38 = vsel %vm540_vm15, %v8580_v43, %v539_v17  ;;  %v8756_v15 = vadd.f32 %v8574_v30, %v495_v5  ;;  %v8759_v58 = vadd.f32 %v8577_v62, %v502_v49  ;;  %v6679_v62 = vpop.eup %6678 }
  0x96   :  { %vm18910_vm13 = vcmp.eq.f32.partialorder %v8557_v4, 0.0  ;;  %vm18911_vm5 = vcmp.eq.f32.partialorder %v8562_v63, 0.0  ;;  %vm18912_vm14 = vcmp.eq.f32.partialorder %v8586_v20, inf  ;;  %v560_v30 = vmul.f32 %v6675_v42, %v8612_v35  ;;  %v8868_v42 = vld [vmem:[#allocation5 + $0x20] sm:$0xff] }
  0x97   :  { %v523_v18 = vsel %vm18910_vm13, %v522_v7, %v520_v24  ;;  %v530_v61 = vsel %vm18911_vm5, %v529_v22, %v527_v8  ;;  %v548_v14 = vsel %vm18912_vm14, %v8586_v20, %v546_v3  ;;  %vm577_vm15 = vcmp.eq.f32.partialorder %v8624_v40, 0.0 }
  0x98   :  { %v555_v46 = vsel %vm554_vm7, %v8592_v31, %v553_v0  ;;  %v8778_v4 = vadd.f32 %v8583_v21, %v509_v59  ;;  %v8781_v7 = vadd.f32 %v8589_v47, %v516_v55  ;;  %v612_v63 = vmul.f32 %v580_v10, %v580_v10  ;;  %v8820_v31 = vld [vmem:[#allocation5] sm:$0xff]  ;;  %v8889_v55 = vld [vmem:[#allocation5 + $0x30] sm:$0xff] }
  0x99   :  { %v537_v22 = vsel %vm535_vm10, %v536_v9, %v534_v29  ;;  %v544_v51 = vsel %vm542_vm2, %v543_v16, %v541_v38  ;;  %v567_v27 = vmul.f32 %v6677_v45, %v8620_v28  ;;  %v613_v21 = vmul.f32 %v8744_v56, %v8744_v56  ;;  %v8900_v38 = vld [vmem:[#allocation5 + $0x38] sm:$0xff] }
  0x9a   :  { %v551_v47 = vsel %vm549_vm11, %v550_v12, %v548_v14  ;;  %v8797_v50 = vadd.f32 %v8595_v19, %v523_v18  ;;  %v8800_v11 = vadd.f32 %v8597_v54, %v530_v61  ;;  %v614_v23 = vmul.f32 %v8747_v25, %v8747_v25  ;;  %v8907_v61 = vld [vmem:[#allocation5 + $0x40] sm:$0xff] }
  0x9b   :  { %v558_v43 = vsel %vm556_vm6, %v557_v39, %v555_v46  ;;  %v562_v9 = vsel %vm561_vm12, %v8612_v35, %v560_v30  ;;  %v574_v16 = vmul.f32 %v6679_v62, %v8624_v40  ;;  %v615_v20 = vmul.f32 %v8756_v15, %v8756_v15  ;;  %v8917_v62 = vld [vmem:[#allocation5 + $0x48] sm:$0xff] }
  0x9c   :  { %v8813_v19 = vadd.f32 %v8600_v13, %v537_v22  ;;  %v8816_v54 = vadd.f32 %v8602_v32, %v544_v51  ;;  %v616_v12 = vmul.f32 %v8759_v58, %v8759_v58  ;;  %v8823_v39 = vadd.f32 %v8820_v31, %v612_v63  ;;  %v8833_v32 = vld [vmem:[#allocation5 + $0x8] sm:$0xff]  ;;  %18913 = vst [vmem:[#allocation18_spill] sm:$0xff] %v8917_v62  ;;  %v8929_v22 = vld [vmem:[#allocation5 + $0x50] sm:$0xff] }
  0x9d   :  { %v569_v33 = vsel %vm568_vm8, %v8620_v28, %v567_v27  ;;  %v8829_v2 = vadd.f32 %v8604_v52, %v551_v47  ;;  %v617_v13 = vmul.f32 %v8778_v4, %v8778_v4  ;;  %v8836_v26 = vadd.f32 %v8833_v32, %v613_v21  ;;  %v8845_v52 = vld [vmem:[#allocation5 + $0x10] sm:$0xff]  ;;  %18914 = vst [vmem:[#allocation11_spill] sm:$0xff] %v8929_v22  ;;  %v8938_v27 = vld [vmem:[#allocation5 + $0x58] sm:$0xff]  ;;  %v8947_v47 = vld [vmem:[#allocation5 + $0x60] sm:$0xff] }
  0x9e   :  { %v565_v48 = vsel %vm563_vm1, %v564_v37, %v562_v9  ;;  %v592_v34 = vadd.f32 %v8607_v6, %v558_v43  ;;  %v618_v36 = vmul.f32 %v8781_v7, %v8781_v7  ;;  %v8848_v60 = vadd.f32 %v8845_v52, %v614_v23  ;;  %v8857_v37 = vld [vmem:[#allocation5 + $0x18] sm:$0xff]  ;;  %18915 = vst [vmem:[#allocation12_spill] sm:$0xff] %v8938_v27 }
  0x9f   :  { %v576_v17 = vsel %vm575_vm4, %v8624_v40, %v574_v16  ;;  %v8853_v5 = vadd.f32 -0.5, %v580_v10  ;;  %v619_v35 = vmul.f32 %v8797_v50, %v8797_v50  ;;  %v8860_v6 = vadd.f32 %v8857_v37, %v615_v20  ;;  %v8877_v10 = vld [vmem:[#allocation5 + $0x28] sm:$0xff]  ;;  %18916 = vst [vmem:[#allocation13_spill] sm:$0xff] %v8947_v47 }
  0xa0   :  { %v572_v49 = vsel %vm570_vm9, %v571_v44, %v569_v33  ;;  %v620_v3 = vmul.f32 %v8800_v11, %v8800_v11  ;;  %v8871_v24 = vadd.f32 %v8868_v42, %v616_v12  ;;  %6680 = vrsqrt.f32 %v8823_v39 }
  0xa1   :  { %v593_v8 = vadd.f32 %v8609_v41, %v565_v48  ;;  %v621_v0 = vmul.f32 %v8813_v19, %v8813_v19  ;;  %v8880_v28 = vadd.f32 %v8877_v10, %v617_v13  ;;  %6682 = vrsqrt.f32 %v8836_v26  ;;  %v8984_v13 = vld [vmem:[#allocation5 + $0x70] sm:$0xff] }
  0xa2   :  { %v579_v44 = vsel %vm577_vm15, %v578_v57, %v576_v17  ;;  %v622_v59 = vmul.f32 %v8816_v54, %v8816_v54  ;;  %v8892_v41 = vadd.f32 %v8889_v55, %v618_v36  ;;  %6684 = vrsqrt.f32 %v8848_v60  ;;  %18919 = vst [vmem:[#allocation16_spill] sm:$0xff] %v8984_v13 }
  0xa3   :  { %v8896_v45 = vadd.f32 -0.5, %v8744_v56  ;;  %v623_v29 = vmul.f32 %v8829_v2, %v8829_v2  ;;  %v8903_v40 = vadd.f32 %v8900_v38, %v619_v35  ;;  %6686 = vrsqrt.f32 %v8860_v6 }
  0xa4   :  { %v594_v57 = vadd.f32 %v8615_v53, %v572_v49  ;;  %v624_v18 = vmul.f32 %v592_v34, %v592_v34  ;;  %v8910_v14 = vadd.f32 %v8907_v61, %v620_v3  ;;  %6688 = vrsqrt.f32 %v8871_v24 }
  0xa5   :  { %v595_v56 = vadd.f32 %v8617_v1, %v579_v44  ;;  %v8915_v30 = vadd.f32 -0.5, %v8747_v25  ;;  %v8920_v46 = vadd.f32 %v8917_v62, %v621_v0  ;;  %6690 = vrsqrt.f32 %v8880_v28 }
  0xa6   :  { %v8924_v53 = vadd.f32 -0.5, %v8756_v15  ;;  %v8927_v63 = vadd.f32 -0.5, %v8759_v58  ;;  %v8932_v1 = vadd.f32 %v8929_v22, %v622_v59  ;;  %6692 = vrsqrt.f32 %v8892_v41 }
  0xa7   :  { %v8936_v25 = vadd.f32 -0.5, %v8778_v4  ;;  %v625_v51 = vmul.f32 %v593_v8, %v593_v8  ;;  %v8941_v21 = vadd.f32 %v8938_v27, %v623_v29  ;;  %6694 = vrsqrt.f32 %v8903_v40 }
  0xa8   :  { %v8945_v15 = vadd.f32 -0.5, %v8781_v7  ;;  %v626_v58 = vmul.f32 %v594_v57, %v594_v57  ;;  %v8950_v23 = vadd.f32 %v8947_v47, %v624_v18  ;;  %6696 = vrsqrt.f32 %v8910_v14 }
  0xa9   :  { %v8954_v4 = vadd.f32 -0.5, %v8797_v50  ;;  %v8957_v43 = vadd.f32 -0.5, %v8800_v11  ;;  %v627_v9 = vmul.f32 %v595_v56, %v595_v56  ;;  %6698 = vrsqrt.f32 %v8920_v46  ;;  %v8974_v11 = vld [vmem:[#allocation5 + $0x68] sm:$0xff] }
  0xaa   :  { %v8961_v7 = vadd.f32 -0.5, %v8813_v19  ;;  %v8964_v16 = vadd.f32 -0.5, %v8816_v54  ;;  %v8967_v20 = vadd.f32 -0.5, %v8829_v2  ;;  %6700 = vrsqrt.f32 %v8932_v1  ;;  %18917 = vst [vmem:[#allocation14_spill] sm:$0xff] %v8974_v11 }
  0xab   :  { %v8970_v12 = vadd.f32 -0.5, %v592_v34  ;;  %v8972_v50 = vadd.f32 -0.5, %v593_v8  ;;  %v8977_v33 = vadd.f32 %v8974_v11, %v625_v51  ;;  %6702 = vrsqrt.f32 %v8941_v21  ;;  %v8990_v34 = vld [vmem:[#allocation5 + $0x78] sm:$0xff] }
  0xac   :  { %v8980_v19 = vadd.f32 -0.5, %v594_v57  ;;  %v8982_v54 = vadd.f32 -0.5, %v595_v56  ;;  %v8987_v2 = vadd.f32 %v8984_v13, %v626_v58  ;;  %6704 = vrsqrt.f32 %v8950_v23  ;;  %18920 = vst [vmem:[#allocation17_spill] sm:$0xff] %v8990_v34 }
  0xad   :  { %v6681_v48 = vpop.eup %6680  ;;  %v8993_v36 = vadd.f32 %v8990_v34, %v627_v9  ;;  %vm646_vm11 = vcmp.eq.f32.partialorder %v8823_v39, inf  ;;  %vm653_vm2 = vcmp.eq.f32.partialorder %v8836_v26, inf  ;;  %vm648_vm7 = vcmp.eq.f32.partialorder %v8823_v39, 0.0 }
  0xae   :  { %18918 = vst [vmem:[#allocation15_spill] sm:$0xff] %v8982_v54  ;;  %v6683_v35 = vpop.eup %6682  ;;  %vm655_vm10 = vcmp.eq.f32.partialorder %v8836_v26, 0.0  ;;  %vm660_vm6 = vcmp.eq.f32.partialorder %v8848_v60, inf  ;;  %vm662_vm12 = vcmp.eq.f32.partialorder %v8848_v60, 0.0  ;;  %vm667_vm8 = vcmp.eq.f32.partialorder %v8860_v6, inf }
  0xaf   :  { %v6685_v3 = vpop.eup %6684  ;;  %6706 = vrsqrt.f32 %v8977_v33  ;;  %vm669_vm1 = vcmp.eq.f32.partialorder %v8860_v6, 0.0  ;;  %vm674_vm4 = vcmp.eq.f32.partialorder %v8871_v24, inf  ;;  %vm681_vm0 = vcmp.eq.f32.partialorder %v8880_v28, inf }
  0xb0   :  { %v6687_v44 = vpop.eup %6686  ;;  %v645_v57 = vmul.f32 %v6681_v48, %v8823_v39  ;;  %vm688_vm9 = vcmp.eq.f32.partialorder %v8892_v41, inf  ;;  %6708 = vrsqrt.f32 %v8987_v2  ;;  %v652_v51 = vmul.f32 %v6683_v35, %v8836_v26 }
  0xb1   :  { %v6689_v29 = vpop.eup %6688  ;;  %v659_v58 = vmul.f32 %v6685_v3, %v8848_v60  ;;  %v691_v9 = vand.u32 2147483648, %v8892_v41  ;;  %6710 = vrsqrt.f32 %v8993_v36  ;;  %v666_v3 = vmul.f32 %v6687_v44, %v8860_v6 }
  0xb2   :  { %v6691_v56 = vpop.eup %6690  ;;  %v673_v0 = vmul.f32 %v6689_v29, %v8871_v24  ;;  %vm709_vm14 = vcmp.eq.f32.partialorder %v8920_v46, inf  ;;  %v647_v59 = vsel %vm646_vm11, %v8823_v39, %v645_v57  ;;  %vm716_vm15 = vcmp.eq.f32.partialorder %v8932_v1, inf }
  0xb3   :  { %v6693_v48 = vpop.eup %6692  ;;  %v654_v29 = vsel %vm653_vm2, %v8836_v26, %v652_v51  ;;  %v661_v8 = vsel %vm660_vm6, %v8848_v60, %v659_v58  ;;  %v680_v17 = vmul.f32 %v6691_v56, %v8880_v28  ;;  %vm711_vm11 = vcmp.eq.f32.partialorder %v8920_v46, 0.0 }
  0xb4   :  { %v6695_v35 = vpop.eup %6694  ;;  %v687_v34 = vmul.f32 %v6693_v48, %v8892_v41  ;;  %vm718_vm13 = vcmp.eq.f32.partialorder %v8932_v1, 0.0  ;;  %vm725_vm3 = vcmp.eq.f32.partialorder %v8941_v21, 0.0  ;;  %v726_v49 = vand.u32 2147483648, %v8941_v21 }
  0xb5   :  { %v6697_v18 = vpop.eup %6696  ;;  %vm730_vm5 = vcmp.eq.f32.partialorder %v8950_v23, inf  ;;  %v733_v51 = vand.u32 2147483648, %v8950_v23  ;;  %v668_v56 = vsel %vm667_vm8, %v8860_v6, %v666_v3  ;;  %v675_v48 = vsel %vm674_vm4, %v8871_v24, %v673_v0 }
  0xb6   :  { %v6699_v44 = vpop.eup %6698  ;;  %v694_v11 = vmul.f32 %v6695_v35, %v8903_v40  ;;  %v701_v47 = vmul.f32 %v6697_v18, %v8910_v14  ;;  %vm732_vm2 = vcmp.eq.f32.partialorder %v8950_v23, 0.0  ;;  %vm737_vm6 = vcmp.eq.f32.partialorder %v8977_v33, inf }
  0xb7   :  { %v6701_v57 = vpop.eup %6700  ;;  %v18921_v13 = vand.u32 2147483648, %v8823_v39  ;;  %v18922_v3 = vand.u32 2147483648, %v8836_v26  ;;  %v18923_v0 = vand.u32 2147483648, %v8848_v60  ;;  %v747_v35 = vand.u32 2147483648, %v8987_v2 }
  0xb8   :  { %v6703_v58 = vpop.eup %6702  ;;  %v682_v54 = vsel %vm681_vm0, %v8880_v28, %v680_v17  ;;  %v689_v39 = vsel %vm688_vm9, %v8892_v41, %v687_v34  ;;  %v715_v26 = vmul.f32 %v6701_v57, %v8932_v1  ;;  %v754_v34 = vand.u32 2147483648, %v8993_v36 }
  0xb9   :  { %v6705_v27 = vpop.eup %6704  ;;  %v650_v22 = vsel %vm648_vm7, %v18921_v13, %v647_v59  ;;  %v657_v62 = vsel %vm655_vm10, %v18922_v3, %v654_v29  ;;  %v664_v18 = vsel %vm662_vm12, %v18923_v0, %v661_v8  ;;  %v708_v13 = vmul.f32 %v6699_v44, %v8920_v46 }
  0xba   :  { %vm744_vm7 = vcmp.eq.f32.partialorder %v8987_v2, inf  ;;  %v18924_v59 = vand.u32 2147483648, %v8860_v6  ;;  %v18925_v8 = vand.u32 2147483648, %v8871_v24  ;;  %vm18926_vm10 = vcmp.eq.f32.partialorder %v8871_v24, 0.0 }
  0xbb   :  { %v722_v29 = vmul.f32 %v6703_v58, %v8941_v21  ;;  %vm739_vm12 = vcmp.eq.f32.partialorder %v8977_v33, 0.0  ;;  %vm18927_vm8 = vcmp.eq.f32.partialorder %v8903_v40, inf  ;;  %vm18928_vm4 = vcmp.eq.f32.partialorder %v8910_v14, inf }
  0xbc   :  { %v671_v60 = vsel %vm669_vm1, %v18924_v59, %v668_v56  ;;  %v678_v17 = vsel %vm18926_vm10, %v18925_v8, %v675_v48  ;;  %v6707_v44 = vpop.eup %6706  ;;  %v696_v57 = vsel %vm18927_vm8, %v8903_v40, %v694_v11  ;;  %v703_v6 = vsel %vm18928_vm4, %v8910_v14, %v701_v47 }
  0xbd   :  { %v729_v56 = vmul.f32 %v6705_v27, %v8950_v23  ;;  %vm751_vm1 = vcmp.eq.f32.partialorder %v8993_v36, inf  ;;  %v756_v24 = vadd.f32 %v8853_v5, %v650_v22  ;;  %v18929_v58 = vand.u32 2147483648, %v8880_v28  ;;  %v6709_v27 = vpop.eup %6708 }
  0xbe   :  { %vm18930_vm0 = vcmp.eq.f32.partialorder %v8880_v28, 0.0  ;;  %vm18931_vm9 = vcmp.eq.f32.partialorder %v8892_v41, 0.0  ;;  %vm746_vm10 = vcmp.eq.f32.partialorder %v8987_v2, 0.0  ;;  %v757_v11 = vadd.f32 %v8896_v45, %v657_v62 }
  0xbf   :  { %v685_v48 = vsel %vm18930_vm0, %v18929_v58, %v682_v54  ;;  %v692_v3 = vsel %vm18931_vm9, %v691_v9, %v689_v39  ;;  %v9114_v47 = vadd.f32 %v8915_v30, %v664_v18  ;;  %v710_v5 = vsel %vm709_vm14, %v8920_v46, %v708_v13 }
  0xc0   :  { %v717_v28 = vsel %vm716_vm15, %v8932_v1, %v715_v26  ;;  %v9123_v22 = vadd.f32 %v8924_v53, %v671_v60  ;;  %v9126_v41 = vadd.f32 %v8927_v63, %v678_v17  ;;  %v18932_v45 = vand.u32 2147483648, %v8903_v40  ;;  %v6711_v63 = vpop.eup %6710 }
  0xc1   :  { %vm18933_vm8 = vcmp.eq.f32.partialorder %v8903_v40, 0.0  ;;  %v18934_v62 = vand.u32 2147483648, %v8910_v14  ;;  %vm18935_vm4 = vcmp.eq.f32.partialorder %v8910_v14, 0.0  ;;  %vm18936_vm14 = vcmp.eq.f32.partialorder %v8941_v21, inf }
  0xc2   :  { %v699_v30 = vsel %vm18933_vm8, %v18932_v45, %v696_v57  ;;  %v724_v9 = vsel %vm18936_vm14, %v8941_v21, %v722_v29  ;;  %v736_v53 = vmul.f32 %v6707_v44, %v8977_v33  ;;  %vm753_vm15 = vcmp.eq.f32.partialorder %v8993_v36, 0.0 }
  0xc3   :  { %v706_v54 = vsel %vm18935_vm4, %v18934_v62, %v703_v6  ;;  %v731_v0 = vsel %vm730_vm5, %v8950_v23, %v729_v56  ;;  %v761_v40 = vadd.f32 %v8936_v25, %v685_v48  ;;  %v762_v18 = vadd.f32 %v8945_v15, %v692_v3 }
  0xc4   :  { %v788_v39 = vmul.f32 %v756_v24, %v756_v24  ;;  %v18937_v14 = vand.u32 2147483648, %v8920_v46  ;;  %v18938_v26 = vand.u32 2147483648, %v8932_v1  ;;  %v743_v60 = vmul.f32 %v6709_v27, %v8987_v2 }
  0xc5   :  { %v789_v8 = vmul.f32 %v757_v11, %v757_v11  ;;  %v727_v17 = vsel %vm725_vm3, %v726_v49, %v724_v9  ;;  %v763_v25 = vadd.f32 %v8954_v4, %v699_v30  ;;  %v764_v15 = vadd.f32 %v8957_v43, %v706_v54 }
  0xc6   :  { %v713_v13 = vsel %vm711_vm11, %v18937_v14, %v710_v5  ;;  %v720_v59 = vsel %vm718_vm13, %v18938_v26, %v717_v28  ;;  %v790_v29 = vmul.f32 %v9114_v47, %v9114_v47  ;;  %v734_v46 = vsel %vm732_vm2, %v733_v51, %v731_v0 }
  0xc7   :  { %v738_v1 = vsel %vm737_vm6, %v8977_v33, %v736_v53  ;;  %v750_v44 = vmul.f32 %v6711_v63, %v8993_v36  ;;  %v791_v21 = vmul.f32 %v9123_v22, %v9123_v22  ;;  %v765_v49 = vadd.f32 %v8961_v7, %v713_v13 }
  0xc8   :  { %v766_v4 = vadd.f32 %v8964_v16, %v720_v59  ;;  %v792_v43 = vmul.f32 %v9126_v41, %v9126_v41  ;;  %v9174_v57 = vadd.f32 %v8820_v31, %v788_v39  ;;  %v745_v23 = vsel %vm744_vm7, %v8987_v2, %v743_v60  ;;  %v18942_v59 = vld [vmem:[#allocation11_spill] sm:$0xff] }
  0xc9   :  { %v767_v51 = vadd.f32 %v8967_v20, %v727_v17  ;;  %v793_v6 = vmul.f32 %v761_v40, %v761_v40  ;;  %v9181_v56 = vadd.f32 %v8833_v32, %v789_v8  ;;  %v18939_v7 = vand.u32 2147483648, %v8977_v33  ;;  %v18943_v17 = vld [vmem:[#allocation12_spill] sm:$0xff] }
  0xca   :  { %v768_v58 = vadd.f32 %v8970_v12, %v734_v46  ;;  %v794_v48 = vmul.f32 %v762_v18, %v762_v18  ;;  %v9189_v3 = vadd.f32 %v8845_v52, %v790_v29  ;;  %v752_v27 = vsel %vm751_vm1, %v8993_v36, %v750_v44 }
  0xcb   :  { %v741_v16 = vsel %vm739_vm12, %v18939_v7, %v738_v1  ;;  %v9194_v20 = vadd.f32 -0.5, %v756_v24  ;;  %v795_v5 = vmul.f32 %v763_v25, %v763_v25  ;;  %v9197_v28 = vadd.f32 %v8857_v37, %v791_v21  ;;  %v18944_v1 = vld [vmem:[#allocation13_spill] sm:$0xff] }
  0xcc   :  { %v748_v33 = vsel %vm746_vm10, %v747_v35, %v745_v23  ;;  %v796_v12 = vmul.f32 %v764_v15, %v764_v15  ;;  %v9204_v45 = vadd.f32 %v8868_v42, %v792_v43  ;;  %6712 = vrsqrt.f32 %v9174_v57 }
  0xcd   :  { %v769_v30 = vadd.f32 %v8972_v50, %v741_v16  ;;  %v797_v62 = vmul.f32 %v765_v49, %v765_v49  ;;  %v9209_v24 = vadd.f32 %v8877_v10, %v793_v6  ;;  %6714 = vrsqrt.f32 %v9181_v56  ;;  %v18945_v16 = vld [vmem:[#allocation14_spill] sm:$0xff] }
  0xce   :  { %v755_v2 = vsel %vm753_vm15, %v754_v34, %v752_v27  ;;  %v798_v35 = vmul.f32 %v766_v4, %v766_v4  ;;  %v9217_v54 = vadd.f32 %v8889_v55, %v794_v48  ;;  %6716 = vrsqrt.f32 %v9189_v3  ;;  %v18940_v34 = vld [vmem:[#allocation15_spill] sm:$0xff]  ;;  %v18948_v27 = vld [vmem:[#allocation17_spill] sm:$0xff] }
  0xcf   :  { %v9220_v9 = vadd.f32 -0.5, %v757_v11  ;;  %v799_v50 = vmul.f32 %v767_v51, %v767_v51  ;;  %v9223_v53 = vadd.f32 %v8900_v38, %v795_v5  ;;  %6718 = vrsqrt.f32 %v9197_v28  ;;  %v18941_v11 = vld [vmem:[#allocation18_spill] sm:$0xff] }
  0xd0   :  { %v770_v63 = vadd.f32 %v8980_v19, %v748_v33  ;;  %v800_v0 = vmul.f32 %v768_v58, %v768_v58  ;;  %v9228_v36 = vadd.f32 %v8907_v61, %v796_v12  ;;  %6720 = vrsqrt.f32 %v9204_v45 }
  0xd1   :  { %v771_v39 = vadd.f32 %v18940_v34, %v755_v2  ;;  %v9233_v14 = vadd.f32 -0.5, %v9114_v47  ;;  %v9236_v13 = vadd.f32 %v18941_v11, %v797_v62  ;;  %6722 = vrsqrt.f32 %v9209_v24 }
  0xd2   :  { %v9240_v26 = vadd.f32 -0.5, %v9123_v22  ;;  %v9243_v19 = vadd.f32 -0.5, %v9126_v41  ;;  %v9246_v60 = vadd.f32 %v18942_v59, %v798_v35  ;;  %6724 = vrsqrt.f32 %v9217_v54 }
  0xd3   :  { %v9249_v8 = vadd.f32 -0.5, %v761_v40  ;;  %v801_v47 = vmul.f32 %v769_v30, %v769_v30  ;;  %v9252_v29 = vadd.f32 %v18943_v17, %v799_v50  ;;  %6726 = vrsqrt.f32 %v9223_v53 }
  0xd4   :  { %v9255_v46 = vadd.f32 -0.5, %v762_v18  ;;  %v802_v22 = vmul.f32 %v770_v63, %v770_v63  ;;  %v9258_v44 = vadd.f32 %v18944_v1, %v800_v0  ;;  %6728 = vrsqrt.f32 %v9228_v36 }
  0xd5   :  { %v9261_v41 = vadd.f32 -0.5, %v763_v25  ;;  %v9263_v21 = vadd.f32 -0.5, %v764_v15  ;;  %v803_v40 = vmul.f32 %v771_v39, %v771_v39  ;;  %6730 = vrsqrt.f32 %v9236_v13 }
  0xd6   :  { %v9266_v43 = vadd.f32 -0.5, %v765_v49  ;;  %v9268_v23 = vadd.f32 -0.5, %v766_v4  ;;  %v9270_v6 = vadd.f32 -0.5, %v767_v51  ;;  %6732 = vrsqrt.f32 %v9246_v60  ;;  %v18947_v49 = vld [vmem:[#allocation16_spill] sm:$0xff] }
  0xd7   :  { %v9273_v18 = vadd.f32 -0.5, %v768_v58  ;;  %v9275_v7 = vadd.f32 -0.5, %v769_v30  ;;  %v9278_v25 = vadd.f32 %v18945_v16, %v801_v47  ;;  %6734 = vrsqrt.f32 %v9252_v29 }
  0xd8   :  { %v9281_v15 = vadd.f32 -0.5, %v770_v63  ;;  %v9283_v48 = vadd.f32 -0.5, %v771_v39  ;;  %v9286_v4 = vadd.f32 %v18947_v49, %v802_v22  ;;  %6736 = vrsqrt.f32 %v9258_v44 }
  0xd9   :  { %v6713_v51 = vpop.eup %6712  ;;  %v9290_v58 = vadd.f32 %v18948_v27, %v803_v40  ;;  %vm822_vm3 = vcmp.eq.f32.partialorder %v9174_v57, inf  ;;  %vm829_vm13 = vcmp.eq.f32.partialorder %v9181_v56, inf  ;;  %vm824_vm5 = vcmp.eq.f32.partialorder %v9174_v57, 0.0 }
  0xda   :  { %18946 = vst [vmem:[#allocation15_spill] sm:$0xff] %v9283_v48  ;;  %v6715_v33 = vpop.eup %6714  ;;  %vm831_vm11 = vcmp.eq.f32.partialorder %v9181_v56, 0.0  ;;  %vm836_vm2 = vcmp.eq.f32.partialorder %v9189_v3, inf  ;;  %vm838_vm6 = vcmp.eq.f32.partialorder %v9189_v3, 0.0  ;;  %vm843_vm7 = vcmp.eq.f32.partialorder %v9197_v28, inf }
  0xdb   :  { %v6717_v30 = vpop.eup %6716  ;;  %6738 = vrsqrt.f32 %v9278_v25  ;;  %vm845_vm12 = vcmp.eq.f32.partialorder %v9197_v28, 0.0  ;;  %vm850_vm1 = vcmp.eq.f32.partialorder %v9204_v45, inf  ;;  %vm857_vm9 = vcmp.eq.f32.partialorder %v9209_v24, inf }
  0xdc   :  { %v6719_v35 = vpop.eup %6718  ;;  %v821_v0 = vmul.f32 %v6713_v51, %v9174_v57  ;;  %vm864_vm10 = vcmp.eq.f32.partialorder %v9217_v54, inf  ;;  %6740 = vrsqrt.f32 %v9286_v4  ;;  %v828_v47 = vmul.f32 %v6715_v33, %v9181_v56 }
  0xdd   :  { %v6721_v63 = vpop.eup %6720  ;;  %v835_v22 = vmul.f32 %v6717_v30, %v9189_v3  ;;  %v867_v40 = vand.u32 2147483648, %v9217_v54  ;;  %6742 = vrsqrt.f32 %v9290_v58  ;;  %v842_v30 = vmul.f32 %v6719_v35, %v9197_v28 }
  0xde   :  { %v6723_v39 = vpop.eup %6722  ;;  %v849_v2 = vmul.f32 %v6721_v63, %v9204_v45  ;;  %vm885_vm14 = vcmp.eq.f32.partialorder %v9236_v13, inf  ;;  %v823_v50 = vsel %vm822_vm3, %v9174_v57, %v821_v0  ;;  %vm892_vm15 = vcmp.eq.f32.partialorder %v9246_v60, inf }
  0xdf   :  { %v6725_v51 = vpop.eup %6724  ;;  %v830_v63 = vsel %vm829_vm13, %v9181_v56, %v828_v47  ;;  %v837_v62 = vsel %vm836_vm2, %v9189_v3, %v835_v22  ;;  %v856_v5 = vmul.f32 %v6723_v39, %v9209_v24  ;;  %vm887_vm3 = vcmp.eq.f32.partialorder %v9236_v13, 0.0 }
  0xe0   :  { %v6727_v33 = vpop.eup %6726  ;;  %v863_v27 = vmul.f32 %v6725_v51, %v9217_v54  ;;  %vm894_vm8 = vcmp.eq.f32.partialorder %v9246_v60, 0.0  ;;  %vm901_vm0 = vcmp.eq.f32.partialorder %v9252_v29, 0.0  ;;  %v902_v12 = vand.u32 2147483648, %v9252_v29 }
  0xe1   :  { %v6729_v34 = vpop.eup %6728  ;;  %vm906_vm4 = vcmp.eq.f32.partialorder %v9258_v44, inf  ;;  %v909_v47 = vand.u32 2147483648, %v9258_v44  ;;  %v844_v39 = vsel %vm843_vm7, %v9197_v28, %v842_v30  ;;  %v851_v51 = vsel %vm850_vm1, %v9204_v45, %v849_v2 }
  0xe2   :  { %v6731_v35 = vpop.eup %6730  ;;  %v870_v16 = vmul.f32 %v6727_v33, %v9223_v53  ;;  %v877_v1 = vmul.f32 %v6729_v34, %v9228_v36  ;;  %vm908_vm13 = vcmp.eq.f32.partialorder %v9258_v44, 0.0  ;;  %vm913_vm2 = vcmp.eq.f32.partialorder %v9278_v25, inf }
  0xe3   :  { %v6733_v0 = vpop.eup %6732  ;;  %v18949_v49 = vand.u32 2147483648, %v9174_v57  ;;  %v18950_v30 = vand.u32 2147483648, %v9181_v56  ;;  %v18951_v2 = vand.u32 2147483648, %v9189_v3  ;;  %v923_v33 = vand.u32 2147483648, %v9286_v4 }
  0xe4   :  { %v6735_v22 = vpop.eup %6734  ;;  %v858_v48 = vsel %vm857_vm9, %v9209_v24, %v856_v5  ;;  %v865_v57 = vsel %vm864_vm10, %v9217_v54, %v863_v27  ;;  %v891_v56 = vmul.f32 %v6733_v0, %v9246_v60  ;;  %v930_v27 = vand.u32 2147483648, %v9290_v58 }
  0xe5   :  { %v6737_v17 = vpop.eup %6736  ;;  %v826_v59 = vsel %vm824_vm5, %v18949_v49, %v823_v50  ;;  %v833_v11 = vsel %vm831_vm11, %v18950_v30, %v830_v63  ;;  %v840_v34 = vsel %vm838_vm6, %v18951_v2, %v837_v62  ;;  %v884_v49 = vmul.f32 %v6731_v35, %v9236_v13 }
  0xe6   :  { %vm920_vm5 = vcmp.eq.f32.partialorder %v9286_v4, inf  ;;  %v18952_v50 = vand.u32 2147483648, %v9197_v28  ;;  %v18953_v62 = vand.u32 2147483648, %v9204_v45  ;;  %vm18954_vm11 = vcmp.eq.f32.partialorder %v9204_v45, 0.0 }
  0xe7   :  { %v898_v63 = vmul.f32 %v6735_v22, %v9252_v29  ;;  %vm915_vm6 = vcmp.eq.f32.partialorder %v9278_v25, 0.0  ;;  %vm18955_vm7 = vcmp.eq.f32.partialorder %v9223_v53, inf  ;;  %vm18956_vm1 = vcmp.eq.f32.partialorder %v9228_v36, inf }
  0xe8   :  { %v847_v3 = vsel %vm845_vm12, %v18952_v50, %v844_v39  ;;  %v854_v5 = vsel %vm18954_vm11, %v18953_v62, %v851_v51  ;;  %v6739_v35 = vpop.eup %6738  ;;  %v872_v0 = vsel %vm18955_vm7, %v9223_v53, %v870_v16  ;;  %v879_v28 = vsel %vm18956_vm1, %v9228_v36, %v877_v1 }
  0xe9   :  { %v905_v39 = vmul.f32 %v6737_v17, %v9258_v44  ;;  %vm927_vm12 = vcmp.eq.f32.partialorder %v9290_v58, inf  ;;  %v932_v45 = vadd.f32 %v9194_v20, %v826_v59  ;;  %v18957_v22 = vand.u32 2147483648, %v9209_v24  ;;  %v6741_v17 = vpop.eup %6740 }
  0xea   :  { %vm18958_vm9 = vcmp.eq.f32.partialorder %v9209_v24, 0.0  ;;  %vm18959_vm10 = vcmp.eq.f32.partialorder %v9217_v54, 0.0  ;;  %vm922_vm11 = vcmp.eq.f32.partialorder %v9286_v4, 0.0  ;;  %v933_v16 = vadd.f32 %v9220_v9, %v833_v11 }
  0xeb   :  { %v861_v51 = vsel %vm18958_vm9, %v18957_v22, %v858_v48  ;;  %v868_v30 = vsel %vm18959_vm10, %v867_v40, %v865_v57  ;;  %v9411_v1 = vadd.f32 %v9233_v14, %v840_v34  ;;  %v886_v20 = vsel %vm885_vm14, %v9236_v13, %v884_v49 }
  0xec   :  { %v893_v24 = vsel %vm892_vm15, %v9246_v60, %v891_v56  ;;  %v9420_v59 = vadd.f32 %v9240_v26, %v847_v3  ;;  %v9423_v54 = vadd.f32 %v9243_v19, %v854_v5  ;;  %v18960_v9 = vand.u32 2147483648, %v9223_v53  ;;  %v6743_v19 = vpop.eup %6742 }
  0xed   :  { %vm18961_vm7 = vcmp.eq.f32.partialorder %v9223_v53, 0.0  ;;  %v18962_v11 = vand.u32 2147483648, %v9228_v36  ;;  %vm18963_vm1 = vcmp.eq.f32.partialorder %v9228_v36, 0.0  ;;  %vm18964_vm14 = vcmp.eq.f32.partialorder %v9252_v29, inf }
  0xee   :  { %v875_v14 = vsel %vm18961_vm7, %v18960_v9, %v872_v0  ;;  %v900_v40 = vsel %vm18964_vm14, %v9252_v29, %v898_v63  ;;  %v912_v26 = vmul.f32 %v6739_v35, %v9278_v25  ;;  %vm929_vm15 = vcmp.eq.f32.partialorder %v9290_v58, 0.0 }
  0xef   :  { %v882_v48 = vsel %vm18963_vm1, %v18962_v11, %v879_v28  ;;  %v907_v2 = vsel %vm906_vm4, %v9258_v44, %v905_v39  ;;  %v937_v53 = vadd.f32 %v9249_v8, %v861_v51  ;;  %v938_v34 = vadd.f32 %v9255_v46, %v868_v30 }
  0xf0   :  { %v964_v57 = vmul.f32 %v932_v45, %v932_v45  ;;  %v18965_v36 = vand.u32 2147483648, %v9236_v13  ;;  %v18966_v56 = vand.u32 2147483648, %v9246_v60  ;;  %v919_v3 = vmul.f32 %v6741_v17, %v9286_v4 }
  0xf1   :  { %v965_v62 = vmul.f32 %v933_v16, %v933_v16  ;;  %v903_v5 = vsel %vm901_vm0, %v902_v12, %v900_v40  ;;  %v939_v8 = vadd.f32 %v9261_v41, %v875_v14  ;;  %v940_v46 = vadd.f32 %v9263_v21, %v882_v48 }
  0xf2   :  { %v889_v49 = vsel %vm887_vm3, %v18965_v36, %v886_v20  ;;  %v896_v50 = vsel %vm894_vm8, %v18966_v56, %v893_v24  ;;  %v966_v63 = vmul.f32 %v9411_v1, %v9411_v1  ;;  %v910_v13 = vsel %vm908_vm13, %v909_v47, %v907_v2  ;;  %v18972_v36 = vld [vmem:[#allocation13_spill] sm:$0xff] }
  0xf3   :  { %v914_v60 = vsel %vm913_vm2, %v9278_v25, %v912_v26  ;;  %v926_v35 = vmul.f32 %v6743_v19, %v9290_v58  ;;  %v967_v29 = vmul.f32 %v9420_v59, %v9420_v59  ;;  %v941_v12 = vadd.f32 %v9266_v43, %v889_v49  ;;  %v18971_v19 = vld [vmem:[#allocation12_spill] sm:$0xff] }
  0xf4   :  { %v942_v41 = vadd.f32 %v9268_v23, %v896_v50  ;;  %v968_v21 = vmul.f32 %v9423_v54, %v9423_v54  ;;  %v9471_v0 = vadd.f32 %v8820_v31, %v964_v57  ;;  %v921_v44 = vsel %vm920_vm5, %v9286_v4, %v919_v3 }
  0xf5   :  { %v943_v47 = vadd.f32 %v9270_v6, %v903_v5  ;;  %v969_v28 = vmul.f32 %v937_v53, %v937_v53  ;;  %v9478_v39 = vadd.f32 %v8833_v32, %v965_v62  ;;  %v18967_v43 = vand.u32 2147483648, %v9278_v25 }
  0xf6   :  { %v944_v22 = vadd.f32 %v9273_v18, %v910_v13  ;;  %v970_v51 = vmul.f32 %v938_v34, %v938_v34  ;;  %v9486_v31 = vadd.f32 %v8845_v52, %v966_v63  ;;  %v928_v30 = vsel %vm927_vm12, %v9290_v58, %v926_v35  ;;  %v18973_v63 = vld [vmem:[#allocation14_spill] sm:$0xff] }
  0xf7   :  { %v917_v23 = vsel %vm915_vm6, %v18967_v43, %v914_v60  ;;  %v9491_v6 = vadd.f32 -0.5, %v932_v45  ;;  %v971_v17 = vmul.f32 %v939_v8, %v939_v8  ;;  %v9494_v32 = vadd.f32 %v8857_v37, %v967_v29  ;;  %v18974_v60 = vld [vmem:[#allocation16_spill] sm:$0xff] }
  0xf8   :  { %v924_v25 = vsel %vm922_vm11, %v923_v33, %v921_v44  ;;  %v972_v18 = vmul.f32 %v940_v46, %v940_v46  ;;  %v9501_v20 = vadd.f32 %v8868_v42, %v968_v21  ;;  %6744 = vrsqrt.f32 %v9471_v0 }
  0xf9   :  { %v945_v52 = vadd.f32 %v9275_v7, %v917_v23  ;;  %v973_v24 = vmul.f32 %v941_v12, %v941_v12  ;;  %v9506_v45 = vadd.f32 %v8877_v10, %v969_v28  ;;  %6746 = vrsqrt.f32 %v9478_v39 }
  0xfa   :  { %v931_v37 = vsel %vm929_vm15, %v930_v27, %v928_v30  ;;  %v974_v4 = vmul.f32 %v942_v41, %v942_v41  ;;  %v9514_v33 = vadd.f32 %v8889_v55, %v970_v51  ;;  %6748 = vrsqrt.f32 %v9486_v31  ;;  %v18968_v55 = vld [vmem:[#allocation15_spill] sm:$0xff] }
  0xfb   :  { %v9517_v42 = vadd.f32 -0.5, %v933_v16  ;;  %v975_v7 = vmul.f32 %v943_v47, %v943_v47  ;;  %v9520_v9 = vadd.f32 %v8900_v38, %v971_v17  ;;  %6750 = vrsqrt.f32 %v9494_v32  ;;  %v18969_v16 = vld [vmem:[#allocation18_spill] sm:$0xff] }
  0xfc   :  { %v946_v10 = vadd.f32 %v9281_v15, %v924_v25  ;;  %v976_v14 = vmul.f32 %v944_v22, %v944_v22  ;;  %v9525_v58 = vadd.f32 %v8907_v61, %v972_v18  ;;  %6752 = vrsqrt.f32 %v9501_v20  ;;  %v18970_v61 = vld [vmem:[#allocation11_spill] sm:$0xff] }
  0xfd   :  { %v947_v27 = vadd.f32 %v18968_v55, %v931_v37  ;;  %v9530_v11 = vadd.f32 -0.5, %v9411_v1  ;;  %v9533_v48 = vadd.f32 %v18969_v16, %v973_v24  ;;  %6754 = vrsqrt.f32 %v9506_v45 }
  0xfe   :  { %v9537_v38 = vadd.f32 -0.5, %v9420_v59  ;;  %v9540_v15 = vadd.f32 -0.5, %v9423_v54  ;;  %v9543_v40 = vadd.f32 %v18970_v61, %v974_v4  ;;  %6756 = vrsqrt.f32 %v9514_v33 }
  0xff   :  { %v9546_v26 = vadd.f32 -0.5, %v937_v53  ;;  %v977_v1 = vmul.f32 %v945_v52, %v945_v52  ;;  %v9549_v2 = vadd.f32 %v18971_v19, %v975_v7  ;;  %6758 = vrsqrt.f32 %v9520_v9 }
 0x100   :  { %v9552_v57 = vadd.f32 -0.5, %v938_v34  ;;  %v978_v59 = vmul.f32 %v946_v10, %v946_v10  ;;  %v9555_v49 = vadd.f32 %v18972_v36, %v976_v14  ;;  %6760 = vrsqrt.f32 %v9525_v58 }
 0x101   :  { %v9558_v54 = vadd.f32 -0.5, %v939_v8  ;;  %v9560_v56 = vadd.f32 -0.5, %v940_v46  ;;  %v979_v53 = vmul.f32 %v947_v27, %v947_v27  ;;  %6762 = vrsqrt.f32 %v9533_v48 }
 0x102   :  { %v9563_v50 = vadd.f32 -0.5, %v941_v12  ;;  %v9565_v3 = vadd.f32 -0.5, %v942_v41  ;;  %v9567_v62 = vadd.f32 -0.5, %v943_v47  ;;  %6764 = vrsqrt.f32 %v9543_v40  ;;  %v18975_v12 = vld [vmem:[#allocation17_spill] sm:$0xff] }
 0x103   :  { %v9570_v34 = vadd.f32 -0.5, %v944_v22  ;;  %v9572_v5 = vadd.f32 -0.5, %v945_v52  ;;  %v9575_v8 = vadd.f32 %v18973_v63, %v977_v1  ;;  %6766 = vrsqrt.f32 %v9549_v2 }
 0x104   :  { %v9578_v46 = vadd.f32 -0.5, %v946_v10  ;;  %v9580_v13 = vadd.f32 -0.5, %v947_v27  ;;  %v9583_v35 = vadd.f32 %v18974_v60, %v978_v59  ;;  %6768 = vrsqrt.f32 %v9555_v49 }
 0x105   :  { %v6745_v29 = vpop.eup %6744  ;;  %v9587_v41 = vadd.f32 %v18975_v12, %v979_v53  ;;  %vm998_vm0 = vcmp.eq.f32.partialorder %v9471_v0, inf  ;;  %v1001_v21 = vand.u32 2147483648, %v9471_v0  ;;  %vm1005_vm8 = vcmp.eq.f32.partialorder %v9478_v39, inf }
 0x106   :  { %v6747_v44 = vpop.eup %6746  ;;  %vm1000_vm4 = vcmp.eq.f32.partialorder %v9471_v0, 0.0  ;;  %vm1007_vm3 = vcmp.eq.f32.partialorder %v9478_v39, 0.0  ;;  %v1008_v47 = vand.u32 2147483648, %v9478_v39  ;;  %vm1012_vm13 = vcmp.eq.f32.partialorder %v9486_v31, inf }
 0x107   :  { %vm1014_vm2 = vcmp.eq.f32.partialorder %v9486_v31, 0.0  ;;  %v6749_v28 = vpop.eup %6748  ;;  %v1015_v43 = vand.u32 2147483648, %v9486_v31  ;;  %vm1019_vm5 = vcmp.eq.f32.partialorder %v9494_v32, inf  ;;  %v1022_v23 = vand.u32 2147483648, %v9494_v32 }
 0x108   :  { %6770 = vrsqrt.f32 %v9575_v8  ;;  %v6751_v22 = vpop.eup %6750  ;;  %vm1021_vm6 = vcmp.eq.f32.partialorder %v9494_v32, 0.0  ;;  %vm1026_vm12 = vcmp.eq.f32.partialorder %v9501_v20, inf  ;;  %v1029_v51 = vand.u32 2147483648, %v9501_v20 }
 0x109   :  { %vm1033_vm10 = vcmp.eq.f32.partialorder %v9506_v45, inf  ;;  %v6753_v30 = vpop.eup %6752  ;;  %v997_v17 = vmul.f32 %v6745_v29, %v9471_v0  ;;  %v1036_v25 = vand.u32 2147483648, %v9506_v45  ;;  %vm1040_vm11 = vcmp.eq.f32.partialorder %v9514_v33, inf }
 0x10a   :  { %6772 = vrsqrt.f32 %v9583_v35  ;;  %v6755_v18 = vpop.eup %6754  ;;  %v1004_v52 = vmul.f32 %v6747_v44, %v9478_v39  ;;  %v1011_v24 = vmul.f32 %v6749_v28, %v9486_v31  ;;  %v1043_v37 = vand.u32 2147483648, %v9514_v33 }
 0x10b   :  { %v6757_v4 = vpop.eup %6756  ;;  %v1050_v7 = vand.u32 2147483648, %v9520_v9  ;;  %v1057_v10 = vand.u32 2147483648, %v9525_v58  ;;  %6774 = vrsqrt.f32 %v9587_v41  ;;  %v1018_v55 = vmul.f32 %v6751_v22, %v9494_v32 }
 0x10c   :  { %v6759_v14 = vpop.eup %6758  ;;  %v1025_v27 = vmul.f32 %v6753_v30, %v9501_v20  ;;  %vm1061_vm14 = vcmp.eq.f32.partialorder %v9533_v48, inf  ;;  %v1064_v16 = vand.u32 2147483648, %v9533_v48  ;;  %v999_v1 = vsel %vm998_vm0, %v9471_v0, %v997_v17 }
 0x10d   :  { %v6761_v61 = vpop.eup %6760  ;;  %vm1068_vm15 = vcmp.eq.f32.partialorder %v9543_v40, inf  ;;  %v1071_v19 = vand.u32 2147483648, %v9543_v40  ;;  %v1006_v36 = vsel %vm1005_vm8, %v9478_v39, %v1004_v52  ;;  %v1013_v53 = vsel %vm1012_vm13, %v9486_v31, %v1011_v24 }
 0x10e   :  { %v6763_v59 = vpop.eup %6762  ;;  %v1032_v63 = vmul.f32 %v6755_v18, %v9506_v45  ;;  %v1039_v60 = vmul.f32 %v6757_v4, %v9514_v33  ;;  %vm1063_vm0 = vcmp.eq.f32.partialorder %v9533_v48, 0.0  ;;  %vm1070_vm7 = vcmp.eq.f32.partialorder %v9543_v40, 0.0 }
 0x10f   :  { %v6765_v29 = vpop.eup %6764  ;;  %vm1077_vm9 = vcmp.eq.f32.partialorder %v9549_v2, 0.0  ;;  %v1078_v12 = vand.u32 2147483648, %v9549_v2  ;;  %vm1082_vm1 = vcmp.eq.f32.partialorder %v9555_v49, inf  ;;  %v1085_v44 = vand.u32 2147483648, %v9555_v49 }
 0x110   :  { %v1092_v28 = vand.u32 2147483648, %v9575_v8  ;;  %v6767_v22 = vpop.eup %6766  ;;  %v1020_v30 = vsel %vm1019_vm5, %v9494_v32, %v1018_v55  ;;  %v1027_v17 = vsel %vm1026_vm12, %v9501_v20, %v1025_v27  ;;  %v1046_v18 = vmul.f32 %v6759_v14, %v9520_v9 }
 0x111   :  { %v1053_v52 = vmul.f32 %v6761_v61, %v9525_v58  ;;  %vm1084_vm8 = vcmp.eq.f32.partialorder %v9555_v49, 0.0  ;;  %vm1089_vm13 = vcmp.eq.f32.partialorder %v9575_v8, inf  ;;  %v6769_v24 = vpop.eup %6768  ;;  %v1002_v4 = vsel %vm1000_vm4, %v1001_v21, %v999_v1 }
 0x112   :  { %v1009_v55 = vsel %vm1007_vm3, %v1008_v47, %v1006_v36  ;;  %v1016_v14 = vsel %vm1014_vm2, %v1015_v43, %v1013_v53  ;;  %v1099_v27 = vand.u32 2147483648, %v9583_v35  ;;  %v1034_v61 = vsel %vm1033_vm10, %v9506_v45, %v1032_v63 }
 0x113   :  { %v1041_v0 = vsel %vm1040_vm11, %v9514_v33, %v1039_v60  ;;  %v1060_v21 = vmul.f32 %v6763_v59, %v9533_v48  ;;  %v1067_v39 = vmul.f32 %v6765_v29, %v9543_v40  ;;  %vm1096_vm4 = vcmp.eq.f32.partialorder %v9583_v35, inf }
 0x114   :  { %v1023_v31 = vsel %vm1021_vm6, %v1022_v23, %v1020_v30  ;;  %vm18976_vm3 = vcmp.eq.f32.partialorder %v9501_v20, 0.0  ;;  %v1074_v43 = vmul.f32 %v6767_v22, %v9549_v2  ;;  %vm1091_vm2 = vcmp.eq.f32.partialorder %v9575_v8, 0.0 }
 0x115   :  { %v1030_v47 = vsel %vm18976_vm3, %v1029_v51, %v1027_v17  ;;  %v1106_v1 = vand.u32 2147483648, %v9587_v41  ;;  %v6771_v59 = vpop.eup %6770  ;;  %vm18977_vm5 = vcmp.eq.f32.partialorder %v9520_v9, inf  ;;  %vm18978_vm12 = vcmp.eq.f32.partialorder %v9525_v58, inf }
 0x116   :  { %v1048_v36 = vsel %vm18977_vm5, %v9520_v9, %v1046_v18  ;;  %v1055_v32 = vsel %vm18978_vm12, %v9525_v58, %v1053_v52  ;;  %v1081_v23 = vmul.f32 %v6769_v24, %v9555_v49  ;;  %vm1103_vm6 = vcmp.eq.f32.partialorder %v9587_v41, inf }
 0x117   :  { %v1108_v20 = vadd.f32 %v9491_v6, %v1002_v4  ;;  %vm18979_vm10 = vcmp.eq.f32.partialorder %v9506_v45, 0.0  ;;  %vm18980_vm11 = vcmp.eq.f32.partialorder %v9514_v33, 0.0  ;;  %vm1098_vm3 = vcmp.eq.f32.partialorder %v9583_v35, 0.0  ;;  %v6773_v29 = vpop.eup %6772 }
 0x118   :  { %v1037_v51 = vsel %vm18979_vm10, %v1036_v25, %v1034_v61  ;;  %v1044_v53 = vsel %vm18980_vm11, %v1043_v37, %v1041_v0  ;;  %v9707_v63 = vadd.f32 %v9517_v42, %v1009_v55  ;;  %v9710_v60 = vadd.f32 %v9530_v11, %v1016_v14 }
 0x119   :  { %v1062_v6 = vsel %vm1061_vm14, %v9533_v48, %v1060_v21  ;;  %v1069_v45 = vsel %vm1068_vm15, %v9543_v40, %v1067_v39  ;;  %v9719_v33 = vadd.f32 %v9537_v38, %v1023_v31  ;;  %v9722_v25 = vadd.f32 %v9540_v15, %v1030_v47  ;;  %v6775_v15 = vpop.eup %6774 }
 0x11a   :  { %vm18981_vm5 = vcmp.eq.f32.partialorder %v9520_v9, 0.0  ;;  %vm18982_vm12 = vcmp.eq.f32.partialorder %v9525_v58, 0.0  ;;  %vm18983_vm14 = vcmp.eq.f32.partialorder %v9549_v2, inf  ;;  %v1088_v38 = vmul.f32 %v6771_v59, %v9575_v8  ;;  %v9831_v59 = vld [vmem:[#allocation5 + $0x20] sm:$0xff] }
 0x11b   :  { %v1051_v42 = vsel %vm18981_vm5, %v1050_v7, %v1048_v36  ;;  %v1058_v11 = vsel %vm18982_vm12, %v1057_v10, %v1055_v32  ;;  %v1076_v37 = vsel %vm18983_vm14, %v9549_v2, %v1074_v43  ;;  %vm1105_vm15 = vcmp.eq.f32.partialorder %v9587_v41, 0.0 }
 0x11c   :  { %v1083_v22 = vsel %vm1082_vm1, %v9555_v49, %v1081_v23  ;;  %v9741_v9 = vadd.f32 %v9546_v26, %v1037_v51  ;;  %v9744_v7 = vadd.f32 %v9552_v57, %v1044_v53  ;;  %v1140_v58 = vmul.f32 %v1108_v20, %v1108_v20  ;;  %v9783_v49 = vld [vmem:[#allocation5] sm:$0xff]  ;;  %v9852_v53 = vld [vmem:[#allocation5 + $0x30] sm:$0xff] }
 0x11d   :  { %v1065_v10 = vsel %vm1063_vm0, %v1064_v16, %v1062_v6  ;;  %v1072_v30 = vsel %vm1070_vm7, %v1071_v19, %v1069_v45  ;;  %v1095_v17 = vmul.f32 %v6773_v29, %v9583_v35  ;;  %v1141_v26 = vmul.f32 %v9707_v63, %v9707_v63  ;;  %v9863_v45 = vld [vmem:[#allocation5 + $0x38] sm:$0xff] }
 0x11e   :  { %v1079_v57 = vsel %vm1077_vm9, %v1078_v12, %v1076_v37  ;;  %v9760_v18 = vadd.f32 %v9558_v54, %v1051_v42  ;;  %v9763_v52 = vadd.f32 %v9560_v56, %v1058_v11  ;;  %v1142_v48 = vmul.f32 %v9710_v60, %v9710_v60  ;;  %v9870_v11 = vld [vmem:[#allocation5 + $0x40] sm:$0xff] }
 0x11f   :  { %v1086_v40 = vsel %vm1084_vm8, %v1085_v44, %v1083_v22  ;;  %v1090_v16 = vsel %vm1089_vm13, %v9575_v8, %v1088_v38  ;;  %v1102_v19 = vmul.f32 %v6775_v15, %v9587_v41  ;;  %v1143_v2 = vmul.f32 %v9719_v33, %v9719_v33  ;;  %v9880_v15 = vld [vmem:[#allocation5 + $0x48] sm:$0xff] }
 0x120   :  { %v9776_v54 = vadd.f32 %v9563_v50, %v1065_v10  ;;  %v9779_v56 = vadd.f32 %v9565_v3, %v1072_v30  ;;  %v1144_v12 = vmul.f32 %v9722_v25, %v9722_v25  ;;  %v9786_v44 = vadd.f32 %v9783_v49, %v1140_v58  ;;  %v9796_v3 = vld [vmem:[#allocation5 + $0x8] sm:$0xff]  ;;  %18984 = vst [vmem:[#allocation15_spill] sm:$0xff] %v9880_v15  ;;  %v9892_v10 = vld [vmem:[#allocation5 + $0x50] sm:$0xff] }
 0x121   :  { %v1097_v24 = vsel %vm1096_vm4, %v9583_v35, %v1095_v17  ;;  %v9792_v4 = vadd.f32 %v9567_v62, %v1079_v57  ;;  %v1145_v50 = vmul.f32 %v9741_v9, %v9741_v9  ;;  %v9799_v55 = vadd.f32 %v9796_v3, %v1141_v26  ;;  %v9808_v62 = vld [vmem:[#allocation5 + $0x10] sm:$0xff]  ;;  %18985 = vst [vmem:[#allocation18_spill] sm:$0xff] %v9892_v10  ;;  %v9901_v17 = vld [vmem:[#allocation5 + $0x58] sm:$0xff]  ;;  %v9910_v57 = vld [vmem:[#allocation5 + $0x60] sm:$0xff] }
 0x122   :  { %v1093_v14 = vsel %vm1091_vm2, %v1092_v28, %v1090_v16  ;;  %v1120_v61 = vadd.f32 %v9570_v34, %v1086_v40  ;;  %v1146_v0 = vmul.f32 %v9744_v7, %v9744_v7  ;;  %v9811_v21 = vadd.f32 %v9808_v62, %v1142_v48  ;;  %v9820_v28 = vld [vmem:[#allocation5 + $0x18] sm:$0xff]  ;;  %18986 = vst [vmem:[#allocation11_spill] sm:$0xff] %v9901_v17 }
 0x123   :  { %v1104_v39 = vsel %vm1103_vm6, %v9587_v41, %v1102_v19  ;;  %v9816_v31 = vadd.f32 -0.5, %v1108_v20  ;;  %v1147_v8 = vmul.f32 %v9760_v18, %v9760_v18  ;;  %v9823_v34 = vadd.f32 %v9820_v28, %v1143_v2  ;;  %v9840_v20 = vld [vmem:[#allocation5 + $0x28] sm:$0xff]  ;;  %18987 = vst [vmem:[#allocation12_spill] sm:$0xff] %v9910_v57 }
 0x124   :  { %v1100_v47 = vsel %vm1098_vm3, %v1099_v27, %v1097_v24  ;;  %v1148_v43 = vmul.f32 %v9763_v52, %v9763_v52  ;;  %v9834_v36 = vadd.f32 %v9831_v59, %v1144_v12  ;;  %6776 = vrsqrt.f32 %v9786_v44 }
 0x125   :  { %v1121_v32 = vadd.f32 %v9572_v5, %v1093_v14  ;;  %v1149_v23 = vmul.f32 %v9776_v54, %v9776_v54  ;;  %v9843_v35 = vadd.f32 %v9840_v20, %v1145_v50  ;;  %6778 = vrsqrt.f32 %v9799_v55  ;;  %v9947_v50 = vld [vmem:[#allocation5 + $0x70] sm:$0xff] }
 0x126   :  { %v1107_v27 = vsel %vm1105_vm15, %v1106_v1, %v1104_v39  ;;  %v1150_v51 = vmul.f32 %v9779_v56, %v9779_v56  ;;  %v9855_v5 = vadd.f32 %v9852_v53, %v1146_v0  ;;  %6780 = vrsqrt.f32 %v9811_v21  ;;  %18990 = vst [vmem:[#allocation16_spill] sm:$0xff] %v9947_v50 }
 0x127   :  { %v9859_v29 = vadd.f32 -0.5, %v9707_v63  ;;  %v1151_v6 = vmul.f32 %v9792_v4, %v9792_v4  ;;  %v9866_v41 = vadd.f32 %v9863_v45, %v1147_v8  ;;  %6782 = vrsqrt.f32 %v9823_v34 }
 0x128   :  { %v1122_v1 = vadd.f32 %v9578_v46, %v1100_v47  ;;  %v1152_v42 = vmul.f32 %v1120_v61, %v1120_v61  ;;  %v9873_v37 = vadd.f32 %v9870_v11, %v1148_v43  ;;  %6784 = vrsqrt.f32 %v9834_v36 }
 0x129   :  { %v1123_v63 = vadd.f32 %v9580_v13, %v1107_v27  ;;  %v9878_v38 = vadd.f32 -0.5, %v9710_v60  ;;  %v9883_v22 = vadd.f32 %v9880_v15, %v1149_v23  ;;  %6786 = vrsqrt.f32 %v9843_v35 }
 0x12a   :  { %v9887_v46 = vadd.f32 -0.5, %v9719_v33  ;;  %v9890_v58 = vadd.f32 -0.5, %v9722_v25  ;;  %v9895_v13 = vadd.f32 %v9892_v10, %v1150_v51  ;;  %6788 = vrsqrt.f32 %v9855_v5 }
 0x12b   :  { %v9899_v60 = vadd.f32 -0.5, %v9741_v9  ;;  %v1153_v30 = vmul.f32 %v1121_v32, %v1121_v32  ;;  %v9904_v26 = vadd.f32 %v9901_v17, %v1151_v6  ;;  %6790 = vrsqrt.f32 %v9866_v41 }
 0x12c   :  { %v9908_v33 = vadd.f32 -0.5, %v9744_v7  ;;  %v1154_v25 = vmul.f32 %v1122_v1, %v1122_v1  ;;  %v9913_v48 = vadd.f32 %v9910_v57, %v1152_v42  ;;  %6792 = vrsqrt.f32 %v9873_v37 }
 0x12d   :  { %v9917_v9 = vadd.f32 -0.5, %v9760_v18  ;;  %v9920_v40 = vadd.f32 -0.5, %v9763_v52  ;;  %v1155_v16 = vmul.f32 %v1123_v63, %v1123_v63  ;;  %6794 = vrsqrt.f32 %v9883_v22  ;;  %v9937_v52 = vld [vmem:[#allocation5 + $0x68] sm:$0xff] }
 0x12e   :  { %v9924_v7 = vadd.f32 -0.5, %v9776_v54  ;;  %v9927_v19 = vadd.f32 -0.5, %v9779_v56  ;;  %v9930_v2 = vadd.f32 -0.5, %v9792_v4  ;;  %6796 = vrsqrt.f32 %v9895_v13  ;;  %18988 = vst [vmem:[#allocation13_spill] sm:$0xff] %v9937_v52 }
 0x12f   :  { %v9933_v12 = vadd.f32 -0.5, %v1120_v61  ;;  %v9935_v18 = vadd.f32 -0.5, %v1121_v32  ;;  %v9940_v24 = vadd.f32 %v9937_v52, %v1153_v30  ;;  %6798 = vrsqrt.f32 %v9904_v26  ;;  %v9953_v61 = vld [vmem:[#allocation5 + $0x78] sm:$0xff] }
 0x130   :  { %v9943_v54 = vadd.f32 -0.5, %v1122_v1  ;;  %v9945_v56 = vadd.f32 -0.5, %v1123_v63  ;;  %v9950_v4 = vadd.f32 %v9947_v50, %v1154_v25  ;;  %6800 = vrsqrt.f32 %v9913_v48  ;;  %18991 = vst [vmem:[#allocation17_spill] sm:$0xff] %v9953_v61 }
 0x131   :  { %v6777_v14 = vpop.eup %6776  ;;  %v9956_v0 = vadd.f32 %v9953_v61, %v1155_v16  ;;  %vm1174_vm9 = vcmp.eq.f32.partialorder %v9786_v44, inf  ;;  %vm1181_vm7 = vcmp.eq.f32.partialorder %v9799_v55, inf  ;;  %vm1176_vm1 = vcmp.eq.f32.partialorder %v9786_v44, 0.0 }
 0x132   :  { %18989 = vst [vmem:[#allocation14_spill] sm:$0xff] %v9945_v56  ;;  %v6779_v8 = vpop.eup %6778  ;;  %vm1183_vm0 = vcmp.eq.f32.partialorder %v9799_v55, 0.0  ;;  %vm1188_vm8 = vcmp.eq.f32.partialorder %v9811_v21, inf  ;;  %vm1190_vm13 = vcmp.eq.f32.partialorder %v9811_v21, 0.0  ;;  %vm1195_vm4 = vcmp.eq.f32.partialorder %v9823_v34, inf }
 0x133   :  { %v6781_v43 = vpop.eup %6780  ;;  %6802 = vrsqrt.f32 %v9940_v24  ;;  %vm1197_vm2 = vcmp.eq.f32.partialorder %v9823_v34, 0.0  ;;  %vm1202_vm6 = vcmp.eq.f32.partialorder %v9834_v36, inf  ;;  %vm1209_vm11 = vcmp.eq.f32.partialorder %v9843_v35, inf }
 0x134   :  { %v6783_v27 = vpop.eup %6782  ;;  %v1173_v1 = vmul.f32 %v6777_v14, %v9786_v44  ;;  %vm1216_vm3 = vcmp.eq.f32.partialorder %v9855_v5, inf  ;;  %6804 = vrsqrt.f32 %v9950_v4  ;;  %v1180_v30 = vmul.f32 %v6779_v8, %v9799_v55 }
 0x135   :  { %v6785_v6 = vpop.eup %6784  ;;  %v1187_v25 = vmul.f32 %v6781_v43, %v9811_v21  ;;  %v1219_v16 = vand.u32 2147483648, %v9855_v5  ;;  %6806 = vrsqrt.f32 %v9956_v0  ;;  %v1194_v43 = vmul.f32 %v6783_v27, %v9823_v34 }
 0x136   :  { %v6787_v63 = vpop.eup %6786  ;;  %v1201_v23 = vmul.f32 %v6785_v6, %v9834_v36  ;;  %vm1237_vm14 = vcmp.eq.f32.partialorder %v9883_v22, inf  ;;  %v1175_v51 = vsel %vm1174_vm9, %v9786_v44, %v1173_v1  ;;  %vm1244_vm15 = vcmp.eq.f32.partialorder %v9895_v13, inf }
 0x137   :  { %v6789_v14 = vpop.eup %6788  ;;  %v1182_v6 = vsel %vm1181_vm7, %v9799_v55, %v1180_v30  ;;  %v1189_v32 = vsel %vm1188_vm8, %v9811_v21, %v1187_v25  ;;  %v1208_v39 = vmul.f32 %v6787_v63, %v9843_v35  ;;  %vm1239_vm9 = vcmp.eq.f32.partialorder %v9883_v22, 0.0 }
 0x138   :  { %v6791_v8 = vpop.eup %6790  ;;  %v1215_v61 = vmul.f32 %v6789_v14, %v9855_v5  ;;  %vm1246_vm5 = vcmp.eq.f32.partialorder %v9895_v13, 0.0  ;;  %vm1253_vm10 = vcmp.eq.f32.partialorder %v9904_v26, 0.0  ;;  %v1254_v47 = vand.u32 2147483648, %v9904_v26 }
 0x139   :  { %v6793_v42 = vpop.eup %6792  ;;  %vm1258_vm12 = vcmp.eq.f32.partialorder %v9913_v48, inf  ;;  %v1261_v30 = vand.u32 2147483648, %v9913_v48  ;;  %v1196_v63 = vsel %vm1195_vm4, %v9823_v34, %v1194_v43  ;;  %v1203_v14 = vsel %vm1202_vm6, %v9834_v36, %v1201_v23 }
 0x13a   :  { %v6795_v27 = vpop.eup %6794  ;;  %v1222_v52 = vmul.f32 %v6791_v8, %v9866_v41  ;;  %v1229_v57 = vmul.f32 %v6793_v42, %v9873_v37  ;;  %vm1260_vm7 = vcmp.eq.f32.partialorder %v9913_v48, 0.0  ;;  %vm1265_vm8 = vcmp.eq.f32.partialorder %v9940_v24, inf }
 0x13b   :  { %v6797_v1 = vpop.eup %6796  ;;  %v18992_v50 = vand.u32 2147483648, %v9786_v44  ;;  %v18993_v43 = vand.u32 2147483648, %v9799_v55  ;;  %v18994_v23 = vand.u32 2147483648, %v9811_v21  ;;  %v1275_v8 = vand.u32 2147483648, %v9950_v4 }
 0x13c   :  { %v6799_v25 = vpop.eup %6798  ;;  %v1210_v56 = vsel %vm1209_vm11, %v9843_v35, %v1208_v39  ;;  %v1217_v44 = vsel %vm1216_vm3, %v9855_v5, %v1215_v61  ;;  %v1243_v55 = vmul.f32 %v6797_v1, %v9895_v13  ;;  %v1282_v61 = vand.u32 2147483648, %v9956_v0 }
 0x13d   :  { %v6801_v17 = vpop.eup %6800  ;;  %v1178_v10 = vsel %vm1176_vm1, %v18992_v50, %v1175_v51  ;;  %v1185_v15 = vsel %vm1183_vm0, %v18993_v43, %v1182_v6  ;;  %v1192_v42 = vsel %vm1190_vm13, %v18994_v23, %v1189_v32  ;;  %v1236_v50 = vmul.f32 %v6795_v27, %v9883_v22 }
 0x13e   :  { %vm1272_vm1 = vcmp.eq.f32.partialorder %v9950_v4, inf  ;;  %v18995_v51 = vand.u32 2147483648, %v9823_v34  ;;  %v18996_v32 = vand.u32 2147483648, %v9834_v36  ;;  %vm18997_vm0 = vcmp.eq.f32.partialorder %v9834_v36, 0.0 }
 0x13f   :  { %v1250_v6 = vmul.f32 %v6799_v25, %v9904_v26  ;;  %vm1267_vm13 = vcmp.eq.f32.partialorder %v9940_v24, 0.0  ;;  %vm18998_vm4 = vcmp.eq.f32.partialorder %v9866_v41, inf  ;;  %vm18999_vm6 = vcmp.eq.f32.partialorder %v9873_v37, inf }
 0x140   :  { %v1199_v21 = vsel %vm1197_vm2, %v18995_v51, %v1196_v63  ;;  %v1206_v39 = vsel %vm18997_vm0, %v18996_v32, %v1203_v14  ;;  %v6803_v27 = vpop.eup %6802  ;;  %v1224_v1 = vsel %vm18998_vm4, %v9866_v41, %v1222_v52  ;;  %v1231_v34 = vsel %vm18999_vm6, %v9873_v37, %v1229_v57 }
 0x141   :  { %v1257_v63 = vmul.f32 %v6801_v17, %v9913_v48  ;;  %vm1279_vm2 = vcmp.eq.f32.partialorder %v9956_v0, inf  ;;  %v1284_v36 = vadd.f32 %v9816_v31, %v1178_v10  ;;  %v19000_v25 = vand.u32 2147483648, %v9843_v35  ;;  %v6805_v17 = vpop.eup %6804 }
 0x142   :  { %vm19001_vm11 = vcmp.eq.f32.partialorder %v9843_v35, 0.0  ;;  %vm19002_vm3 = vcmp.eq.f32.partialorder %v9855_v5, 0.0  ;;  %vm1274_vm0 = vcmp.eq.f32.partialorder %v9950_v4, 0.0  ;;  %v1285_v52 = vadd.f32 %v9859_v29, %v1185_v15 }
 0x143   :  { %v1213_v14 = vsel %vm19001_vm11, %v19000_v25, %v1210_v56  ;;  %v1220_v43 = vsel %vm19002_vm3, %v1219_v16, %v1217_v44  ;;  %v10077_v57 = vadd.f32 %v9878_v38, %v1192_v42  ;;  %v1238_v31 = vsel %vm1237_vm14, %v9883_v22, %v1236_v50 }
 0x144   :  { %v1245_v35 = vsel %vm1244_vm15, %v9895_v13, %v1243_v55  ;;  %v10086_v10 = vadd.f32 %v9887_v46, %v1199_v21  ;;  %v10089_v5 = vadd.f32 %v9890_v58, %v1206_v39  ;;  %v19003_v29 = vand.u32 2147483648, %v9866_v41  ;;  %v6807_v58 = vpop.eup %6806 }
 0x145   :  { %vm19004_vm4 = vcmp.eq.f32.partialorder %v9866_v41, 0.0  ;;  %v19005_v15 = vand.u32 2147483648, %v9873_v37  ;;  %vm19006_vm6 = vcmp.eq.f32.partialorder %v9873_v37, 0.0  ;;  %vm19007_vm14 = vcmp.eq.f32.partialorder %v9904_v26, inf }
 0x146   :  { %v1227_v38 = vsel %vm19004_vm4, %v19003_v29, %v1224_v1  ;;  %v1252_v16 = vsel %vm19007_vm14, %v9904_v26, %v1250_v6  ;;  %v1264_v46 = vmul.f32 %v6803_v27, %v9940_v24  ;;  %vm1281_vm15 = vcmp.eq.f32.partialorder %v9956_v0, 0.0 }
 0x147   :  { %v1234_v56 = vsel %vm19006_vm6, %v19005_v15, %v1231_v34  ;;  %v1259_v23 = vsel %vm1258_vm12, %v9913_v48, %v1257_v63  ;;  %v1289_v41 = vadd.f32 %v9899_v60, %v1213_v14  ;;  %v1290_v42 = vadd.f32 %v9908_v33, %v1220_v43 }
 0x148   :  { %v1316_v44 = vmul.f32 %v1284_v36, %v1284_v36  ;;  %v19008_v37 = vand.u32 2147483648, %v9883_v22  ;;  %v19009_v55 = vand.u32 2147483648, %v9895_v13  ;;  %v1271_v21 = vmul.f32 %v6805_v17, %v9950_v4 }
 0x149   :  { %v1317_v32 = vmul.f32 %v1285_v52, %v1285_v52  ;;  %v1255_v39 = vsel %vm1253_vm10, %v1254_v47, %v1252_v16  ;;  %v1291_v60 = vadd.f32 %v9917_v9, %v1227_v38  ;;  %v1292_v33 = vadd.f32 %v9920_v40, %v1234_v56 }
 0x14a   :  { %v1241_v50 = vsel %vm1239_vm9, %v19008_v37, %v1238_v31  ;;  %v1248_v51 = vsel %vm1246_vm5, %v19009_v55, %v1245_v35  ;;  %v1318_v6 = vmul.f32 %v10077_v57, %v10077_v57  ;;  %v1262_v22 = vsel %vm1260_vm7, %v1261_v30, %v1259_v23 }
 0x14b   :  { %v1266_v13 = vsel %vm1265_vm8, %v9940_v24, %v1264_v46  ;;  %v1278_v27 = vmul.f32 %v6807_v58, %v9956_v0  ;;  %v1319_v26 = vmul.f32 %v10086_v10, %v10086_v10  ;;  %v1293_v47 = vadd.f32 %v9924_v7, %v1241_v50 }
 0x14c   :  { %v1294_v9 = vadd.f32 %v9927_v19, %v1248_v51  ;;  %v1320_v40 = vmul.f32 %v10089_v5, %v10089_v5  ;;  %v10137_v1 = vadd.f32 %v9783_v49, %v1316_v44  ;;  %v1273_v48 = vsel %vm1272_vm1, %v9950_v4, %v1271_v21  ;;  %v19013_v51 = vld [vmem:[#allocation18_spill] sm:$0xff] }
 0x14d   :  { %v1295_v30 = vadd.f32 %v9930_v2, %v1255_v39  ;;  %v1321_v34 = vmul.f32 %v1289_v41, %v1289_v41  ;;  %v10144_v63 = vadd.f32 %v9796_v3, %v1317_v32  ;;  %v19010_v7 = vand.u32 2147483648, %v9940_v24  ;;  %v19014_v39 = vld [vmem:[#allocation11_spill] sm:$0xff] }
 0x14e   :  { %v1296_v25 = vadd.f32 %v9933_v12, %v1262_v22  ;;  %v1322_v14 = vmul.f32 %v1290_v42, %v1290_v42  ;;  %v10152_v43 = vadd.f32 %v9808_v62, %v1318_v6  ;;  %v1280_v17 = vsel %vm1279_vm2, %v9956_v0, %v1278_v27 }
 0x14f   :  { %v1269_v19 = vsel %vm1267_vm13, %v19010_v7, %v1266_v13  ;;  %v10157_v2 = vadd.f32 -0.5, %v1284_v36  ;;  %v1323_v31 = vmul.f32 %v1291_v60, %v1291_v60  ;;  %v10160_v35 = vadd.f32 %v9820_v28, %v1319_v26  ;;  %v19015_v13 = vld [vmem:[#allocation12_spill] sm:$0xff] }
 0x150   :  { %v1276_v24 = vsel %vm1274_vm0, %v1275_v8, %v1273_v48  ;;  %v1324_v12 = vmul.f32 %v1292_v33, %v1292_v33  ;;  %v10167_v29 = vadd.f32 %v9831_v59, %v1320_v40  ;;  %6808 = vrsqrt.f32 %v10137_v1 }
 0x151   :  { %v1297_v38 = vadd.f32 %v9935_v18, %v1269_v19  ;;  %v1325_v15 = vmul.f32 %v1293_v47, %v1293_v47  ;;  %v10172_v36 = vadd.f32 %v9840_v20, %v1321_v34  ;;  %6810 = vrsqrt.f32 %v10144_v63  ;;  %v19016_v19 = vld [vmem:[#allocation13_spill] sm:$0xff] }
 0x152   :  { %v1283_v4 = vsel %vm1281_vm15, %v1282_v61, %v1280_v17  ;;  %v1326_v8 = vmul.f32 %v1294_v9, %v1294_v9  ;;  %v10180_v56 = vadd.f32 %v9852_v53, %v1322_v14  ;;  %6812 = vrsqrt.f32 %v10152_v43  ;;  %v19011_v61 = vld [vmem:[#allocation14_spill] sm:$0xff]  ;;  %v19019_v17 = vld [vmem:[#allocation17_spill] sm:$0xff] }
 0x153   :  { %v10183_v16 = vadd.f32 -0.5, %v1285_v52  ;;  %v1327_v18 = vmul.f32 %v1295_v30, %v1295_v30  ;;  %v10186_v46 = vadd.f32 %v9863_v45, %v1323_v31  ;;  %6814 = vrsqrt.f32 %v10160_v35  ;;  %v19012_v52 = vld [vmem:[#allocation15_spill] sm:$0xff] }
 0x154   :  { %v1298_v58 = vadd.f32 %v9943_v54, %v1276_v24  ;;  %v1328_v23 = vmul.f32 %v1296_v25, %v1296_v25  ;;  %v10191_v0 = vadd.f32 %v9870_v11, %v1324_v12  ;;  %6816 = vrsqrt.f32 %v10167_v29 }
 0x155   :  { %v1299_v44 = vadd.f32 %v19011_v61, %v1283_v4  ;;  %v10196_v37 = vadd.f32 -0.5, %v10077_v57  ;;  %v10199_v50 = vadd.f32 %v19012_v52, %v1325_v15  ;;  %6818 = vrsqrt.f32 %v10172_v36 }
 0x156   :  { %v10203_v55 = vadd.f32 -0.5, %v10086_v10  ;;  %v10206_v54 = vadd.f32 -0.5, %v10089_v5  ;;  %v10209_v21 = vadd.f32 %v19013_v51, %v1326_v8  ;;  %6820 = vrsqrt.f32 %v10180_v56 }
 0x157   :  { %v10212_v32 = vadd.f32 -0.5, %v1289_v41  ;;  %v1329_v57 = vmul.f32 %v1297_v38, %v1297_v38  ;;  %v10215_v6 = vadd.f32 %v19014_v39, %v1327_v18  ;;  %6822 = vrsqrt.f32 %v10186_v46 }
 0x158   :  { %v10218_v22 = vadd.f32 -0.5, %v1290_v42  ;;  %v1330_v10 = vmul.f32 %v1298_v58, %v1298_v58  ;;  %v10221_v27 = vadd.f32 %v19015_v13, %v1328_v23  ;;  %6824 = vrsqrt.f32 %v10191_v0 }
 0x159   :  { %v10224_v5 = vadd.f32 -0.5, %v1291_v60  ;;  %v10226_v26 = vadd.f32 -0.5, %v1292_v33  ;;  %v1331_v41 = vmul.f32 %v1299_v44, %v1299_v44  ;;  %6826 = vrsqrt.f32 %v10199_v50 }
 0x15a   :  { %v10229_v40 = vadd.f32 -0.5, %v1293_v47  ;;  %v10231_v48 = vadd.f32 -0.5, %v1294_v9  ;;  %v10233_v34 = vadd.f32 -0.5, %v1295_v30  ;;  %6828 = vrsqrt.f32 %v10209_v21  ;;  %v19018_v47 = vld [vmem:[#allocation16_spill] sm:$0xff] }
 0x15b   :  { %v10236_v42 = vadd.f32 -0.5, %v1296_v25  ;;  %v10238_v7 = vadd.f32 -0.5, %v1297_v38  ;;  %v10241_v60 = vadd.f32 %v19016_v19, %v1329_v57  ;;  %6830 = vrsqrt.f32 %v10215_v6 }
 0x15c   :  { %v10244_v33 = vadd.f32 -0.5, %v1298_v58  ;;  %v10246_v14 = vadd.f32 -0.5, %v1299_v44  ;;  %v10249_v9 = vadd.f32 %v19018_v47, %v1330_v10  ;;  %6832 = vrsqrt.f32 %v10221_v27 }
 0x15d   :  { %v6809_v30 = vpop.eup %6808  ;;  %v10253_v25 = vadd.f32 %v19019_v17, %v1331_v41  ;;  %vm1350_vm10 = vcmp.eq.f32.partialorder %v10137_v1, inf  ;;  %vm1357_vm5 = vcmp.eq.f32.partialorder %v10144_v63, inf  ;;  %vm1352_vm12 = vcmp.eq.f32.partialorder %v10137_v1, 0.0 }
 0x15e   :  { %19017 = vst [vmem:[#allocation14_spill] sm:$0xff] %v10246_v14  ;;  %v6811_v24 = vpop.eup %6810  ;;  %vm1359_vm9 = vcmp.eq.f32.partialorder %v10144_v63, 0.0  ;;  %vm1364_vm7 = vcmp.eq.f32.partialorder %v10152_v43, inf  ;;  %vm1366_vm8 = vcmp.eq.f32.partialorder %v10152_v43, 0.0  ;;  %vm1371_vm1 = vcmp.eq.f32.partialorder %v10160_v35, inf }
 0x15f   :  { %v6813_v38 = vpop.eup %6812  ;;  %6834 = vrsqrt.f32 %v10241_v60  ;;  %vm1373_vm13 = vcmp.eq.f32.partialorder %v10160_v35, 0.0  ;;  %vm1378_vm2 = vcmp.eq.f32.partialorder %v10167_v29, inf  ;;  %vm1385_vm3 = vcmp.eq.f32.partialorder %v10172_v36, inf }
 0x160   :  { %v6815_v8 = vpop.eup %6814  ;;  %v1349_v23 = vmul.f32 %v6809_v30, %v10137_v1  ;;  %vm1392_vm0 = vcmp.eq.f32.partialorder %v10180_v56, inf  ;;  %6836 = vrsqrt.f32 %v10249_v9  ;;  %v1356_v57 = vmul.f32 %v6811_v24, %v10144_v63 }
 0x161   :  { %v6817_v58 = vpop.eup %6816  ;;  %v1363_v10 = vmul.f32 %v6813_v38, %v10152_v43  ;;  %v1395_v41 = vand.u32 2147483648, %v10180_v56  ;;  %6838 = vrsqrt.f32 %v10253_v25  ;;  %v1370_v38 = vmul.f32 %v6815_v8, %v10160_v35 }
 0x162   :  { %v6819_v44 = vpop.eup %6818  ;;  %v1377_v4 = vmul.f32 %v6817_v58, %v10167_v29  ;;  %vm1413_vm14 = vcmp.eq.f32.partialorder %v10199_v50, inf  ;;  %v1351_v18 = vsel %vm1350_vm10, %v10137_v1, %v1349_v23  ;;  %vm1420_vm15 = vcmp.eq.f32.partialorder %v10209_v21, inf }
 0x163   :  { %v6821_v30 = vpop.eup %6820  ;;  %v1358_v58 = vsel %vm1357_vm5, %v10144_v63, %v1356_v57  ;;  %v1365_v15 = vsel %vm1364_vm7, %v10152_v43, %v1363_v10  ;;  %v1384_v31 = vmul.f32 %v6819_v44, %v10172_v36  ;;  %vm1415_vm10 = vcmp.eq.f32.partialorder %v10199_v50, 0.0 }
 0x164   :  { %v6823_v24 = vpop.eup %6822  ;;  %v1391_v17 = vmul.f32 %v6821_v30, %v10180_v56  ;;  %vm1422_vm4 = vcmp.eq.f32.partialorder %v10209_v21, 0.0  ;;  %vm1429_vm11 = vcmp.eq.f32.partialorder %v10215_v6, 0.0  ;;  %v1430_v12 = vand.u32 2147483648, %v10215_v6 }
 0x165   :  { %v6825_v61 = vpop.eup %6824  ;;  %vm1434_vm6 = vcmp.eq.f32.partialorder %v10221_v27, inf  ;;  %v1437_v57 = vand.u32 2147483648, %v10221_v27  ;;  %v1372_v44 = vsel %vm1371_vm1, %v10160_v35, %v1370_v38  ;;  %v1379_v30 = vsel %vm1378_vm2, %v10167_v29, %v1377_v4 }
 0x166   :  { %v6827_v8 = vpop.eup %6826  ;;  %v1398_v19 = vmul.f32 %v6823_v24, %v10186_v46  ;;  %v1405_v13 = vmul.f32 %v6825_v61, %v10191_v0  ;;  %vm1436_vm5 = vcmp.eq.f32.partialorder %v10221_v27, 0.0  ;;  %vm1441_vm7 = vcmp.eq.f32.partialorder %v10241_v60, inf }
 0x167   :  { %v6829_v23 = vpop.eup %6828  ;;  %v19020_v47 = vand.u32 2147483648, %v10137_v1  ;;  %v19021_v38 = vand.u32 2147483648, %v10144_v63  ;;  %v19022_v4 = vand.u32 2147483648, %v10152_v43  ;;  %v1451_v24 = vand.u32 2147483648, %v10249_v9 }
 0x168   :  { %v6831_v10 = vpop.eup %6830  ;;  %v1386_v14 = vsel %vm1385_vm3, %v10172_v36, %v1384_v31  ;;  %v1393_v1 = vsel %vm1392_vm0, %v10180_v56, %v1391_v17  ;;  %v1419_v63 = vmul.f32 %v6829_v23, %v10209_v21  ;;  %v1458_v17 = vand.u32 2147483648, %v10253_v25 }
 0x169   :  { %v6833_v39 = vpop.eup %6832  ;;  %v1354_v51 = vsel %vm1352_vm12, %v19020_v47, %v1351_v18  ;;  %v1361_v52 = vsel %vm1359_vm9, %v19021_v38, %v1358_v58  ;;  %v1368_v61 = vsel %vm1366_vm8, %v19022_v4, %v1365_v15  ;;  %v1412_v47 = vmul.f32 %v6827_v8, %v10199_v50 }
 0x16a   :  { %vm1448_vm12 = vcmp.eq.f32.partialorder %v10249_v9, inf  ;;  %v19023_v18 = vand.u32 2147483648, %v10160_v35  ;;  %v19024_v15 = vand.u32 2147483648, %v10167_v29  ;;  %vm19025_vm9 = vcmp.eq.f32.partialorder %v10167_v29, 0.0 }
 0x16b   :  { %v1426_v58 = vmul.f32 %v6831_v10, %v10215_v6  ;;  %vm1443_vm8 = vcmp.eq.f32.partialorder %v10241_v60, 0.0  ;;  %vm19026_vm1 = vcmp.eq.f32.partialorder %v10186_v46, inf  ;;  %vm19027_vm2 = vcmp.eq.f32.partialorder %v10191_v0, inf }
 0x16c   :  { %v1375_v43 = vsel %vm1373_vm13, %v19023_v18, %v1372_v44  ;;  %v1382_v31 = vsel %vm19025_vm9, %v19024_v15, %v1379_v30  ;;  %v6835_v8 = vpop.eup %6834  ;;  %v1400_v23 = vsel %vm19026_vm1, %v10186_v46, %v1398_v19  ;;  %v1407_v35 = vsel %vm19027_vm2, %v10191_v0, %v1405_v13 }
 0x16d   :  { %v1433_v44 = vmul.f32 %v6833_v39, %v10221_v27  ;;  %vm1455_vm13 = vcmp.eq.f32.partialorder %v10253_v25, inf  ;;  %v1460_v29 = vadd.f32 %v10157_v2, %v1354_v51  ;;  %v19028_v10 = vand.u32 2147483648, %v10172_v36  ;;  %v6837_v39 = vpop.eup %6836 }
 0x16e   :  { %vm19029_vm3 = vcmp.eq.f32.partialorder %v10172_v36, 0.0  ;;  %vm19030_vm0 = vcmp.eq.f32.partialorder %v10180_v56, 0.0  ;;  %vm1450_vm9 = vcmp.eq.f32.partialorder %v10249_v9, 0.0  ;;  %v1461_v19 = vadd.f32 %v10183_v16, %v1361_v52 }
 0x16f   :  { %v1389_v30 = vsel %vm19029_vm3, %v19028_v10, %v1386_v14  ;;  %v1396_v38 = vsel %vm19030_vm0, %v1395_v41, %v1393_v1  ;;  %v10374_v13 = vadd.f32 %v10196_v37, %v1368_v61  ;;  %v1414_v2 = vsel %vm1413_vm14, %v10199_v50, %v1412_v47 }
 0x170   :  { %v1421_v36 = vsel %vm1420_vm15, %v10209_v21, %v1419_v63  ;;  %v10383_v51 = vadd.f32 %v10203_v55, %v1375_v43  ;;  %v10386_v56 = vadd.f32 %v10206_v54, %v1382_v31  ;;  %v19031_v16 = vand.u32 2147483648, %v10186_v46  ;;  %v6839_v54 = vpop.eup %6838 }
 0x171   :  { %vm19032_vm1 = vcmp.eq.f32.partialorder %v10186_v46, 0.0  ;;  %v19033_v52 = vand.u32 2147483648, %v10191_v0  ;;  %vm19034_vm2 = vcmp.eq.f32.partialorder %v10191_v0, 0.0  ;;  %vm19035_vm14 = vcmp.eq.f32.partialorder %v10215_v6, inf }
 0x172   :  { %v1403_v37 = vsel %vm19032_vm1, %v19031_v16, %v1400_v23  ;;  %v1428_v41 = vsel %vm19035_vm14, %v10215_v6, %v1426_v58  ;;  %v1440_v55 = vmul.f32 %v6835_v8, %v10241_v60  ;;  %vm1457_vm15 = vcmp.eq.f32.partialorder %v10253_v25, 0.0 }
 0x173   :  { %v1410_v14 = vsel %vm19034_vm2, %v19033_v52, %v1407_v35  ;;  %v1435_v4 = vsel %vm1434_vm6, %v10221_v27, %v1433_v44  ;;  %v1465_v46 = vadd.f32 %v10212_v32, %v1389_v30  ;;  %v1466_v61 = vadd.f32 %v10218_v22, %v1396_v38 }
 0x174   :  { %v1492_v1 = vmul.f32 %v1460_v29, %v1460_v29  ;;  %v19036_v0 = vand.u32 2147483648, %v10199_v50  ;;  %v19037_v63 = vand.u32 2147483648, %v10209_v21  ;;  %v1447_v43 = vmul.f32 %v6837_v39, %v10249_v9 }
 0x175   :  { %v1493_v15 = vmul.f32 %v1461_v19, %v1461_v19  ;;  %v1431_v31 = vsel %vm1429_vm11, %v1430_v12, %v1428_v41  ;;  %v1467_v32 = vadd.f32 %v10224_v5, %v1403_v37  ;;  %v1468_v22 = vadd.f32 %v10226_v26, %v1410_v14 }
 0x176   :  { %v1417_v47 = vsel %vm1415_vm10, %v19036_v0, %v1414_v2  ;;  %v1424_v18 = vsel %vm1422_vm4, %v19037_v63, %v1421_v36  ;;  %v1494_v58 = vmul.f32 %v10374_v13, %v10374_v13  ;;  %v1438_v50 = vsel %vm1436_vm5, %v1437_v57, %v1435_v4  ;;  %v19043_v0 = vld [vmem:[#allocation12_spill] sm:$0xff] }
 0x177   :  { %v1442_v21 = vsel %vm1441_vm7, %v10241_v60, %v1440_v55  ;;  %v1454_v8 = vmul.f32 %v6839_v54, %v10253_v25  ;;  %v1495_v6 = vmul.f32 %v10383_v51, %v10383_v51  ;;  %v1469_v12 = vadd.f32 %v10229_v40, %v1417_v47  ;;  %v19042_v54 = vld [vmem:[#allocation11_spill] sm:$0xff] }
 0x178   :  { %v1470_v5 = vadd.f32 %v10231_v48, %v1424_v18  ;;  %v1496_v26 = vmul.f32 %v10386_v56, %v10386_v56  ;;  %v10434_v23 = vadd.f32 %v9783_v49, %v1492_v1  ;;  %v1449_v27 = vsel %vm1448_vm12, %v10249_v9, %v1447_v43 }
 0x179   :  { %v1471_v57 = vadd.f32 %v10233_v34, %v1431_v31  ;;  %v1497_v35 = vmul.f32 %v1465_v46, %v1465_v46  ;;  %v10441_v44 = vadd.f32 %v9796_v3, %v1493_v15  ;;  %v19038_v40 = vand.u32 2147483648, %v10241_v60 }
 0x17a   :  { %v1472_v10 = vadd.f32 %v10236_v42, %v1438_v50  ;;  %v1498_v30 = vmul.f32 %v1466_v61, %v1466_v61  ;;  %v10449_v49 = vadd.f32 %v9808_v62, %v1494_v58  ;;  %v1456_v38 = vsel %vm1455_vm13, %v10253_v25, %v1454_v8  ;;  %v19044_v58 = vld [vmem:[#allocation13_spill] sm:$0xff] }
 0x17b   :  { %v1445_v48 = vsel %vm1443_vm8, %v19038_v40, %v1442_v21  ;;  %v10454_v34 = vadd.f32 -0.5, %v1460_v29  ;;  %v1499_v39 = vmul.f32 %v1467_v32, %v1467_v32  ;;  %v10457_v3 = vadd.f32 %v9820_v28, %v1495_v6  ;;  %v19045_v21 = vld [vmem:[#allocation16_spill] sm:$0xff] }
 0x17c   :  { %v1452_v60 = vsel %vm1450_vm9, %v1451_v24, %v1449_v27  ;;  %v1500_v42 = vmul.f32 %v1468_v22, %v1468_v22  ;;  %v10464_v2 = vadd.f32 %v9831_v59, %v1496_v26  ;;  %6840 = vrsqrt.f32 %v10434_v23 }
 0x17d   :  { %v1473_v62 = vadd.f32 %v10238_v7, %v1445_v48  ;;  %v1501_v36 = vmul.f32 %v1469_v12, %v1469_v12  ;;  %v10469_v29 = vadd.f32 %v9840_v20, %v1497_v35  ;;  %6842 = vrsqrt.f32 %v10441_v44 }
 0x17e   :  { %v1459_v28 = vsel %vm1457_vm15, %v1458_v17, %v1456_v38  ;;  %v1502_v9 = vmul.f32 %v1470_v5, %v1470_v5  ;;  %v10477_v24 = vadd.f32 %v9852_v53, %v1498_v30  ;;  %6844 = vrsqrt.f32 %v10449_v49  ;;  %v19039_v53 = vld [vmem:[#allocation14_spill] sm:$0xff] }
 0x17f   :  { %v10480_v59 = vadd.f32 -0.5, %v1461_v19  ;;  %v1503_v7 = vmul.f32 %v1471_v57, %v1471_v57  ;;  %v10483_v16 = vadd.f32 %v9863_v45, %v1499_v39  ;;  %6846 = vrsqrt.f32 %v10457_v3  ;;  %v19040_v19 = vld [vmem:[#allocation15_spill] sm:$0xff] }
 0x180   :  { %v1474_v20 = vadd.f32 %v10244_v33, %v1452_v60  ;;  %v1504_v37 = vmul.f32 %v1472_v10, %v1472_v10  ;;  %v10488_v25 = vadd.f32 %v9870_v11, %v1500_v42  ;;  %6848 = vrsqrt.f32 %v10464_v2  ;;  %v19041_v11 = vld [vmem:[#allocation18_spill] sm:$0xff] }
 0x181   :  { %v1475_v17 = vadd.f32 %v19039_v53, %v1459_v28  ;;  %v10493_v52 = vadd.f32 -0.5, %v10374_v13  ;;  %v10496_v14 = vadd.f32 %v19040_v19, %v1501_v36  ;;  %6850 = vrsqrt.f32 %v10469_v29 }
 0x182   :  { %v10500_v45 = vadd.f32 -0.5, %v10383_v51  ;;  %v10503_v33 = vadd.f32 -0.5, %v10386_v56  ;;  %v10506_v41 = vadd.f32 %v19041_v11, %v1502_v9  ;;  %6852 = vrsqrt.f32 %v10477_v24 }
 0x183   :  { %v10509_v55 = vadd.f32 -0.5, %v1465_v46  ;;  %v1505_v13 = vmul.f32 %v1473_v62, %v1473_v62  ;;  %v10512_v4 = vadd.f32 %v19042_v54, %v1503_v7  ;;  %6854 = vrsqrt.f32 %v10483_v16 }
 0x184   :  { %v10515_v1 = vadd.f32 -0.5, %v1466_v61  ;;  %v1506_v51 = vmul.f32 %v1474_v20, %v1474_v20  ;;  %v10518_v47 = vadd.f32 %v19043_v0, %v1504_v37  ;;  %6856 = vrsqrt.f32 %v10488_v25 }
 0x185   :  { %v10521_v56 = vadd.f32 -0.5, %v1467_v32  ;;  %v10523_v63 = vadd.f32 -0.5, %v1468_v22  ;;  %v1507_v46 = vmul.f32 %v1475_v17, %v1475_v17  ;;  %6858 = vrsqrt.f32 %v10496_v14 }
 0x186   :  { %v10526_v18 = vadd.f32 -0.5, %v1469_v12  ;;  %v10528_v43 = vadd.f32 -0.5, %v1470_v5  ;;  %v10530_v15 = vadd.f32 -0.5, %v1471_v57  ;;  %6860 = vrsqrt.f32 %v10506_v41  ;;  %v19046_v12 = vld [vmem:[#allocation17_spill] sm:$0xff] }
 0x187   :  { %v10533_v61 = vadd.f32 -0.5, %v1472_v10  ;;  %v10535_v31 = vadd.f32 -0.5, %v1473_v62  ;;  %v10538_v32 = vadd.f32 %v19044_v58, %v1505_v13  ;;  %6862 = vrsqrt.f32 %v10512_v4 }
 0x188   :  { %v10541_v22 = vadd.f32 -0.5, %v1474_v20  ;;  %v10543_v50 = vadd.f32 -0.5, %v1475_v17  ;;  %v10546_v8 = vadd.f32 %v19045_v21, %v1506_v51  ;;  %6864 = vrsqrt.f32 %v10518_v47 }
 0x189   :  { %v6841_v6 = vpop.eup %6840  ;;  %v10550_v5 = vadd.f32 %v19046_v12, %v1507_v46  ;;  %vm1526_vm11 = vcmp.eq.f32.partialorder %v10434_v23, inf  ;;  %v1529_v26 = vand.u32 2147483648, %v10434_v23  ;;  %vm1533_vm4 = vcmp.eq.f32.partialorder %v10441_v44, inf }
 0x18a   :  { %v6843_v27 = vpop.eup %6842  ;;  %vm1528_vm6 = vcmp.eq.f32.partialorder %v10434_v23, 0.0  ;;  %vm1535_vm10 = vcmp.eq.f32.partialorder %v10441_v44, 0.0  ;;  %v1536_v57 = vand.u32 2147483648, %v10441_v44  ;;  %vm1540_vm5 = vcmp.eq.f32.partialorder %v10449_v49, inf }
 0x18b   :  { %vm1542_vm7 = vcmp.eq.f32.partialorder %v10449_v49, 0.0  ;;  %v6845_v35 = vpop.eup %6844  ;;  %v1543_v40 = vand.u32 2147483648, %v10449_v49  ;;  %vm1547_vm12 = vcmp.eq.f32.partialorder %v10457_v3, inf  ;;  %v1550_v48 = vand.u32 2147483648, %v10457_v3 }
 0x18c   :  { %6866 = vrsqrt.f32 %v10538_v32  ;;  %v6847_v10 = vpop.eup %6846  ;;  %vm1549_vm8 = vcmp.eq.f32.partialorder %v10457_v3, 0.0  ;;  %vm1554_vm13 = vcmp.eq.f32.partialorder %v10464_v2, inf  ;;  %v1557_v30 = vand.u32 2147483648, %v10464_v2 }
 0x18d   :  { %vm1561_vm0 = vcmp.eq.f32.partialorder %v10469_v29, inf  ;;  %v6849_v38 = vpop.eup %6848  ;;  %v1525_v39 = vmul.f32 %v6841_v6, %v10434_v23  ;;  %v1564_v60 = vand.u32 2147483648, %v10469_v29  ;;  %vm1568_vm9 = vcmp.eq.f32.partialorder %v10477_v24, inf }
 0x18e   :  { %6868 = vrsqrt.f32 %v10546_v8  ;;  %v6851_v42 = vpop.eup %6850  ;;  %v1532_v62 = vmul.f32 %v6843_v27, %v10441_v44  ;;  %v1539_v36 = vmul.f32 %v6845_v35, %v10449_v49  ;;  %v1571_v28 = vand.u32 2147483648, %v10477_v24 }
 0x18f   :  { %v6853_v9 = vpop.eup %6852  ;;  %v1578_v7 = vand.u32 2147483648, %v10483_v16  ;;  %v1585_v20 = vand.u32 2147483648, %v10488_v25  ;;  %6870 = vrsqrt.f32 %v10550_v5  ;;  %v1546_v53 = vmul.f32 %v6847_v10, %v10457_v3 }
 0x190   :  { %v6855_v37 = vpop.eup %6854  ;;  %v1553_v17 = vmul.f32 %v6849_v38, %v10464_v2  ;;  %vm1589_vm14 = vcmp.eq.f32.partialorder %v10496_v14, inf  ;;  %v1592_v19 = vand.u32 2147483648, %v10496_v14  ;;  %v1527_v13 = vsel %vm1526_vm11, %v10434_v23, %v1525_v39 }
 0x191   :  { %v6857_v11 = vpop.eup %6856  ;;  %vm1596_vm15 = vcmp.eq.f32.partialorder %v10506_v41, inf  ;;  %v1599_v54 = vand.u32 2147483648, %v10506_v41  ;;  %v1534_v0 = vsel %vm1533_vm4, %v10441_v44, %v1532_v62  ;;  %v1541_v46 = vsel %vm1540_vm5, %v10449_v49, %v1539_v36 }
 0x192   :  { %v6859_v51 = vpop.eup %6858  ;;  %v1560_v58 = vmul.f32 %v6851_v42, %v10469_v29  ;;  %v1567_v21 = vmul.f32 %v6853_v9, %v10477_v24  ;;  %vm1591_vm11 = vcmp.eq.f32.partialorder %v10496_v14, 0.0  ;;  %vm1598_vm1 = vcmp.eq.f32.partialorder %v10506_v41, 0.0 }
 0x193   :  { %v6861_v6 = vpop.eup %6860  ;;  %vm1605_vm3 = vcmp.eq.f32.partialorder %v10512_v4, 0.0  ;;  %v1606_v12 = vand.u32 2147483648, %v10512_v4  ;;  %vm1610_vm2 = vcmp.eq.f32.partialorder %v10518_v47, inf  ;;  %v1613_v27 = vand.u32 2147483648, %v10518_v47 }
 0x194   :  { %v1620_v35 = vand.u32 2147483648, %v10538_v32  ;;  %v6863_v10 = vpop.eup %6862  ;;  %v1548_v38 = vsel %vm1547_vm12, %v10457_v3, %v1546_v53  ;;  %v1555_v39 = vsel %vm1554_vm13, %v10464_v2, %v1553_v17  ;;  %v1574_v42 = vmul.f32 %v6855_v37, %v10483_v16 }
 0x195   :  { %v1581_v62 = vmul.f32 %v6857_v11, %v10488_v25  ;;  %vm1612_vm4 = vcmp.eq.f32.partialorder %v10518_v47, 0.0  ;;  %vm1617_vm5 = vcmp.eq.f32.partialorder %v10538_v32, inf  ;;  %v6865_v36 = vpop.eup %6864  ;;  %v1530_v9 = vsel %vm1528_vm6, %v1529_v26, %v1527_v13 }
 0x196   :  { %v1537_v53 = vsel %vm1535_vm10, %v1536_v57, %v1534_v0  ;;  %v1544_v37 = vsel %vm1542_vm7, %v1543_v40, %v1541_v46  ;;  %v1627_v17 = vand.u32 2147483648, %v10546_v8  ;;  %v1562_v11 = vsel %vm1561_vm0, %v10469_v29, %v1560_v58 }
 0x197   :  { %v1569_v23 = vsel %vm1568_vm9, %v10477_v24, %v1567_v21  ;;  %v1588_v26 = vmul.f32 %v6859_v51, %v10496_v14  ;;  %v1595_v44 = vmul.f32 %v6861_v6, %v10506_v41  ;;  %vm1624_vm6 = vcmp.eq.f32.partialorder %v10546_v8, inf }
 0x198   :  { %v1551_v49 = vsel %vm1549_vm8, %v1550_v48, %v1548_v38  ;;  %vm19047_vm10 = vcmp.eq.f32.partialorder %v10464_v2, 0.0  ;;  %v1602_v40 = vmul.f32 %v6863_v10, %v10512_v4  ;;  %vm1619_vm7 = vcmp.eq.f32.partialorder %v10538_v32, 0.0 }
 0x199   :  { %v1558_v57 = vsel %vm19047_vm10, %v1557_v30, %v1555_v39  ;;  %v1634_v13 = vand.u32 2147483648, %v10550_v5  ;;  %v6867_v51 = vpop.eup %6866  ;;  %vm19048_vm12 = vcmp.eq.f32.partialorder %v10483_v16, inf  ;;  %vm19049_vm13 = vcmp.eq.f32.partialorder %v10488_v25, inf }
 0x19a   :  { %v1576_v0 = vsel %vm19048_vm12, %v10483_v16, %v1574_v42  ;;  %v1583_v3 = vsel %vm19049_vm13, %v10488_v25, %v1581_v62  ;;  %v1609_v48 = vmul.f32 %v6865_v36, %v10518_v47  ;;  %vm1631_vm8 = vcmp.eq.f32.partialorder %v10550_v5, inf }
 0x19b   :  { %v1636_v2 = vadd.f32 %v10454_v34, %v1530_v9  ;;  %vm19050_vm0 = vcmp.eq.f32.partialorder %v10469_v29, 0.0  ;;  %vm19051_vm9 = vcmp.eq.f32.partialorder %v10477_v24, 0.0  ;;  %vm1626_vm10 = vcmp.eq.f32.partialorder %v10546_v8, 0.0  ;;  %v6869_v6 = vpop.eup %6868 }
 0x19c   :  { %v1565_v30 = vsel %vm19050_vm0, %v1564_v60, %v1562_v11  ;;  %v1572_v46 = vsel %vm19051_vm9, %v1571_v28, %v1569_v23  ;;  %v10670_v58 = vadd.f32 %v10480_v59, %v1537_v53  ;;  %v10673_v21 = vadd.f32 %v10493_v52, %v1544_v37 }
 0x19d   :  { %v1590_v34 = vsel %vm1589_vm14, %v10496_v14, %v1588_v26  ;;  %v1597_v29 = vsel %vm1596_vm15, %v10506_v41, %v1595_v44  ;;  %v10682_v24 = vadd.f32 %v10500_v45, %v1551_v49  ;;  %v10685_v60 = vadd.f32 %v10503_v33, %v1558_v57  ;;  %v6871_v33 = vpop.eup %6870 }
 0x19e   :  { %vm19052_vm12 = vcmp.eq.f32.partialorder %v10483_v16, 0.0  ;;  %vm19053_vm13 = vcmp.eq.f32.partialorder %v10488_v25, 0.0  ;;  %vm19054_vm14 = vcmp.eq.f32.partialorder %v10512_v4, inf  ;;  %v1616_v45 = vmul.f32 %v6867_v51, %v10538_v32  ;;  %v10794_v51 = vld [vmem:[#allocation5 + $0x20] sm:$0xff] }
 0x19f   :  { %v1579_v59 = vsel %vm19052_vm12, %v1578_v7, %v1576_v0  ;;  %v1586_v52 = vsel %vm19053_vm13, %v1585_v20, %v1583_v3  ;;  %v1604_v28 = vsel %vm19054_vm14, %v10512_v4, %v1602_v40  ;;  %vm1633_vm15 = vcmp.eq.f32.partialorder %v10550_v5, 0.0 }
 0x1a0   :  { %v1611_v10 = vsel %vm1610_vm2, %v10518_v47, %v1609_v48  ;;  %v10704_v16 = vadd.f32 %v10509_v55, %v1565_v30  ;;  %v10707_v7 = vadd.f32 %v10515_v1, %v1572_v46  ;;  %v1668_v25 = vmul.f32 %v1636_v2, %v1636_v2  ;;  %v10746_v47 = vld [vmem:[#allocation5] sm:$0xff]  ;;  %v10815_v46 = vld [vmem:[#allocation5 + $0x30] sm:$0xff] }
 0x1a1   :  { %v1593_v20 = vsel %vm1591_vm11, %v1592_v19, %v1590_v34  ;;  %v1600_v38 = vsel %vm1598_vm1, %v1599_v54, %v1597_v29  ;;  %v1623_v39 = vmul.f32 %v6869_v6, %v10546_v8  ;;  %v1669_v55 = vmul.f32 %v10670_v58, %v10670_v58  ;;  %v10826_v29 = vld [vmem:[#allocation5 + $0x38] sm:$0xff] }
 0x1a2   :  { %v1607_v1 = vsel %vm1605_vm3, %v1606_v12, %v1604_v28  ;;  %v10723_v42 = vadd.f32 %v10521_v56, %v1579_v59  ;;  %v10726_v62 = vadd.f32 %v10523_v63, %v1586_v52  ;;  %v1670_v14 = vmul.f32 %v10673_v21, %v10673_v21  ;;  %v10833_v52 = vld [vmem:[#allocation5 + $0x40] sm:$0xff] }
 0x1a3   :  { %v1614_v41 = vsel %vm1612_vm4, %v1613_v27, %v1611_v10  ;;  %v1618_v19 = vsel %vm1617_vm5, %v10538_v32, %v1616_v45  ;;  %v1630_v54 = vmul.f32 %v6871_v33, %v10550_v5  ;;  %v1671_v4 = vmul.f32 %v10682_v24, %v10682_v24  ;;  %v10843_v33 = vld [vmem:[#allocation5 + $0x48] sm:$0xff] }
 0x1a4   :  { %v10739_v56 = vadd.f32 %v10526_v18, %v1593_v20  ;;  %v10742_v63 = vadd.f32 %v10528_v43, %v1600_v38  ;;  %v1672_v12 = vmul.f32 %v10685_v60, %v10685_v60  ;;  %v10749_v27 = vadd.f32 %v10746_v47, %v1668_v25  ;;  %v10759_v43 = vld [vmem:[#allocation5 + $0x8] sm:$0xff]  ;;  %19055 = vst [vmem:[#allocation14_spill] sm:$0xff] %v10843_v33  ;;  %v10855_v20 = vld [vmem:[#allocation5 + $0x50] sm:$0xff] }
 0x1a5   :  { %v1625_v36 = vsel %vm1624_vm6, %v10546_v8, %v1623_v39  ;;  %v10755_v9 = vadd.f32 %v10530_v15, %v1607_v1  ;;  %v1673_v18 = vmul.f32 %v10704_v16, %v10704_v16  ;;  %v10762_v53 = vadd.f32 %v10759_v43, %v1669_v55  ;;  %v10771_v15 = vld [vmem:[#allocation5 + $0x10] sm:$0xff]  ;;  %19056 = vst [vmem:[#allocation15_spill] sm:$0xff] %v10855_v20  ;;  %v10864_v39 = vld [vmem:[#allocation5 + $0x58] sm:$0xff]  ;;  %v10873_v1 = vld [vmem:[#allocation5 + $0x60] sm:$0xff] }
 0x1a6   :  { %v1621_v37 = vsel %vm1619_vm7, %v1620_v35, %v1618_v19  ;;  %v1648_v11 = vadd.f32 %v10533_v61, %v1614_v41  ;;  %v1674_v23 = vmul.f32 %v10707_v7, %v10707_v7  ;;  %v10774_v26 = vadd.f32 %v10771_v15, %v1670_v14  ;;  %v10783_v35 = vld [vmem:[#allocation5 + $0x18] sm:$0xff]  ;;  %19057 = vst [vmem:[#allocation18_spill] sm:$0xff] %v10864_v39 }
 0x1a7   :  { %v1632_v44 = vsel %vm1631_vm8, %v10550_v5, %v1630_v54  ;;  %v10779_v49 = vadd.f32 -0.5, %v1636_v2  ;;  %v1675_v32 = vmul.f32 %v10723_v42, %v10723_v42  ;;  %v10786_v61 = vadd.f32 %v10783_v35, %v1671_v4  ;;  %v10803_v2 = vld [vmem:[#allocation5 + $0x28] sm:$0xff]  ;;  %19058 = vst [vmem:[#allocation11_spill] sm:$0xff] %v10873_v1 }
 0x1a8   :  { %v1628_v57 = vsel %vm1626_vm10, %v1627_v17, %v1625_v36  ;;  %v1676_v40 = vmul.f32 %v10726_v62, %v10726_v62  ;;  %v10797_v0 = vadd.f32 %v10794_v51, %v1672_v12  ;;  %6872 = vrsqrt.f32 %v10749_v27 }
 0x1a9   :  { %v1649_v3 = vadd.f32 %v10535_v31, %v1621_v37  ;;  %v1677_v48 = vmul.f32 %v10739_v56, %v10739_v56  ;;  %v10806_v8 = vadd.f32 %v10803_v2, %v1673_v18  ;;  %6874 = vrsqrt.f32 %v10762_v53  ;;  %v10910_v18 = vld [vmem:[#allocation5 + $0x70] sm:$0xff] }
 0x1aa   :  { %v1635_v17 = vsel %vm1633_vm15, %v1634_v13, %v1632_v44  ;;  %v1678_v30 = vmul.f32 %v10742_v63, %v10742_v63  ;;  %v10818_v31 = vadd.f32 %v10815_v46, %v1674_v23  ;;  %6876 = vrsqrt.f32 %v10774_v26  ;;  %19061 = vst [vmem:[#allocation16_spill] sm:$0xff] %v10910_v18 }
 0x1ab   :  { %v10822_v6 = vadd.f32 -0.5, %v10670_v58  ;;  %v1679_v34 = vmul.f32 %v10755_v9, %v10755_v9  ;;  %v10829_v5 = vadd.f32 %v10826_v29, %v1675_v32  ;;  %6878 = vrsqrt.f32 %v10786_v61 }
 0x1ac   :  { %v1650_v13 = vadd.f32 %v10541_v22, %v1628_v57  ;;  %v1680_v59 = vmul.f32 %v1648_v11, %v1648_v11  ;;  %v10836_v28 = vadd.f32 %v10833_v52, %v1676_v40  ;;  %6880 = vrsqrt.f32 %v10797_v0 }
 0x1ad   :  { %v1651_v58 = vadd.f32 %v10543_v50, %v1635_v17  ;;  %v10841_v45 = vadd.f32 -0.5, %v10673_v21  ;;  %v10846_v10 = vadd.f32 %v10843_v33, %v1677_v48  ;;  %6882 = vrsqrt.f32 %v10806_v8 }
 0x1ae   :  { %v10850_v22 = vadd.f32 -0.5, %v10682_v24  ;;  %v10853_v25 = vadd.f32 -0.5, %v10685_v60  ;;  %v10858_v50 = vadd.f32 %v10855_v20, %v1678_v30  ;;  %6884 = vrsqrt.f32 %v10818_v31 }
 0x1af   :  { %v10862_v21 = vadd.f32 -0.5, %v10704_v16  ;;  %v1681_v38 = vmul.f32 %v1649_v3, %v1649_v3  ;;  %v10867_v55 = vadd.f32 %v10864_v39, %v1679_v34  ;;  %6886 = vrsqrt.f32 %v10829_v5 }
 0x1b0   :  { %v10871_v24 = vadd.f32 -0.5, %v10707_v7  ;;  %v1682_v60 = vmul.f32 %v1650_v13, %v1650_v13  ;;  %v10876_v14 = vadd.f32 %v10873_v1, %v1680_v59  ;;  %6888 = vrsqrt.f32 %v10836_v28 }
 0x1b1   :  { %v10880_v16 = vadd.f32 -0.5, %v10723_v42  ;;  %v10883_v41 = vadd.f32 -0.5, %v10726_v62  ;;  %v1683_v19 = vmul.f32 %v1651_v58, %v1651_v58  ;;  %6890 = vrsqrt.f32 %v10846_v10  ;;  %v10900_v62 = vld [vmem:[#allocation5 + $0x68] sm:$0xff] }
 0x1b2   :  { %v10887_v7 = vadd.f32 -0.5, %v10739_v56  ;;  %v10890_v54 = vadd.f32 -0.5, %v10742_v63  ;;  %v10893_v4 = vadd.f32 -0.5, %v10755_v9  ;;  %6892 = vrsqrt.f32 %v10858_v50  ;;  %19059 = vst [vmem:[#allocation12_spill] sm:$0xff] %v10900_v62 }
 0x1b3   :  { %v10896_v12 = vadd.f32 -0.5, %v1648_v11  ;;  %v10898_v42 = vadd.f32 -0.5, %v1649_v3  ;;  %v10903_v36 = vadd.f32 %v10900_v62, %v1681_v38  ;;  %6894 = vrsqrt.f32 %v10867_v55  ;;  %v10916_v11 = vld [vmem:[#allocation5 + $0x78] sm:$0xff] }
 0x1b4   :  { %v10906_v56 = vadd.f32 -0.5, %v1650_v13  ;;  %v10908_v63 = vadd.f32 -0.5, %v1651_v58  ;;  %v10913_v9 = vadd.f32 %v10910_v18, %v1682_v60  ;;  %6896 = vrsqrt.f32 %v10876_v14  ;;  %19062 = vst [vmem:[#allocation17_spill] sm:$0xff] %v10916_v11 }
 0x1b5   :  { %v6873_v37 = vpop.eup %6872  ;;  %v10919_v23 = vadd.f32 %v10916_v11, %v1683_v19  ;;  %vm1702_vm3 = vcmp.eq.f32.partialorder %v10749_v27, inf  ;;  %vm1709_vm1 = vcmp.eq.f32.partialorder %v10762_v53, inf  ;;  %vm1704_vm2 = vcmp.eq.f32.partialorder %v10749_v27, 0.0 }
 0x1b6   :  { %19060 = vst [vmem:[#allocation13_spill] sm:$0xff] %v10908_v63  ;;  %v6875_v32 = vpop.eup %6874  ;;  %vm1711_vm11 = vcmp.eq.f32.partialorder %v10762_v53, 0.0  ;;  %vm1716_vm4 = vcmp.eq.f32.partialorder %v10774_v26, inf  ;;  %vm1718_vm5 = vcmp.eq.f32.partialorder %v10774_v26, 0.0  ;;  %vm1723_vm6 = vcmp.eq.f32.partialorder %v10786_v61, inf }
 0x1b7   :  { %v6877_v40 = vpop.eup %6876  ;;  %6898 = vrsqrt.f32 %v10903_v36  ;;  %vm1725_vm7 = vcmp.eq.f32.partialorder %v10786_v61, 0.0  ;;  %vm1730_vm8 = vcmp.eq.f32.partialorder %v10797_v0, inf  ;;  %vm1737_vm9 = vcmp.eq.f32.partialorder %v10806_v8, inf }
 0x1b8   :  { %v6879_v17 = vpop.eup %6878  ;;  %v1701_v13 = vmul.f32 %v6873_v37, %v10749_v27  ;;  %vm1744_vm10 = vcmp.eq.f32.partialorder %v10818_v31, inf  ;;  %6900 = vrsqrt.f32 %v10913_v9  ;;  %v1708_v38 = vmul.f32 %v6875_v32, %v10762_v53 }
 0x1b9   :  { %v6881_v34 = vpop.eup %6880  ;;  %v1715_v60 = vmul.f32 %v6877_v40, %v10774_v26  ;;  %v1747_v19 = vand.u32 2147483648, %v10818_v31  ;;  %6902 = vrsqrt.f32 %v10919_v23  ;;  %v1722_v40 = vmul.f32 %v6879_v17, %v10786_v61 }
 0x1ba   :  { %v6883_v58 = vpop.eup %6882  ;;  %v1729_v48 = vmul.f32 %v6881_v34, %v10797_v0  ;;  %vm1765_vm14 = vcmp.eq.f32.partialorder %v10846_v10, inf  ;;  %v1703_v30 = vsel %vm1702_vm3, %v10749_v27, %v1701_v13  ;;  %vm1772_vm15 = vcmp.eq.f32.partialorder %v10858_v50, inf }
 0x1bb   :  { %v6885_v37 = vpop.eup %6884  ;;  %v1710_v34 = vsel %vm1709_vm1, %v10762_v53, %v1708_v38  ;;  %v1717_v3 = vsel %vm1716_vm4, %v10774_v26, %v1715_v60  ;;  %v1736_v44 = vmul.f32 %v6883_v58, %v10806_v8  ;;  %vm1767_vm3 = vcmp.eq.f32.partialorder %v10846_v10, 0.0 }
 0x1bc   :  { %v6887_v32 = vpop.eup %6886  ;;  %v1743_v11 = vmul.f32 %v6885_v37, %v10818_v31  ;;  %vm1774_vm12 = vcmp.eq.f32.partialorder %v10858_v50, 0.0  ;;  %vm1781_vm0 = vcmp.eq.f32.partialorder %v10867_v55, 0.0  ;;  %v1782_v57 = vand.u32 2147483648, %v10867_v55 }
 0x1bd   :  { %v6889_v59 = vpop.eup %6888  ;;  %vm1786_vm13 = vcmp.eq.f32.partialorder %v10876_v14, inf  ;;  %v1789_v38 = vand.u32 2147483648, %v10876_v14  ;;  %v1724_v58 = vsel %vm1723_vm6, %v10786_v61, %v1722_v40  ;;  %v1731_v37 = vsel %vm1730_vm8, %v10797_v0, %v1729_v48 }
 0x1be   :  { %v6891_v17 = vpop.eup %6890  ;;  %v1750_v62 = vmul.f32 %v6887_v32, %v10829_v5  ;;  %v1757_v1 = vmul.f32 %v6889_v59, %v10836_v28  ;;  %vm1788_vm1 = vcmp.eq.f32.partialorder %v10876_v14, 0.0  ;;  %vm1793_vm4 = vcmp.eq.f32.partialorder %v10903_v36, inf }
 0x1bf   :  { %v6893_v13 = vpop.eup %6892  ;;  %v19063_v18 = vand.u32 2147483648, %v10749_v27  ;;  %v19064_v40 = vand.u32 2147483648, %v10762_v53  ;;  %v19065_v48 = vand.u32 2147483648, %v10774_v26  ;;  %v1803_v32 = vand.u32 2147483648, %v10913_v9 }
 0x1c0   :  { %v6895_v60 = vpop.eup %6894  ;;  %v1738_v63 = vsel %vm1737_vm9, %v10806_v8, %v1736_v44  ;;  %v1745_v27 = vsel %vm1744_vm10, %v10818_v31, %v1743_v11  ;;  %v1771_v53 = vmul.f32 %v6893_v13, %v10858_v50  ;;  %v1810_v11 = vand.u32 2147483648, %v10919_v23 }
 0x1c1   :  { %v6897_v39 = vpop.eup %6896  ;;  %v1706_v20 = vsel %vm1704_vm2, %v19063_v18, %v1703_v30  ;;  %v1713_v33 = vsel %vm1711_vm11, %v19064_v40, %v1710_v34  ;;  %v1720_v59 = vsel %vm1718_vm5, %v19065_v48, %v1717_v3  ;;  %v1764_v18 = vmul.f32 %v6891_v17, %v10846_v10 }
 0x1c2   :  { %vm1800_vm2 = vcmp.eq.f32.partialorder %v10913_v9, inf  ;;  %v19066_v30 = vand.u32 2147483648, %v10786_v61  ;;  %v19067_v3 = vand.u32 2147483648, %v10797_v0  ;;  %vm19068_vm11 = vcmp.eq.f32.partialorder %v10797_v0, 0.0 }
 0x1c3   :  { %v1778_v34 = vmul.f32 %v6895_v60, %v10867_v55  ;;  %vm1795_vm5 = vcmp.eq.f32.partialorder %v10903_v36, 0.0  ;;  %vm19069_vm6 = vcmp.eq.f32.partialorder %v10829_v5, inf  ;;  %vm19070_vm8 = vcmp.eq.f32.partialorder %v10836_v28, inf }
 0x1c4   :  { %v1727_v26 = vsel %vm1725_vm7, %v19066_v30, %v1724_v58  ;;  %v1734_v44 = vsel %vm19068_vm11, %v19067_v3, %v1731_v37  ;;  %v6899_v17 = vpop.eup %6898  ;;  %v1752_v13 = vsel %vm19069_vm6, %v10829_v5, %v1750_v62  ;;  %v1759_v61 = vsel %vm19070_vm8, %v10836_v28, %v1757_v1 }
 0x1c5   :  { %v1785_v58 = vmul.f32 %v6897_v39, %v10876_v14  ;;  %vm1807_vm7 = vcmp.eq.f32.partialorder %v10919_v23, inf  ;;  %v1812_v0 = vadd.f32 %v10779_v49, %v1706_v20  ;;  %v19071_v60 = vand.u32 2147483648, %v10806_v8  ;;  %v6901_v39 = vpop.eup %6900 }
 0x1c6   :  { %vm19072_vm9 = vcmp.eq.f32.partialorder %v10806_v8, 0.0  ;;  %vm19073_vm10 = vcmp.eq.f32.partialorder %v10818_v31, 0.0  ;;  %vm1802_vm11 = vcmp.eq.f32.partialorder %v10913_v9, 0.0  ;;  %v1813_v62 = vadd.f32 %v10822_v6, %v1713_v33 }
 0x1c7   :  { %v1741_v37 = vsel %vm19072_vm9, %v19071_v60, %v1738_v63  ;;  %v1748_v40 = vsel %vm19073_vm10, %v1747_v19, %v1745_v27  ;;  %v11040_v1 = vadd.f32 %v10841_v45, %v1720_v59  ;;  %v1766_v49 = vsel %vm1765_vm14, %v10846_v10, %v1764_v18 }
 0x1c8   :  { %v1773_v8 = vsel %vm1772_vm15, %v10858_v50, %v1771_v53  ;;  %v11049_v20 = vadd.f32 %v10850_v22, %v1727_v26  ;;  %v11052_v31 = vadd.f32 %v10853_v25, %v1734_v44  ;;  %v19074_v6 = vand.u32 2147483648, %v10829_v5  ;;  %v6903_v25 = vpop.eup %6902 }
 0x1c9   :  { %vm19075_vm6 = vcmp.eq.f32.partialorder %v10829_v5, 0.0  ;;  %v19076_v33 = vand.u32 2147483648, %v10836_v28  ;;  %vm19077_vm8 = vcmp.eq.f32.partialorder %v10836_v28, 0.0  ;;  %vm19078_vm14 = vcmp.eq.f32.partialorder %v10867_v55, inf }
 0x1ca   :  { %v1755_v45 = vsel %vm19075_vm6, %v19074_v6, %v1752_v13  ;;  %v1780_v19 = vsel %vm19078_vm14, %v10867_v55, %v1778_v34  ;;  %v1792_v22 = vmul.f32 %v6899_v17, %v10903_v36  ;;  %vm1809_vm15 = vcmp.eq.f32.partialorder %v10919_v23, 0.0 }
 0x1cb   :  { %v1762_v63 = vsel %vm19077_vm8, %v19076_v33, %v1759_v61  ;;  %v1787_v48 = vsel %vm1786_vm13, %v10876_v14, %v1785_v58  ;;  %v1817_v5 = vadd.f32 %v10862_v21, %v1741_v37  ;;  %v1818_v59 = vadd.f32 %v10871_v24, %v1748_v40 }
 0x1cc   :  { %v1844_v27 = vmul.f32 %v1812_v0, %v1812_v0  ;;  %v19079_v28 = vand.u32 2147483648, %v10846_v10  ;;  %v19080_v53 = vand.u32 2147483648, %v10858_v50  ;;  %v1799_v26 = vmul.f32 %v6901_v39, %v10913_v9 }
 0x1cd   :  { %v1845_v3 = vmul.f32 %v1813_v62, %v1813_v62  ;;  %v1783_v44 = vsel %vm1781_vm0, %v1782_v57, %v1780_v19  ;;  %v1819_v21 = vadd.f32 %v10880_v16, %v1755_v45  ;;  %v1820_v24 = vadd.f32 %v10883_v41, %v1762_v63 }
 0x1ce   :  { %v1769_v18 = vsel %vm1767_vm3, %v19079_v28, %v1766_v49  ;;  %v1776_v30 = vsel %vm1774_vm12, %v19080_v53, %v1773_v8  ;;  %v1846_v34 = vmul.f32 %v11040_v1, %v11040_v1  ;;  %v1790_v10 = vsel %vm1788_vm1, %v1789_v38, %v1787_v48 }
 0x1cf   :  { %v1794_v50 = vsel %vm1793_vm4, %v10903_v36, %v1792_v22  ;;  %v1806_v17 = vmul.f32 %v6903_v25, %v10919_v23  ;;  %v1847_v55 = vmul.f32 %v11049_v20, %v11049_v20  ;;  %v1821_v57 = vadd.f32 %v10887_v7, %v1769_v18 }
 0x1d0   :  { %v1822_v16 = vadd.f32 %v10890_v54, %v1776_v30  ;;  %v1848_v41 = vmul.f32 %v11052_v31, %v11052_v31  ;;  %v11100_v13 = vadd.f32 %v10746_v47, %v1844_v27  ;;  %v1801_v14 = vsel %vm1800_vm2, %v10913_v9, %v1799_v26  ;;  %v19084_v30 = vld [vmem:[#allocation15_spill] sm:$0xff] }
 0x1d1   :  { %v1823_v38 = vadd.f32 %v10893_v4, %v1783_v44  ;;  %v1849_v61 = vmul.f32 %v1817_v5, %v1817_v5  ;;  %v11107_v58 = vadd.f32 %v10759_v43, %v1845_v3  ;;  %v19081_v7 = vand.u32 2147483648, %v10903_v36  ;;  %v19085_v44 = vld [vmem:[#allocation18_spill] sm:$0xff] }
 0x1d2   :  { %v1824_v60 = vadd.f32 %v10896_v12, %v1790_v10  ;;  %v1850_v37 = vmul.f32 %v1818_v59, %v1818_v59  ;;  %v11115_v40 = vadd.f32 %v10771_v15, %v1846_v34  ;;  %v1808_v39 = vsel %vm1807_vm7, %v10919_v23, %v1806_v17 }
 0x1d3   :  { %v1797_v54 = vsel %vm1795_vm5, %v19081_v7, %v1794_v50  ;;  %v11120_v4 = vadd.f32 -0.5, %v1812_v0  ;;  %v1851_v49 = vmul.f32 %v1819_v21, %v1819_v21  ;;  %v11123_v8 = vadd.f32 %v10783_v35, %v1847_v55  ;;  %v19086_v50 = vld [vmem:[#allocation11_spill] sm:$0xff] }
 0x1d4   :  { %v1804_v36 = vsel %vm1802_vm11, %v1803_v32, %v1801_v14  ;;  %v1852_v12 = vmul.f32 %v1820_v24, %v1820_v24  ;;  %v11130_v6 = vadd.f32 %v10794_v51, %v1848_v41  ;;  %6904 = vrsqrt.f32 %v11100_v13 }
 0x1d5   :  { %v1825_v45 = vadd.f32 %v10898_v42, %v1797_v54  ;;  %v1853_v33 = vmul.f32 %v1821_v57, %v1821_v57  ;;  %v11135_v0 = vadd.f32 %v10803_v2, %v1849_v61  ;;  %6906 = vrsqrt.f32 %v11107_v58  ;;  %v19087_v54 = vld [vmem:[#allocation12_spill] sm:$0xff] }
 0x1d6   :  { %v1811_v9 = vsel %vm1809_vm15, %v1810_v11, %v1808_v39  ;;  %v1854_v32 = vmul.f32 %v1822_v16, %v1822_v16  ;;  %v11143_v63 = vadd.f32 %v10815_v46, %v1850_v37  ;;  %6908 = vrsqrt.f32 %v11115_v40  ;;  %v19082_v11 = vld [vmem:[#allocation13_spill] sm:$0xff] }
 0x1d7   :  { %v11146_v19 = vadd.f32 -0.5, %v1813_v62  ;;  %v1855_v42 = vmul.f32 %v1823_v38, %v1823_v38  ;;  %v11149_v22 = vadd.f32 %v10826_v29, %v1851_v49  ;;  %6910 = vrsqrt.f32 %v11123_v8  ;;  %v19083_v62 = vld [vmem:[#allocation14_spill] sm:$0xff]  ;;  %v19090_v39 = vld [vmem:[#allocation17_spill] sm:$0xff] }
 0x1d8   :  { %v1826_v25 = vadd.f32 %v10906_v56, %v1804_v36  ;;  %v1856_v48 = vmul.f32 %v1824_v60, %v1824_v60  ;;  %v11154_v23 = vadd.f32 %v10833_v52, %v1852_v12  ;;  %6912 = vrsqrt.f32 %v11130_v6 }
 0x1d9   :  { %v1827_v27 = vadd.f32 %v19082_v11, %v1811_v9  ;;  %v11159_v28 = vadd.f32 -0.5, %v11040_v1  ;;  %v11162_v18 = vadd.f32 %v19083_v62, %v1853_v33  ;;  %6914 = vrsqrt.f32 %v11135_v0 }
 0x1da   :  { %v11166_v53 = vadd.f32 -0.5, %v11049_v20  ;;  %v11169_v56 = vadd.f32 -0.5, %v11052_v31  ;;  %v11172_v26 = vadd.f32 %v19084_v30, %v1854_v32  ;;  %6916 = vrsqrt.f32 %v11143_v63 }
 0x1db   :  { %v11175_v3 = vadd.f32 -0.5, %v1817_v5  ;;  %v1857_v1 = vmul.f32 %v1825_v45, %v1825_v45  ;;  %v11178_v34 = vadd.f32 %v19085_v44, %v1855_v42  ;;  %6918 = vrsqrt.f32 %v11149_v22 }
 0x1dc   :  { %v11181_v10 = vadd.f32 -0.5, %v1818_v59  ;;  %v1858_v20 = vmul.f32 %v1826_v25, %v1826_v25  ;;  %v11184_v17 = vadd.f32 %v19086_v50, %v1856_v48  ;;  %6920 = vrsqrt.f32 %v11154_v23 }
 0x1dd   :  { %v11187_v31 = vadd.f32 -0.5, %v1819_v21  ;;  %v11189_v55 = vadd.f32 -0.5, %v1820_v24  ;;  %v1859_v5 = vmul.f32 %v1827_v27, %v1827_v27  ;;  %6922 = vrsqrt.f32 %v11162_v18 }
 0x1de   :  { %v11192_v41 = vadd.f32 -0.5, %v1821_v57  ;;  %v11194_v14 = vadd.f32 -0.5, %v1822_v16  ;;  %v11196_v61 = vadd.f32 -0.5, %v1823_v38  ;;  %6924 = vrsqrt.f32 %v11172_v26  ;;  %v19089_v57 = vld [vmem:[#allocation16_spill] sm:$0xff] }
 0x1df   :  { %v11199_v59 = vadd.f32 -0.5, %v1824_v60  ;;  %v11201_v7 = vadd.f32 -0.5, %v1825_v45  ;;  %v11204_v21 = vadd.f32 %v19087_v54, %v1857_v1  ;;  %6926 = vrsqrt.f32 %v11178_v34 }
 0x1e0   :  { %v11207_v24 = vadd.f32 -0.5, %v1826_v25  ;;  %v11209_v37 = vadd.f32 -0.5, %v1827_v27  ;;  %v11212_v16 = vadd.f32 %v19089_v57, %v1858_v20  ;;  %6928 = vrsqrt.f32 %v11184_v17 }
 0x1e1   :  { %v6905_v38 = vpop.eup %6904  ;;  %v11216_v60 = vadd.f32 %v19090_v39, %v1859_v5  ;;  %vm1878_vm0 = vcmp.eq.f32.partialorder %v11100_v13, inf  ;;  %vm1885_vm12 = vcmp.eq.f32.partialorder %v11107_v58, inf  ;;  %vm1880_vm13 = vcmp.eq.f32.partialorder %v11100_v13, 0.0 }
 0x1e2   :  { %19088 = vst [vmem:[#allocation13_spill] sm:$0xff] %v11209_v37  ;;  %v6907_v36 = vpop.eup %6906  ;;  %vm1887_vm3 = vcmp.eq.f32.partialorder %v11107_v58, 0.0  ;;  %vm1892_vm1 = vcmp.eq.f32.partialorder %v11115_v40, inf  ;;  %vm1894_vm4 = vcmp.eq.f32.partialorder %v11115_v40, 0.0  ;;  %vm1899_vm2 = vcmp.eq.f32.partialorder %v11123_v8, inf }
 0x1e3   :  { %v6909_v45 = vpop.eup %6908  ;;  %6930 = vrsqrt.f32 %v11204_v21  ;;  %vm1901_vm5 = vcmp.eq.f32.partialorder %v11123_v8, 0.0  ;;  %vm1906_vm7 = vcmp.eq.f32.partialorder %v11130_v6, inf  ;;  %vm1913_vm10 = vcmp.eq.f32.partialorder %v11135_v0, inf }
 0x1e4   :  { %v6911_v32 = vpop.eup %6910  ;;  %v1877_v48 = vmul.f32 %v6905_v38, %v11100_v13  ;;  %vm1920_vm11 = vcmp.eq.f32.partialorder %v11143_v63, inf  ;;  %6932 = vrsqrt.f32 %v11212_v16  ;;  %v1884_v1 = vmul.f32 %v6907_v36, %v11107_v58 }
 0x1e5   :  { %v6913_v25 = vpop.eup %6912  ;;  %v1891_v20 = vmul.f32 %v6909_v45, %v11115_v40  ;;  %v1923_v5 = vand.u32 2147483648, %v11143_v63  ;;  %6934 = vrsqrt.f32 %v11216_v60  ;;  %v1898_v45 = vmul.f32 %v6911_v32, %v11123_v8 }
 0x1e6   :  { %v6915_v27 = vpop.eup %6914  ;;  %v1905_v9 = vmul.f32 %v6913_v25, %v11130_v6  ;;  %vm1941_vm14 = vcmp.eq.f32.partialorder %v11162_v18, inf  ;;  %v1879_v42 = vsel %vm1878_vm0, %v11100_v13, %v1877_v48  ;;  %vm1948_vm15 = vcmp.eq.f32.partialorder %v11172_v26, inf }
 0x1e7   :  { %v6917_v38 = vpop.eup %6916  ;;  %v1886_v25 = vsel %vm1885_vm12, %v11107_v58, %v1884_v1  ;;  %v1893_v33 = vsel %vm1892_vm1, %v11115_v40, %v1891_v20  ;;  %v1912_v49 = vmul.f32 %v6915_v27, %v11135_v0  ;;  %vm1943_vm0 = vcmp.eq.f32.partialorder %v11162_v18, 0.0 }
 0x1e8   :  { %v6919_v36 = vpop.eup %6918  ;;  %v1919_v39 = vmul.f32 %v6917_v38, %v11143_v63  ;;  %vm1950_vm6 = vcmp.eq.f32.partialorder %v11172_v26, 0.0  ;;  %vm1957_vm9 = vcmp.eq.f32.partialorder %v11178_v34, 0.0  ;;  %v1958_v12 = vand.u32 2147483648, %v11178_v34 }
 0x1e9   :  { %v6921_v11 = vpop.eup %6920  ;;  %vm1962_vm8 = vcmp.eq.f32.partialorder %v11184_v17, inf  ;;  %v1965_v1 = vand.u32 2147483648, %v11184_v17  ;;  %v1900_v27 = vsel %vm1899_vm2, %v11123_v8, %v1898_v45  ;;  %v1907_v38 = vsel %vm1906_vm7, %v11130_v6, %v1905_v9 }
 0x1ea   :  { %v6923_v32 = vpop.eup %6922  ;;  %v1926_v54 = vmul.f32 %v6919_v36, %v11149_v22  ;;  %v1933_v50 = vmul.f32 %v6921_v11, %v11154_v23  ;;  %vm1964_vm12 = vcmp.eq.f32.partialorder %v11184_v17, 0.0  ;;  %vm1969_vm1 = vcmp.eq.f32.partialorder %v11204_v21, inf }
 0x1eb   :  { %v6925_v48 = vpop.eup %6924  ;;  %v19091_v57 = vand.u32 2147483648, %v11100_v13  ;;  %v19092_v45 = vand.u32 2147483648, %v11107_v58  ;;  %v19093_v9 = vand.u32 2147483648, %v11115_v40  ;;  %v1979_v36 = vand.u32 2147483648, %v11212_v16 }
 0x1ec   :  { %v6927_v20 = vpop.eup %6926  ;;  %v1914_v37 = vsel %vm1913_vm10, %v11135_v0, %v1912_v49  ;;  %v1921_v13 = vsel %vm1920_vm11, %v11143_v63, %v1919_v39  ;;  %v1947_v58 = vmul.f32 %v6925_v48, %v11172_v26  ;;  %v1986_v39 = vand.u32 2147483648, %v11216_v60 }
 0x1ed   :  { %v6929_v44 = vpop.eup %6928  ;;  %v1882_v30 = vsel %vm1880_vm13, %v19091_v57, %v1879_v42  ;;  %v1889_v62 = vsel %vm1887_vm3, %v19092_v45, %v1886_v25  ;;  %v1896_v11 = vsel %vm1894_vm4, %v19093_v9, %v1893_v33  ;;  %v1940_v57 = vmul.f32 %v6923_v32, %v11162_v18 }
 0x1ee   :  { %vm1976_vm13 = vcmp.eq.f32.partialorder %v11212_v16, inf  ;;  %v19094_v42 = vand.u32 2147483648, %v11123_v8  ;;  %v19095_v33 = vand.u32 2147483648, %v11130_v6  ;;  %vm19096_vm3 = vcmp.eq.f32.partialorder %v11130_v6, 0.0 }
 0x1ef   :  { %v1954_v25 = vmul.f32 %v6927_v20, %v11178_v34  ;;  %vm1971_vm4 = vcmp.eq.f32.partialorder %v11204_v21, 0.0  ;;  %vm19097_vm2 = vcmp.eq.f32.partialorder %v11149_v22, inf  ;;  %vm19098_vm7 = vcmp.eq.f32.partialorder %v11154_v23, inf }
 0x1f0   :  { %v1903_v40 = vsel %vm1901_vm5, %v19094_v42, %v1900_v27  ;;  %v1910_v49 = vsel %vm19096_vm3, %v19095_v33, %v1907_v38  ;;  %v6931_v32 = vpop.eup %6930  ;;  %v1928_v48 = vsel %vm19097_vm2, %v11149_v22, %v1926_v54  ;;  %v1935_v8 = vsel %vm19098_vm7, %v11154_v23, %v1933_v50 }
 0x1f1   :  { %v1961_v27 = vmul.f32 %v6929_v44, %v11184_v17  ;;  %vm1983_vm5 = vcmp.eq.f32.partialorder %v11216_v60, inf  ;;  %v1988_v6 = vadd.f32 %v11120_v4, %v1882_v30  ;;  %v19099_v20 = vand.u32 2147483648, %v11135_v0  ;;  %v6933_v44 = vpop.eup %6932 }
 0x1f2   :  { %vm19100_vm10 = vcmp.eq.f32.partialorder %v11135_v0, 0.0  ;;  %vm19101_vm11 = vcmp.eq.f32.partialorder %v11143_v63, 0.0  ;;  %vm1978_vm3 = vcmp.eq.f32.partialorder %v11212_v16, 0.0  ;;  %v1989_v54 = vadd.f32 %v11146_v19, %v1889_v62 }
 0x1f3   :  { %v1917_v38 = vsel %vm19100_vm10, %v19099_v20, %v1914_v37  ;;  %v1924_v45 = vsel %vm19101_vm11, %v1923_v5, %v1921_v13  ;;  %v11337_v50 = vadd.f32 %v11159_v28, %v1896_v11  ;;  %v1942_v4 = vsel %vm1941_vm14, %v11162_v18, %v1940_v57 }
 0x1f4   :  { %v1949_v0 = vsel %vm1948_vm15, %v11172_v26, %v1947_v58  ;;  %v11346_v30 = vadd.f32 %v11166_v53, %v1903_v40  ;;  %v11349_v63 = vadd.f32 %v11169_v56, %v1910_v49  ;;  %v19102_v19 = vand.u32 2147483648, %v11149_v22  ;;  %v6935_v56 = vpop.eup %6934 }
 0x1f5   :  { %vm19103_vm2 = vcmp.eq.f32.partialorder %v11149_v22, 0.0  ;;  %v19104_v62 = vand.u32 2147483648, %v11154_v23  ;;  %vm19105_vm7 = vcmp.eq.f32.partialorder %v11154_v23, 0.0  ;;  %vm19106_vm14 = vcmp.eq.f32.partialorder %v11178_v34, inf }
 0x1f6   :  { %v1931_v28 = vsel %vm19103_vm2, %v19102_v19, %v1928_v48  ;;  %v1956_v5 = vsel %vm19106_vm14, %v11178_v34, %v1954_v25  ;;  %v1968_v53 = vmul.f32 %v6931_v32, %v11204_v21  ;;  %vm1985_vm15 = vcmp.eq.f32.partialorder %v11216_v60, 0.0 }
 0x1f7   :  { %v1938_v37 = vsel %vm19105_vm7, %v19104_v62, %v1935_v8  ;;  %v1963_v9 = vsel %vm1962_vm8, %v11184_v17, %v1961_v27  ;;  %v1993_v22 = vadd.f32 %v11175_v3, %v1917_v38  ;;  %v1994_v11 = vadd.f32 %v11181_v10, %v1924_v45 }
 0x1f8   :  { %v2020_v13 = vmul.f32 %v1988_v6, %v1988_v6  ;;  %v19107_v23 = vand.u32 2147483648, %v11162_v18  ;;  %v19108_v58 = vand.u32 2147483648, %v11172_v26  ;;  %v1975_v40 = vmul.f32 %v6933_v44, %v11212_v16 }
 0x1f9   :  { %v2021_v33 = vmul.f32 %v1989_v54, %v1989_v54  ;;  %v1959_v49 = vsel %vm1957_vm9, %v1958_v12, %v1956_v5  ;;  %v1995_v3 = vadd.f32 %v11187_v31, %v1931_v28  ;;  %v1996_v10 = vadd.f32 %v11189_v55, %v1938_v37 }
 0x1fa   :  { %v1945_v57 = vsel %vm1943_vm0, %v19107_v23, %v1942_v4  ;;  %v1952_v42 = vsel %vm1950_vm6, %v19108_v58, %v1949_v0  ;;  %v2022_v25 = vmul.f32 %v11337_v50, %v11337_v50  ;;  %v1966_v18 = vsel %vm1964_vm12, %v1965_v1, %v1963_v9  ;;  %v19114_v23 = vld [vmem:[#allocation11_spill] sm:$0xff] }
 0x1fb   :  { %v1970_v26 = vsel %vm1969_vm1, %v11204_v21, %v1968_v53  ;;  %v1982_v32 = vmul.f32 %v6935_v56, %v11216_v60  ;;  %v2023_v34 = vmul.f32 %v11346_v30, %v11346_v30  ;;  %v1997_v12 = vadd.f32 %v11192_v41, %v1945_v57  ;;  %v19113_v56 = vld [vmem:[#allocation18_spill] sm:$0xff] }
 0x1fc   :  { %v1998_v31 = vadd.f32 %v11194_v14, %v1952_v42  ;;  %v2024_v55 = vmul.f32 %v11349_v63, %v11349_v63  ;;  %v11397_v48 = vadd.f32 %v10746_v47, %v2020_v13  ;;  %v1977_v17 = vsel %vm1976_vm13, %v11212_v16, %v1975_v40 }
 0x1fd   :  { %v1999_v1 = vadd.f32 %v11196_v61, %v1959_v49  ;;  %v2025_v8 = vmul.f32 %v1993_v22, %v1993_v22  ;;  %v11404_v27 = vadd.f32 %v10759_v43, %v2021_v33  ;;  %v19109_v41 = vand.u32 2147483648, %v11204_v21 }
 0x1fe   :  { %v2000_v20 = vadd.f32 %v11199_v59, %v1966_v18  ;;  %v2026_v38 = vmul.f32 %v1994_v11, %v1994_v11  ;;  %v11412_v47 = vadd.f32 %v10771_v15, %v2022_v25  ;;  %v1984_v45 = vsel %vm1983_vm5, %v11216_v60, %v1982_v32  ;;  %v19115_v25 = vld [vmem:[#allocation12_spill] sm:$0xff] }
 0x1ff   :  { %v1973_v14 = vsel %vm1971_vm4, %v19109_v41, %v1970_v26  ;;  %v11417_v61 = vadd.f32 -0.5, %v1988_v6  ;;  %v2027_v44 = vmul.f32 %v1995_v3, %v1995_v3  ;;  %v11420_v43 = vadd.f32 %v10783_v35, %v2023_v34  ;;  %v19116_v26 = vld [vmem:[#allocation16_spill] sm:$0xff] }
 0x200   :  { %v1980_v21 = vsel %vm1978_vm3, %v1979_v36, %v1977_v17  ;;  %v2028_v59 = vmul.f32 %v1996_v10, %v1996_v10  ;;  %v11427_v4 = vadd.f32 %v10794_v51, %v2024_v55  ;;  %6936 = vrsqrt.f32 %v11397_v48 }
 0x201   :  { %v2001_v15 = vadd.f32 %v11201_v7, %v1973_v14  ;;  %v2029_v0 = vmul.f32 %v1997_v12, %v1997_v12  ;;  %v11432_v6 = vadd.f32 %v10803_v2, %v2025_v8  ;;  %6938 = vrsqrt.f32 %v11404_v27 }
 0x202   :  { %v1987_v35 = vsel %vm1985_vm15, %v1986_v39, %v1984_v45  ;;  %v2030_v16 = vmul.f32 %v1998_v31, %v1998_v31  ;;  %v11440_v36 = vadd.f32 %v10815_v46, %v2026_v38  ;;  %6940 = vrsqrt.f32 %v11412_v47  ;;  %v19110_v46 = vld [vmem:[#allocation13_spill] sm:$0xff] }
 0x203   :  { %v11443_v51 = vadd.f32 -0.5, %v1989_v54  ;;  %v2031_v7 = vmul.f32 %v1999_v1, %v1999_v1  ;;  %v11446_v19 = vadd.f32 %v10826_v29, %v2027_v44  ;;  %6942 = vrsqrt.f32 %v11420_v43  ;;  %v19111_v54 = vld [vmem:[#allocation14_spill] sm:$0xff] }
 0x204   :  { %v2002_v2 = vadd.f32 %v11207_v24, %v1980_v21  ;;  %v2032_v28 = vmul.f32 %v2000_v20, %v2000_v20  ;;  %v11451_v60 = vadd.f32 %v10833_v52, %v2028_v59  ;;  %6944 = vrsqrt.f32 %v11427_v4  ;;  %v19112_v52 = vld [vmem:[#allocation15_spill] sm:$0xff] }
 0x205   :  { %v2003_v39 = vadd.f32 %v19110_v46, %v1987_v35  ;;  %v11456_v62 = vadd.f32 -0.5, %v11337_v50  ;;  %v11459_v37 = vadd.f32 %v19111_v54, %v2029_v0  ;;  %6946 = vrsqrt.f32 %v11432_v6 }
 0x206   :  { %v11463_v29 = vadd.f32 -0.5, %v11346_v30  ;;  %v11466_v24 = vadd.f32 -0.5, %v11349_v63  ;;  %v11469_v5 = vadd.f32 %v19112_v52, %v2030_v16  ;;  %6948 = vrsqrt.f32 %v11440_v36 }
 0x207   :  { %v11472_v53 = vadd.f32 -0.5, %v1993_v22  ;;  %v2033_v50 = vmul.f32 %v2001_v15, %v2001_v15  ;;  %v11475_v9 = vadd.f32 %v19113_v56, %v2031_v7  ;;  %6950 = vrsqrt.f32 %v11446_v19 }
 0x208   :  { %v11478_v13 = vadd.f32 -0.5, %v1994_v11  ;;  %v2034_v30 = vmul.f32 %v2002_v2, %v2002_v2  ;;  %v11481_v57 = vadd.f32 %v19114_v23, %v2032_v28  ;;  %6952 = vrsqrt.f32 %v11451_v60 }
 0x209   :  { %v11484_v63 = vadd.f32 -0.5, %v1995_v3  ;;  %v11486_v58 = vadd.f32 -0.5, %v1996_v10  ;;  %v2035_v22 = vmul.f32 %v2003_v39, %v2003_v39  ;;  %6954 = vrsqrt.f32 %v11459_v37 }
 0x20a   :  { %v11489_v42 = vadd.f32 -0.5, %v1997_v12  ;;  %v11491_v40 = vadd.f32 -0.5, %v1998_v31  ;;  %v11493_v33 = vadd.f32 -0.5, %v1999_v1  ;;  %6956 = vrsqrt.f32 %v11469_v5  ;;  %v19117_v12 = vld [vmem:[#allocation17_spill] sm:$0xff] }
 0x20b   :  { %v11496_v11 = vadd.f32 -0.5, %v2000_v20  ;;  %v11498_v49 = vadd.f32 -0.5, %v2001_v15  ;;  %v11501_v3 = vadd.f32 %v19115_v25, %v2033_v50  ;;  %6958 = vrsqrt.f32 %v11475_v9 }
 0x20c   :  { %v11504_v10 = vadd.f32 -0.5, %v2002_v2  ;;  %v11506_v18 = vadd.f32 -0.5, %v2003_v39  ;;  %v11509_v32 = vadd.f32 %v19116_v26, %v2034_v30  ;;  %6960 = vrsqrt.f32 %v11481_v57 }
 0x20d   :  { %v6937_v34 = vpop.eup %6936  ;;  %v11513_v31 = vadd.f32 %v19117_v12, %v2035_v22  ;;  %vm2054_vm9 = vcmp.eq.f32.partialorder %v11397_v48, inf  ;;  %v2057_v55 = vand.u32 2147483648, %v11397_v48  ;;  %vm2061_vm6 = vcmp.eq.f32.partialorder %v11404_v27, inf }
 0x20e   :  { %v6939_v17 = vpop.eup %6938  ;;  %vm2056_vm8 = vcmp.eq.f32.partialorder %v11397_v48, 0.0  ;;  %vm2063_vm0 = vcmp.eq.f32.partialorder %v11404_v27, 0.0  ;;  %v2064_v1 = vand.u32 2147483648, %v11404_v27  ;;  %vm2068_vm12 = vcmp.eq.f32.partialorder %v11412_v47, inf }
 0x20f   :  { %vm2070_vm1 = vcmp.eq.f32.partialorder %v11412_v47, 0.0  ;;  %v6941_v8 = vpop.eup %6940  ;;  %v2071_v41 = vand.u32 2147483648, %v11412_v47  ;;  %vm2075_vm13 = vcmp.eq.f32.partialorder %v11420_v43, inf  ;;  %v2078_v14 = vand.u32 2147483648, %v11420_v43 }
 0x210   :  { %6962 = vrsqrt.f32 %v11501_v3  ;;  %v6943_v20 = vpop.eup %6942  ;;  %vm2077_vm4 = vcmp.eq.f32.partialorder %v11420_v43, 0.0  ;;  %vm2082_vm5 = vcmp.eq.f32.partialorder %v11427_v4, inf  ;;  %v2085_v38 = vand.u32 2147483648, %v11427_v4 }
 0x211   :  { %vm2089_vm11 = vcmp.eq.f32.partialorder %v11432_v6, inf  ;;  %v6945_v45 = vpop.eup %6944  ;;  %v2053_v44 = vmul.f32 %v6937_v34, %v11397_v48  ;;  %v2092_v21 = vand.u32 2147483648, %v11432_v6  ;;  %vm2096_vm3 = vcmp.eq.f32.partialorder %v11440_v36, inf }
 0x212   :  { %6964 = vrsqrt.f32 %v11509_v32  ;;  %v6947_v59 = vpop.eup %6946  ;;  %v2060_v15 = vmul.f32 %v6939_v17, %v11404_v27  ;;  %v2067_v0 = vmul.f32 %v6941_v8, %v11412_v47  ;;  %v2099_v35 = vand.u32 2147483648, %v11440_v36 }
 0x213   :  { %v6949_v16 = vpop.eup %6948  ;;  %v2106_v7 = vand.u32 2147483648, %v11446_v19  ;;  %v2113_v2 = vand.u32 2147483648, %v11451_v60  ;;  %6966 = vrsqrt.f32 %v11513_v31  ;;  %v2074_v46 = vmul.f32 %v6943_v20, %v11420_v43 }
 0x214   :  { %v6951_v28 = vpop.eup %6950  ;;  %v2081_v39 = vmul.f32 %v6945_v45, %v11427_v4  ;;  %vm2117_vm14 = vcmp.eq.f32.partialorder %v11459_v37, inf  ;;  %v2120_v54 = vand.u32 2147483648, %v11459_v37  ;;  %v2055_v50 = vsel %vm2054_vm9, %v11397_v48, %v2053_v44 }
 0x215   :  { %v6953_v52 = vpop.eup %6952  ;;  %vm2124_vm15 = vcmp.eq.f32.partialorder %v11469_v5, inf  ;;  %v2127_v56 = vand.u32 2147483648, %v11469_v5  ;;  %v2062_v23 = vsel %vm2061_vm6, %v11404_v27, %v2060_v15  ;;  %v2069_v22 = vsel %vm2068_vm12, %v11412_v47, %v2067_v0 }
 0x216   :  { %v6955_v30 = vpop.eup %6954  ;;  %v2088_v25 = vmul.f32 %v6947_v59, %v11432_v6  ;;  %v2095_v26 = vmul.f32 %v6949_v16, %v11440_v36  ;;  %vm2119_vm9 = vcmp.eq.f32.partialorder %v11459_v37, 0.0  ;;  %vm2126_vm2 = vcmp.eq.f32.partialorder %v11469_v5, 0.0 }
 0x217   :  { %v6957_v34 = vpop.eup %6956  ;;  %vm2133_vm10 = vcmp.eq.f32.partialorder %v11475_v9, 0.0  ;;  %v2134_v12 = vand.u32 2147483648, %v11475_v9  ;;  %vm2138_vm7 = vcmp.eq.f32.partialorder %v11481_v57, inf  ;;  %v2141_v17 = vand.u32 2147483648, %v11481_v57 }
 0x218   :  { %v2148_v8 = vand.u32 2147483648, %v11501_v3  ;;  %v6959_v20 = vpop.eup %6958  ;;  %v2076_v45 = vsel %vm2075_vm13, %v11420_v43, %v2074_v46  ;;  %v2083_v44 = vsel %vm2082_vm5, %v11427_v4, %v2081_v39  ;;  %v2102_v59 = vmul.f32 %v6951_v28, %v11446_v19 }
 0x219   :  { %v2109_v15 = vmul.f32 %v6953_v52, %v11451_v60  ;;  %vm2140_vm6 = vcmp.eq.f32.partialorder %v11481_v57, 0.0  ;;  %vm2145_vm12 = vcmp.eq.f32.partialorder %v11501_v3, inf  ;;  %v6961_v0 = vpop.eup %6960  ;;  %v2058_v16 = vsel %vm2056_vm8, %v2057_v55, %v2055_v50 }
 0x21a   :  { %v2065_v46 = vsel %vm2063_vm0, %v2064_v1, %v2062_v23  ;;  %v2072_v28 = vsel %vm2070_vm1, %v2071_v41, %v2069_v22  ;;  %v2155_v39 = vand.u32 2147483648, %v11509_v32  ;;  %v2090_v52 = vsel %vm2089_vm11, %v11432_v6, %v2088_v25 }
 0x21b   :  { %v2097_v48 = vsel %vm2096_vm3, %v11440_v36, %v2095_v26  ;;  %v2116_v55 = vmul.f32 %v6955_v30, %v11459_v37  ;;  %v2123_v27 = vmul.f32 %v6957_v34, %v11469_v5  ;;  %vm2152_vm8 = vcmp.eq.f32.partialorder %v11509_v32, inf }
 0x21c   :  { %v2079_v47 = vsel %vm2077_vm4, %v2078_v14, %v2076_v45  ;;  %vm19118_vm0 = vcmp.eq.f32.partialorder %v11427_v4, 0.0  ;;  %v2130_v41 = vmul.f32 %v6959_v20, %v11475_v9  ;;  %vm2147_vm1 = vcmp.eq.f32.partialorder %v11501_v3, 0.0 }
 0x21d   :  { %v2086_v1 = vsel %vm19118_vm0, %v2085_v38, %v2083_v44  ;;  %v2162_v50 = vand.u32 2147483648, %v11513_v31  ;;  %v6963_v30 = vpop.eup %6962  ;;  %vm19119_vm13 = vcmp.eq.f32.partialorder %v11446_v19, inf  ;;  %vm19120_vm5 = vcmp.eq.f32.partialorder %v11451_v60, inf }
 0x21e   :  { %v2104_v23 = vsel %vm19119_vm13, %v11446_v19, %v2102_v59  ;;  %v2111_v43 = vsel %vm19120_vm5, %v11451_v60, %v2109_v15  ;;  %v2137_v14 = vmul.f32 %v6961_v0, %v11481_v57  ;;  %vm2159_vm4 = vcmp.eq.f32.partialorder %v11513_v31, inf }
 0x21f   :  { %v2164_v4 = vadd.f32 %v11417_v61, %v2058_v16  ;;  %vm19121_vm11 = vcmp.eq.f32.partialorder %v11432_v6, 0.0  ;;  %vm19122_vm3 = vcmp.eq.f32.partialorder %v11440_v36, 0.0  ;;  %vm2154_vm0 = vcmp.eq.f32.partialorder %v11509_v32, 0.0  ;;  %v6965_v34 = vpop.eup %6964 }
 0x220   :  { %v2093_v38 = vsel %vm19121_vm11, %v2092_v21, %v2090_v52  ;;  %v2100_v22 = vsel %vm19122_vm3, %v2099_v35, %v2097_v48  ;;  %v11633_v25 = vadd.f32 %v11443_v51, %v2065_v46  ;;  %v11636_v26 = vadd.f32 %v11456_v62, %v2072_v28 }
 0x221   :  { %v2118_v61 = vsel %vm2117_vm14, %v11459_v37, %v2116_v55  ;;  %v2125_v6 = vsel %vm2124_vm15, %v11469_v5, %v2123_v27  ;;  %v11645_v36 = vadd.f32 %v11463_v29, %v2079_v47  ;;  %v11648_v21 = vadd.f32 %v11466_v24, %v2086_v1  ;;  %v6967_v24 = vpop.eup %6966 }
 0x222   :  { %vm19123_vm13 = vcmp.eq.f32.partialorder %v11446_v19, 0.0  ;;  %vm19124_vm5 = vcmp.eq.f32.partialorder %v11451_v60, 0.0  ;;  %vm19125_vm14 = vcmp.eq.f32.partialorder %v11475_v9, inf  ;;  %v2144_v29 = vmul.f32 %v6963_v30, %v11501_v3  ;;  %v11757_v30 = vld [vmem:[#allocation5 + $0x20] sm:$0xff] }
 0x223   :  { %v2107_v51 = vsel %vm19123_vm13, %v2106_v7, %v2104_v23  ;;  %v2114_v62 = vsel %vm19124_vm5, %v2113_v2, %v2111_v43  ;;  %v2132_v35 = vsel %vm19125_vm14, %v11475_v9, %v2130_v41  ;;  %vm2161_vm15 = vcmp.eq.f32.partialorder %v11513_v31, 0.0 }
 0x224   :  { %v2139_v20 = vsel %vm2138_vm7, %v11481_v57, %v2137_v14  ;;  %v11667_v19 = vadd.f32 %v11472_v53, %v2093_v38  ;;  %v11670_v7 = vadd.f32 %v11478_v13, %v2100_v22  ;;  %v2196_v60 = vmul.f32 %v2164_v4, %v2164_v4  ;;  %v11709_v57 = vld [vmem:[#allocation5] sm:$0xff]  ;;  %v11778_v22 = vld [vmem:[#allocation5 + $0x30] sm:$0xff] }
 0x225   :  { %v2121_v2 = vsel %vm2119_vm9, %v2120_v54, %v2118_v61  ;;  %v2128_v45 = vsel %vm2126_vm2, %v2127_v56, %v2125_v6  ;;  %v2151_v44 = vmul.f32 %v6965_v34, %v11509_v32  ;;  %v2197_v53 = vmul.f32 %v11633_v25, %v11633_v25  ;;  %v11789_v6 = vld [vmem:[#allocation5 + $0x38] sm:$0xff] }
 0x226   :  { %v2135_v13 = vsel %vm2133_vm10, %v2134_v12, %v2132_v35  ;;  %v11686_v59 = vadd.f32 %v11484_v63, %v2107_v51  ;;  %v11689_v15 = vadd.f32 %v11486_v58, %v2114_v62  ;;  %v2198_v37 = vmul.f32 %v11636_v26, %v11636_v26  ;;  %v11796_v62 = vld [vmem:[#allocation5 + $0x40] sm:$0xff] }
 0x227   :  { %v2142_v5 = vsel %vm2140_vm6, %v2141_v17, %v2139_v20  ;;  %v2146_v54 = vsel %vm2145_vm12, %v11501_v3, %v2144_v29  ;;  %v2158_v56 = vmul.f32 %v6967_v24, %v11513_v31  ;;  %v2199_v9 = vmul.f32 %v11645_v36, %v11645_v36  ;;  %v11806_v24 = vld [vmem:[#allocation5 + $0x48] sm:$0xff] }
 0x228   :  { %v11702_v63 = vadd.f32 %v11489_v42, %v2121_v2  ;;  %v11705_v58 = vadd.f32 %v11491_v40, %v2128_v45  ;;  %v2200_v12 = vmul.f32 %v11648_v21, %v11648_v21  ;;  %v11712_v17 = vadd.f32 %v11709_v57, %v2196_v60  ;;  %v11722_v40 = vld [vmem:[#allocation5 + $0x8] sm:$0xff]  ;;  %19126 = vst [vmem:[#allocation13_spill] sm:$0xff] %v11806_v24  ;;  %v11818_v2 = vld [vmem:[#allocation5 + $0x50] sm:$0xff] }
 0x229   :  { %v2153_v0 = vsel %vm2152_vm8, %v11509_v32, %v2151_v44  ;;  %v11718_v16 = vadd.f32 %v11493_v33, %v2135_v13  ;;  %v2201_v42 = vmul.f32 %v11667_v19, %v11667_v19  ;;  %v11725_v46 = vadd.f32 %v11722_v40, %v2197_v53  ;;  %v11734_v33 = vld [vmem:[#allocation5 + $0x10] sm:$0xff]  ;;  %19127 = vst [vmem:[#allocation14_spill] sm:$0xff] %v11818_v2  ;;  %v11827_v44 = vld [vmem:[#allocation5 + $0x58] sm:$0xff]  ;;  %v11836_v13 = vld [vmem:[#allocation5 + $0x60] sm:$0xff] }
 0x22a   :  { %v2149_v28 = vsel %vm2147_vm1, %v2148_v8, %v2146_v54  ;;  %v2176_v52 = vadd.f32 %v11496_v11, %v2142_v5  ;;  %v2202_v48 = vmul.f32 %v11670_v7, %v11670_v7  ;;  %v11737_v55 = vadd.f32 %v11734_v33, %v2198_v37  ;;  %v11746_v8 = vld [vmem:[#allocation5 + $0x18] sm:$0xff]  ;;  %19128 = vst [vmem:[#allocation15_spill] sm:$0xff] %v11827_v44 }
 0x22b   :  { %v2160_v27 = vsel %vm2159_vm4, %v11513_v31, %v2158_v56  ;;  %v11742_v47 = vadd.f32 -0.5, %v2164_v4  ;;  %v2203_v3 = vmul.f32 %v11686_v59, %v11686_v59  ;;  %v11749_v11 = vadd.f32 %v11746_v8, %v2199_v9  ;;  %v11766_v4 = vld [vmem:[#allocation5 + $0x28] sm:$0xff]  ;;  %19129 = vst [vmem:[#allocation18_spill] sm:$0xff] %v11836_v13 }
 0x22c   :  { %v2156_v1 = vsel %vm2154_vm0, %v2155_v39, %v2153_v0  ;;  %v2204_v41 = vmul.f32 %v11689_v15, %v11689_v15  ;;  %v11760_v23 = vadd.f32 %v11757_v30, %v2200_v12  ;;  %6968 = vrsqrt.f32 %v11712_v17 }
 0x22d   :  { %v2177_v43 = vadd.f32 %v11498_v49, %v2149_v28  ;;  %v2205_v14 = vmul.f32 %v11702_v63, %v11702_v63  ;;  %v11769_v32 = vadd.f32 %v11766_v4, %v2201_v42  ;;  %6970 = vrsqrt.f32 %v11725_v46  ;;  %v11873_v42 = vld [vmem:[#allocation5 + $0x70] sm:$0xff] }
 0x22e   :  { %v2163_v39 = vsel %vm2161_vm15, %v2162_v50, %v2160_v27  ;;  %v2206_v38 = vmul.f32 %v11705_v58, %v11705_v58  ;;  %v11781_v49 = vadd.f32 %v11778_v22, %v2202_v48  ;;  %6972 = vrsqrt.f32 %v11737_v55  ;;  %19132 = vst [vmem:[#allocation16_spill] sm:$0xff] %v11873_v42 }
 0x22f   :  { %v11785_v34 = vadd.f32 -0.5, %v11633_v25  ;;  %v2207_v61 = vmul.f32 %v11718_v16, %v11718_v16  ;;  %v11792_v31 = vadd.f32 %v11789_v6, %v2203_v3  ;;  %6974 = vrsqrt.f32 %v11749_v11 }
 0x230   :  { %v2178_v50 = vadd.f32 %v11504_v10, %v2156_v1  ;;  %v2208_v51 = vmul.f32 %v2176_v52, %v2176_v52  ;;  %v11799_v35 = vadd.f32 %v11796_v62, %v2204_v41  ;;  %6976 = vrsqrt.f32 %v11760_v23 }
 0x231   :  { %v2179_v25 = vadd.f32 %v11506_v18, %v2163_v39  ;;  %v11804_v29 = vadd.f32 -0.5, %v11636_v26  ;;  %v11809_v20 = vadd.f32 %v11806_v24, %v2205_v14  ;;  %6978 = vrsqrt.f32 %v11769_v32 }
 0x232   :  { %v11813_v10 = vadd.f32 -0.5, %v11645_v36  ;;  %v11816_v60 = vadd.f32 -0.5, %v11648_v21  ;;  %v11821_v18 = vadd.f32 %v11818_v2, %v2206_v38  ;;  %6980 = vrsqrt.f32 %v11781_v49 }
 0x233   :  { %v11825_v26 = vadd.f32 -0.5, %v11667_v19  ;;  %v2209_v45 = vmul.f32 %v2177_v43, %v2177_v43  ;;  %v11830_v53 = vadd.f32 %v11827_v44, %v2207_v61  ;;  %6982 = vrsqrt.f32 %v11792_v31 }
 0x234   :  { %v11834_v36 = vadd.f32 -0.5, %v11670_v7  ;;  %v2210_v21 = vmul.f32 %v2178_v50, %v2178_v50  ;;  %v11839_v37 = vadd.f32 %v11836_v13, %v2208_v51  ;;  %6984 = vrsqrt.f32 %v11799_v35 }
 0x235   :  { %v11843_v19 = vadd.f32 -0.5, %v11686_v59  ;;  %v11846_v5 = vadd.f32 -0.5, %v11689_v15  ;;  %v2211_v54 = vmul.f32 %v2179_v25, %v2179_v25  ;;  %6986 = vrsqrt.f32 %v11809_v20  ;;  %v11863_v15 = vld [vmem:[#allocation5 + $0x68] sm:$0xff] }
 0x236   :  { %v11850_v7 = vadd.f32 -0.5, %v11702_v63  ;;  %v11853_v56 = vadd.f32 -0.5, %v11705_v58  ;;  %v11856_v9 = vadd.f32 -0.5, %v11718_v16  ;;  %6988 = vrsqrt.f32 %v11821_v18  ;;  %19130 = vst [vmem:[#allocation11_spill] sm:$0xff] %v11863_v15 }
 0x237   :  { %v11859_v12 = vadd.f32 -0.5, %v2176_v52  ;;  %v11861_v59 = vadd.f32 -0.5, %v2177_v43  ;;  %v11866_v0 = vadd.f32 %v11863_v15, %v2209_v45  ;;  %6990 = vrsqrt.f32 %v11830_v53  ;;  %v11879_v52 = vld [vmem:[#allocation5 + $0x78] sm:$0xff] }
 0x238   :  { %v11869_v63 = vadd.f32 -0.5, %v2178_v50  ;;  %v11871_v58 = vadd.f32 -0.5, %v2179_v25  ;;  %v11876_v16 = vadd.f32 %v11873_v42, %v2210_v21  ;;  %6992 = vrsqrt.f32 %v11839_v37  ;;  %19133 = vst [vmem:[#allocation17_spill] sm:$0xff] %v11879_v52 }
 0x239   :  { %v6969_v28 = vpop.eup %6968  ;;  %v11882_v48 = vadd.f32 %v11879_v52, %v2211_v54  ;;  %vm2230_vm10 = vcmp.eq.f32.partialorder %v11712_v17, inf  ;;  %vm2237_vm2 = vcmp.eq.f32.partialorder %v11725_v46, inf  ;;  %vm2232_vm7 = vcmp.eq.f32.partialorder %v11712_v17, 0.0 }
 0x23a   :  { %19131 = vst [vmem:[#allocation12_spill] sm:$0xff] %v11871_v58  ;;  %v6971_v3 = vpop.eup %6970  ;;  %vm2239_vm9 = vcmp.eq.f32.partialorder %v11725_v46, 0.0  ;;  %vm2244_vm6 = vcmp.eq.f32.partialorder %v11737_v55, inf  ;;  %vm2246_vm12 = vcmp.eq.f32.partialorder %v11737_v55, 0.0  ;;  %vm2251_vm8 = vcmp.eq.f32.partialorder %v11749_v11, inf }
 0x23b   :  { %v6973_v41 = vpop.eup %6972  ;;  %6994 = vrsqrt.f32 %v11866_v0  ;;  %vm2253_vm1 = vcmp.eq.f32.partialorder %v11749_v11, 0.0  ;;  %vm2258_vm4 = vcmp.eq.f32.partialorder %v11760_v23, inf  ;;  %vm2265_vm3 = vcmp.eq.f32.partialorder %v11769_v32, inf }
 0x23c   :  { %v6975_v39 = vpop.eup %6974  ;;  %v2229_v50 = vmul.f32 %v6969_v28, %v11712_v17  ;;  %vm2272_vm0 = vcmp.eq.f32.partialorder %v11781_v49, inf  ;;  %6996 = vrsqrt.f32 %v11876_v16  ;;  %v2236_v45 = vmul.f32 %v6971_v3, %v11725_v46 }
 0x23d   :  { %v6977_v61 = vpop.eup %6976  ;;  %v2243_v21 = vmul.f32 %v6973_v41, %v11737_v55  ;;  %v2275_v54 = vand.u32 2147483648, %v11781_v49  ;;  %6998 = vrsqrt.f32 %v11882_v48  ;;  %v2250_v41 = vmul.f32 %v6975_v39, %v11749_v11 }
 0x23e   :  { %v6979_v25 = vpop.eup %6978  ;;  %v2257_v14 = vmul.f32 %v6977_v61, %v11760_v23  ;;  %vm2293_vm14 = vcmp.eq.f32.partialorder %v11809_v20, inf  ;;  %v2231_v38 = vsel %vm2230_vm10, %v11712_v17, %v2229_v50  ;;  %vm2300_vm15 = vcmp.eq.f32.partialorder %v11821_v18, inf }
 0x23f   :  { %v6981_v28 = vpop.eup %6980  ;;  %v2238_v61 = vsel %vm2237_vm2, %v11725_v46, %v2236_v45  ;;  %v2245_v43 = vsel %vm2244_vm6, %v11737_v55, %v2243_v21  ;;  %v2264_v27 = vmul.f32 %v6979_v25, %v11769_v32  ;;  %vm2295_vm10 = vcmp.eq.f32.partialorder %v11809_v20, 0.0 }
 0x240   :  { %v6983_v3 = vpop.eup %6982  ;;  %v2271_v52 = vmul.f32 %v6981_v28, %v11781_v49  ;;  %vm2302_vm13 = vcmp.eq.f32.partialorder %v11821_v18, 0.0  ;;  %vm2309_vm11 = vcmp.eq.f32.partialorder %v11830_v53, 0.0  ;;  %v2310_v1 = vand.u32 2147483648, %v11830_v53 }
 0x241   :  { %v6985_v51 = vpop.eup %6984  ;;  %vm2314_vm5 = vcmp.eq.f32.partialorder %v11839_v37, inf  ;;  %v2317_v45 = vand.u32 2147483648, %v11839_v37  ;;  %v2252_v25 = vsel %vm2251_vm8, %v11749_v11, %v2250_v41  ;;  %v2259_v28 = vsel %vm2258_vm4, %v11760_v23, %v2257_v14 }
 0x242   :  { %v6987_v39 = vpop.eup %6986  ;;  %v2278_v15 = vmul.f32 %v6983_v3, %v11792_v31  ;;  %v2285_v13 = vmul.f32 %v6985_v51, %v11799_v35  ;;  %vm2316_vm2 = vcmp.eq.f32.partialorder %v11839_v37, 0.0  ;;  %vm2321_vm6 = vcmp.eq.f32.partialorder %v11866_v0, inf }
 0x243   :  { %v6989_v50 = vpop.eup %6988  ;;  %v19134_v42 = vand.u32 2147483648, %v11712_v17  ;;  %v19135_v41 = vand.u32 2147483648, %v11725_v46  ;;  %v19136_v14 = vand.u32 2147483648, %v11737_v55  ;;  %v2331_v3 = vand.u32 2147483648, %v11876_v16 }
 0x244   :  { %v6991_v21 = vpop.eup %6990  ;;  %v2266_v58 = vsel %vm2265_vm3, %v11769_v32, %v2264_v27  ;;  %v2273_v17 = vsel %vm2272_vm0, %v11781_v49, %v2271_v52  ;;  %v2299_v46 = vmul.f32 %v6989_v50, %v11821_v18  ;;  %v2338_v52 = vand.u32 2147483648, %v11882_v48 }
 0x245   :  { %v6993_v44 = vpop.eup %6992  ;;  %v2234_v2 = vsel %vm2232_vm7, %v19134_v42, %v2231_v38  ;;  %v2241_v24 = vsel %vm2239_vm9, %v19135_v41, %v2238_v61  ;;  %v2248_v51 = vsel %vm2246_vm12, %v19136_v14, %v2245_v43  ;;  %v2292_v42 = vmul.f32 %v6987_v39, %v11809_v20 }
 0x246   :  { %vm2328_vm7 = vcmp.eq.f32.partialorder %v11876_v16, inf  ;;  %v19137_v38 = vand.u32 2147483648, %v11749_v11  ;;  %v19138_v43 = vand.u32 2147483648, %v11760_v23  ;;  %vm19139_vm9 = vcmp.eq.f32.partialorder %v11760_v23, 0.0 }
 0x247   :  { %v2306_v61 = vmul.f32 %v6991_v21, %v11830_v53  ;;  %vm2323_vm12 = vcmp.eq.f32.partialorder %v11866_v0, 0.0  ;;  %vm19140_vm8 = vcmp.eq.f32.partialorder %v11792_v31, inf  ;;  %vm19141_vm4 = vcmp.eq.f32.partialorder %v11799_v35, inf }
 0x248   :  { %v2255_v55 = vsel %vm2253_vm1, %v19137_v38, %v2252_v25  ;;  %v2262_v27 = vsel %vm19139_vm9, %v19138_v43, %v2259_v28  ;;  %v6995_v39 = vpop.eup %6994  ;;  %v2280_v50 = vsel %vm19140_vm8, %v11792_v31, %v2278_v15  ;;  %v2287_v11 = vsel %vm19141_vm4, %v11799_v35, %v2285_v13 }
 0x249   :  { %v2313_v25 = vmul.f32 %v6993_v44, %v11839_v37  ;;  %vm2335_vm1 = vcmp.eq.f32.partialorder %v11882_v48, inf  ;;  %v2340_v23 = vadd.f32 %v11742_v47, %v2234_v2  ;;  %v19142_v21 = vand.u32 2147483648, %v11769_v32  ;;  %v6997_v44 = vpop.eup %6996 }
 0x24a   :  { %vm19143_vm3 = vcmp.eq.f32.partialorder %v11769_v32, 0.0  ;;  %vm19144_vm0 = vcmp.eq.f32.partialorder %v11781_v49, 0.0  ;;  %vm2330_vm9 = vcmp.eq.f32.partialorder %v11876_v16, 0.0  ;;  %v2341_v15 = vadd.f32 %v11785_v34, %v2241_v24 }
 0x24b   :  { %v2269_v28 = vsel %vm19143_vm3, %v19142_v21, %v2266_v58  ;;  %v2276_v41 = vsel %vm19144_vm0, %v2275_v54, %v2273_v17  ;;  %v12003_v13 = vadd.f32 %v11804_v29, %v2248_v51  ;;  %v2294_v47 = vsel %vm2293_vm14, %v11809_v20, %v2292_v42 }
 0x24c   :  { %v2301_v32 = vsel %vm2300_vm15, %v11821_v18, %v2299_v46  ;;  %v12012_v2 = vadd.f32 %v11813_v10, %v2255_v55  ;;  %v12015_v49 = vadd.f32 %v11816_v60, %v2262_v27  ;;  %v19145_v34 = vand.u32 2147483648, %v11792_v31  ;;  %v6999_v60 = vpop.eup %6998 }
 0x24d   :  { %vm19146_vm8 = vcmp.eq.f32.partialorder %v11792_v31, 0.0  ;;  %v19147_v24 = vand.u32 2147483648, %v11799_v35  ;;  %vm19148_vm4 = vcmp.eq.f32.partialorder %v11799_v35, 0.0  ;;  %vm19149_vm14 = vcmp.eq.f32.partialorder %v11830_v53, inf }
 0x24e   :  { %v2283_v29 = vsel %vm19146_vm8, %v19145_v34, %v2280_v50  ;;  %v2308_v54 = vsel %vm19149_vm14, %v11830_v53, %v2306_v61  ;;  %v2320_v10 = vmul.f32 %v6995_v39, %v11866_v0  ;;  %vm2337_vm15 = vcmp.eq.f32.partialorder %v11882_v48, 0.0 }
 0x24f   :  { %v2290_v58 = vsel %vm19148_vm4, %v19147_v24, %v2287_v11  ;;  %v2315_v14 = vsel %vm2314_vm5, %v11839_v37, %v2313_v25  ;;  %v2345_v31 = vadd.f32 %v11825_v26, %v2269_v28  ;;  %v2346_v51 = vadd.f32 %v11834_v36, %v2276_v41 }
 0x250   :  { %v2372_v17 = vmul.f32 %v2340_v23, %v2340_v23  ;;  %v19150_v35 = vand.u32 2147483648, %v11809_v20  ;;  %v19151_v46 = vand.u32 2147483648, %v11821_v18  ;;  %v2327_v55 = vmul.f32 %v6997_v44, %v11876_v16 }
 0x251   :  { %v2373_v43 = vmul.f32 %v2341_v15, %v2341_v15  ;;  %v2311_v27 = vsel %vm2309_vm11, %v2310_v1, %v2308_v54  ;;  %v2347_v26 = vadd.f32 %v11843_v19, %v2283_v29  ;;  %v2348_v36 = vadd.f32 %v11846_v5, %v2290_v58 }
 0x252   :  { %v2297_v42 = vsel %vm2295_vm10, %v19150_v35, %v2294_v47  ;;  %v2304_v38 = vsel %vm2302_vm13, %v19151_v46, %v2301_v32  ;;  %v2374_v61 = vmul.f32 %v12003_v13, %v12003_v13  ;;  %v2318_v20 = vsel %vm2316_vm2, %v2317_v45, %v2315_v14 }
 0x253   :  { %v2322_v18 = vsel %vm2321_vm6, %v11866_v0, %v2320_v10  ;;  %v2334_v39 = vmul.f32 %v6999_v60, %v11882_v48  ;;  %v2375_v53 = vmul.f32 %v12012_v2, %v12012_v2  ;;  %v2349_v1 = vadd.f32 %v11850_v7, %v2297_v42 }
 0x254   :  { %v2350_v19 = vadd.f32 %v11853_v56, %v2304_v38  ;;  %v2376_v5 = vmul.f32 %v12015_v49, %v12015_v49  ;;  %v12063_v50 = vadd.f32 %v11709_v57, %v2372_v17  ;;  %v2329_v37 = vsel %vm2328_vm7, %v11876_v16, %v2327_v55  ;;  %v19155_v38 = vld [vmem:[#allocation14_spill] sm:$0xff] }
 0x255   :  { %v2351_v45 = vadd.f32 %v11856_v9, %v2311_v27  ;;  %v2377_v11 = vmul.f32 %v2345_v31, %v2345_v31  ;;  %v12070_v25 = vadd.f32 %v11722_v40, %v2373_v43  ;;  %v19152_v7 = vand.u32 2147483648, %v11866_v0  ;;  %v19156_v27 = vld [vmem:[#allocation15_spill] sm:$0xff] }
 0x256   :  { %v2352_v21 = vadd.f32 %v11859_v12, %v2318_v20  ;;  %v2378_v28 = vmul.f32 %v2346_v51, %v2346_v51  ;;  %v12078_v41 = vadd.f32 %v11734_v33, %v2374_v61  ;;  %v2336_v44 = vsel %vm2335_vm1, %v11882_v48, %v2334_v39 }
 0x257   :  { %v2325_v56 = vsel %vm2323_vm12, %v19152_v7, %v2322_v18  ;;  %v12083_v9 = vadd.f32 -0.5, %v2340_v23  ;;  %v2379_v47 = vmul.f32 %v2347_v26, %v2347_v26  ;;  %v12086_v32 = vadd.f32 %v11746_v8, %v2375_v53  ;;  %v19157_v18 = vld [vmem:[#allocation18_spill] sm:$0xff] }
 0x258   :  { %v2332_v0 = vsel %vm2330_vm9, %v2331_v3, %v2329_v37  ;;  %v2380_v12 = vmul.f32 %v2348_v36, %v2348_v36  ;;  %v12093_v34 = vadd.f32 %v11757_v30, %v2376_v5  ;;  %7000 = vrsqrt.f32 %v12063_v50 }
 0x259   :  { %v2353_v29 = vadd.f32 %v11861_v59, %v2325_v56  ;;  %v2381_v24 = vmul.f32 %v2349_v1, %v2349_v1  ;;  %v12098_v23 = vadd.f32 %v11766_v4, %v2377_v11  ;;  %7002 = vrsqrt.f32 %v12070_v25  ;;  %v19158_v56 = vld [vmem:[#allocation11_spill] sm:$0xff] }
 0x25a   :  { %v2339_v16 = vsel %vm2337_vm15, %v2338_v52, %v2336_v44  ;;  %v2382_v3 = vmul.f32 %v2350_v19, %v2350_v19  ;;  %v12106_v58 = vadd.f32 %v11778_v22, %v2378_v28  ;;  %7004 = vrsqrt.f32 %v12078_v41  ;;  %v19153_v52 = vld [vmem:[#allocation12_spill] sm:$0xff]  ;;  %v19161_v44 = vld [vmem:[#allocation17_spill] sm:$0xff] }
 0x25b   :  { %v12109_v54 = vadd.f32 -0.5, %v2341_v15  ;;  %v2383_v59 = vmul.f32 %v2351_v45, %v2351_v45  ;;  %v12112_v10 = vadd.f32 %v11789_v6, %v2379_v47  ;;  %7006 = vrsqrt.f32 %v12086_v32  ;;  %v19154_v15 = vld [vmem:[#allocation13_spill] sm:$0xff] }
 0x25c   :  { %v2354_v60 = vadd.f32 %v11869_v63, %v2332_v0  ;;  %v2384_v14 = vmul.f32 %v2352_v21, %v2352_v21  ;;  %v12117_v48 = vadd.f32 %v11796_v62, %v2380_v12  ;;  %7008 = vrsqrt.f32 %v12093_v34 }
 0x25d   :  { %v2355_v17 = vadd.f32 %v19153_v52, %v2339_v16  ;;  %v12122_v35 = vadd.f32 -0.5, %v12003_v13  ;;  %v12125_v42 = vadd.f32 %v19154_v15, %v2381_v24  ;;  %7010 = vrsqrt.f32 %v12098_v23 }
 0x25e   :  { %v12129_v46 = vadd.f32 -0.5, %v12012_v2  ;;  %v12132_v63 = vadd.f32 -0.5, %v12015_v49  ;;  %v12135_v55 = vadd.f32 %v19155_v38, %v2382_v3  ;;  %7012 = vrsqrt.f32 %v12106_v58 }
 0x25f   :  { %v12138_v43 = vadd.f32 -0.5, %v2345_v31  ;;  %v2385_v13 = vmul.f32 %v2353_v29, %v2353_v29  ;;  %v12141_v61 = vadd.f32 %v19156_v27, %v2383_v59  ;;  %7014 = vrsqrt.f32 %v12112_v10 }
 0x260   :  { %v12144_v20 = vadd.f32 -0.5, %v2346_v51  ;;  %v2386_v2 = vmul.f32 %v2354_v60, %v2354_v60  ;;  %v12147_v39 = vadd.f32 %v19157_v18, %v2384_v14  ;;  %7016 = vrsqrt.f32 %v12117_v48 }
 0x261   :  { %v12150_v49 = vadd.f32 -0.5, %v2347_v26  ;;  %v12152_v53 = vadd.f32 -0.5, %v2348_v36  ;;  %v2387_v31 = vmul.f32 %v2355_v17, %v2355_v17  ;;  %7018 = vrsqrt.f32 %v12125_v42 }
 0x262   :  { %v12155_v5 = vadd.f32 -0.5, %v2349_v1  ;;  %v12157_v37 = vadd.f32 -0.5, %v2350_v19  ;;  %v12159_v11 = vadd.f32 -0.5, %v2351_v45  ;;  %7020 = vrsqrt.f32 %v12135_v55  ;;  %v19160_v1 = vld [vmem:[#allocation16_spill] sm:$0xff] }
 0x263   :  { %v12162_v51 = vadd.f32 -0.5, %v2352_v21  ;;  %v12164_v7 = vadd.f32 -0.5, %v2353_v29  ;;  %v12167_v26 = vadd.f32 %v19158_v56, %v2385_v13  ;;  %7022 = vrsqrt.f32 %v12141_v61 }
 0x264   :  { %v12170_v36 = vadd.f32 -0.5, %v2354_v60  ;;  %v12172_v28 = vadd.f32 -0.5, %v2355_v17  ;;  %v12175_v19 = vadd.f32 %v19160_v1, %v2386_v2  ;;  %7024 = vrsqrt.f32 %v12147_v39 }
 0x265   :  { %v7001_v45 = vpop.eup %7000  ;;  %v12179_v21 = vadd.f32 %v19161_v44, %v2387_v31  ;;  %vm2406_vm11 = vcmp.eq.f32.partialorder %v12063_v50, inf  ;;  %vm2413_vm13 = vcmp.eq.f32.partialorder %v12070_v25, inf  ;;  %vm2408_vm5 = vcmp.eq.f32.partialorder %v12063_v50, 0.0 }
 0x266   :  { %19159 = vst [vmem:[#allocation12_spill] sm:$0xff] %v12172_v28  ;;  %v7003_v0 = vpop.eup %7002  ;;  %vm2415_vm10 = vcmp.eq.f32.partialorder %v12070_v25, 0.0  ;;  %vm2420_vm2 = vcmp.eq.f32.partialorder %v12078_v41, inf  ;;  %vm2422_vm6 = vcmp.eq.f32.partialorder %v12078_v41, 0.0  ;;  %vm2427_vm7 = vcmp.eq.f32.partialorder %v12086_v32, inf }
 0x267   :  { %v7005_v29 = vpop.eup %7004  ;;  %7026 = vrsqrt.f32 %v12167_v26  ;;  %vm2429_vm12 = vcmp.eq.f32.partialorder %v12086_v32, 0.0  ;;  %vm2434_vm1 = vcmp.eq.f32.partialorder %v12093_v34, inf  ;;  %vm2441_vm0 = vcmp.eq.f32.partialorder %v12098_v23, inf }
 0x268   :  { %v7007_v3 = vpop.eup %7006  ;;  %v2405_v14 = vmul.f32 %v7001_v45, %v12063_v50  ;;  %vm2448_vm9 = vcmp.eq.f32.partialorder %v12106_v58, inf  ;;  %7028 = vrsqrt.f32 %v12175_v19  ;;  %v2412_v13 = vmul.f32 %v7003_v0, %v12070_v25 }
 0x269   :  { %v7009_v60 = vpop.eup %7008  ;;  %v2419_v2 = vmul.f32 %v7005_v29, %v12078_v41  ;;  %v2451_v31 = vand.u32 2147483648, %v12106_v58  ;;  %7030 = vrsqrt.f32 %v12179_v21  ;;  %v2426_v29 = vmul.f32 %v7007_v3, %v12086_v32 }
 0x26a   :  { %v7011_v17 = vpop.eup %7010  ;;  %v2433_v16 = vmul.f32 %v7009_v60, %v12093_v34  ;;  %vm2469_vm14 = vcmp.eq.f32.partialorder %v12125_v42, inf  ;;  %v2407_v59 = vsel %vm2406_vm11, %v12063_v50, %v2405_v14  ;;  %vm2476_vm15 = vcmp.eq.f32.partialorder %v12135_v55, inf }
 0x26b   :  { %v7013_v45 = vpop.eup %7012  ;;  %v2414_v60 = vsel %vm2413_vm13, %v12070_v25, %v2412_v13  ;;  %v2421_v24 = vsel %vm2420_vm2, %v12078_v41, %v2419_v2  ;;  %v2440_v47 = vmul.f32 %v7011_v17, %v12098_v23  ;;  %vm2471_vm11 = vcmp.eq.f32.partialorder %v12125_v42, 0.0 }
 0x26c   :  { %v7015_v0 = vpop.eup %7014  ;;  %v2447_v44 = vmul.f32 %v7013_v45, %v12106_v58  ;;  %vm2478_vm8 = vcmp.eq.f32.partialorder %v12135_v55, 0.0  ;;  %vm2485_vm3 = vcmp.eq.f32.partialorder %v12141_v61, 0.0  ;;  %v2486_v12 = vand.u32 2147483648, %v12141_v61 }
 0x26d   :  { %v7017_v52 = vpop.eup %7016  ;;  %vm2490_vm4 = vcmp.eq.f32.partialorder %v12147_v39, inf  ;;  %v2493_v13 = vand.u32 2147483648, %v12147_v39  ;;  %v2428_v17 = vsel %vm2427_vm7, %v12086_v32, %v2426_v29  ;;  %v2435_v45 = vsel %vm2434_vm1, %v12093_v34, %v2433_v16 }
 0x26e   :  { %v7019_v3 = vpop.eup %7018  ;;  %v2454_v56 = vmul.f32 %v7015_v0, %v12112_v10  ;;  %v2461_v18 = vmul.f32 %v7017_v52, %v12117_v48  ;;  %vm2492_vm13 = vcmp.eq.f32.partialorder %v12147_v39, 0.0  ;;  %vm2497_vm2 = vcmp.eq.f32.partialorder %v12167_v26, inf }
 0x26f   :  { %v7021_v14 = vpop.eup %7020  ;;  %v19162_v1 = vand.u32 2147483648, %v12063_v50  ;;  %v19163_v29 = vand.u32 2147483648, %v12070_v25  ;;  %v19164_v16 = vand.u32 2147483648, %v12078_v41  ;;  %v2507_v0 = vand.u32 2147483648, %v12175_v19 }
 0x270   :  { %v7023_v2 = vpop.eup %7022  ;;  %v2442_v28 = vsel %vm2441_vm0, %v12098_v23, %v2440_v47  ;;  %v2449_v50 = vsel %vm2448_vm9, %v12106_v58, %v2447_v44  ;;  %v2475_v25 = vmul.f32 %v7021_v14, %v12135_v55  ;;  %v2514_v44 = vand.u32 2147483648, %v12179_v21 }
 0x271   :  { %v7025_v27 = vpop.eup %7024  ;;  %v2410_v38 = vsel %vm2408_vm5, %v19162_v1, %v2407_v59  ;;  %v2417_v15 = vsel %vm2415_vm10, %v19163_v29, %v2414_v60  ;;  %v2424_v52 = vsel %vm2422_vm6, %v19164_v16, %v2421_v24  ;;  %v2468_v1 = vmul.f32 %v7019_v3, %v12125_v42 }
 0x272   :  { %vm2504_vm5 = vcmp.eq.f32.partialorder %v12175_v19, inf  ;;  %v19165_v59 = vand.u32 2147483648, %v12086_v32  ;;  %v19166_v24 = vand.u32 2147483648, %v12093_v34  ;;  %vm19167_vm10 = vcmp.eq.f32.partialorder %v12093_v34, 0.0 }
 0x273   :  { %v2482_v60 = vmul.f32 %v7023_v2, %v12141_v61  ;;  %vm2499_vm6 = vcmp.eq.f32.partialorder %v12167_v26, 0.0  ;;  %vm19168_vm7 = vcmp.eq.f32.partialorder %v12112_v10, inf  ;;  %vm19169_vm1 = vcmp.eq.f32.partialorder %v12117_v48, inf }
 0x274   :  { %v2431_v41 = vsel %vm2429_vm12, %v19165_v59, %v2428_v17  ;;  %v2438_v47 = vsel %vm19167_vm10, %v19166_v24, %v2435_v45  ;;  %v7027_v3 = vpop.eup %7026  ;;  %v2456_v14 = vsel %vm19168_vm7, %v12112_v10, %v2454_v56  ;;  %v2463_v32 = vsel %vm19169_vm1, %v12117_v48, %v2461_v18 }
 0x275   :  { %v2489_v17 = vmul.f32 %v7025_v27, %v12147_v39  ;;  %vm2511_vm12 = vcmp.eq.f32.partialorder %v12179_v21, inf  ;;  %v2516_v34 = vadd.f32 %v12083_v9, %v2410_v38  ;;  %v19170_v2 = vand.u32 2147483648, %v12098_v23  ;;  %v7029_v27 = vpop.eup %7028 }
 0x276   :  { %vm19171_vm0 = vcmp.eq.f32.partialorder %v12098_v23, 0.0  ;;  %vm19172_vm9 = vcmp.eq.f32.partialorder %v12106_v58, 0.0  ;;  %vm2506_vm10 = vcmp.eq.f32.partialorder %v12175_v19, 0.0  ;;  %v2517_v56 = vadd.f32 %v12109_v54, %v2417_v15 }
 0x277   :  { %v2445_v45 = vsel %vm19171_vm0, %v19170_v2, %v2442_v28  ;;  %v2452_v29 = vsel %vm19172_vm9, %v2451_v31, %v2449_v50  ;;  %v12300_v18 = vadd.f32 %v12122_v35, %v2424_v52  ;;  %v2470_v9 = vsel %vm2469_vm14, %v12125_v42, %v2468_v1 }
 0x278   :  { %v2477_v23 = vsel %vm2476_vm15, %v12135_v55, %v2475_v25  ;;  %v12309_v38 = vadd.f32 %v12129_v46, %v2431_v41  ;;  %v12312_v58 = vadd.f32 %v12132_v63, %v2438_v47  ;;  %v19173_v54 = vand.u32 2147483648, %v12112_v10  ;;  %v7031_v63 = vpop.eup %7030 }
 0x279   :  { %vm19174_vm7 = vcmp.eq.f32.partialorder %v12112_v10, 0.0  ;;  %v19175_v15 = vand.u32 2147483648, %v12117_v48  ;;  %vm19176_vm1 = vcmp.eq.f32.partialorder %v12117_v48, 0.0  ;;  %vm19177_vm14 = vcmp.eq.f32.partialorder %v12141_v61, inf }
 0x27a   :  { %v2459_v35 = vsel %vm19174_vm7, %v19173_v54, %v2456_v14  ;;  %v2484_v31 = vsel %vm19177_vm14, %v12141_v61, %v2482_v60  ;;  %v2496_v46 = vmul.f32 %v7027_v3, %v12167_v26  ;;  %vm2513_vm15 = vcmp.eq.f32.partialorder %v12179_v21, 0.0 }
 0x27b   :  { %v2466_v28 = vsel %vm19176_vm1, %v19175_v15, %v2463_v32  ;;  %v2491_v16 = vsel %vm2490_vm4, %v12147_v39, %v2489_v17  ;;  %v2521_v10 = vadd.f32 %v12138_v43, %v2445_v45  ;;  %v2522_v52 = vadd.f32 %v12144_v20, %v2452_v29 }
 0x27c   :  { %v2548_v50 = vmul.f32 %v2516_v34, %v2516_v34  ;;  %v19178_v48 = vand.u32 2147483648, %v12125_v42  ;;  %v19179_v25 = vand.u32 2147483648, %v12135_v55  ;;  %v2503_v41 = vmul.f32 %v7029_v27, %v12175_v19 }
 0x27d   :  { %v2549_v24 = vmul.f32 %v2517_v56, %v2517_v56  ;;  %v2487_v47 = vsel %vm2485_vm3, %v2486_v12, %v2484_v31  ;;  %v2523_v43 = vadd.f32 %v12150_v49, %v2459_v35  ;;  %v2524_v20 = vadd.f32 %v12152_v53, %v2466_v28 }
 0x27e   :  { %v2473_v1 = vsel %vm2471_vm11, %v19178_v48, %v2470_v9  ;;  %v2480_v59 = vsel %vm2478_vm8, %v19179_v25, %v2477_v23  ;;  %v2550_v60 = vmul.f32 %v12300_v18, %v12300_v18  ;;  %v2494_v42 = vsel %vm2492_vm13, %v2493_v13, %v2491_v16  ;;  %v19185_v48 = vld [vmem:[#allocation18_spill] sm:$0xff] }
 0x27f   :  { %v2498_v55 = vsel %vm2497_vm2, %v12167_v26, %v2496_v46  ;;  %v2510_v3 = vmul.f32 %v7031_v63, %v12179_v21  ;;  %v2551_v61 = vmul.f32 %v12309_v38, %v12309_v38  ;;  %v2525_v12 = vadd.f32 %v12155_v5, %v2473_v1  ;;  %v19184_v63 = vld [vmem:[#allocation15_spill] sm:$0xff] }
 0x280   :  { %v2526_v49 = vadd.f32 %v12157_v37, %v2480_v59  ;;  %v2552_v53 = vmul.f32 %v12312_v58, %v12312_v58  ;;  %v12360_v14 = vadd.f32 %v11709_v57, %v2548_v50  ;;  %v2505_v39 = vsel %vm2504_vm5, %v12175_v19, %v2503_v41 }
 0x281   :  { %v2527_v13 = vadd.f32 %v12159_v11, %v2487_v47  ;;  %v2553_v32 = vmul.f32 %v2521_v10, %v2521_v10  ;;  %v12367_v17 = vadd.f32 %v11722_v40, %v2549_v24  ;;  %v19180_v5 = vand.u32 2147483648, %v12167_v26 }
 0x282   :  { %v2528_v2 = vadd.f32 %v12162_v51, %v2494_v42  ;;  %v2554_v45 = vmul.f32 %v2522_v52, %v2522_v52  ;;  %v12375_v57 = vadd.f32 %v11734_v33, %v2550_v60  ;;  %v2512_v29 = vsel %vm2511_vm12, %v12179_v21, %v2510_v3  ;;  %v19186_v60 = vld [vmem:[#allocation11_spill] sm:$0xff] }
 0x283   :  { %v2501_v37 = vsel %vm2499_vm6, %v19180_v5, %v2498_v55  ;;  %v12380_v11 = vadd.f32 -0.5, %v2516_v34  ;;  %v2555_v27 = vmul.f32 %v2523_v43, %v2523_v43  ;;  %v12383_v40 = vadd.f32 %v11746_v8, %v2551_v61  ;;  %v19187_v55 = vld [vmem:[#allocation16_spill] sm:$0xff] }
 0x284   :  { %v2508_v26 = vsel %vm2506_vm10, %v2507_v0, %v2505_v39  ;;  %v2556_v51 = vmul.f32 %v2524_v20, %v2524_v20  ;;  %v12390_v9 = vadd.f32 %v11757_v30, %v2552_v53  ;;  %7032 = vrsqrt.f32 %v12360_v14 }
 0x285   :  { %v2529_v33 = vadd.f32 %v12164_v7, %v2501_v37  ;;  %v2557_v23 = vmul.f32 %v2525_v12, %v2525_v12  ;;  %v12395_v34 = vadd.f32 %v11766_v4, %v2553_v32  ;;  %7034 = vrsqrt.f32 %v12367_v17 }
 0x286   :  { %v2515_v8 = vsel %vm2513_vm15, %v2514_v44, %v2512_v29  ;;  %v2558_v19 = vmul.f32 %v2526_v49, %v2526_v49  ;;  %v12403_v0 = vadd.f32 %v11778_v22, %v2554_v45  ;;  %7036 = vrsqrt.f32 %v12375_v57  ;;  %v19181_v22 = vld [vmem:[#allocation12_spill] sm:$0xff] }
 0x287   :  { %v12406_v30 = vadd.f32 -0.5, %v2517_v56  ;;  %v2559_v7 = vmul.f32 %v2527_v13, %v2527_v13  ;;  %v12409_v54 = vadd.f32 %v11789_v6, %v2555_v27  ;;  %7038 = vrsqrt.f32 %v12383_v40  ;;  %v19182_v56 = vld [vmem:[#allocation13_spill] sm:$0xff] }
 0x288   :  { %v2530_v4 = vadd.f32 %v12170_v36, %v2508_v26  ;;  %v2560_v35 = vmul.f32 %v2528_v2, %v2528_v2  ;;  %v12414_v21 = vadd.f32 %v11796_v62, %v2556_v51  ;;  %7040 = vrsqrt.f32 %v12390_v9  ;;  %v19183_v62 = vld [vmem:[#allocation14_spill] sm:$0xff] }
 0x289   :  { %v2531_v44 = vadd.f32 %v19181_v22, %v2515_v8  ;;  %v12419_v15 = vadd.f32 -0.5, %v12300_v18  ;;  %v12422_v28 = vadd.f32 %v19182_v56, %v2557_v23  ;;  %7042 = vrsqrt.f32 %v12395_v34 }
 0x28a   :  { %v12426_v6 = vadd.f32 -0.5, %v12309_v38  ;;  %v12429_v36 = vadd.f32 -0.5, %v12312_v58  ;;  %v12432_v31 = vadd.f32 %v19183_v62, %v2558_v19  ;;  %7044 = vrsqrt.f32 %v12403_v0 }
 0x28b   :  { %v12435_v46 = vadd.f32 -0.5, %v2521_v10  ;;  %v2561_v18 = vmul.f32 %v2529_v33, %v2529_v33  ;;  %v12438_v16 = vadd.f32 %v19184_v63, %v2559_v7  ;;  %7046 = vrsqrt.f32 %v12409_v54 }
 0x28c   :  { %v12441_v50 = vadd.f32 -0.5, %v2522_v52  ;;  %v2562_v38 = vmul.f32 %v2530_v4, %v2530_v4  ;;  %v12444_v1 = vadd.f32 %v19185_v48, %v2560_v35  ;;  %7048 = vrsqrt.f32 %v12414_v21 }
 0x28d   :  { %v12447_v58 = vadd.f32 -0.5, %v2523_v43  ;;  %v12449_v25 = vadd.f32 -0.5, %v2524_v20  ;;  %v2563_v10 = vmul.f32 %v2531_v44, %v2531_v44  ;;  %7050 = vrsqrt.f32 %v12422_v28 }
 0x28e   :  { %v12452_v59 = vadd.f32 -0.5, %v2525_v12  ;;  %v12454_v41 = vadd.f32 -0.5, %v2526_v49  ;;  %v12456_v24 = vadd.f32 -0.5, %v2527_v13  ;;  %7052 = vrsqrt.f32 %v12432_v31  ;;  %v19188_v12 = vld [vmem:[#allocation17_spill] sm:$0xff] }
 0x28f   :  { %v12459_v52 = vadd.f32 -0.5, %v2528_v2  ;;  %v12461_v47 = vadd.f32 -0.5, %v2529_v33  ;;  %v12464_v43 = vadd.f32 %v19186_v60, %v2561_v18  ;;  %7054 = vrsqrt.f32 %v12438_v16 }
 0x290   :  { %v12467_v20 = vadd.f32 -0.5, %v2530_v4  ;;  %v12469_v42 = vadd.f32 -0.5, %v2531_v44  ;;  %v12472_v3 = vadd.f32 %v19187_v55, %v2562_v38  ;;  %7056 = vrsqrt.f32 %v12444_v1 }
 0x291   :  { %v7033_v61 = vpop.eup %7032  ;;  %v12476_v49 = vadd.f32 %v19188_v12, %v2563_v10  ;;  %vm2582_vm3 = vcmp.eq.f32.partialorder %v12360_v14, inf  ;;  %v2585_v53 = vand.u32 2147483648, %v12360_v14  ;;  %vm2589_vm8 = vcmp.eq.f32.partialorder %v12367_v17, inf }
 0x292   :  { %v7035_v39 = vpop.eup %7034  ;;  %vm2584_vm4 = vcmp.eq.f32.partialorder %v12360_v14, 0.0  ;;  %vm2591_vm11 = vcmp.eq.f32.partialorder %v12367_v17, 0.0  ;;  %v2592_v13 = vand.u32 2147483648, %v12367_v17  ;;  %vm2596_vm13 = vcmp.eq.f32.partialorder %v12375_v57, inf }
 0x293   :  { %vm2598_vm2 = vcmp.eq.f32.partialorder %v12375_v57, 0.0  ;;  %v7037_v32 = vpop.eup %7036  ;;  %v2599_v5 = vand.u32 2147483648, %v12375_v57  ;;  %vm2603_vm5 = vcmp.eq.f32.partialorder %v12383_v40, inf  ;;  %v2606_v37 = vand.u32 2147483648, %v12383_v40 }
 0x294   :  { %7058 = vrsqrt.f32 %v12464_v43  ;;  %v7039_v2 = vpop.eup %7038  ;;  %vm2605_vm6 = vcmp.eq.f32.partialorder %v12383_v40, 0.0  ;;  %vm2610_vm12 = vcmp.eq.f32.partialorder %v12390_v9, inf  ;;  %v2613_v45 = vand.u32 2147483648, %v12390_v9 }
 0x295   :  { %vm2617_vm9 = vcmp.eq.f32.partialorder %v12395_v34, inf  ;;  %v7041_v29 = vpop.eup %7040  ;;  %v2581_v27 = vmul.f32 %v7033_v61, %v12360_v14  ;;  %v2620_v26 = vand.u32 2147483648, %v12395_v34  ;;  %vm2624_vm10 = vcmp.eq.f32.partialorder %v12403_v0, inf }
 0x296   :  { %7060 = vrsqrt.f32 %v12472_v3  ;;  %v7043_v51 = vpop.eup %7042  ;;  %v2588_v33 = vmul.f32 %v7035_v39, %v12367_v17  ;;  %v2595_v23 = vmul.f32 %v7037_v32, %v12375_v57  ;;  %v2627_v8 = vand.u32 2147483648, %v12403_v0 }
 0x297   :  { %v7045_v19 = vpop.eup %7044  ;;  %v2634_v7 = vand.u32 2147483648, %v12409_v54  ;;  %v2641_v4 = vand.u32 2147483648, %v12414_v21  ;;  %7062 = vrsqrt.f32 %v12476_v49  ;;  %v2602_v22 = vmul.f32 %v7039_v2, %v12383_v40 }
 0x298   :  { %v7047_v35 = vpop.eup %7046  ;;  %v2609_v44 = vmul.f32 %v7041_v29, %v12390_v9  ;;  %vm2645_vm14 = vcmp.eq.f32.partialorder %v12422_v28, inf  ;;  %v2648_v56 = vand.u32 2147483648, %v12422_v28  ;;  %v2583_v18 = vsel %vm2582_vm3, %v12360_v14, %v2581_v27 }
 0x299   :  { %v7049_v62 = vpop.eup %7048  ;;  %vm2652_vm15 = vcmp.eq.f32.partialorder %v12432_v31, inf  ;;  %v2655_v63 = vand.u32 2147483648, %v12432_v31  ;;  %v2590_v48 = vsel %vm2589_vm8, %v12367_v17, %v2588_v33  ;;  %v2597_v10 = vsel %vm2596_vm13, %v12375_v57, %v2595_v23 }
 0x29a   :  { %v7051_v38 = vpop.eup %7050  ;;  %v2616_v60 = vmul.f32 %v7043_v51, %v12395_v34  ;;  %v2623_v55 = vmul.f32 %v7045_v19, %v12403_v0  ;;  %vm2647_vm3 = vcmp.eq.f32.partialorder %v12422_v28, 0.0  ;;  %vm2654_vm7 = vcmp.eq.f32.partialorder %v12432_v31, 0.0 }
 0x29b   :  { %v7053_v61 = vpop.eup %7052  ;;  %vm2661_vm0 = vcmp.eq.f32.partialorder %v12438_v16, 0.0  ;;  %v2662_v12 = vand.u32 2147483648, %v12438_v16  ;;  %vm2666_vm1 = vcmp.eq.f32.partialorder %v12444_v1, inf  ;;  %v2669_v39 = vand.u32 2147483648, %v12444_v1 }
 0x29c   :  { %v2676_v32 = vand.u32 2147483648, %v12464_v43  ;;  %v7055_v2 = vpop.eup %7054  ;;  %v2604_v29 = vsel %vm2603_vm5, %v12383_v40, %v2602_v22  ;;  %v2611_v27 = vsel %vm2610_vm12, %v12390_v9, %v2609_v44  ;;  %v2630_v51 = vmul.f32 %v7047_v35, %v12409_v54 }
 0x29d   :  { %v2637_v33 = vmul.f32 %v7049_v62, %v12414_v21  ;;  %vm2668_vm8 = vcmp.eq.f32.partialorder %v12444_v1, 0.0  ;;  %vm2673_vm13 = vcmp.eq.f32.partialorder %v12464_v43, inf  ;;  %v7057_v23 = vpop.eup %7056  ;;  %v2586_v19 = vsel %vm2584_vm4, %v2585_v53, %v2583_v18 }
 0x29e   :  { %v2593_v22 = vsel %vm2591_vm11, %v2592_v13, %v2590_v48  ;;  %v2600_v35 = vsel %vm2598_vm2, %v2599_v5, %v2597_v10  ;;  %v2683_v44 = vand.u32 2147483648, %v12472_v3  ;;  %v2618_v62 = vsel %vm2617_vm9, %v12395_v34, %v2616_v60 }
 0x29f   :  { %v2625_v14 = vsel %vm2624_vm10, %v12403_v0, %v2623_v55  ;;  %v2644_v53 = vmul.f32 %v7051_v38, %v12422_v28  ;;  %v2651_v17 = vmul.f32 %v7053_v61, %v12432_v31  ;;  %vm2680_vm4 = vcmp.eq.f32.partialorder %v12472_v3, inf }
 0x2a0   :  { %v2607_v57 = vsel %vm2605_vm6, %v2606_v37, %v2604_v29  ;;  %vm19189_vm11 = vcmp.eq.f32.partialorder %v12390_v9, 0.0  ;;  %v2658_v5 = vmul.f32 %v7055_v2, %v12438_v16  ;;  %vm2675_vm2 = vcmp.eq.f32.partialorder %v12464_v43, 0.0 }
 0x2a1   :  { %v2614_v13 = vsel %vm19189_vm11, %v2613_v45, %v2611_v27  ;;  %v2690_v18 = vand.u32 2147483648, %v12476_v49  ;;  %v7059_v38 = vpop.eup %7058  ;;  %vm19190_vm5 = vcmp.eq.f32.partialorder %v12409_v54, inf  ;;  %vm19191_vm12 = vcmp.eq.f32.partialorder %v12414_v21, inf }
 0x2a2   :  { %v2632_v48 = vsel %vm19190_vm5, %v12409_v54, %v2630_v51  ;;  %v2639_v40 = vsel %vm19191_vm12, %v12414_v21, %v2637_v33  ;;  %v2665_v37 = vmul.f32 %v7057_v23, %v12444_v1  ;;  %vm2687_vm6 = vcmp.eq.f32.partialorder %v12476_v49, inf }
 0x2a3   :  { %v2692_v9 = vadd.f32 %v12380_v11, %v2586_v19  ;;  %vm19192_vm9 = vcmp.eq.f32.partialorder %v12395_v34, 0.0  ;;  %vm19193_vm10 = vcmp.eq.f32.partialorder %v12403_v0, 0.0  ;;  %vm2682_vm11 = vcmp.eq.f32.partialorder %v12472_v3, 0.0  ;;  %v7061_v61 = vpop.eup %7060 }
 0x2a4   :  { %v2621_v45 = vsel %vm19192_vm9, %v2620_v26, %v2618_v62  ;;  %v2628_v10 = vsel %vm19193_vm10, %v2627_v8, %v2625_v14  ;;  %v12596_v60 = vadd.f32 %v12406_v30, %v2593_v22  ;;  %v12599_v55 = vadd.f32 %v12419_v15, %v2600_v35 }
 0x2a5   :  { %v2646_v11 = vsel %vm2645_vm14, %v12422_v28, %v2644_v53  ;;  %v2653_v34 = vsel %vm2652_vm15, %v12432_v31, %v2651_v17  ;;  %v12608_v0 = vadd.f32 %v12426_v6, %v2607_v57  ;;  %v12611_v26 = vadd.f32 %v12429_v36, %v2614_v13  ;;  %v7063_v36 = vpop.eup %7062 }
 0x2a6   :  { %vm19194_vm5 = vcmp.eq.f32.partialorder %v12409_v54, 0.0  ;;  %vm19195_vm12 = vcmp.eq.f32.partialorder %v12414_v21, 0.0  ;;  %vm19196_vm14 = vcmp.eq.f32.partialorder %v12438_v16, inf  ;;  %v2672_v6 = vmul.f32 %v7059_v38, %v12464_v43  ;;  %v12720_v38 = vld [vmem:[#allocation5 + $0x20] sm:$0xff] }
 0x2a7   :  { %v2635_v30 = vsel %vm19194_vm5, %v2634_v7, %v2632_v48  ;;  %v2642_v15 = vsel %vm19195_vm12, %v2641_v4, %v2639_v40  ;;  %v2660_v8 = vsel %vm19196_vm14, %v12438_v16, %v2658_v5  ;;  %vm2689_vm15 = vcmp.eq.f32.partialorder %v12476_v49, 0.0 }
 0x2a8   :  { %v2667_v2 = vsel %vm2666_vm1, %v12444_v1, %v2665_v37  ;;  %v12630_v54 = vadd.f32 %v12435_v46, %v2621_v45  ;;  %v12633_v7 = vadd.f32 %v12441_v50, %v2628_v10  ;;  %v2724_v21 = vmul.f32 %v2692_v9, %v2692_v9  ;;  %v12672_v1 = vld [vmem:[#allocation5] sm:$0xff]  ;;  %v12741_v10 = vld [vmem:[#allocation5 + $0x30] sm:$0xff] }
 0x2a9   :  { %v2649_v4 = vsel %vm2647_vm3, %v2648_v56, %v2646_v11  ;;  %v2656_v29 = vsel %vm2654_vm7, %v2655_v63, %v2653_v34  ;;  %v2679_v27 = vmul.f32 %v7061_v61, %v12472_v3  ;;  %v2725_v46 = vmul.f32 %v12596_v60, %v12596_v60  ;;  %v12752_v34 = vld [vmem:[#allocation5 + $0x38] sm:$0xff] }
 0x2aa   :  { %v2663_v50 = vsel %vm2661_vm0, %v2662_v12, %v2660_v8  ;;  %v12649_v51 = vadd.f32 %v12447_v58, %v2635_v30  ;;  %v12652_v33 = vadd.f32 %v12449_v25, %v2642_v15  ;;  %v2726_v28 = vmul.f32 %v12599_v55, %v12599_v55  ;;  %v12759_v15 = vld [vmem:[#allocation5 + $0x40] sm:$0xff] }
 0x2ab   :  { %v2670_v31 = vsel %vm2668_vm8, %v2669_v39, %v2667_v2  ;;  %v2674_v56 = vsel %vm2673_vm13, %v12464_v43, %v2672_v6  ;;  %v2686_v63 = vmul.f32 %v7063_v36, %v12476_v49  ;;  %v2727_v16 = vmul.f32 %v12608_v0, %v12608_v0  ;;  %v12769_v36 = vld [vmem:[#allocation5 + $0x48] sm:$0xff] }
 0x2ac   :  { %v12665_v58 = vadd.f32 %v12452_v59, %v2649_v4  ;;  %v12668_v25 = vadd.f32 %v12454_v41, %v2656_v29  ;;  %v2728_v12 = vmul.f32 %v12611_v26, %v12611_v26  ;;  %v12675_v39 = vadd.f32 %v12672_v1, %v2724_v21  ;;  %v12685_v41 = vld [vmem:[#allocation5 + $0x8] sm:$0xff]  ;;  %19197 = vst [vmem:[#allocation12_spill] sm:$0xff] %v12769_v36  ;;  %v12781_v4 = vld [vmem:[#allocation5 + $0x50] sm:$0xff] }
 0x2ad   :  { %v2681_v23 = vsel %vm2680_vm4, %v12472_v3, %v2679_v27  ;;  %v12681_v19 = vadd.f32 %v12456_v24, %v2663_v50  ;;  %v2729_v59 = vmul.f32 %v12630_v54, %v12630_v54  ;;  %v12688_v22 = vadd.f32 %v12685_v41, %v2725_v46  ;;  %v12697_v24 = vld [vmem:[#allocation5 + $0x10] sm:$0xff]  ;;  %19198 = vst [vmem:[#allocation13_spill] sm:$0xff] %v12781_v4  ;;  %v12790_v27 = vld [vmem:[#allocation5 + $0x58] sm:$0xff]  ;;  %v12799_v50 = vld [vmem:[#allocation5 + $0x60] sm:$0xff] }
 0x2ae   :  { %v2677_v35 = vsel %vm2675_vm2, %v2676_v32, %v2674_v56  ;;  %v2704_v62 = vadd.f32 %v12459_v52, %v2670_v31  ;;  %v2730_v14 = vmul.f32 %v12633_v7, %v12633_v7  ;;  %v12700_v53 = vadd.f32 %v12697_v24, %v2726_v28  ;;  %v12709_v32 = vld [vmem:[#allocation5 + $0x18] sm:$0xff]  ;;  %19199 = vst [vmem:[#allocation14_spill] sm:$0xff] %v12790_v27 }
 0x2af   :  { %v2688_v17 = vsel %vm2687_vm6, %v12476_v49, %v2686_v63  ;;  %v12705_v57 = vadd.f32 -0.5, %v2692_v9  ;;  %v2731_v43 = vmul.f32 %v12649_v51, %v12649_v51  ;;  %v12712_v52 = vadd.f32 %v12709_v32, %v2727_v16  ;;  %v12729_v9 = vld [vmem:[#allocation5 + $0x28] sm:$0xff]  ;;  %19200 = vst [vmem:[#allocation15_spill] sm:$0xff] %v12799_v50 }
 0x2b0   :  { %v2684_v13 = vsel %vm2682_vm11, %v2683_v44, %v2681_v23  ;;  %v2732_v5 = vmul.f32 %v12652_v33, %v12652_v33  ;;  %v12723_v48 = vadd.f32 %v12720_v38, %v2728_v12  ;;  %7064 = vrsqrt.f32 %v12675_v39 }
 0x2b1   :  { %v2705_v40 = vadd.f32 %v12461_v47, %v2677_v35  ;;  %v2733_v37 = vmul.f32 %v12665_v58, %v12665_v58  ;;  %v12732_v3 = vadd.f32 %v12729_v9, %v2729_v59  ;;  %7066 = vrsqrt.f32 %v12688_v22  ;;  %v12836_v59 = vld [vmem:[#allocation5 + $0x70] sm:$0xff] }
 0x2b2   :  { %v2691_v44 = vsel %vm2689_vm15, %v2690_v18, %v2688_v17  ;;  %v2734_v45 = vmul.f32 %v12668_v25, %v12668_v25  ;;  %v12744_v47 = vadd.f32 %v12741_v10, %v2730_v14  ;;  %7068 = vrsqrt.f32 %v12700_v53  ;;  %19203 = vst [vmem:[#allocation16_spill] sm:$0xff] %v12836_v59 }
 0x2b3   :  { %v12748_v61 = vadd.f32 -0.5, %v12596_v60  ;;  %v2735_v11 = vmul.f32 %v12681_v19, %v12681_v19  ;;  %v12755_v49 = vadd.f32 %v12752_v34, %v2731_v43  ;;  %7070 = vrsqrt.f32 %v12712_v52 }
 0x2b4   :  { %v2706_v18 = vadd.f32 %v12467_v20, %v2684_v13  ;;  %v2736_v30 = vmul.f32 %v2704_v62, %v2704_v62  ;;  %v12762_v8 = vadd.f32 %v12759_v15, %v2732_v5  ;;  %7072 = vrsqrt.f32 %v12723_v48 }
 0x2b5   :  { %v2707_v60 = vadd.f32 %v12469_v42, %v2691_v44  ;;  %v12767_v6 = vadd.f32 -0.5, %v12599_v55  ;;  %v12772_v2 = vadd.f32 %v12769_v36, %v2733_v37  ;;  %7074 = vrsqrt.f32 %v12732_v3 }
 0x2b6   :  { %v12776_v20 = vadd.f32 -0.5, %v12608_v0  ;;  %v12779_v21 = vadd.f32 -0.5, %v12611_v26  ;;  %v12784_v42 = vadd.f32 %v12781_v4, %v2734_v45  ;;  %7076 = vrsqrt.f32 %v12744_v47 }
 0x2b7   :  { %v12788_v55 = vadd.f32 -0.5, %v12630_v54  ;;  %v2737_v29 = vmul.f32 %v2705_v40, %v2705_v40  ;;  %v12793_v46 = vadd.f32 %v12790_v27, %v2735_v11  ;;  %7078 = vrsqrt.f32 %v12755_v49 }
 0x2b8   :  { %v12797_v0 = vadd.f32 -0.5, %v12633_v7  ;;  %v2738_v26 = vmul.f32 %v2706_v18, %v2706_v18  ;;  %v12802_v28 = vadd.f32 %v12799_v50, %v2736_v30  ;;  %7080 = vrsqrt.f32 %v12762_v8 }
 0x2b9   :  { %v12806_v54 = vadd.f32 -0.5, %v12649_v51  ;;  %v12809_v31 = vadd.f32 -0.5, %v12652_v33  ;;  %v2739_v56 = vmul.f32 %v2707_v60, %v2707_v60  ;;  %7082 = vrsqrt.f32 %v12772_v2  ;;  %v12826_v33 = vld [vmem:[#allocation5 + $0x68] sm:$0xff] }
 0x2ba   :  { %v12813_v7 = vadd.f32 -0.5, %v12665_v58  ;;  %v12816_v63 = vadd.f32 -0.5, %v12668_v25  ;;  %v12819_v16 = vadd.f32 -0.5, %v12681_v19  ;;  %7084 = vrsqrt.f32 %v12784_v42  ;;  %19201 = vst [vmem:[#allocation18_spill] sm:$0xff] %v12826_v33 }
 0x2bb   :  { %v12822_v12 = vadd.f32 -0.5, %v2704_v62  ;;  %v12824_v51 = vadd.f32 -0.5, %v2705_v40  ;;  %v12829_v23 = vadd.f32 %v12826_v33, %v2737_v29  ;;  %7086 = vrsqrt.f32 %v12793_v46  ;;  %v12842_v62 = vld [vmem:[#allocation5 + $0x78] sm:$0xff] }
 0x2bc   :  { %v12832_v58 = vadd.f32 -0.5, %v2706_v18  ;;  %v12834_v25 = vadd.f32 -0.5, %v2707_v60  ;;  %v12839_v19 = vadd.f32 %v12836_v59, %v2738_v26  ;;  %7088 = vrsqrt.f32 %v12802_v28  ;;  %19204 = vst [vmem:[#allocation17_spill] sm:$0xff] %v12842_v62 }
 0x2bd   :  { %v7065_v35 = vpop.eup %7064  ;;  %v12845_v14 = vadd.f32 %v12842_v62, %v2739_v56  ;;  %vm2758_vm0 = vcmp.eq.f32.partialorder %v12675_v39, inf  ;;  %vm2765_vm7 = vcmp.eq.f32.partialorder %v12688_v22, inf  ;;  %vm2760_vm1 = vcmp.eq.f32.partialorder %v12675_v39, 0.0 }
 0x2be   :  { %19202 = vst [vmem:[#allocation11_spill] sm:$0xff] %v12834_v25  ;;  %v7067_v43 = vpop.eup %7066  ;;  %vm2767_vm3 = vcmp.eq.f32.partialorder %v12688_v22, 0.0  ;;  %vm2772_vm8 = vcmp.eq.f32.partialorder %v12700_v53, inf  ;;  %vm2774_vm13 = vcmp.eq.f32.partialorder %v12700_v53, 0.0  ;;  %vm2779_vm4 = vcmp.eq.f32.partialorder %v12712_v52, inf }
 0x2bf   :  { %v7069_v5 = vpop.eup %7068  ;;  %7090 = vrsqrt.f32 %v12829_v23  ;;  %vm2781_vm2 = vcmp.eq.f32.partialorder %v12712_v52, 0.0  ;;  %vm2786_vm6 = vcmp.eq.f32.partialorder %v12723_v48, inf  ;;  %vm2793_vm10 = vcmp.eq.f32.partialorder %v12732_v3, inf }
 0x2c0   :  { %v7071_v44 = vpop.eup %7070  ;;  %v2757_v18 = vmul.f32 %v7065_v35, %v12675_v39  ;;  %vm2800_vm11 = vcmp.eq.f32.partialorder %v12744_v47, inf  ;;  %7092 = vrsqrt.f32 %v12839_v19  ;;  %v2764_v29 = vmul.f32 %v7067_v43, %v12688_v22 }
 0x2c1   :  { %v7073_v11 = vpop.eup %7072  ;;  %v2771_v26 = vmul.f32 %v7069_v5, %v12700_v53  ;;  %v2803_v56 = vand.u32 2147483648, %v12744_v47  ;;  %7094 = vrsqrt.f32 %v12845_v14  ;;  %v2778_v5 = vmul.f32 %v7071_v44, %v12712_v52 }
 0x2c2   :  { %v7075_v60 = vpop.eup %7074  ;;  %v2785_v37 = vmul.f32 %v7073_v11, %v12723_v48  ;;  %vm2821_vm14 = vcmp.eq.f32.partialorder %v12772_v2, inf  ;;  %v2759_v45 = vsel %vm2758_vm0, %v12675_v39, %v2757_v18  ;;  %vm2828_vm15 = vcmp.eq.f32.partialorder %v12784_v42, inf }
 0x2c3   :  { %v7077_v35 = vpop.eup %7076  ;;  %v2766_v11 = vsel %vm2765_vm7, %v12688_v22, %v2764_v29  ;;  %v2773_v40 = vsel %vm2772_vm8, %v12700_v53, %v2771_v26  ;;  %v2792_v17 = vmul.f32 %v7075_v60, %v12732_v3  ;;  %vm2823_vm0 = vcmp.eq.f32.partialorder %v12772_v2, 0.0 }
 0x2c4   :  { %v7079_v43 = vpop.eup %7078  ;;  %v2799_v62 = vmul.f32 %v7077_v35, %v12744_v47  ;;  %vm2830_vm5 = vcmp.eq.f32.partialorder %v12784_v42, 0.0  ;;  %vm2837_vm9 = vcmp.eq.f32.partialorder %v12793_v46, 0.0  ;;  %v2838_v13 = vand.u32 2147483648, %v12793_v46 }
 0x2c5   :  { %v7081_v30 = vpop.eup %7080  ;;  %vm2842_vm12 = vcmp.eq.f32.partialorder %v12802_v28, inf  ;;  %v2845_v29 = vand.u32 2147483648, %v12802_v28  ;;  %v2780_v60 = vsel %vm2779_vm4, %v12712_v52, %v2778_v5  ;;  %v2787_v35 = vsel %vm2786_vm6, %v12723_v48, %v2785_v37 }
 0x2c6   :  { %v7083_v44 = vpop.eup %7082  ;;  %v2806_v33 = vmul.f32 %v7079_v43, %v12755_v49  ;;  %v2813_v50 = vmul.f32 %v7081_v30, %v12762_v8  ;;  %vm2844_vm7 = vcmp.eq.f32.partialorder %v12802_v28, 0.0  ;;  %vm2849_vm8 = vcmp.eq.f32.partialorder %v12829_v23, inf }
 0x2c7   :  { %v7085_v18 = vpop.eup %7084  ;;  %v19205_v59 = vand.u32 2147483648, %v12675_v39  ;;  %v19206_v5 = vand.u32 2147483648, %v12688_v22  ;;  %v19207_v37 = vand.u32 2147483648, %v12700_v53  ;;  %v2859_v43 = vand.u32 2147483648, %v12839_v19 }
 0x2c8   :  { %v7087_v26 = vpop.eup %7086  ;;  %v2794_v25 = vsel %vm2793_vm10, %v12732_v3, %v2792_v17  ;;  %v2801_v39 = vsel %vm2800_vm11, %v12744_v47, %v2799_v62  ;;  %v2827_v22 = vmul.f32 %v7085_v18, %v12784_v42  ;;  %v2866_v62 = vand.u32 2147483648, %v12845_v14 }
 0x2c9   :  { %v7089_v27 = vpop.eup %7088  ;;  %v2762_v4 = vsel %vm2760_vm1, %v19205_v59, %v2759_v45  ;;  %v2769_v36 = vsel %vm2767_vm3, %v19206_v5, %v2766_v11  ;;  %v2776_v30 = vsel %vm2774_vm13, %v19207_v37, %v2773_v40  ;;  %v2820_v59 = vmul.f32 %v7083_v44, %v12772_v2 }
 0x2ca   :  { %vm2856_vm1 = vcmp.eq.f32.partialorder %v12839_v19, inf  ;;  %v19208_v45 = vand.u32 2147483648, %v12712_v52  ;;  %v19209_v40 = vand.u32 2147483648, %v12723_v48  ;;  %vm19210_vm3 = vcmp.eq.f32.partialorder %v12723_v48, 0.0 }
 0x2cb   :  { %v2834_v11 = vmul.f32 %v7087_v26, %v12793_v46  ;;  %vm2851_vm13 = vcmp.eq.f32.partialorder %v12829_v23, 0.0  ;;  %vm19211_vm4 = vcmp.eq.f32.partialorder %v12755_v49, inf  ;;  %vm19212_vm6 = vcmp.eq.f32.partialorder %v12762_v8, inf }
 0x2cc   :  { %v2783_v53 = vsel %vm2781_vm2, %v19208_v45, %v2780_v60  ;;  %v2790_v17 = vsel %vm19210_vm3, %v19209_v40, %v2787_v35  ;;  %v7091_v44 = vpop.eup %7090  ;;  %v2808_v18 = vsel %vm19211_vm4, %v12755_v49, %v2806_v33  ;;  %v2815_v52 = vsel %vm19212_vm6, %v12762_v8, %v2813_v50 }
 0x2cd   :  { %v2841_v60 = vmul.f32 %v7089_v27, %v12802_v28  ;;  %vm2863_vm2 = vcmp.eq.f32.partialorder %v12845_v14, inf  ;;  %v2868_v48 = vadd.f32 %v12705_v57, %v2762_v4  ;;  %v19213_v26 = vand.u32 2147483648, %v12732_v3  ;;  %v7093_v27 = vpop.eup %7092 }
 0x2ce   :  { %vm19214_vm10 = vcmp.eq.f32.partialorder %v12732_v3, 0.0  ;;  %vm19215_vm11 = vcmp.eq.f32.partialorder %v12744_v47, 0.0  ;;  %vm2858_vm3 = vcmp.eq.f32.partialorder %v12839_v19, 0.0  ;;  %v2869_v33 = vadd.f32 %v12748_v61, %v2769_v36 }
 0x2cf   :  { %v2797_v35 = vsel %vm19214_vm10, %v19213_v26, %v2794_v25  ;;  %v2804_v5 = vsel %vm19215_vm11, %v2803_v56, %v2801_v39  ;;  %v12966_v50 = vadd.f32 %v12767_v6, %v2776_v30  ;;  %v2822_v57 = vsel %vm2821_vm14, %v12772_v2, %v2820_v59 }
 0x2d0   :  { %v2829_v3 = vsel %vm2828_vm15, %v12784_v42, %v2827_v22  ;;  %v12975_v4 = vadd.f32 %v12776_v20, %v2783_v53  ;;  %v12978_v47 = vadd.f32 %v12779_v21, %v2790_v17  ;;  %v19216_v61 = vand.u32 2147483648, %v12755_v49  ;;  %v7095_v21 = vpop.eup %7094 }
 0x2d1   :  { %vm19217_vm4 = vcmp.eq.f32.partialorder %v12755_v49, 0.0  ;;  %v19218_v36 = vand.u32 2147483648, %v12762_v8  ;;  %vm19219_vm6 = vcmp.eq.f32.partialorder %v12762_v8, 0.0  ;;  %vm19220_vm14 = vcmp.eq.f32.partialorder %v12793_v46, inf }
 0x2d2   :  { %v2811_v6 = vsel %vm19217_vm4, %v19216_v61, %v2808_v18  ;;  %v2836_v56 = vsel %vm19220_vm14, %v12793_v46, %v2834_v11  ;;  %v2848_v20 = vmul.f32 %v7091_v44, %v12829_v23  ;;  %vm2865_vm15 = vcmp.eq.f32.partialorder %v12845_v14, 0.0 }
 0x2d3   :  { %v2818_v25 = vsel %vm19219_vm6, %v19218_v36, %v2815_v52  ;;  %v2843_v37 = vsel %vm2842_vm12, %v12802_v28, %v2841_v60  ;;  %v2873_v49 = vadd.f32 %v12788_v55, %v2797_v35  ;;  %v2874_v30 = vadd.f32 %v12797_v0, %v2804_v5 }
 0x2d4   :  { %v2900_v39 = vmul.f32 %v2868_v48, %v2868_v48  ;;  %v19221_v8 = vand.u32 2147483648, %v12772_v2  ;;  %v19222_v22 = vand.u32 2147483648, %v12784_v42  ;;  %v2855_v53 = vmul.f32 %v7093_v27, %v12839_v19 }
 0x2d5   :  { %v2901_v40 = vmul.f32 %v2869_v33, %v2869_v33  ;;  %v2839_v17 = vsel %vm2837_vm9, %v2838_v13, %v2836_v56  ;;  %v2875_v55 = vadd.f32 %v12806_v54, %v2811_v6  ;;  %v2876_v0 = vadd.f32 %v12809_v31, %v2818_v25 }
 0x2d6   :  { %v2825_v59 = vsel %vm2823_vm0, %v19221_v8, %v2822_v57  ;;  %v2832_v45 = vsel %vm2830_vm5, %v19222_v22, %v2829_v3  ;;  %v2902_v11 = vmul.f32 %v12966_v50, %v12966_v50  ;;  %v2846_v2 = vsel %vm2844_vm7, %v2845_v29, %v2843_v37 }
 0x2d7   :  { %v2850_v42 = vsel %vm2849_vm8, %v12829_v23, %v2848_v20  ;;  %v2862_v44 = vmul.f32 %v7095_v21, %v12845_v14  ;;  %v2903_v46 = vmul.f32 %v12975_v4, %v12975_v4  ;;  %v2877_v13 = vadd.f32 %v12813_v7, %v2825_v59 }
 0x2d8   :  { %v2878_v54 = vadd.f32 %v12816_v63, %v2832_v45  ;;  %v2904_v31 = vmul.f32 %v12978_v47, %v12978_v47  ;;  %v13026_v18 = vadd.f32 %v12672_v1, %v2900_v39  ;;  %v2857_v28 = vsel %vm2856_vm1, %v12839_v19, %v2855_v53  ;;  %v19226_v45 = vld [vmem:[#allocation13_spill] sm:$0xff] }
 0x2d9   :  { %v2879_v29 = vadd.f32 %v12819_v16, %v2839_v17  ;;  %v2905_v52 = vmul.f32 %v2873_v49, %v2873_v49  ;;  %v13033_v60 = vadd.f32 %v12685_v41, %v2901_v40  ;;  %v19223_v7 = vand.u32 2147483648, %v12829_v23  ;;  %v19227_v17 = vld [vmem:[#allocation14_spill] sm:$0xff] }
 0x2da   :  { %v2880_v26 = vadd.f32 %v12822_v12, %v2846_v2  ;;  %v2906_v35 = vmul.f32 %v2874_v30, %v2874_v30  ;;  %v13041_v5 = vadd.f32 %v12697_v24, %v2902_v11  ;;  %v2864_v27 = vsel %vm2863_vm2, %v12845_v14, %v2862_v44 }
 0x2db   :  { %v2853_v63 = vsel %vm2851_vm13, %v19223_v7, %v2850_v42  ;;  %v13046_v16 = vadd.f32 -0.5, %v2868_v48  ;;  %v2907_v57 = vmul.f32 %v2875_v55, %v2875_v55  ;;  %v13049_v3 = vadd.f32 %v12709_v32, %v2903_v46  ;;  %v19228_v42 = vld [vmem:[#allocation15_spill] sm:$0xff] }
 0x2dc   :  { %v2860_v23 = vsel %vm2858_vm3, %v2859_v43, %v2857_v28  ;;  %v2908_v12 = vmul.f32 %v2876_v0, %v2876_v0  ;;  %v13056_v61 = vadd.f32 %v12720_v38, %v2904_v31  ;;  %7096 = vrsqrt.f32 %v13026_v18 }
 0x2dd   :  { %v2881_v6 = vadd.f32 %v12824_v51, %v2853_v63  ;;  %v2909_v36 = vmul.f32 %v2877_v13, %v2877_v13  ;;  %v13061_v48 = vadd.f32 %v12729_v9, %v2905_v52  ;;  %7098 = vrsqrt.f32 %v13033_v60  ;;  %v19229_v63 = vld [vmem:[#allocation18_spill] sm:$0xff] }
 0x2de   :  { %v2867_v19 = vsel %vm2865_vm15, %v2866_v62, %v2864_v27  ;;  %v2910_v43 = vmul.f32 %v2878_v54, %v2878_v54  ;;  %v13069_v25 = vadd.f32 %v12741_v10, %v2906_v35  ;;  %7100 = vrsqrt.f32 %v13041_v5  ;;  %v19224_v62 = vld [vmem:[#allocation11_spill] sm:$0xff]  ;;  %v19232_v27 = vld [vmem:[#allocation17_spill] sm:$0xff] }
 0x2df   :  { %v13072_v56 = vadd.f32 -0.5, %v2869_v33  ;;  %v2911_v51 = vmul.f32 %v2879_v29, %v2879_v29  ;;  %v13075_v20 = vadd.f32 %v12752_v34, %v2907_v57  ;;  %7102 = vrsqrt.f32 %v13049_v3  ;;  %v19225_v33 = vld [vmem:[#allocation12_spill] sm:$0xff] }
 0x2e0   :  { %v2882_v21 = vadd.f32 %v12832_v58, %v2860_v23  ;;  %v2912_v37 = vmul.f32 %v2880_v26, %v2880_v26  ;;  %v13080_v14 = vadd.f32 %v12759_v15, %v2908_v12  ;;  %7104 = vrsqrt.f32 %v13056_v61 }
 0x2e1   :  { %v2883_v39 = vadd.f32 %v19224_v62, %v2867_v19  ;;  %v13085_v8 = vadd.f32 -0.5, %v12966_v50  ;;  %v13088_v59 = vadd.f32 %v19225_v33, %v2909_v36  ;;  %7106 = vrsqrt.f32 %v13061_v48 }
 0x2e2   :  { %v13092_v22 = vadd.f32 -0.5, %v12975_v4  ;;  %v13095_v58 = vadd.f32 -0.5, %v12978_v47  ;;  %v13098_v53 = vadd.f32 %v19226_v45, %v2910_v43  ;;  %7108 = vrsqrt.f32 %v13069_v25 }
 0x2e3   :  { %v13101_v40 = vadd.f32 -0.5, %v2873_v49  ;;  %v2913_v50 = vmul.f32 %v2881_v6, %v2881_v6  ;;  %v13104_v11 = vadd.f32 %v19227_v17, %v2911_v51  ;;  %7110 = vrsqrt.f32 %v13075_v20 }
 0x2e4   :  { %v13107_v2 = vadd.f32 -0.5, %v2874_v30  ;;  %v2914_v4 = vmul.f32 %v2882_v21, %v2882_v21  ;;  %v13110_v44 = vadd.f32 %v19228_v42, %v2912_v37  ;;  %7112 = vrsqrt.f32 %v13080_v14 }
 0x2e5   :  { %v13113_v47 = vadd.f32 -0.5, %v2875_v55  ;;  %v13115_v46 = vadd.f32 -0.5, %v2876_v0  ;;  %v2915_v49 = vmul.f32 %v2883_v39, %v2883_v39  ;;  %7114 = vrsqrt.f32 %v13088_v59 }
 0x2e6   :  { %v13118_v31 = vadd.f32 -0.5, %v2877_v13  ;;  %v13120_v28 = vadd.f32 -0.5, %v2878_v54  ;;  %v13122_v52 = vadd.f32 -0.5, %v2879_v29  ;;  %7116 = vrsqrt.f32 %v13098_v53  ;;  %v19231_v13 = vld [vmem:[#allocation16_spill] sm:$0xff] }
 0x2e7   :  { %v13125_v30 = vadd.f32 -0.5, %v2880_v26  ;;  %v13127_v7 = vadd.f32 -0.5, %v2881_v6  ;;  %v13130_v55 = vadd.f32 %v19229_v63, %v2913_v50  ;;  %7118 = vrsqrt.f32 %v13104_v11 }
 0x2e8   :  { %v13133_v0 = vadd.f32 -0.5, %v2882_v21  ;;  %v13135_v35 = vadd.f32 -0.5, %v2883_v39  ;;  %v13138_v54 = vadd.f32 %v19231_v13, %v2914_v4  ;;  %7120 = vrsqrt.f32 %v13110_v44 }
 0x2e9   :  { %v7097_v29 = vpop.eup %7096  ;;  %v13142_v26 = vadd.f32 %v19232_v27, %v2915_v49  ;;  %vm2934_vm9 = vcmp.eq.f32.partialorder %v13026_v18, inf  ;;  %vm2941_vm5 = vcmp.eq.f32.partialorder %v13033_v60, inf  ;;  %vm2936_vm12 = vcmp.eq.f32.partialorder %v13026_v18, 0.0 }
 0x2ea   :  { %19230 = vst [vmem:[#allocation11_spill] sm:$0xff] %v13135_v35  ;;  %v7099_v23 = vpop.eup %7098  ;;  %vm2943_vm0 = vcmp.eq.f32.partialorder %v13033_v60, 0.0  ;;  %vm2948_vm7 = vcmp.eq.f32.partialorder %v13041_v5, inf  ;;  %vm2950_vm8 = vcmp.eq.f32.partialorder %v13041_v5, 0.0  ;;  %vm2955_vm1 = vcmp.eq.f32.partialorder %v13049_v3, inf }
 0x2eb   :  { %v7101_v6 = vpop.eup %7100  ;;  %7122 = vrsqrt.f32 %v13130_v55  ;;  %vm2957_vm13 = vcmp.eq.f32.partialorder %v13049_v3, 0.0  ;;  %vm2962_vm2 = vcmp.eq.f32.partialorder %v13056_v61, inf  ;;  %vm2969_vm11 = vcmp.eq.f32.partialorder %v13061_v48, inf }
 0x2ec   :  { %v7103_v43 = vpop.eup %7102  ;;  %v2933_v37 = vmul.f32 %v7097_v29, %v13026_v18  ;;  %vm2976_vm3 = vcmp.eq.f32.partialorder %v13069_v25, inf  ;;  %7124 = vrsqrt.f32 %v13138_v54  ;;  %v2940_v50 = vmul.f32 %v7099_v23, %v13033_v60 }
 0x2ed   :  { %v7105_v21 = vpop.eup %7104  ;;  %v2947_v4 = vmul.f32 %v7101_v6, %v13041_v5  ;;  %v2979_v49 = vand.u32 2147483648, %v13069_v25  ;;  %7126 = vrsqrt.f32 %v13142_v26  ;;  %v2954_v6 = vmul.f32 %v7103_v43, %v13049_v3 }
 0x2ee   :  { %v7107_v39 = vpop.eup %7106  ;;  %v2961_v19 = vmul.f32 %v7105_v21, %v13056_v61  ;;  %vm2997_vm14 = vcmp.eq.f32.partialorder %v13088_v59, inf  ;;  %v2935_v51 = vsel %vm2934_vm9, %v13026_v18, %v2933_v37  ;;  %vm3004_vm15 = vcmp.eq.f32.partialorder %v13098_v53, inf }
 0x2ef   :  { %v7109_v29 = vpop.eup %7108  ;;  %v2942_v21 = vsel %vm2941_vm5, %v13033_v60, %v2940_v50  ;;  %v2949_v36 = vsel %vm2948_vm7, %v13041_v5, %v2947_v4  ;;  %v2968_v57 = vmul.f32 %v7107_v39, %v13061_v48  ;;  %vm2999_vm9 = vcmp.eq.f32.partialorder %v13088_v59, 0.0 }
 0x2f0   :  { %v7111_v23 = vpop.eup %7110  ;;  %v2975_v27 = vmul.f32 %v7109_v29, %v13069_v25  ;;  %vm3006_vm4 = vcmp.eq.f32.partialorder %v13098_v53, 0.0  ;;  %vm3013_vm10 = vcmp.eq.f32.partialorder %v13104_v11, 0.0  ;;  %v3014_v12 = vand.u32 2147483648, %v13104_v11 }
 0x2f1   :  { %v7113_v62 = vpop.eup %7112  ;;  %vm3018_vm6 = vcmp.eq.f32.partialorder %v13110_v44, inf  ;;  %v3021_v50 = vand.u32 2147483648, %v13110_v44  ;;  %v2956_v39 = vsel %vm2955_vm1, %v13049_v3, %v2954_v6  ;;  %v2963_v29 = vsel %vm2962_vm2, %v13056_v61, %v2961_v19 }
 0x2f2   :  { %v7115_v43 = vpop.eup %7114  ;;  %v2982_v63 = vmul.f32 %v7111_v23, %v13075_v20  ;;  %v2989_v42 = vmul.f32 %v7113_v62, %v13080_v14  ;;  %vm3020_vm5 = vcmp.eq.f32.partialorder %v13110_v44, 0.0  ;;  %vm3025_vm7 = vcmp.eq.f32.partialorder %v13130_v55, inf }
 0x2f3   :  { %v7117_v37 = vpop.eup %7116  ;;  %v19233_v13 = vand.u32 2147483648, %v13026_v18  ;;  %v19234_v6 = vand.u32 2147483648, %v13033_v60  ;;  %v19235_v19 = vand.u32 2147483648, %v13041_v5  ;;  %v3035_v23 = vand.u32 2147483648, %v13138_v54 }
 0x2f4   :  { %v7119_v4 = vpop.eup %7118  ;;  %v2970_v35 = vsel %vm2969_vm11, %v13061_v48, %v2968_v57  ;;  %v2977_v18 = vsel %vm2976_vm3, %v13069_v25, %v2975_v27  ;;  %v3003_v60 = vmul.f32 %v7117_v37, %v13098_v53  ;;  %v3042_v27 = vand.u32 2147483648, %v13142_v26 }
 0x2f5   :  { %v7121_v17 = vpop.eup %7120  ;;  %v2938_v45 = vsel %vm2936_vm12, %v19233_v13, %v2935_v51  ;;  %v2945_v33 = vsel %vm2943_vm0, %v19234_v6, %v2942_v21  ;;  %v2952_v62 = vsel %vm2950_vm8, %v19235_v19, %v2949_v36  ;;  %v2996_v13 = vmul.f32 %v7115_v43, %v13088_v59 }
 0x2f6   :  { %vm3032_vm12 = vcmp.eq.f32.partialorder %v13138_v54, inf  ;;  %v19236_v51 = vand.u32 2147483648, %v13049_v3  ;;  %v19237_v36 = vand.u32 2147483648, %v13056_v61  ;;  %vm19238_vm0 = vcmp.eq.f32.partialorder %v13056_v61, 0.0 }
 0x2f7   :  { %v3010_v21 = vmul.f32 %v7119_v4, %v13104_v11  ;;  %vm3027_vm8 = vcmp.eq.f32.partialorder %v13130_v55, 0.0  ;;  %vm19239_vm1 = vcmp.eq.f32.partialorder %v13075_v20, inf  ;;  %vm19240_vm2 = vcmp.eq.f32.partialorder %v13080_v14, inf }
 0x2f8   :  { %v2959_v5 = vsel %vm2957_vm13, %v19236_v51, %v2956_v39  ;;  %v2966_v57 = vsel %vm19238_vm0, %v19237_v36, %v2963_v29  ;;  %v7123_v43 = vpop.eup %7122  ;;  %v2984_v37 = vsel %vm19239_vm1, %v13075_v20, %v2982_v63  ;;  %v2991_v3 = vsel %vm19240_vm2, %v13080_v14, %v2989_v42 }
 0x2f9   :  { %v3017_v39 = vmul.f32 %v7121_v17, %v13110_v44  ;;  %vm3039_vm13 = vcmp.eq.f32.partialorder %v13142_v26, inf  ;;  %v3044_v61 = vadd.f32 %v13046_v16, %v2938_v45  ;;  %v19241_v4 = vand.u32 2147483648, %v13061_v48  ;;  %v7125_v17 = vpop.eup %7124 }
 0x2fa   :  { %vm19242_vm11 = vcmp.eq.f32.partialorder %v13061_v48, 0.0  ;;  %vm19243_vm3 = vcmp.eq.f32.partialorder %v13069_v25, 0.0  ;;  %vm3034_vm0 = vcmp.eq.f32.partialorder %v13138_v54, 0.0  ;;  %v3045_v63 = vadd.f32 %v13072_v56, %v2945_v33 }
 0x2fb   :  { %v2973_v29 = vsel %vm19242_vm11, %v19241_v4, %v2970_v35  ;;  %v2980_v6 = vsel %vm19243_vm3, %v2979_v49, %v2977_v18  ;;  %v13263_v42 = vadd.f32 %v13085_v8, %v2952_v62  ;;  %v2998_v16 = vsel %vm2997_vm14, %v13088_v59, %v2996_v13 }
 0x2fc   :  { %v3005_v48 = vsel %vm3004_vm15, %v13098_v53, %v3003_v60  ;;  %v13272_v45 = vadd.f32 %v13092_v22, %v2959_v5  ;;  %v13275_v25 = vadd.f32 %v13095_v58, %v2966_v57  ;;  %v19244_v56 = vand.u32 2147483648, %v13075_v20  ;;  %v7127_v58 = vpop.eup %7126 }
 0x2fd   :  { %vm19245_vm1 = vcmp.eq.f32.partialorder %v13075_v20, 0.0  ;;  %v19246_v33 = vand.u32 2147483648, %v13080_v14  ;;  %vm19247_vm2 = vcmp.eq.f32.partialorder %v13080_v14, 0.0  ;;  %vm19248_vm14 = vcmp.eq.f32.partialorder %v13104_v11, inf }
 0x2fe   :  { %v2987_v8 = vsel %vm19245_vm1, %v19244_v56, %v2984_v37  ;;  %v3012_v49 = vsel %vm19248_vm14, %v13104_v11, %v3010_v21  ;;  %v3024_v22 = vmul.f32 %v7123_v43, %v13130_v55  ;;  %vm3041_vm15 = vcmp.eq.f32.partialorder %v13142_v26, 0.0 }
 0x2ff   :  { %v2994_v35 = vsel %vm19247_vm2, %v19246_v33, %v2991_v3  ;;  %v3019_v19 = vsel %vm3018_vm6, %v13110_v44, %v3017_v39  ;;  %v3049_v20 = vadd.f32 %v13101_v40, %v2973_v29  ;;  %v3050_v62 = vadd.f32 %v13107_v2, %v2980_v6 }
 0x300   :  { %v3076_v18 = vmul.f32 %v3044_v61, %v3044_v61  ;;  %v19249_v14 = vand.u32 2147483648, %v13088_v59  ;;  %v19250_v60 = vand.u32 2147483648, %v13098_v53  ;;  %v3031_v5 = vmul.f32 %v7125_v17, %v13138_v54 }
 0x301   :  { %v3077_v36 = vmul.f32 %v3045_v63, %v3045_v63  ;;  %v3015_v57 = vsel %vm3013_vm10, %v3014_v12, %v3012_v49  ;;  %v3051_v40 = vadd.f32 %v13113_v47, %v2987_v8  ;;  %v3052_v2 = vadd.f32 %v13115_v46, %v2994_v35 }
 0x302   :  { %v3001_v13 = vsel %vm2999_vm9, %v19249_v14, %v2998_v16  ;;  %v3008_v51 = vsel %vm3006_vm4, %v19250_v60, %v3005_v48  ;;  %v3078_v21 = vmul.f32 %v13263_v42, %v13263_v42  ;;  %v3022_v59 = vsel %vm3020_vm5, %v3021_v50, %v3019_v19  ;;  %v19256_v14 = vld [vmem:[#allocation15_spill] sm:$0xff] }
 0x303   :  { %v3026_v53 = vsel %vm3025_vm7, %v13130_v55, %v3024_v22  ;;  %v3038_v43 = vmul.f32 %v7127_v58, %v13142_v26  ;;  %v3079_v11 = vmul.f32 %v13272_v45, %v13272_v45  ;;  %v3053_v12 = vadd.f32 %v13118_v31, %v3001_v13  ;;  %v19255_v58 = vld [vmem:[#allocation14_spill] sm:$0xff] }
 0x304   :  { %v3054_v47 = vadd.f32 %v13120_v28, %v3008_v51  ;;  %v3080_v46 = vmul.f32 %v13275_v25, %v13275_v25  ;;  %v13323_v37 = vadd.f32 %v12672_v1, %v3076_v18  ;;  %v3033_v44 = vsel %vm3032_vm12, %v13138_v54, %v3031_v5 }
 0x305   :  { %v3055_v50 = vadd.f32 %v13122_v52, %v3015_v57  ;;  %v3081_v3 = vmul.f32 %v3049_v20, %v3049_v20  ;;  %v13330_v39 = vadd.f32 %v12685_v41, %v3077_v36  ;;  %v19251_v31 = vand.u32 2147483648, %v13130_v55 }
 0x306   :  { %v3056_v4 = vadd.f32 %v13125_v30, %v3022_v59  ;;  %v3082_v29 = vmul.f32 %v3050_v62, %v3050_v62  ;;  %v13338_v1 = vadd.f32 %v12697_v24, %v3078_v21  ;;  %v3040_v6 = vsel %vm3039_vm13, %v13142_v26, %v3038_v43  ;;  %v19257_v21 = vld [vmem:[#allocation18_spill] sm:$0xff] }
 0x307   :  { %v3029_v28 = vsel %vm3027_vm8, %v19251_v31, %v3026_v53  ;;  %v13343_v52 = vadd.f32 -0.5, %v3044_v61  ;;  %v3083_v17 = vmul.f32 %v3051_v40, %v3051_v40  ;;  %v13346_v41 = vadd.f32 %v12709_v32, %v3079_v11  ;;  %v19258_v53 = vld [vmem:[#allocation16_spill] sm:$0xff] }
 0x308   :  { %v3036_v55 = vsel %vm3034_vm0, %v3035_v23, %v3033_v44  ;;  %v3084_v30 = vmul.f32 %v3052_v2, %v3052_v2  ;;  %v13353_v16 = vadd.f32 %v12720_v38, %v3080_v46  ;;  %7128 = vrsqrt.f32 %v13323_v37 }
 0x309   :  { %v3057_v24 = vadd.f32 %v13127_v7, %v3029_v28  ;;  %v3085_v48 = vmul.f32 %v3053_v12, %v3053_v12  ;;  %v13358_v61 = vadd.f32 %v12729_v9, %v3081_v3  ;;  %7130 = vrsqrt.f32 %v13330_v39 }
 0x30a   :  { %v3043_v32 = vsel %vm3041_vm15, %v3042_v27, %v3040_v6  ;;  %v3086_v54 = vmul.f32 %v3054_v47, %v3054_v47  ;;  %v13366_v23 = vadd.f32 %v12741_v10, %v3082_v29  ;;  %7132 = vrsqrt.f32 %v13338_v1  ;;  %v19252_v10 = vld [vmem:[#allocation11_spill] sm:$0xff] }
 0x30b   :  { %v13369_v38 = vadd.f32 -0.5, %v3045_v63  ;;  %v3087_v7 = vmul.f32 %v3055_v50, %v3055_v50  ;;  %v13372_v56 = vadd.f32 %v12752_v34, %v3083_v17  ;;  %7134 = vrsqrt.f32 %v13346_v41  ;;  %v19253_v63 = vld [vmem:[#allocation12_spill] sm:$0xff] }
 0x30c   :  { %v3058_v9 = vadd.f32 %v13133_v0, %v3036_v55  ;;  %v3088_v8 = vmul.f32 %v3056_v4, %v3056_v4  ;;  %v13377_v26 = vadd.f32 %v12759_v15, %v3084_v30  ;;  %7136 = vrsqrt.f32 %v13353_v16  ;;  %v19254_v15 = vld [vmem:[#allocation13_spill] sm:$0xff] }
 0x30d   :  { %v3059_v27 = vadd.f32 %v19252_v10, %v3043_v32  ;;  %v13382_v33 = vadd.f32 -0.5, %v13263_v42  ;;  %v13385_v35 = vadd.f32 %v19253_v63, %v3085_v48  ;;  %7138 = vrsqrt.f32 %v13358_v61 }
 0x30e   :  { %v13389_v34 = vadd.f32 -0.5, %v13272_v45  ;;  %v13392_v0 = vadd.f32 -0.5, %v13275_v25  ;;  %v13395_v49 = vadd.f32 %v19254_v15, %v3086_v54  ;;  %7140 = vrsqrt.f32 %v13366_v23 }
 0x30f   :  { %v13398_v22 = vadd.f32 -0.5, %v3049_v20  ;;  %v3089_v42 = vmul.f32 %v3057_v24, %v3057_v24  ;;  %v13401_v19 = vadd.f32 %v19255_v58, %v3087_v7  ;;  %7142 = vrsqrt.f32 %v13372_v56 }
 0x310   :  { %v13404_v18 = vadd.f32 -0.5, %v3050_v62  ;;  %v3090_v45 = vmul.f32 %v3058_v9, %v3058_v9  ;;  %v13407_v13 = vadd.f32 %v19256_v14, %v3088_v8  ;;  %7144 = vrsqrt.f32 %v13377_v26 }
 0x311   :  { %v13410_v25 = vadd.f32 -0.5, %v3051_v40  ;;  %v13412_v60 = vadd.f32 -0.5, %v3052_v2  ;;  %v3091_v20 = vmul.f32 %v3059_v27, %v3059_v27  ;;  %7146 = vrsqrt.f32 %v13385_v35 }
 0x312   :  { %v13415_v51 = vadd.f32 -0.5, %v3053_v12  ;;  %v13417_v5 = vadd.f32 -0.5, %v3054_v47  ;;  %v13419_v36 = vadd.f32 -0.5, %v3055_v50  ;;  %7148 = vrsqrt.f32 %v13395_v49  ;;  %v19259_v12 = vld [vmem:[#allocation17_spill] sm:$0xff] }
 0x313   :  { %v13422_v62 = vadd.f32 -0.5, %v3056_v4  ;;  %v13424_v57 = vadd.f32 -0.5, %v3057_v24  ;;  %v13427_v40 = vadd.f32 %v19257_v21, %v3089_v42  ;;  %7150 = vrsqrt.f32 %v13401_v19 }
 0x314   :  { %v13430_v2 = vadd.f32 -0.5, %v3058_v9  ;;  %v13432_v59 = vadd.f32 -0.5, %v3059_v27  ;;  %v13435_v43 = vadd.f32 %v19258_v53, %v3090_v45  ;;  %7152 = vrsqrt.f32 %v13407_v13 }
 0x315   :  { %v7129_v11 = vpop.eup %7128  ;;  %v13439_v47 = vadd.f32 %v19259_v12, %v3091_v20  ;;  %vm3110_vm10 = vcmp.eq.f32.partialorder %v13323_v37, inf  ;;  %v3113_v46 = vand.u32 2147483648, %v13323_v37  ;;  %vm3117_vm4 = vcmp.eq.f32.partialorder %v13330_v39, inf }
 0x316   :  { %v7131_v44 = vpop.eup %7130  ;;  %vm3112_vm6 = vcmp.eq.f32.partialorder %v13323_v37, 0.0  ;;  %vm3119_vm9 = vcmp.eq.f32.partialorder %v13330_v39, 0.0  ;;  %v3120_v50 = vand.u32 2147483648, %v13330_v39  ;;  %vm3124_vm5 = vcmp.eq.f32.partialorder %v13338_v1, inf }
 0x317   :  { %vm3126_vm7 = vcmp.eq.f32.partialorder %v13338_v1, 0.0  ;;  %v7133_v3 = vpop.eup %7132  ;;  %v3127_v31 = vand.u32 2147483648, %v13338_v1  ;;  %vm3131_vm12 = vcmp.eq.f32.partialorder %v13346_v41, inf  ;;  %v3134_v28 = vand.u32 2147483648, %v13346_v41 }
 0x318   :  { %7154 = vrsqrt.f32 %v13427_v40  ;;  %v7135_v4 = vpop.eup %7134  ;;  %vm3133_vm8 = vcmp.eq.f32.partialorder %v13346_v41, 0.0  ;;  %vm3138_vm13 = vcmp.eq.f32.partialorder %v13353_v16, inf  ;;  %v3141_v29 = vand.u32 2147483648, %v13353_v16 }
 0x319   :  { %vm3145_vm3 = vcmp.eq.f32.partialorder %v13358_v61, inf  ;;  %v7137_v6 = vpop.eup %7136  ;;  %v3109_v17 = vmul.f32 %v7129_v11, %v13323_v37  ;;  %v3148_v55 = vand.u32 2147483648, %v13358_v61  ;;  %vm3152_vm0 = vcmp.eq.f32.partialorder %v13366_v23, inf }
 0x31a   :  { %7156 = vrsqrt.f32 %v13435_v43  ;;  %v7139_v30 = vpop.eup %7138  ;;  %v3116_v24 = vmul.f32 %v7131_v44, %v13330_v39  ;;  %v3123_v48 = vmul.f32 %v7133_v3, %v13338_v1  ;;  %v3155_v32 = vand.u32 2147483648, %v13366_v23 }
 0x31b   :  { %v7141_v54 = vpop.eup %7140  ;;  %v3162_v7 = vand.u32 2147483648, %v13372_v56  ;;  %v3169_v9 = vand.u32 2147483648, %v13377_v26  ;;  %7158 = vrsqrt.f32 %v13439_v47  ;;  %v3130_v10 = vmul.f32 %v7135_v4, %v13346_v41 }
 0x31c   :  { %v7143_v8 = vpop.eup %7142  ;;  %v3137_v27 = vmul.f32 %v7137_v6, %v13353_v16  ;;  %vm3173_vm14 = vcmp.eq.f32.partialorder %v13385_v35, inf  ;;  %v3176_v63 = vand.u32 2147483648, %v13385_v35  ;;  %v3111_v42 = vsel %vm3110_vm10, %v13323_v37, %v3109_v17 }
 0x31d   :  { %v7145_v15 = vpop.eup %7144  ;;  %vm3180_vm15 = vcmp.eq.f32.partialorder %v13395_v49, inf  ;;  %v3183_v58 = vand.u32 2147483648, %v13395_v49  ;;  %v3118_v14 = vsel %vm3117_vm4, %v13330_v39, %v3116_v24  ;;  %v3125_v20 = vsel %vm3124_vm5, %v13338_v1, %v3123_v48 }
 0x31e   :  { %v7147_v45 = vpop.eup %7146  ;;  %v3144_v21 = vmul.f32 %v7139_v30, %v13358_v61  ;;  %v3151_v53 = vmul.f32 %v7141_v54, %v13366_v23  ;;  %vm3175_vm10 = vcmp.eq.f32.partialorder %v13385_v35, 0.0  ;;  %vm3182_vm1 = vcmp.eq.f32.partialorder %v13395_v49, 0.0 }
 0x31f   :  { %v7149_v11 = vpop.eup %7148  ;;  %vm3189_vm11 = vcmp.eq.f32.partialorder %v13401_v19, 0.0  ;;  %v3190_v12 = vand.u32 2147483648, %v13401_v19  ;;  %vm3194_vm2 = vcmp.eq.f32.partialorder %v13407_v13, inf  ;;  %v3197_v44 = vand.u32 2147483648, %v13407_v13 }
 0x320   :  { %v3204_v3 = vand.u32 2147483648, %v13427_v40  ;;  %v7151_v4 = vpop.eup %7150  ;;  %v3132_v6 = vsel %vm3131_vm12, %v13346_v41, %v3130_v10  ;;  %v3139_v17 = vsel %vm3138_vm13, %v13353_v16, %v3137_v27  ;;  %v3158_v30 = vmul.f32 %v7143_v8, %v13372_v56 }
 0x321   :  { %v3165_v24 = vmul.f32 %v7145_v15, %v13377_v26  ;;  %vm3196_vm4 = vcmp.eq.f32.partialorder %v13407_v13, 0.0  ;;  %vm3201_vm5 = vcmp.eq.f32.partialorder %v13427_v40, inf  ;;  %v7153_v48 = vpop.eup %7152  ;;  %v3114_v54 = vsel %vm3112_vm6, %v3113_v46, %v3111_v42 }
 0x322   :  { %v3121_v10 = vsel %vm3119_vm9, %v3120_v50, %v3118_v14  ;;  %v3128_v8 = vsel %vm3126_vm7, %v3127_v31, %v3125_v20  ;;  %v3211_v27 = vand.u32 2147483648, %v13435_v43  ;;  %v3146_v15 = vsel %vm3145_vm3, %v13358_v61, %v3144_v21 }
 0x323   :  { %v3153_v37 = vsel %vm3152_vm0, %v13366_v23, %v3151_v53  ;;  %v3172_v46 = vmul.f32 %v7147_v45, %v13385_v35  ;;  %v3179_v39 = vmul.f32 %v7149_v11, %v13395_v49  ;;  %vm3208_vm6 = vcmp.eq.f32.partialorder %v13435_v43, inf }
 0x324   :  { %v3135_v1 = vsel %vm3133_vm8, %v3134_v28, %v3132_v6  ;;  %vm19260_vm9 = vcmp.eq.f32.partialorder %v13353_v16, 0.0  ;;  %v3186_v31 = vmul.f32 %v7151_v4, %v13401_v19  ;;  %vm3203_vm7 = vcmp.eq.f32.partialorder %v13427_v40, 0.0 }
 0x325   :  { %v3142_v50 = vsel %vm19260_vm9, %v3141_v29, %v3139_v17  ;;  %v3218_v42 = vand.u32 2147483648, %v13439_v47  ;;  %v7155_v45 = vpop.eup %7154  ;;  %vm19261_vm12 = vcmp.eq.f32.partialorder %v13372_v56, inf  ;;  %vm19262_vm13 = vcmp.eq.f32.partialorder %v13377_v26, inf }
 0x326   :  { %v3160_v14 = vsel %vm19261_vm12, %v13372_v56, %v3158_v30  ;;  %v3167_v41 = vsel %vm19262_vm13, %v13377_v26, %v3165_v24  ;;  %v3193_v28 = vmul.f32 %v7153_v48, %v13407_v13  ;;  %vm3215_vm8 = vcmp.eq.f32.partialorder %v13439_v47, inf }
 0x327   :  { %v3220_v16 = vadd.f32 %v13343_v52, %v3114_v54  ;;  %vm19263_vm3 = vcmp.eq.f32.partialorder %v13358_v61, 0.0  ;;  %vm19264_vm0 = vcmp.eq.f32.partialorder %v13366_v23, 0.0  ;;  %vm3210_vm9 = vcmp.eq.f32.partialorder %v13435_v43, 0.0  ;;  %v7157_v11 = vpop.eup %7156 }
 0x328   :  { %v3149_v29 = vsel %vm19263_vm3, %v3148_v55, %v3146_v15  ;;  %v3156_v20 = vsel %vm19264_vm0, %v3155_v32, %v3153_v37  ;;  %v13559_v21 = vadd.f32 %v13369_v38, %v3121_v10  ;;  %v13562_v53 = vadd.f32 %v13382_v33, %v3128_v8 }
 0x329   :  { %v3174_v52 = vsel %vm3173_vm14, %v13385_v35, %v3172_v46  ;;  %v3181_v61 = vsel %vm3180_vm15, %v13395_v49, %v3179_v39  ;;  %v13571_v23 = vadd.f32 %v13389_v34, %v3135_v1  ;;  %v13574_v55 = vadd.f32 %v13392_v0, %v3142_v50  ;;  %v7159_v0 = vpop.eup %7158 }
 0x32a   :  { %vm19265_vm12 = vcmp.eq.f32.partialorder %v13372_v56, 0.0  ;;  %vm19266_vm13 = vcmp.eq.f32.partialorder %v13377_v26, 0.0  ;;  %vm19267_vm14 = vcmp.eq.f32.partialorder %v13401_v19, inf  ;;  %v3200_v34 = vmul.f32 %v7155_v45, %v13427_v40  ;;  %v13683_v45 = vld [vmem:[#allocation5 + $0x20] sm:$0xff] }
 0x32b   :  { %v3163_v38 = vsel %vm19265_vm12, %v3162_v7, %v3160_v14  ;;  %v3170_v33 = vsel %vm19266_vm13, %v3169_v9, %v3167_v41  ;;  %v3188_v32 = vsel %vm19267_vm14, %v13401_v19, %v3186_v31  ;;  %vm3217_vm15 = vcmp.eq.f32.partialorder %v13439_v47, 0.0 }
 0x32c   :  { %v3195_v4 = vsel %vm3194_vm2, %v13407_v13, %v3193_v28  ;;  %v13593_v56 = vadd.f32 %v13398_v22, %v3149_v29  ;;  %v13596_v7 = vadd.f32 %v13404_v18, %v3156_v20  ;;  %v3252_v26 = vmul.f32 %v3220_v16, %v3220_v16  ;;  %v13635_v13 = vld [vmem:[#allocation5] sm:$0xff]  ;;  %v13704_v20 = vld [vmem:[#allocation5 + $0x30] sm:$0xff] }
 0x32d   :  { %v3177_v9 = vsel %vm3175_vm10, %v3176_v63, %v3174_v52  ;;  %v3184_v6 = vsel %vm3182_vm1, %v3183_v58, %v3181_v61  ;;  %v3207_v17 = vmul.f32 %v7157_v11, %v13435_v43  ;;  %v3253_v22 = vmul.f32 %v13559_v21, %v13559_v21  ;;  %v13715_v61 = vld [vmem:[#allocation5 + $0x38] sm:$0xff] }
 0x32e   :  { %v3191_v18 = vsel %vm3189_vm11, %v3190_v12, %v3188_v32  ;;  %v13612_v30 = vadd.f32 %v13410_v25, %v3163_v38  ;;  %v13615_v24 = vadd.f32 %v13412_v60, %v3170_v33  ;;  %v3254_v35 = vmul.f32 %v13562_v53, %v13562_v53  ;;  %v13722_v33 = vld [vmem:[#allocation5 + $0x40] sm:$0xff] }
 0x32f   :  { %v3198_v49 = vsel %vm3196_vm4, %v3197_v44, %v3195_v4  ;;  %v3202_v63 = vsel %vm3201_vm5, %v13427_v40, %v3200_v34  ;;  %v3214_v58 = vmul.f32 %v7159_v0, %v13439_v47  ;;  %v3255_v19 = vmul.f32 %v13571_v23, %v13571_v23  ;;  %v13732_v0 = vld [vmem:[#allocation5 + $0x48] sm:$0xff] }
 0x330   :  { %v13628_v25 = vadd.f32 %v13415_v51, %v3177_v9  ;;  %v13631_v60 = vadd.f32 %v13417_v5, %v3184_v6  ;;  %v3256_v12 = vmul.f32 %v13574_v55, %v13574_v55  ;;  %v13638_v44 = vadd.f32 %v13635_v13, %v3252_v26  ;;  %v13648_v5 = vld [vmem:[#allocation5 + $0x8] sm:$0xff]  ;;  %19268 = vst [vmem:[#allocation11_spill] sm:$0xff] %v13732_v0  ;;  %v13744_v9 = vld [vmem:[#allocation5 + $0x50] sm:$0xff] }
 0x331   :  { %v3209_v48 = vsel %vm3208_vm6, %v13435_v43, %v3207_v17  ;;  %v13644_v54 = vadd.f32 %v13419_v36, %v3191_v18  ;;  %v3257_v51 = vmul.f32 %v13593_v56, %v13593_v56  ;;  %v13651_v10 = vadd.f32 %v13648_v5, %v3253_v22  ;;  %v13660_v36 = vld [vmem:[#allocation5 + $0x10] sm:$0xff]  ;;  %19269 = vst [vmem:[#allocation12_spill] sm:$0xff] %v13744_v9  ;;  %v13753_v17 = vld [vmem:[#allocation5 + $0x58] sm:$0xff]  ;;  %v13762_v18 = vld [vmem:[#allocation5 + $0x60] sm:$0xff] }
 0x332   :  { %v3205_v8 = vsel %vm3203_vm7, %v3204_v3, %v3202_v63  ;;  %v3232_v15 = vadd.f32 %v13422_v62, %v3198_v49  ;;  %v3258_v37 = vmul.f32 %v13596_v7, %v13596_v7  ;;  %v13663_v46 = vadd.f32 %v13660_v36, %v3254_v35  ;;  %v13672_v3 = vld [vmem:[#allocation5 + $0x18] sm:$0xff]  ;;  %19270 = vst [vmem:[#allocation13_spill] sm:$0xff] %v13753_v17 }
 0x333   :  { %v3216_v39 = vsel %vm3215_vm8, %v13439_v47, %v3214_v58  ;;  %v13668_v1 = vadd.f32 -0.5, %v3220_v16  ;;  %v3259_v40 = vmul.f32 %v13612_v30, %v13612_v30  ;;  %v13675_v62 = vadd.f32 %v13672_v3, %v3255_v19  ;;  %v13692_v16 = vld [vmem:[#allocation5 + $0x28] sm:$0xff]  ;;  %19271 = vst [vmem:[#allocation14_spill] sm:$0xff] %v13762_v18 }
 0x334   :  { %v3212_v50 = vsel %vm3210_vm9, %v3211_v27, %v3209_v48  ;;  %v3260_v31 = vmul.f32 %v13615_v24, %v13615_v24  ;;  %v13686_v14 = vadd.f32 %v13683_v45, %v3256_v12  ;;  %7160 = vrsqrt.f32 %v13638_v44 }
 0x335   :  { %v3233_v41 = vadd.f32 %v13424_v57, %v3205_v8  ;;  %v3261_v28 = vmul.f32 %v13628_v25, %v13628_v25  ;;  %v13695_v43 = vadd.f32 %v13692_v16, %v3257_v51  ;;  %7162 = vrsqrt.f32 %v13651_v10  ;;  %v13799_v51 = vld [vmem:[#allocation5 + $0x70] sm:$0xff] }
 0x336   :  { %v3219_v27 = vsel %vm3217_vm15, %v3218_v42, %v3216_v39  ;;  %v3262_v29 = vmul.f32 %v13631_v60, %v13631_v60  ;;  %v13707_v57 = vadd.f32 %v13704_v20, %v3258_v37  ;;  %7164 = vrsqrt.f32 %v13663_v46  ;;  %19274 = vst [vmem:[#allocation16_spill] sm:$0xff] %v13799_v51 }
 0x337   :  { %v13711_v11 = vadd.f32 -0.5, %v13559_v21  ;;  %v3263_v52 = vmul.f32 %v13644_v54, %v13644_v54  ;;  %v13718_v47 = vadd.f32 %v13715_v61, %v3259_v40  ;;  %7166 = vrsqrt.f32 %v13675_v62 }
 0x338   :  { %v3234_v42 = vadd.f32 %v13430_v2, %v3212_v50  ;;  %v3264_v38 = vmul.f32 %v3232_v15, %v3232_v15  ;;  %v13725_v32 = vadd.f32 %v13722_v33, %v3260_v31  ;;  %7168 = vrsqrt.f32 %v13686_v14 }
 0x339   :  { %v3235_v21 = vadd.f32 %v13432_v59, %v3219_v27  ;;  %v13730_v34 = vadd.f32 -0.5, %v13562_v53  ;;  %v13735_v4 = vadd.f32 %v13732_v0, %v3261_v28  ;;  %7170 = vrsqrt.f32 %v13695_v43 }
 0x33a   :  { %v13739_v2 = vadd.f32 -0.5, %v13571_v23  ;;  %v13742_v26 = vadd.f32 -0.5, %v13574_v55  ;;  %v13747_v59 = vadd.f32 %v13744_v9, %v3262_v29  ;;  %7172 = vrsqrt.f32 %v13707_v57 }
 0x33b   :  { %v13751_v53 = vadd.f32 -0.5, %v13593_v56  ;;  %v3265_v6 = vmul.f32 %v3233_v41, %v3233_v41  ;;  %v13756_v22 = vadd.f32 %v13753_v17, %v3263_v52  ;;  %7174 = vrsqrt.f32 %v13718_v47 }
 0x33c   :  { %v13760_v23 = vadd.f32 -0.5, %v13596_v7  ;;  %v3266_v55 = vmul.f32 %v3234_v42, %v3234_v42  ;;  %v13765_v35 = vadd.f32 %v13762_v18, %v3264_v38  ;;  %7176 = vrsqrt.f32 %v13725_v32 }
 0x33d   :  { %v13769_v56 = vadd.f32 -0.5, %v13612_v30  ;;  %v13772_v49 = vadd.f32 -0.5, %v13615_v24  ;;  %v3267_v63 = vmul.f32 %v3235_v21, %v3235_v21  ;;  %7178 = vrsqrt.f32 %v13735_v4  ;;  %v13789_v24 = vld [vmem:[#allocation5 + $0x68] sm:$0xff] }
 0x33e   :  { %v13776_v7 = vadd.f32 -0.5, %v13628_v25  ;;  %v13779_v58 = vadd.f32 -0.5, %v13631_v60  ;;  %v13782_v19 = vadd.f32 -0.5, %v13644_v54  ;;  %7180 = vrsqrt.f32 %v13747_v59  ;;  %19272 = vst [vmem:[#allocation15_spill] sm:$0xff] %v13789_v24 }
 0x33f   :  { %v13785_v12 = vadd.f32 -0.5, %v3232_v15  ;;  %v13787_v30 = vadd.f32 -0.5, %v3233_v41  ;;  %v13792_v48 = vadd.f32 %v13789_v24, %v3265_v6  ;;  %7182 = vrsqrt.f32 %v13756_v22  ;;  %v13805_v15 = vld [vmem:[#allocation5 + $0x78] sm:$0xff] }
 0x340   :  { %v13795_v25 = vadd.f32 -0.5, %v3234_v42  ;;  %v13797_v60 = vadd.f32 -0.5, %v3235_v21  ;;  %v13802_v54 = vadd.f32 %v13799_v51, %v3266_v55  ;;  %7184 = vrsqrt.f32 %v13765_v35  ;;  %19275 = vst [vmem:[#allocation17_spill] sm:$0xff] %v13805_v15 }
 0x341   :  { %v7161_v8 = vpop.eup %7160  ;;  %v13808_v37 = vadd.f32 %v13805_v15, %v3267_v63  ;;  %vm3286_vm11 = vcmp.eq.f32.partialorder %v13638_v44, inf  ;;  %vm3293_vm1 = vcmp.eq.f32.partialorder %v13651_v10, inf  ;;  %vm3288_vm2 = vcmp.eq.f32.partialorder %v13638_v44, 0.0 }
 0x342   :  { %19273 = vst [vmem:[#allocation18_spill] sm:$0xff] %v13797_v60  ;;  %v7163_v40 = vpop.eup %7162  ;;  %vm3295_vm10 = vcmp.eq.f32.partialorder %v13651_v10, 0.0  ;;  %vm3300_vm4 = vcmp.eq.f32.partialorder %v13663_v46, inf  ;;  %vm3302_vm5 = vcmp.eq.f32.partialorder %v13663_v46, 0.0  ;;  %vm3307_vm6 = vcmp.eq.f32.partialorder %v13675_v62, inf }
 0x343   :  { %v7165_v31 = vpop.eup %7164  ;;  %7186 = vrsqrt.f32 %v13792_v48  ;;  %vm3309_vm7 = vcmp.eq.f32.partialorder %v13675_v62, 0.0  ;;  %vm3314_vm8 = vcmp.eq.f32.partialorder %v13686_v14, inf  ;;  %vm3321_vm0 = vcmp.eq.f32.partialorder %v13695_v43, inf }
 0x344   :  { %v7167_v27 = vpop.eup %7166  ;;  %v3285_v42 = vmul.f32 %v7161_v8, %v13638_v44  ;;  %vm3328_vm9 = vcmp.eq.f32.partialorder %v13707_v57, inf  ;;  %7188 = vrsqrt.f32 %v13802_v54  ;;  %v3292_v6 = vmul.f32 %v7163_v40, %v13651_v10 }
 0x345   :  { %v7169_v52 = vpop.eup %7168  ;;  %v3299_v55 = vmul.f32 %v7165_v31, %v13663_v46  ;;  %v3331_v63 = vand.u32 2147483648, %v13707_v57  ;;  %7190 = vrsqrt.f32 %v13808_v37  ;;  %v3306_v31 = vmul.f32 %v7167_v27, %v13675_v62 }
 0x346   :  { %v7171_v21 = vpop.eup %7170  ;;  %v3313_v28 = vmul.f32 %v7169_v52, %v13686_v14  ;;  %vm3349_vm14 = vcmp.eq.f32.partialorder %v13735_v4, inf  ;;  %v3287_v29 = vsel %vm3286_vm11, %v13638_v44, %v3285_v42  ;;  %vm3356_vm15 = vcmp.eq.f32.partialorder %v13747_v59, inf }
 0x347   :  { %v7173_v8 = vpop.eup %7172  ;;  %v3294_v52 = vsel %vm3293_vm1, %v13651_v10, %v3292_v6  ;;  %v3301_v41 = vsel %vm3300_vm4, %v13663_v46, %v3299_v55  ;;  %v3320_v39 = vmul.f32 %v7171_v21, %v13695_v43  ;;  %vm3351_vm11 = vcmp.eq.f32.partialorder %v13735_v4, 0.0 }
 0x348   :  { %v7175_v40 = vpop.eup %7174  ;;  %v3327_v15 = vmul.f32 %v7173_v8, %v13707_v57  ;;  %vm3358_vm12 = vcmp.eq.f32.partialorder %v13747_v59, 0.0  ;;  %vm3365_vm3 = vcmp.eq.f32.partialorder %v13756_v22, 0.0  ;;  %v3366_v50 = vand.u32 2147483648, %v13756_v22 }
 0x349   :  { %v7177_v38 = vpop.eup %7176  ;;  %vm3370_vm13 = vcmp.eq.f32.partialorder %v13765_v35, inf  ;;  %v3373_v6 = vand.u32 2147483648, %v13765_v35  ;;  %v3308_v21 = vsel %vm3307_vm6, %v13675_v62, %v3306_v31  ;;  %v3315_v8 = vsel %vm3314_vm8, %v13686_v14, %v3313_v28 }
 0x34a   :  { %v7179_v27 = vpop.eup %7178  ;;  %v3334_v24 = vmul.f32 %v7175_v40, %v13718_v47  ;;  %v3341_v18 = vmul.f32 %v7177_v38, %v13725_v32  ;;  %vm3372_vm1 = vcmp.eq.f32.partialorder %v13765_v35, 0.0  ;;  %vm3377_vm4 = vcmp.eq.f32.partialorder %v13792_v48, inf }
 0x34b   :  { %v7181_v42 = vpop.eup %7180  ;;  %v19276_v51 = vand.u32 2147483648, %v13638_v44  ;;  %v19277_v31 = vand.u32 2147483648, %v13651_v10  ;;  %v19278_v28 = vand.u32 2147483648, %v13663_v46  ;;  %v3387_v40 = vand.u32 2147483648, %v13802_v54 }
 0x34c   :  { %v7183_v55 = vpop.eup %7182  ;;  %v3322_v60 = vsel %vm3321_vm0, %v13695_v43, %v3320_v39  ;;  %v3329_v44 = vsel %vm3328_vm9, %v13707_v57, %v3327_v15  ;;  %v3355_v10 = vmul.f32 %v7181_v42, %v13747_v59  ;;  %v3394_v15 = vand.u32 2147483648, %v13808_v37 }
 0x34d   :  { %v7185_v17 = vpop.eup %7184  ;;  %v3290_v9 = vsel %vm3288_vm2, %v19276_v51, %v3287_v29  ;;  %v3297_v0 = vsel %vm3295_vm10, %v19277_v31, %v3294_v52  ;;  %v3304_v38 = vsel %vm3302_vm5, %v19278_v28, %v3301_v41  ;;  %v3348_v51 = vmul.f32 %v7179_v27, %v13735_v4 }
 0x34e   :  { %vm3384_vm2 = vcmp.eq.f32.partialorder %v13802_v54, inf  ;;  %v19279_v29 = vand.u32 2147483648, %v13675_v62  ;;  %v19280_v41 = vand.u32 2147483648, %v13686_v14  ;;  %vm19281_vm10 = vcmp.eq.f32.partialorder %v13686_v14, 0.0 }
 0x34f   :  { %v3362_v52 = vmul.f32 %v7183_v55, %v13756_v22  ;;  %vm3379_vm5 = vcmp.eq.f32.partialorder %v13792_v48, 0.0  ;;  %vm19282_vm6 = vcmp.eq.f32.partialorder %v13718_v47, inf  ;;  %vm19283_vm8 = vcmp.eq.f32.partialorder %v13725_v32, inf }
 0x350   :  { %v3311_v46 = vsel %vm3309_vm7, %v19279_v29, %v3308_v21  ;;  %v3318_v39 = vsel %vm19281_vm10, %v19280_v41, %v3315_v8  ;;  %v7187_v27 = vpop.eup %7186  ;;  %v3336_v42 = vsel %vm19282_vm6, %v13718_v47, %v3334_v24  ;;  %v3343_v62 = vsel %vm19283_vm8, %v13725_v32, %v3341_v18 }
 0x351   :  { %v3369_v21 = vmul.f32 %v7185_v17, %v13765_v35  ;;  %vm3391_vm7 = vcmp.eq.f32.partialorder %v13808_v37, inf  ;;  %v3396_v14 = vadd.f32 %v13668_v1, %v3290_v9  ;;  %v19284_v55 = vand.u32 2147483648, %v13695_v43  ;;  %v7189_v17 = vpop.eup %7188 }
 0x352   :  { %vm19285_vm0 = vcmp.eq.f32.partialorder %v13695_v43, 0.0  ;;  %vm19286_vm9 = vcmp.eq.f32.partialorder %v13707_v57, 0.0  ;;  %vm3386_vm10 = vcmp.eq.f32.partialorder %v13802_v54, 0.0  ;;  %v3397_v24 = vadd.f32 %v13711_v11, %v3297_v0 }
 0x353   :  { %v3325_v8 = vsel %vm19285_vm0, %v19284_v55, %v3322_v60  ;;  %v3332_v31 = vsel %vm19286_vm9, %v3331_v63, %v3329_v44  ;;  %v13929_v18 = vadd.f32 %v13730_v34, %v3304_v38  ;;  %v3350_v1 = vsel %vm3349_vm14, %v13735_v4, %v3348_v51 }
 0x354   :  { %v3357_v43 = vsel %vm3356_vm15, %v13747_v59, %v3355_v10  ;;  %v13938_v9 = vadd.f32 %v13739_v2, %v3311_v46  ;;  %v13941_v57 = vadd.f32 %v13742_v26, %v3318_v39  ;;  %v19287_v11 = vand.u32 2147483648, %v13718_v47  ;;  %v7191_v26 = vpop.eup %7190 }
 0x355   :  { %vm19288_vm6 = vcmp.eq.f32.partialorder %v13718_v47, 0.0  ;;  %v19289_v0 = vand.u32 2147483648, %v13725_v32  ;;  %vm19290_vm8 = vcmp.eq.f32.partialorder %v13725_v32, 0.0  ;;  %vm19291_vm14 = vcmp.eq.f32.partialorder %v13756_v22, inf }
 0x356   :  { %v3339_v34 = vsel %vm19288_vm6, %v19287_v11, %v3336_v42  ;;  %v3364_v63 = vsel %vm19291_vm14, %v13756_v22, %v3362_v52  ;;  %v3376_v2 = vmul.f32 %v7187_v27, %v13792_v48  ;;  %vm3393_vm15 = vcmp.eq.f32.partialorder %v13808_v37, 0.0 }
 0x357   :  { %v3346_v60 = vsel %vm19290_vm8, %v19289_v0, %v3343_v62  ;;  %v3371_v28 = vsel %vm3370_vm13, %v13765_v35, %v3369_v21  ;;  %v3401_v47 = vadd.f32 %v13751_v53, %v3325_v8  ;;  %v3402_v38 = vadd.f32 %v13760_v23, %v3332_v31 }
 0x358   :  { %v3428_v44 = vmul.f32 %v3396_v14, %v3396_v14  ;;  %v19292_v32 = vand.u32 2147483648, %v13735_v4  ;;  %v19293_v10 = vand.u32 2147483648, %v13747_v59  ;;  %v3383_v46 = vmul.f32 %v7189_v17, %v13802_v54 }
 0x359   :  { %v3429_v41 = vmul.f32 %v3397_v24, %v3397_v24  ;;  %v3367_v39 = vsel %vm3365_vm3, %v3366_v50, %v3364_v63  ;;  %v3403_v53 = vadd.f32 %v13769_v56, %v3339_v34  ;;  %v3404_v23 = vadd.f32 %v13772_v49, %v3346_v60 }
 0x35a   :  { %v3353_v51 = vsel %vm3351_vm11, %v19292_v32, %v3350_v1  ;;  %v3360_v29 = vsel %vm3358_vm12, %v19293_v10, %v3357_v43  ;;  %v3430_v52 = vmul.f32 %v13929_v18, %v13929_v18  ;;  %v3374_v4 = vsel %vm3372_vm1, %v3373_v6, %v3371_v28 }
 0x35b   :  { %v3378_v59 = vsel %vm3377_vm4, %v13792_v48, %v3376_v2  ;;  %v3390_v27 = vmul.f32 %v7191_v26, %v13808_v37  ;;  %v3431_v22 = vmul.f32 %v13938_v9, %v13938_v9  ;;  %v3405_v50 = vadd.f32 %v13776_v7, %v3353_v51 }
 0x35c   :  { %v3406_v56 = vadd.f32 %v13779_v58, %v3360_v29  ;;  %v3432_v49 = vmul.f32 %v13941_v57, %v13941_v57  ;;  %v13989_v42 = vadd.f32 %v13635_v13, %v3428_v44  ;;  %v3385_v35 = vsel %vm3384_vm2, %v13802_v54, %v3383_v46  ;;  %v19297_v29 = vld [vmem:[#allocation12_spill] sm:$0xff] }
 0x35d   :  { %v3407_v6 = vadd.f32 %v13782_v19, %v3367_v39  ;;  %v3433_v62 = vmul.f32 %v3401_v47, %v3401_v47  ;;  %v13996_v21 = vadd.f32 %v13648_v5, %v3429_v41  ;;  %v19294_v7 = vand.u32 2147483648, %v13792_v48  ;;  %v19298_v39 = vld [vmem:[#allocation13_spill] sm:$0xff] }
 0x35e   :  { %v3408_v55 = vadd.f32 %v13785_v12, %v3374_v4  ;;  %v3434_v8 = vmul.f32 %v3402_v38, %v3402_v38  ;;  %v14004_v31 = vadd.f32 %v13660_v36, %v3430_v52  ;;  %v3392_v17 = vsel %vm3391_vm7, %v13808_v37, %v3390_v27 }
 0x35f   :  { %v3381_v58 = vsel %vm3379_vm5, %v19294_v7, %v3378_v59  ;;  %v14009_v19 = vadd.f32 -0.5, %v3396_v14  ;;  %v3435_v1 = vmul.f32 %v3403_v53, %v3403_v53  ;;  %v14012_v43 = vadd.f32 %v13672_v3, %v3431_v22  ;;  %v19299_v59 = vld [vmem:[#allocation14_spill] sm:$0xff] }
 0x360   :  { %v3388_v48 = vsel %vm3386_vm10, %v3387_v40, %v3385_v35  ;;  %v3436_v12 = vmul.f32 %v3404_v23, %v3404_v23  ;;  %v14019_v11 = vadd.f32 %v13683_v45, %v3432_v49  ;;  %7192 = vrsqrt.f32 %v13989_v42 }
 0x361   :  { %v3409_v34 = vadd.f32 %v13787_v30, %v3381_v58  ;;  %v3437_v0 = vmul.f32 %v3405_v50, %v3405_v50  ;;  %v14024_v14 = vadd.f32 %v13692_v16, %v3433_v62  ;;  %7194 = vrsqrt.f32 %v13996_v21  ;;  %v19300_v58 = vld [vmem:[#allocation15_spill] sm:$0xff] }
 0x362   :  { %v3395_v54 = vsel %vm3393_vm15, %v3394_v15, %v3392_v17  ;;  %v3438_v40 = vmul.f32 %v3406_v56, %v3406_v56  ;;  %v14032_v60 = vadd.f32 %v13704_v20, %v3434_v8  ;;  %7196 = vrsqrt.f32 %v14004_v31  ;;  %v19295_v15 = vld [vmem:[#allocation18_spill] sm:$0xff]  ;;  %v19303_v17 = vld [vmem:[#allocation17_spill] sm:$0xff] }
 0x363   :  { %v14035_v63 = vadd.f32 -0.5, %v3397_v24  ;;  %v3439_v30 = vmul.f32 %v3407_v6, %v3407_v6  ;;  %v14038_v2 = vadd.f32 %v13715_v61, %v3435_v1  ;;  %7198 = vrsqrt.f32 %v14012_v43  ;;  %v19296_v24 = vld [vmem:[#allocation11_spill] sm:$0xff] }
 0x364   :  { %v3410_v26 = vadd.f32 %v13795_v25, %v3388_v48  ;;  %v3440_v28 = vmul.f32 %v3408_v55, %v3408_v55  ;;  %v14043_v37 = vadd.f32 %v13722_v33, %v3436_v12  ;;  %7200 = vrsqrt.f32 %v14019_v11 }
 0x365   :  { %v3411_v44 = vadd.f32 %v19295_v15, %v3395_v54  ;;  %v14048_v32 = vadd.f32 -0.5, %v13929_v18  ;;  %v14051_v51 = vadd.f32 %v19296_v24, %v3437_v0  ;;  %7202 = vrsqrt.f32 %v14024_v14 }
 0x366   :  { %v14055_v10 = vadd.f32 -0.5, %v13938_v9  ;;  %v14058_v25 = vadd.f32 -0.5, %v13941_v57  ;;  %v14061_v46 = vadd.f32 %v19297_v29, %v3438_v40  ;;  %7204 = vrsqrt.f32 %v14032_v60 }
 0x367   :  { %v14064_v41 = vadd.f32 -0.5, %v3401_v47  ;;  %v3441_v18 = vmul.f32 %v3409_v34, %v3409_v34  ;;  %v14067_v52 = vadd.f32 %v19298_v39, %v3439_v30  ;;  %7206 = vrsqrt.f32 %v14038_v2 }
 0x368   :  { %v14070_v4 = vadd.f32 -0.5, %v3402_v38  ;;  %v3442_v9 = vmul.f32 %v3410_v26, %v3410_v26  ;;  %v14073_v27 = vadd.f32 %v19299_v59, %v3440_v28  ;;  %7208 = vrsqrt.f32 %v14043_v37 }
 0x369   :  { %v14076_v57 = vadd.f32 -0.5, %v3403_v53  ;;  %v14078_v22 = vadd.f32 -0.5, %v3404_v23  ;;  %v3443_v47 = vmul.f32 %v3411_v44, %v3411_v44  ;;  %7210 = vrsqrt.f32 %v14051_v51 }
 0x36a   :  { %v14081_v49 = vadd.f32 -0.5, %v3405_v50  ;;  %v14083_v35 = vadd.f32 -0.5, %v3406_v56  ;;  %v14085_v62 = vadd.f32 -0.5, %v3407_v6  ;;  %7212 = vrsqrt.f32 %v14061_v46  ;;  %v19302_v50 = vld [vmem:[#allocation16_spill] sm:$0xff] }
 0x36b   :  { %v14088_v38 = vadd.f32 -0.5, %v3408_v55  ;;  %v14090_v7 = vadd.f32 -0.5, %v3409_v34  ;;  %v14093_v53 = vadd.f32 %v19300_v58, %v3441_v18  ;;  %7214 = vrsqrt.f32 %v14067_v52 }
 0x36c   :  { %v14096_v23 = vadd.f32 -0.5, %v3410_v26  ;;  %v14098_v8 = vadd.f32 -0.5, %v3411_v44  ;;  %v14101_v56 = vadd.f32 %v19302_v50, %v3442_v9  ;;  %7216 = vrsqrt.f32 %v14073_v27 }
 0x36d   :  { %v7193_v6 = vpop.eup %7192  ;;  %v14105_v55 = vadd.f32 %v19303_v17, %v3443_v47  ;;  %vm3462_vm3 = vcmp.eq.f32.partialorder %v13989_v42, inf  ;;  %vm3469_vm12 = vcmp.eq.f32.partialorder %v13996_v21, inf  ;;  %vm3464_vm13 = vcmp.eq.f32.partialorder %v13989_v42, 0.0 }
 0x36e   :  { %19301 = vst [vmem:[#allocation18_spill] sm:$0xff] %v14098_v8  ;;  %v7195_v48 = vpop.eup %7194  ;;  %vm3471_vm11 = vcmp.eq.f32.partialorder %v13996_v21, 0.0  ;;  %vm3476_vm1 = vcmp.eq.f32.partialorder %v14004_v31, inf  ;;  %vm3478_vm4 = vcmp.eq.f32.partialorder %v14004_v31, 0.0  ;;  %vm3483_vm2 = vcmp.eq.f32.partialorder %v14012_v43, inf }
 0x36f   :  { %v7197_v34 = vpop.eup %7196  ;;  %7218 = vrsqrt.f32 %v14093_v53  ;;  %vm3485_vm5 = vcmp.eq.f32.partialorder %v14012_v43, 0.0  ;;  %vm3490_vm7 = vcmp.eq.f32.partialorder %v14019_v11, inf  ;;  %vm3497_vm9 = vcmp.eq.f32.partialorder %v14024_v14, inf }
 0x370   :  { %v7199_v40 = vpop.eup %7198  ;;  %v3461_v28 = vmul.f32 %v7193_v6, %v13989_v42  ;;  %vm3504_vm10 = vcmp.eq.f32.partialorder %v14032_v60, inf  ;;  %7220 = vrsqrt.f32 %v14101_v56  ;;  %v3468_v18 = vmul.f32 %v7195_v48, %v13996_v21 }
 0x371   :  { %v7201_v26 = vpop.eup %7200  ;;  %v3475_v9 = vmul.f32 %v7197_v34, %v14004_v31  ;;  %v3507_v47 = vand.u32 2147483648, %v14032_v60  ;;  %7222 = vrsqrt.f32 %v14105_v55  ;;  %v3482_v34 = vmul.f32 %v7199_v40, %v14012_v43 }
 0x372   :  { %v7203_v44 = vpop.eup %7202  ;;  %v3489_v54 = vmul.f32 %v7201_v26, %v14019_v11  ;;  %vm3525_vm14 = vcmp.eq.f32.partialorder %v14051_v51, inf  ;;  %v3463_v30 = vsel %vm3462_vm3, %v13989_v42, %v3461_v28  ;;  %vm3532_vm15 = vcmp.eq.f32.partialorder %v14061_v46, inf }
 0x373   :  { %v7205_v6 = vpop.eup %7204  ;;  %v3470_v26 = vsel %vm3469_vm12, %v13996_v21, %v3468_v18  ;;  %v3477_v0 = vsel %vm3476_vm1, %v14004_v31, %v3475_v9  ;;  %v3496_v1 = vmul.f32 %v7203_v44, %v14024_v14  ;;  %vm3527_vm3 = vcmp.eq.f32.partialorder %v14051_v51, 0.0 }
 0x374   :  { %v7207_v48 = vpop.eup %7206  ;;  %v3503_v17 = vmul.f32 %v7205_v6, %v14032_v60  ;;  %vm3534_vm6 = vcmp.eq.f32.partialorder %v14061_v46, 0.0  ;;  %vm3541_vm0 = vcmp.eq.f32.partialorder %v14067_v52, 0.0  ;;  %v3542_v12 = vand.u32 2147483648, %v14067_v52 }
 0x375   :  { %v7209_v15 = vpop.eup %7208  ;;  %vm3546_vm8 = vcmp.eq.f32.partialorder %v14073_v27, inf  ;;  %v3549_v18 = vand.u32 2147483648, %v14073_v27  ;;  %v3484_v44 = vsel %vm3483_vm2, %v14012_v43, %v3482_v34  ;;  %v3491_v6 = vsel %vm3490_vm7, %v14019_v11, %v3489_v54 }
 0x376   :  { %v7211_v40 = vpop.eup %7210  ;;  %v3510_v58 = vmul.f32 %v7207_v48, %v14038_v2  ;;  %v3517_v59 = vmul.f32 %v7209_v15, %v14043_v37  ;;  %vm3548_vm12 = vcmp.eq.f32.partialorder %v14073_v27, 0.0  ;;  %vm3553_vm1 = vcmp.eq.f32.partialorder %v14093_v53, inf }
 0x377   :  { %v7213_v28 = vpop.eup %7212  ;;  %v19304_v50 = vand.u32 2147483648, %v13989_v42  ;;  %v19305_v34 = vand.u32 2147483648, %v13996_v21  ;;  %v19306_v54 = vand.u32 2147483648, %v14004_v31  ;;  %v3563_v48 = vand.u32 2147483648, %v14101_v56 }
 0x378   :  { %v7215_v9 = vpop.eup %7214  ;;  %v3498_v8 = vsel %vm3497_vm9, %v14024_v14, %v3496_v1  ;;  %v3505_v42 = vsel %vm3504_vm10, %v14032_v60, %v3503_v17  ;;  %v3531_v21 = vmul.f32 %v7213_v28, %v14061_v46  ;;  %v3570_v17 = vand.u32 2147483648, %v14105_v55 }
 0x379   :  { %v7217_v39 = vpop.eup %7216  ;;  %v3466_v29 = vsel %vm3464_vm13, %v19304_v50, %v3463_v30  ;;  %v3473_v24 = vsel %vm3471_vm11, %v19305_v34, %v3470_v26  ;;  %v3480_v15 = vsel %vm3478_vm4, %v19306_v54, %v3477_v0  ;;  %v3524_v50 = vmul.f32 %v7211_v40, %v14051_v51 }
 0x37a   :  { %vm3560_vm13 = vcmp.eq.f32.partialorder %v14101_v56, inf  ;;  %v19307_v30 = vand.u32 2147483648, %v14012_v43  ;;  %v19308_v0 = vand.u32 2147483648, %v14019_v11  ;;  %vm19309_vm11 = vcmp.eq.f32.partialorder %v14019_v11, 0.0 }
 0x37b   :  { %v3538_v26 = vmul.f32 %v7215_v9, %v14067_v52  ;;  %vm3555_vm4 = vcmp.eq.f32.partialorder %v14093_v53, 0.0  ;;  %vm19310_vm2 = vcmp.eq.f32.partialorder %v14038_v2, inf  ;;  %vm19311_vm7 = vcmp.eq.f32.partialorder %v14043_v37, inf }
 0x37c   :  { %v3487_v31 = vsel %vm3485_vm5, %v19307_v30, %v3484_v44  ;;  %v3494_v1 = vsel %vm19309_vm11, %v19308_v0, %v3491_v6  ;;  %v7219_v40 = vpop.eup %7218  ;;  %v3512_v28 = vsel %vm19310_vm2, %v14038_v2, %v3510_v58  ;;  %v3519_v43 = vsel %vm19311_vm7, %v14043_v37, %v3517_v59 }
 0x37d   :  { %v3545_v44 = vmul.f32 %v7217_v39, %v14073_v27  ;;  %vm3567_vm5 = vcmp.eq.f32.partialorder %v14105_v55, inf  ;;  %v3572_v11 = vadd.f32 %v14009_v19, %v3466_v29  ;;  %v19312_v9 = vand.u32 2147483648, %v14024_v14  ;;  %v7221_v39 = vpop.eup %7220 }
 0x37e   :  { %vm19313_vm9 = vcmp.eq.f32.partialorder %v14024_v14, 0.0  ;;  %vm19314_vm10 = vcmp.eq.f32.partialorder %v14032_v60, 0.0  ;;  %vm3562_vm11 = vcmp.eq.f32.partialorder %v14101_v56, 0.0  ;;  %v3573_v58 = vadd.f32 %v14035_v63, %v3473_v24 }
 0x37f   :  { %v3501_v6 = vsel %vm19313_vm9, %v19312_v9, %v3498_v8  ;;  %v3508_v34 = vsel %vm19314_vm10, %v3507_v47, %v3505_v42  ;;  %v14226_v59 = vadd.f32 %v14048_v32, %v3480_v15  ;;  %v3526_v19 = vsel %vm3525_vm14, %v14051_v51, %v3524_v50 }
 0x380   :  { %v3533_v14 = vsel %vm3532_vm15, %v14061_v46, %v3531_v21  ;;  %v14235_v29 = vadd.f32 %v14055_v10, %v3487_v31  ;;  %v14238_v60 = vadd.f32 %v14058_v25, %v3494_v1  ;;  %v19315_v63 = vand.u32 2147483648, %v14038_v2  ;;  %v7223_v25 = vpop.eup %7222 }
 0x381   :  { %vm19316_vm2 = vcmp.eq.f32.partialorder %v14038_v2, 0.0  ;;  %v19317_v24 = vand.u32 2147483648, %v14043_v37  ;;  %vm19318_vm7 = vcmp.eq.f32.partialorder %v14043_v37, 0.0  ;;  %vm19319_vm14 = vcmp.eq.f32.partialorder %v14067_v52, inf }
 0x382   :  { %v3515_v32 = vsel %vm19316_vm2, %v19315_v63, %v3512_v28  ;;  %v3540_v47 = vsel %vm19319_vm14, %v14067_v52, %v3538_v26  ;;  %v3552_v10 = vmul.f32 %v7219_v40, %v14093_v53  ;;  %vm3569_vm15 = vcmp.eq.f32.partialorder %v14105_v55, 0.0 }
 0x383   :  { %v3522_v8 = vsel %vm19318_vm7, %v19317_v24, %v3519_v43  ;;  %v3547_v54 = vsel %vm3546_vm8, %v14073_v27, %v3545_v44  ;;  %v3577_v2 = vadd.f32 %v14064_v41, %v3501_v6  ;;  %v3578_v15 = vadd.f32 %v14070_v4, %v3508_v34 }
 0x384   :  { %v3604_v42 = vmul.f32 %v3572_v11, %v3572_v11  ;;  %v19320_v37 = vand.u32 2147483648, %v14051_v51  ;;  %v19321_v21 = vand.u32 2147483648, %v14061_v46  ;;  %v3559_v31 = vmul.f32 %v7221_v39, %v14101_v56 }
 0x385   :  { %v3605_v0 = vmul.f32 %v3573_v58, %v3573_v58  ;;  %v3543_v1 = vsel %vm3541_vm0, %v3542_v12, %v3540_v47  ;;  %v3579_v41 = vadd.f32 %v14076_v57, %v3515_v32  ;;  %v3580_v4 = vadd.f32 %v14078_v22, %v3522_v8 }
 0x386   :  { %v3529_v50 = vsel %vm3527_vm3, %v19320_v37, %v3526_v19  ;;  %v3536_v30 = vsel %vm3534_vm6, %v19321_v21, %v3533_v14  ;;  %v3606_v26 = vmul.f32 %v14226_v59, %v14226_v59  ;;  %v3550_v51 = vsel %vm3548_vm12, %v3549_v18, %v3547_v54  ;;  %v19327_v37 = vld [vmem:[#allocation14_spill] sm:$0xff] }
 0x387   :  { %v3554_v46 = vsel %vm3553_vm1, %v14093_v53, %v3552_v10  ;;  %v3566_v40 = vmul.f32 %v7223_v25, %v14105_v55  ;;  %v3607_v52 = vmul.f32 %v14235_v29, %v14235_v29  ;;  %v3581_v12 = vadd.f32 %v14081_v49, %v3529_v50  ;;  %v19326_v25 = vld [vmem:[#allocation13_spill] sm:$0xff] }
 0x388   :  { %v3582_v57 = vadd.f32 %v14083_v35, %v3536_v30  ;;  %v3608_v22 = vmul.f32 %v14238_v60, %v14238_v60  ;;  %v14286_v28 = vadd.f32 %v13635_v13, %v3604_v42  ;;  %v3561_v27 = vsel %vm3560_vm13, %v14101_v56, %v3559_v31 }
 0x389   :  { %v3583_v18 = vadd.f32 %v14085_v62, %v3543_v1  ;;  %v3609_v43 = vmul.f32 %v3577_v2, %v3577_v2  ;;  %v14293_v44 = vadd.f32 %v13648_v5, %v3605_v0  ;;  %v19322_v49 = vand.u32 2147483648, %v14093_v53 }
 0x38a   :  { %v3584_v9 = vadd.f32 %v14088_v38, %v3550_v51  ;;  %v3610_v6 = vmul.f32 %v3578_v15, %v3578_v15  ;;  %v14301_v13 = vadd.f32 %v13660_v36, %v3606_v26  ;;  %v3568_v34 = vsel %vm3567_vm5, %v14105_v55, %v3566_v40  ;;  %v19328_v26 = vld [vmem:[#allocation15_spill] sm:$0xff] }
 0x38b   :  { %v3557_v35 = vsel %vm3555_vm4, %v19322_v49, %v3554_v46  ;;  %v14306_v62 = vadd.f32 -0.5, %v3572_v11  ;;  %v3611_v39 = vmul.f32 %v3579_v41, %v3579_v41  ;;  %v14309_v5 = vadd.f32 %v13672_v3, %v3607_v52  ;;  %v19329_v46 = vld [vmem:[#allocation16_spill] sm:$0xff] }
 0x38c   :  { %v3564_v53 = vsel %vm3562_vm11, %v3563_v48, %v3561_v27  ;;  %v3612_v38 = vmul.f32 %v3580_v4, %v3580_v4  ;;  %v14316_v19 = vadd.f32 %v13683_v45, %v3608_v22  ;;  %7224 = vrsqrt.f32 %v14286_v28 }
 0x38d   :  { %v3585_v36 = vadd.f32 %v14090_v7, %v3557_v35  ;;  %v3613_v14 = vmul.f32 %v3581_v12, %v3581_v12  ;;  %v14321_v11 = vadd.f32 %v13692_v16, %v3609_v43  ;;  %7226 = vrsqrt.f32 %v14293_v44 }
 0x38e   :  { %v3571_v3 = vsel %vm3569_vm15, %v3570_v17, %v3568_v34  ;;  %v3614_v56 = vmul.f32 %v3582_v57, %v3582_v57  ;;  %v14329_v48 = vadd.f32 %v13704_v20, %v3610_v6  ;;  %7228 = vrsqrt.f32 %v14301_v13  ;;  %v19323_v20 = vld [vmem:[#allocation18_spill] sm:$0xff] }
 0x38f   :  { %v14332_v45 = vadd.f32 -0.5, %v3573_v58  ;;  %v3615_v7 = vmul.f32 %v3583_v18, %v3583_v18  ;;  %v14335_v63 = vadd.f32 %v13715_v61, %v3611_v39  ;;  %7230 = vrsqrt.f32 %v14309_v5  ;;  %v19324_v58 = vld [vmem:[#allocation11_spill] sm:$0xff] }
 0x390   :  { %v3586_v16 = vadd.f32 %v14096_v23, %v3564_v53  ;;  %v3616_v32 = vmul.f32 %v3584_v9, %v3584_v9  ;;  %v14340_v55 = vadd.f32 %v13722_v33, %v3612_v38  ;;  %7232 = vrsqrt.f32 %v14316_v19  ;;  %v19325_v33 = vld [vmem:[#allocation12_spill] sm:$0xff] }
 0x391   :  { %v3587_v17 = vadd.f32 %v19323_v20, %v3571_v3  ;;  %v14345_v24 = vadd.f32 -0.5, %v14226_v59  ;;  %v14348_v8 = vadd.f32 %v19324_v58, %v3613_v14  ;;  %7234 = vrsqrt.f32 %v14321_v11 }
 0x392   :  { %v14352_v61 = vadd.f32 -0.5, %v14235_v29  ;;  %v14355_v23 = vadd.f32 -0.5, %v14238_v60  ;;  %v14358_v47 = vadd.f32 %v19325_v33, %v3614_v56  ;;  %7236 = vrsqrt.f32 %v14329_v48 }
 0x393   :  { %v14361_v10 = vadd.f32 -0.5, %v3577_v2  ;;  %v3617_v59 = vmul.f32 %v3585_v36, %v3585_v36  ;;  %v14364_v54 = vadd.f32 %v19326_v25, %v3615_v7  ;;  %7238 = vrsqrt.f32 %v14335_v63 }
 0x394   :  { %v14367_v42 = vadd.f32 -0.5, %v3578_v15  ;;  %v3618_v29 = vmul.f32 %v3586_v16, %v3586_v16  ;;  %v14370_v50 = vadd.f32 %v19327_v37, %v3616_v32  ;;  %7240 = vrsqrt.f32 %v14340_v55 }
 0x395   :  { %v14373_v60 = vadd.f32 -0.5, %v3579_v41  ;;  %v14375_v21 = vadd.f32 -0.5, %v3580_v4  ;;  %v3619_v2 = vmul.f32 %v3587_v17, %v3587_v17  ;;  %7242 = vrsqrt.f32 %v14348_v8 }
 0x396   :  { %v14378_v30 = vadd.f32 -0.5, %v3581_v12  ;;  %v14380_v31 = vadd.f32 -0.5, %v3582_v57  ;;  %v14382_v0 = vadd.f32 -0.5, %v3583_v18  ;;  %7244 = vrsqrt.f32 %v14358_v47  ;;  %v19330_v12 = vld [vmem:[#allocation17_spill] sm:$0xff] }
 0x397   :  { %v14385_v15 = vadd.f32 -0.5, %v3584_v9  ;;  %v14387_v1 = vadd.f32 -0.5, %v3585_v36  ;;  %v14390_v41 = vadd.f32 %v19328_v26, %v3617_v59  ;;  %7246 = vrsqrt.f32 %v14364_v54 }
 0x398   :  { %v14393_v4 = vadd.f32 -0.5, %v3586_v16  ;;  %v14395_v51 = vadd.f32 -0.5, %v3587_v17  ;;  %v14398_v40 = vadd.f32 %v19329_v46, %v3618_v29  ;;  %7248 = vrsqrt.f32 %v14370_v50 }
 0x399   :  { %v7225_v52 = vpop.eup %7224  ;;  %v14402_v57 = vadd.f32 %v19330_v12, %v3619_v2  ;;  %vm3638_vm0 = vcmp.eq.f32.partialorder %v14286_v28, inf  ;;  %v3641_v22 = vand.u32 2147483648, %v14286_v28  ;;  %vm3645_vm6 = vcmp.eq.f32.partialorder %v14293_v44, inf }
 0x39a   :  { %v7227_v27 = vpop.eup %7226  ;;  %vm3640_vm8 = vcmp.eq.f32.partialorder %v14286_v28, 0.0  ;;  %vm3647_vm3 = vcmp.eq.f32.partialorder %v14293_v44, 0.0  ;;  %v3648_v18 = vand.u32 2147483648, %v14293_v44  ;;  %vm3652_vm12 = vcmp.eq.f32.partialorder %v14301_v13, inf }
 0x39b   :  { %vm3654_vm1 = vcmp.eq.f32.partialorder %v14301_v13, 0.0  ;;  %v7229_v43 = vpop.eup %7228  ;;  %v3655_v49 = vand.u32 2147483648, %v14301_v13  ;;  %vm3659_vm13 = vcmp.eq.f32.partialorder %v14309_v5, inf  ;;  %v3662_v35 = vand.u32 2147483648, %v14309_v5 }
 0x39c   :  { %7250 = vrsqrt.f32 %v14390_v41  ;;  %v7231_v9 = vpop.eup %7230  ;;  %vm3661_vm4 = vcmp.eq.f32.partialorder %v14309_v5, 0.0  ;;  %vm3666_vm5 = vcmp.eq.f32.partialorder %v14316_v19, inf  ;;  %v3669_v6 = vand.u32 2147483648, %v14316_v19 }
 0x39d   :  { %vm3673_vm10 = vcmp.eq.f32.partialorder %v14321_v11, inf  ;;  %v7233_v34 = vpop.eup %7232  ;;  %v3637_v39 = vmul.f32 %v7225_v52, %v14286_v28  ;;  %v3676_v53 = vand.u32 2147483648, %v14321_v11  ;;  %vm3680_vm11 = vcmp.eq.f32.partialorder %v14329_v48, inf }
 0x39e   :  { %7252 = vrsqrt.f32 %v14398_v40  ;;  %v7235_v38 = vpop.eup %7234  ;;  %v3644_v36 = vmul.f32 %v7227_v27, %v14293_v44  ;;  %v3651_v14 = vmul.f32 %v7229_v43, %v14301_v13  ;;  %v3683_v3 = vand.u32 2147483648, %v14329_v48 }
 0x39f   :  { %v7237_v56 = vpop.eup %7236  ;;  %v3690_v7 = vand.u32 2147483648, %v14335_v63  ;;  %v3697_v16 = vand.u32 2147483648, %v14340_v55  ;;  %7254 = vrsqrt.f32 %v14402_v57  ;;  %v3658_v20 = vmul.f32 %v7231_v9, %v14309_v5 }
 0x3a0   :  { %v7239_v32 = vpop.eup %7238  ;;  %v3665_v17 = vmul.f32 %v7233_v34, %v14316_v19  ;;  %vm3701_vm14 = vcmp.eq.f32.partialorder %v14348_v8, inf  ;;  %v3704_v58 = vand.u32 2147483648, %v14348_v8  ;;  %v3639_v59 = vsel %vm3638_vm0, %v14286_v28, %v3637_v39 }
 0x3a1   :  { %v7241_v33 = vpop.eup %7240  ;;  %vm3708_vm15 = vcmp.eq.f32.partialorder %v14358_v47, inf  ;;  %v3711_v25 = vand.u32 2147483648, %v14358_v47  ;;  %v3646_v37 = vsel %vm3645_vm6, %v14293_v44, %v3644_v36  ;;  %v3653_v2 = vsel %vm3652_vm12, %v14301_v13, %v3651_v14 }
 0x3a2   :  { %v7243_v29 = vpop.eup %7242  ;;  %v3672_v26 = vmul.f32 %v7235_v38, %v14321_v11  ;;  %v3679_v46 = vmul.f32 %v7237_v56, %v14329_v48  ;;  %vm3703_vm0 = vcmp.eq.f32.partialorder %v14348_v8, 0.0  ;;  %vm3710_vm2 = vcmp.eq.f32.partialorder %v14358_v47, 0.0 }
 0x3a3   :  { %v7245_v52 = vpop.eup %7244  ;;  %vm3717_vm9 = vcmp.eq.f32.partialorder %v14364_v54, 0.0  ;;  %v3718_v12 = vand.u32 2147483648, %v14364_v54  ;;  %vm3722_vm7 = vcmp.eq.f32.partialorder %v14370_v50, inf  ;;  %v3725_v27 = vand.u32 2147483648, %v14370_v50 }
 0x3a4   :  { %v3732_v43 = vand.u32 2147483648, %v14390_v41  ;;  %v7247_v9 = vpop.eup %7246  ;;  %v3660_v34 = vsel %vm3659_vm13, %v14309_v5, %v3658_v20  ;;  %v3667_v39 = vsel %vm3666_vm5, %v14316_v19, %v3665_v17  ;;  %v3686_v38 = vmul.f32 %v7239_v32, %v14335_v63 }
 0x3a5   :  { %v3693_v36 = vmul.f32 %v7241_v33, %v14340_v55  ;;  %vm3724_vm6 = vcmp.eq.f32.partialorder %v14370_v50, 0.0  ;;  %vm3729_vm12 = vcmp.eq.f32.partialorder %v14390_v41, inf  ;;  %v7249_v14 = vpop.eup %7248  ;;  %v3642_v56 = vsel %vm3640_vm8, %v3641_v22, %v3639_v59 }
 0x3a6   :  { %v3649_v20 = vsel %vm3647_vm3, %v3648_v18, %v3646_v37  ;;  %v3656_v32 = vsel %vm3654_vm1, %v3655_v49, %v3653_v2  ;;  %v3739_v17 = vand.u32 2147483648, %v14398_v40  ;;  %v3674_v33 = vsel %vm3673_vm10, %v14321_v11, %v3672_v26 }
 0x3a7   :  { %v3681_v28 = vsel %vm3680_vm11, %v14329_v48, %v3679_v46  ;;  %v3700_v22 = vmul.f32 %v7243_v29, %v14348_v8  ;;  %v3707_v44 = vmul.f32 %v7245_v52, %v14358_v47  ;;  %vm3736_vm8 = vcmp.eq.f32.partialorder %v14398_v40, inf }
 0x3a8   :  { %v3663_v13 = vsel %vm3661_vm4, %v3662_v35, %v3660_v34  ;;  %vm19331_vm3 = vcmp.eq.f32.partialorder %v14316_v19, 0.0  ;;  %v3714_v49 = vmul.f32 %v7247_v9, %v14364_v54  ;;  %vm3731_vm1 = vcmp.eq.f32.partialorder %v14390_v41, 0.0 }
 0x3a9   :  { %v3670_v18 = vsel %vm19331_vm3, %v3669_v6, %v3667_v39  ;;  %v3746_v59 = vand.u32 2147483648, %v14402_v57  ;;  %v7251_v29 = vpop.eup %7250  ;;  %vm19332_vm13 = vcmp.eq.f32.partialorder %v14335_v63, inf  ;;  %vm19333_vm5 = vcmp.eq.f32.partialorder %v14340_v55, inf }
 0x3aa   :  { %v3688_v37 = vsel %vm19332_vm13, %v14335_v63, %v3686_v38  ;;  %v3695_v5 = vsel %vm19333_vm5, %v14340_v55, %v3693_v36  ;;  %v3721_v35 = vmul.f32 %v7249_v14, %v14370_v50  ;;  %vm3743_vm4 = vcmp.eq.f32.partialorder %v14402_v57, inf }
 0x3ab   :  { %v3748_v19 = vadd.f32 %v14306_v62, %v3642_v56  ;;  %vm19334_vm10 = vcmp.eq.f32.partialorder %v14321_v11, 0.0  ;;  %vm19335_vm11 = vcmp.eq.f32.partialorder %v14329_v48, 0.0  ;;  %vm3738_vm3 = vcmp.eq.f32.partialorder %v14398_v40, 0.0  ;;  %v7253_v52 = vpop.eup %7252 }
 0x3ac   :  { %v3677_v6 = vsel %vm19334_vm10, %v3676_v53, %v3674_v33  ;;  %v3684_v2 = vsel %vm19335_vm11, %v3683_v3, %v3681_v28  ;;  %v14522_v26 = vadd.f32 %v14332_v45, %v3649_v20  ;;  %v14525_v46 = vadd.f32 %v14345_v24, %v3656_v32 }
 0x3ad   :  { %v3702_v62 = vsel %vm3701_vm14, %v14348_v8, %v3700_v22  ;;  %v3709_v11 = vsel %vm3708_vm15, %v14358_v47, %v3707_v44  ;;  %v14534_v48 = vadd.f32 %v14352_v61, %v3663_v13  ;;  %v14537_v53 = vadd.f32 %v14355_v23, %v3670_v18  ;;  %v7255_v23 = vpop.eup %7254 }
 0x3ae   :  { %vm19336_vm13 = vcmp.eq.f32.partialorder %v14335_v63, 0.0  ;;  %vm19337_vm5 = vcmp.eq.f32.partialorder %v14340_v55, 0.0  ;;  %vm19338_vm14 = vcmp.eq.f32.partialorder %v14364_v54, inf  ;;  %v3728_v61 = vmul.f32 %v7251_v29, %v14390_v41  ;;  %v14646_v29 = vld [vmem:[#allocation5 + $0x20] sm:$0xff] }
 0x3af   :  { %v3691_v45 = vsel %vm19336_vm13, %v3690_v7, %v3688_v37  ;;  %v3698_v24 = vsel %vm19337_vm5, %v3697_v16, %v3695_v5  ;;  %v3716_v3 = vsel %vm19338_vm14, %v14364_v54, %v3714_v49  ;;  %vm3745_vm15 = vcmp.eq.f32.partialorder %v14402_v57, 0.0 }
 0x3b0   :  { %v3723_v9 = vsel %vm3722_vm7, %v14370_v50, %v3721_v35  ;;  %v14556_v63 = vadd.f32 %v14361_v10, %v3677_v6  ;;  %v14559_v7 = vadd.f32 %v14367_v42, %v3684_v2  ;;  %v3780_v55 = vmul.f32 %v3748_v19, %v3748_v19  ;;  %v14598_v50 = vld [vmem:[#allocation5] sm:$0xff]  ;;  %v14667_v2 = vld [vmem:[#allocation5 + $0x30] sm:$0xff] }
 0x3b1   :  { %v3705_v16 = vsel %vm3703_vm0, %v3704_v58, %v3702_v62  ;;  %v3712_v34 = vsel %vm3710_vm2, %v3711_v25, %v3709_v11  ;;  %v3735_v39 = vmul.f32 %v7253_v52, %v14398_v40  ;;  %v3781_v10 = vmul.f32 %v14522_v26, %v14522_v26  ;;  %v14678_v11 = vld [vmem:[#allocation5 + $0x38] sm:$0xff] }
 0x3b2   :  { %v3719_v42 = vsel %vm3717_vm9, %v3718_v12, %v3716_v3  ;;  %v14575_v38 = vadd.f32 %v14373_v60, %v3691_v45  ;;  %v14578_v36 = vadd.f32 %v14375_v21, %v3698_v24  ;;  %v3782_v8 = vmul.f32 %v14525_v46, %v14525_v46  ;;  %v14685_v24 = vld [vmem:[#allocation5 + $0x40] sm:$0xff] }
 0x3b3   :  { %v3726_v47 = vsel %vm3724_vm6, %v3725_v27, %v3723_v9  ;;  %v3730_v58 = vsel %vm3729_vm12, %v14390_v41, %v3728_v61  ;;  %v3742_v25 = vmul.f32 %v7255_v23, %v14402_v57  ;;  %v3783_v54 = vmul.f32 %v14534_v48, %v14534_v48  ;;  %v14695_v23 = vld [vmem:[#allocation5 + $0x48] sm:$0xff] }
 0x3b4   :  { %v14591_v60 = vadd.f32 %v14378_v30, %v3705_v16  ;;  %v14594_v21 = vadd.f32 %v14380_v31, %v3712_v34  ;;  %v3784_v12 = vmul.f32 %v14537_v53, %v14537_v53  ;;  %v14601_v27 = vadd.f32 %v14598_v50, %v3780_v55  ;;  %v14611_v31 = vld [vmem:[#allocation5 + $0x8] sm:$0xff]  ;;  %19339 = vst [vmem:[#allocation18_spill] sm:$0xff] %v14695_v23  ;;  %v14707_v16 = vld [vmem:[#allocation5 + $0x50] sm:$0xff] }
 0x3b5   :  { %v3737_v14 = vsel %vm3736_vm8, %v14398_v40, %v3735_v39  ;;  %v14607_v56 = vadd.f32 %v14382_v0, %v3719_v42  ;;  %v3785_v30 = vmul.f32 %v14556_v63, %v14556_v63  ;;  %v14614_v20 = vadd.f32 %v14611_v31, %v3781_v10  ;;  %v14623_v0 = vld [vmem:[#allocation5 + $0x10] sm:$0xff]  ;;  %19340 = vst [vmem:[#allocation11_spill] sm:$0xff] %v14707_v16  ;;  %v14716_v39 = vld [vmem:[#allocation5 + $0x58] sm:$0xff]  ;;  %v14725_v42 = vld [vmem:[#allocation5 + $0x60] sm:$0xff] }
 0x3b6   :  { %v3733_v32 = vsel %vm3731_vm1, %v3732_v43, %v3730_v58  ;;  %v3760_v33 = vadd.f32 %v14385_v15, %v3726_v47  ;;  %v3786_v28 = vmul.f32 %v14559_v7, %v14559_v7  ;;  %v14626_v22 = vadd.f32 %v14623_v0, %v3782_v8  ;;  %v14635_v43 = vld [vmem:[#allocation5 + $0x18] sm:$0xff]  ;;  %19341 = vst [vmem:[#allocation12_spill] sm:$0xff] %v14716_v39 }
 0x3b7   :  { %v3744_v44 = vsel %vm3743_vm4, %v14402_v57, %v3742_v25  ;;  %v14631_v13 = vadd.f32 -0.5, %v3748_v19  ;;  %v3787_v41 = vmul.f32 %v14575_v38, %v14575_v38  ;;  %v14638_v15 = vadd.f32 %v14635_v43, %v3783_v54  ;;  %v14655_v19 = vld [vmem:[#allocation5 + $0x28] sm:$0xff]  ;;  %19342 = vst [vmem:[#allocation13_spill] sm:$0xff] %v14725_v42 }
 0x3b8   :  { %v3740_v18 = vsel %vm3738_vm3, %v3739_v17, %v3737_v14  ;;  %v3788_v49 = vmul.f32 %v14578_v36, %v14578_v36  ;;  %v14649_v37 = vadd.f32 %v14646_v29, %v3784_v12  ;;  %7256 = vrsqrt.f32 %v14601_v27 }
 0x3b9   :  { %v3761_v5 = vadd.f32 %v14387_v1, %v3733_v32  ;;  %v3789_v35 = vmul.f32 %v14591_v60, %v14591_v60  ;;  %v14658_v40 = vadd.f32 %v14655_v19, %v3785_v30  ;;  %7258 = vrsqrt.f32 %v14614_v20  ;;  %v14762_v30 = vld [vmem:[#allocation5 + $0x70] sm:$0xff] }
 0x3ba   :  { %v3747_v17 = vsel %vm3745_vm15, %v3746_v59, %v3744_v44  ;;  %v3790_v6 = vmul.f32 %v14594_v21, %v14594_v21  ;;  %v14670_v1 = vadd.f32 %v14667_v2, %v3786_v28  ;;  %7260 = vrsqrt.f32 %v14626_v22  ;;  %19345 = vst [vmem:[#allocation16_spill] sm:$0xff] %v14762_v30 }
 0x3bb   :  { %v14674_v52 = vadd.f32 -0.5, %v14522_v26  ;;  %v3791_v62 = vmul.f32 %v14607_v56, %v14607_v56  ;;  %v14681_v57 = vadd.f32 %v14678_v11, %v3787_v41  ;;  %7262 = vrsqrt.f32 %v14638_v15 }
 0x3bc   :  { %v3762_v59 = vadd.f32 %v14393_v4, %v3740_v18  ;;  %v3792_v45 = vmul.f32 %v3760_v33, %v3760_v33  ;;  %v14688_v3 = vadd.f32 %v14685_v24, %v3788_v49  ;;  %7264 = vrsqrt.f32 %v14649_v37 }
 0x3bd   :  { %v3763_v26 = vadd.f32 %v14395_v51, %v3747_v17  ;;  %v14693_v61 = vadd.f32 -0.5, %v14525_v46  ;;  %v14698_v9 = vadd.f32 %v14695_v23, %v3789_v35  ;;  %7266 = vrsqrt.f32 %v14658_v40 }
 0x3be   :  { %v14702_v4 = vadd.f32 -0.5, %v14534_v48  ;;  %v14705_v55 = vadd.f32 -0.5, %v14537_v53  ;;  %v14710_v51 = vadd.f32 %v14707_v16, %v3790_v6  ;;  %7268 = vrsqrt.f32 %v14670_v1 }
 0x3bf   :  { %v14714_v46 = vadd.f32 -0.5, %v14556_v63  ;;  %v3793_v34 = vmul.f32 %v3761_v5, %v3761_v5  ;;  %v14719_v10 = vadd.f32 %v14716_v39, %v3791_v62  ;;  %7270 = vrsqrt.f32 %v14681_v57 }
 0x3c0   :  { %v14723_v48 = vadd.f32 -0.5, %v14559_v7  ;;  %v3794_v53 = vmul.f32 %v3762_v59, %v3762_v59  ;;  %v14728_v8 = vadd.f32 %v14725_v42, %v3792_v45  ;;  %7272 = vrsqrt.f32 %v14688_v3 }
 0x3c1   :  { %v14732_v63 = vadd.f32 -0.5, %v14575_v38  ;;  %v14735_v47 = vadd.f32 -0.5, %v14578_v36  ;;  %v3795_v58 = vmul.f32 %v3763_v26, %v3763_v26  ;;  %7274 = vrsqrt.f32 %v14698_v9  ;;  %v14752_v36 = vld [vmem:[#allocation5 + $0x68] sm:$0xff] }
 0x3c2   :  { %v14739_v7 = vadd.f32 -0.5, %v14591_v60  ;;  %v14742_v25 = vadd.f32 -0.5, %v14594_v21  ;;  %v14745_v54 = vadd.f32 -0.5, %v14607_v56  ;;  %7276 = vrsqrt.f32 %v14710_v51  ;;  %19343 = vst [vmem:[#allocation14_spill] sm:$0xff] %v14752_v36 }
 0x3c3   :  { %v14748_v12 = vadd.f32 -0.5, %v3760_v33  ;;  %v14750_v38 = vadd.f32 -0.5, %v3761_v5  ;;  %v14755_v14 = vadd.f32 %v14752_v36, %v3793_v34  ;;  %7278 = vrsqrt.f32 %v14719_v10  ;;  %v14768_v33 = vld [vmem:[#allocation5 + $0x78] sm:$0xff] }
 0x3c4   :  { %v14758_v60 = vadd.f32 -0.5, %v3762_v59  ;;  %v14760_v21 = vadd.f32 -0.5, %v3763_v26  ;;  %v14765_v56 = vadd.f32 %v14762_v30, %v3794_v53  ;;  %7280 = vrsqrt.f32 %v14728_v8  ;;  %19346 = vst [vmem:[#allocation17_spill] sm:$0xff] %v14768_v33 }
 0x3c5   :  { %v7257_v32 = vpop.eup %7256  ;;  %v14771_v28 = vadd.f32 %v14768_v33, %v3795_v58  ;;  %vm3814_vm9 = vcmp.eq.f32.partialorder %v14601_v27, inf  ;;  %vm3821_vm2 = vcmp.eq.f32.partialorder %v14614_v20, inf  ;;  %vm3816_vm7 = vcmp.eq.f32.partialorder %v14601_v27, 0.0 }
 0x3c6   :  { %19344 = vst [vmem:[#allocation15_spill] sm:$0xff] %v14760_v21  ;;  %v7259_v41 = vpop.eup %7258  ;;  %vm3823_vm0 = vcmp.eq.f32.partialorder %v14614_v20, 0.0  ;;  %vm3828_vm6 = vcmp.eq.f32.partialorder %v14626_v22, inf  ;;  %vm3830_vm12 = vcmp.eq.f32.partialorder %v14626_v22, 0.0  ;;  %vm3835_vm8 = vcmp.eq.f32.partialorder %v14638_v15, inf }
 0x3c7   :  { %v7261_v49 = vpop.eup %7260  ;;  %7282 = vrsqrt.f32 %v14755_v14  ;;  %vm3837_vm1 = vcmp.eq.f32.partialorder %v14638_v15, 0.0  ;;  %vm3842_vm4 = vcmp.eq.f32.partialorder %v14649_v37, inf  ;;  %vm3849_vm11 = vcmp.eq.f32.partialorder %v14658_v40, inf }
 0x3c8   :  { %v7263_v17 = vpop.eup %7262  ;;  %v3813_v59 = vmul.f32 %v7257_v32, %v14601_v27  ;;  %vm3856_vm3 = vcmp.eq.f32.partialorder %v14670_v1, inf  ;;  %7284 = vrsqrt.f32 %v14765_v56  ;;  %v3820_v34 = vmul.f32 %v7259_v41, %v14614_v20 }
 0x3c9   :  { %v7265_v62 = vpop.eup %7264  ;;  %v3827_v53 = vmul.f32 %v7261_v49, %v14626_v22  ;;  %v3859_v58 = vand.u32 2147483648, %v14670_v1  ;;  %7286 = vrsqrt.f32 %v14771_v28  ;;  %v3834_v49 = vmul.f32 %v7263_v17, %v14638_v15 }
 0x3ca   :  { %v7267_v26 = vpop.eup %7266  ;;  %v3841_v35 = vmul.f32 %v7265_v62, %v14649_v37  ;;  %vm3877_vm14 = vcmp.eq.f32.partialorder %v14698_v9, inf  ;;  %v3815_v6 = vsel %vm3814_vm9, %v14601_v27, %v3813_v59  ;;  %vm3884_vm15 = vcmp.eq.f32.partialorder %v14710_v51, inf }
 0x3cb   :  { %v7269_v32 = vpop.eup %7268  ;;  %v3822_v62 = vsel %vm3821_vm2, %v14614_v20, %v3820_v34  ;;  %v3829_v5 = vsel %vm3828_vm6, %v14626_v22, %v3827_v53  ;;  %v3848_v44 = vmul.f32 %v7267_v26, %v14658_v40  ;;  %vm3879_vm9 = vcmp.eq.f32.partialorder %v14698_v9, 0.0 }
 0x3cc   :  { %v7271_v41 = vpop.eup %7270  ;;  %v3855_v33 = vmul.f32 %v7269_v32, %v14670_v1  ;;  %vm3886_vm13 = vcmp.eq.f32.partialorder %v14710_v51, 0.0  ;;  %vm3893_vm10 = vcmp.eq.f32.partialorder %v14719_v10, 0.0  ;;  %v3894_v18 = vand.u32 2147483648, %v14719_v10 }
 0x3cd   :  { %v7273_v45 = vpop.eup %7272  ;;  %vm3898_vm5 = vcmp.eq.f32.partialorder %v14728_v8, inf  ;;  %v3901_v34 = vand.u32 2147483648, %v14728_v8  ;;  %v3836_v26 = vsel %vm3835_vm8, %v14638_v15, %v3834_v49  ;;  %v3843_v32 = vsel %vm3842_vm4, %v14649_v37, %v3841_v35 }
 0x3ce   :  { %v7275_v17 = vpop.eup %7274  ;;  %v3862_v36 = vmul.f32 %v7271_v41, %v14681_v57  ;;  %v3869_v42 = vmul.f32 %v7273_v45, %v14688_v3  ;;  %vm3900_vm2 = vcmp.eq.f32.partialorder %v14728_v8, 0.0  ;;  %vm3905_vm6 = vcmp.eq.f32.partialorder %v14755_v14, inf }
 0x3cf   :  { %v7277_v59 = vpop.eup %7276  ;;  %v19347_v30 = vand.u32 2147483648, %v14601_v27  ;;  %v19348_v49 = vand.u32 2147483648, %v14614_v20  ;;  %v19349_v35 = vand.u32 2147483648, %v14626_v22  ;;  %v3915_v41 = vand.u32 2147483648, %v14765_v56 }
 0x3d0   :  { %v7279_v53 = vpop.eup %7278  ;;  %v3850_v21 = vsel %vm3849_vm11, %v14658_v40, %v3848_v44  ;;  %v3857_v27 = vsel %vm3856_vm3, %v14670_v1, %v3855_v33  ;;  %v3883_v20 = vmul.f32 %v7277_v59, %v14710_v51  ;;  %v3922_v33 = vand.u32 2147483648, %v14771_v28 }
 0x3d1   :  { %v7281_v39 = vpop.eup %7280  ;;  %v3818_v16 = vsel %vm3816_vm7, %v19347_v30, %v3815_v6  ;;  %v3825_v23 = vsel %vm3823_vm0, %v19348_v49, %v3822_v62  ;;  %v3832_v45 = vsel %vm3830_vm12, %v19349_v35, %v3829_v5  ;;  %v3876_v30 = vmul.f32 %v7275_v17, %v14698_v9 }
 0x3d2   :  { %vm3912_vm7 = vcmp.eq.f32.partialorder %v14765_v56, inf  ;;  %v19350_v6 = vand.u32 2147483648, %v14638_v15  ;;  %v19351_v5 = vand.u32 2147483648, %v14649_v37  ;;  %vm19352_vm0 = vcmp.eq.f32.partialorder %v14649_v37, 0.0 }
 0x3d3   :  { %v3890_v62 = vmul.f32 %v7279_v53, %v14719_v10  ;;  %vm3907_vm12 = vcmp.eq.f32.partialorder %v14755_v14, 0.0  ;;  %vm19353_vm8 = vcmp.eq.f32.partialorder %v14681_v57, inf  ;;  %vm19354_vm4 = vcmp.eq.f32.partialorder %v14688_v3, inf }
 0x3d4   :  { %v3839_v22 = vsel %vm3837_vm1, %v19350_v6, %v3836_v26  ;;  %v3846_v44 = vsel %vm19352_vm0, %v19351_v5, %v3843_v32  ;;  %v7283_v17 = vpop.eup %7282  ;;  %v3864_v59 = vsel %vm19353_vm8, %v14681_v57, %v3862_v36  ;;  %v3871_v15 = vsel %vm19354_vm4, %v14688_v3, %v3869_v42 }
 0x3d5   :  { %v3897_v26 = vmul.f32 %v7281_v39, %v14728_v8  ;;  %vm3919_vm1 = vcmp.eq.f32.partialorder %v14771_v28, inf  ;;  %v3924_v37 = vadd.f32 %v14631_v13, %v3818_v16  ;;  %v19355_v53 = vand.u32 2147483648, %v14658_v40  ;;  %v7285_v39 = vpop.eup %7284 }
 0x3d6   :  { %vm19356_vm11 = vcmp.eq.f32.partialorder %v14658_v40, 0.0  ;;  %vm19357_vm3 = vcmp.eq.f32.partialorder %v14670_v1, 0.0  ;;  %vm3914_vm0 = vcmp.eq.f32.partialorder %v14765_v56, 0.0  ;;  %v3925_v36 = vadd.f32 %v14674_v52, %v3825_v23 }
 0x3d7   :  { %v3853_v32 = vsel %vm19356_vm11, %v19355_v53, %v3850_v21  ;;  %v3860_v49 = vsel %vm19357_vm3, %v3859_v58, %v3857_v27  ;;  %v14892_v42 = vadd.f32 %v14693_v61, %v3832_v45  ;;  %v3878_v13 = vsel %vm3877_vm14, %v14698_v9, %v3876_v30 }
 0x3d8   :  { %v3885_v40 = vsel %vm3884_vm15, %v14710_v51, %v3883_v20  ;;  %v14901_v16 = vadd.f32 %v14702_v4, %v3839_v22  ;;  %v14904_v1 = vadd.f32 %v14705_v55, %v3846_v44  ;;  %v19358_v52 = vand.u32 2147483648, %v14681_v57  ;;  %v7287_v55 = vpop.eup %7286 }
 0x3d9   :  { %vm19359_vm8 = vcmp.eq.f32.partialorder %v14681_v57, 0.0  ;;  %v19360_v23 = vand.u32 2147483648, %v14688_v3  ;;  %vm19361_vm4 = vcmp.eq.f32.partialorder %v14688_v3, 0.0  ;;  %vm19362_vm14 = vcmp.eq.f32.partialorder %v14719_v10, inf }
 0x3da   :  { %v3867_v61 = vsel %vm19359_vm8, %v19358_v52, %v3864_v59  ;;  %v3892_v58 = vsel %vm19362_vm14, %v14719_v10, %v3890_v62  ;;  %v3904_v4 = vmul.f32 %v7283_v17, %v14755_v14  ;;  %vm3921_vm15 = vcmp.eq.f32.partialorder %v14771_v28, 0.0 }
 0x3db   :  { %v3874_v21 = vsel %vm19361_vm4, %v19360_v23, %v3871_v15  ;;  %v3899_v35 = vsel %vm3898_vm5, %v14728_v8, %v3897_v26  ;;  %v3929_v57 = vadd.f32 %v14714_v46, %v3853_v32  ;;  %v3930_v45 = vadd.f32 %v14723_v48, %v3860_v49 }
 0x3dc   :  { %v3956_v27 = vmul.f32 %v3924_v37, %v3924_v37  ;;  %v19363_v3 = vand.u32 2147483648, %v14698_v9  ;;  %v19364_v20 = vand.u32 2147483648, %v14710_v51  ;;  %v3911_v22 = vmul.f32 %v7285_v39, %v14765_v56 }
 0x3dd   :  { %v3957_v5 = vmul.f32 %v3925_v36, %v3925_v36  ;;  %v3895_v44 = vsel %vm3893_vm10, %v3894_v18, %v3892_v58  ;;  %v3931_v46 = vadd.f32 %v14732_v63, %v3867_v61  ;;  %v3932_v48 = vadd.f32 %v14735_v47, %v3874_v21 }
 0x3de   :  { %v3881_v30 = vsel %vm3879_vm9, %v19363_v3, %v3878_v13  ;;  %v3888_v6 = vsel %vm3886_vm13, %v19364_v20, %v3885_v40  ;;  %v3958_v62 = vmul.f32 %v14892_v42, %v14892_v42  ;;  %v3902_v9 = vsel %vm3900_vm2, %v3901_v34, %v3899_v35 }
 0x3df   :  { %v3906_v51 = vsel %vm3905_vm6, %v14755_v14, %v3904_v4  ;;  %v3918_v17 = vmul.f32 %v7287_v55, %v14771_v28  ;;  %v3959_v10 = vmul.f32 %v14901_v16, %v14901_v16  ;;  %v3933_v18 = vadd.f32 %v14739_v7, %v3881_v30 }
 0x3e0   :  { %v3934_v63 = vadd.f32 %v14742_v25, %v3888_v6  ;;  %v3960_v47 = vmul.f32 %v14904_v1, %v14904_v1  ;;  %v14952_v59 = vadd.f32 %v14598_v50, %v3956_v27  ;;  %v3913_v8 = vsel %vm3912_vm7, %v14765_v56, %v3911_v22  ;;  %v19368_v6 = vld [vmem:[#allocation11_spill] sm:$0xff] }
 0x3e1   :  { %v3935_v34 = vadd.f32 %v14745_v54, %v3895_v44  ;;  %v3961_v15 = vmul.f32 %v3929_v57, %v3929_v57  ;;  %v14959_v26 = vadd.f32 %v14611_v31, %v3957_v5  ;;  %v19365_v7 = vand.u32 2147483648, %v14755_v14  ;;  %v19369_v44 = vld [vmem:[#allocation12_spill] sm:$0xff] }
 0x3e2   :  { %v3936_v53 = vadd.f32 %v14748_v12, %v3902_v9  ;;  %v3962_v32 = vmul.f32 %v3930_v45, %v3930_v45  ;;  %v14967_v49 = vadd.f32 %v14623_v0, %v3958_v62  ;;  %v3920_v39 = vsel %vm3919_vm1, %v14771_v28, %v3918_v17 }
 0x3e3   :  { %v3909_v25 = vsel %vm3907_vm12, %v19365_v7, %v3906_v51  ;;  %v14972_v54 = vadd.f32 -0.5, %v3924_v37  ;;  %v3963_v13 = vmul.f32 %v3931_v46, %v3931_v46  ;;  %v14975_v40 = vadd.f32 %v14635_v43, %v3959_v10  ;;  %v19370_v51 = vld [vmem:[#allocation13_spill] sm:$0xff] }
 0x3e4   :  { %v3916_v14 = vsel %vm3914_vm0, %v3915_v41, %v3913_v8  ;;  %v3964_v12 = vmul.f32 %v3932_v48, %v3932_v48  ;;  %v14982_v52 = vadd.f32 %v14646_v29, %v3960_v47  ;;  %7288 = vrsqrt.f32 %v14952_v59 }
 0x3e5   :  { %v3937_v61 = vadd.f32 %v14750_v38, %v3909_v25  ;;  %v3965_v23 = vmul.f32 %v3933_v18, %v3933_v18  ;;  %v14987_v37 = vadd.f32 %v14655_v19, %v3961_v15  ;;  %7290 = vrsqrt.f32 %v14959_v26  ;;  %v19371_v25 = vld [vmem:[#allocation14_spill] sm:$0xff] }
 0x3e6   :  { %v3923_v56 = vsel %vm3921_vm15, %v3922_v33, %v3920_v39  ;;  %v3966_v41 = vmul.f32 %v3934_v63, %v3934_v63  ;;  %v14995_v21 = vadd.f32 %v14667_v2, %v3962_v32  ;;  %7292 = vrsqrt.f32 %v14967_v49  ;;  %v19366_v33 = vld [vmem:[#allocation15_spill] sm:$0xff]  ;;  %v19374_v39 = vld [vmem:[#allocation17_spill] sm:$0xff] }
 0x3e7   :  { %v14998_v58 = vadd.f32 -0.5, %v3925_v36  ;;  %v3967_v38 = vmul.f32 %v3935_v34, %v3935_v34  ;;  %v15001_v4 = vadd.f32 %v14678_v11, %v3963_v13  ;;  %7294 = vrsqrt.f32 %v14975_v40  ;;  %v19367_v36 = vld [vmem:[#allocation18_spill] sm:$0xff] }
 0x3e8   :  { %v3938_v55 = vadd.f32 %v14758_v60, %v3916_v14  ;;  %v3968_v35 = vmul.f32 %v3936_v53, %v3936_v53  ;;  %v15006_v28 = vadd.f32 %v14685_v24, %v3964_v12  ;;  %7296 = vrsqrt.f32 %v14982_v52 }
 0x3e9   :  { %v3939_v27 = vadd.f32 %v19366_v33, %v3923_v56  ;;  %v15011_v3 = vadd.f32 -0.5, %v14892_v42  ;;  %v15014_v30 = vadd.f32 %v19367_v36, %v3965_v23  ;;  %7298 = vrsqrt.f32 %v14987_v37 }
 0x3ea   :  { %v15018_v20 = vadd.f32 -0.5, %v14901_v16  ;;  %v15021_v60 = vadd.f32 -0.5, %v14904_v1  ;;  %v15024_v22 = vadd.f32 %v19368_v6, %v3966_v41  ;;  %7300 = vrsqrt.f32 %v14995_v21 }
 0x3eb   :  { %v15027_v5 = vadd.f32 -0.5, %v3929_v57  ;;  %v3969_v42 = vmul.f32 %v3937_v61, %v3937_v61  ;;  %v15030_v62 = vadd.f32 %v19369_v44, %v3967_v38  ;;  %7302 = vrsqrt.f32 %v15001_v4 }
 0x3ec   :  { %v15033_v9 = vadd.f32 -0.5, %v3930_v45  ;;  %v3970_v16 = vmul.f32 %v3938_v55, %v3938_v55  ;;  %v15036_v17 = vadd.f32 %v19370_v51, %v3968_v35  ;;  %7304 = vrsqrt.f32 %v15006_v28 }
 0x3ed   :  { %v15039_v1 = vadd.f32 -0.5, %v3931_v46  ;;  %v15041_v10 = vadd.f32 -0.5, %v3932_v48  ;;  %v3971_v57 = vmul.f32 %v3939_v27, %v3939_v27  ;;  %7306 = vrsqrt.f32 %v15014_v30 }
 0x3ee   :  { %v15044_v47 = vadd.f32 -0.5, %v3933_v18  ;;  %v15046_v8 = vadd.f32 -0.5, %v3934_v63  ;;  %v15048_v15 = vadd.f32 -0.5, %v3935_v34  ;;  %7308 = vrsqrt.f32 %v15024_v22  ;;  %v19373_v18 = vld [vmem:[#allocation16_spill] sm:$0xff] }
 0x3ef   :  { %v15051_v45 = vadd.f32 -0.5, %v3936_v53  ;;  %v15053_v7 = vadd.f32 -0.5, %v3937_v61  ;;  %v15056_v46 = vadd.f32 %v19371_v25, %v3969_v42  ;;  %7310 = vrsqrt.f32 %v15030_v62 }
 0x3f0   :  { %v15059_v48 = vadd.f32 -0.5, %v3938_v55  ;;  %v15061_v32 = vadd.f32 -0.5, %v3939_v27  ;;  %v15064_v63 = vadd.f32 %v19373_v18, %v3970_v16  ;;  %7312 = vrsqrt.f32 %v15036_v17 }
 0x3f1   :  { %v7289_v34 = vpop.eup %7288  ;;  %v15068_v53 = vadd.f32 %v19374_v39, %v3971_v57  ;;  %vm3990_vm10 = vcmp.eq.f32.partialorder %v14952_v59, inf  ;;  %vm3997_vm13 = vcmp.eq.f32.partialorder %v14959_v26, inf  ;;  %vm3992_vm5 = vcmp.eq.f32.partialorder %v14952_v59, 0.0 }
 0x3f2   :  { %19372 = vst [vmem:[#allocation15_spill] sm:$0xff] %v15061_v32  ;;  %v7291_v14 = vpop.eup %7290  ;;  %vm3999_vm9 = vcmp.eq.f32.partialorder %v14959_v26, 0.0  ;;  %vm4004_vm2 = vcmp.eq.f32.partialorder %v14967_v49, inf  ;;  %vm4006_vm6 = vcmp.eq.f32.partialorder %v14967_v49, 0.0  ;;  %vm4011_vm7 = vcmp.eq.f32.partialorder %v14975_v40, inf }
 0x3f3   :  { %v7293_v61 = vpop.eup %7292  ;;  %7314 = vrsqrt.f32 %v15056_v46  ;;  %vm4013_vm12 = vcmp.eq.f32.partialorder %v14975_v40, 0.0  ;;  %vm4018_vm1 = vcmp.eq.f32.partialorder %v14982_v52, inf  ;;  %vm4025_vm3 = vcmp.eq.f32.partialorder %v14987_v37, inf }
 0x3f4   :  { %v7295_v41 = vpop.eup %7294  ;;  %v3989_v35 = vmul.f32 %v7289_v34, %v14952_v59  ;;  %vm4032_vm0 = vcmp.eq.f32.partialorder %v14995_v21, inf  ;;  %7316 = vrsqrt.f32 %v15064_v63  ;;  %v3996_v42 = vmul.f32 %v7291_v14, %v14959_v26 }
 0x3f5   :  { %v7297_v55 = vpop.eup %7296  ;;  %v4003_v16 = vmul.f32 %v7293_v61, %v14967_v49  ;;  %v4035_v57 = vand.u32 2147483648, %v14995_v21  ;;  %7318 = vrsqrt.f32 %v15068_v53  ;;  %v4010_v61 = vmul.f32 %v7295_v41, %v14975_v40 }
 0x3f6   :  { %v7299_v27 = vpop.eup %7298  ;;  %v4017_v56 = vmul.f32 %v7297_v55, %v14982_v52  ;;  %vm4053_vm14 = vcmp.eq.f32.partialorder %v15014_v30, inf  ;;  %v3991_v38 = vsel %vm3990_vm10, %v14952_v59, %v3989_v35  ;;  %vm4060_vm15 = vcmp.eq.f32.partialorder %v15024_v22, inf }
 0x3f7   :  { %v7301_v34 = vpop.eup %7300  ;;  %v3998_v55 = vsel %vm3997_vm13, %v14959_v26, %v3996_v42  ;;  %v4005_v23 = vsel %vm4004_vm2, %v14967_v49, %v4003_v16  ;;  %v4024_v13 = vmul.f32 %v7299_v27, %v14987_v37  ;;  %vm4055_vm10 = vcmp.eq.f32.partialorder %v15014_v30, 0.0 }
 0x3f8   :  { %v7303_v14 = vpop.eup %7302  ;;  %v4031_v39 = vmul.f32 %v7301_v34, %v14995_v21  ;;  %vm4062_vm8 = vcmp.eq.f32.partialorder %v15024_v22, 0.0  ;;  %vm4069_vm11 = vcmp.eq.f32.partialorder %v15030_v62, 0.0  ;;  %v4070_v12 = vand.u32 2147483648, %v15030_v62 }
 0x3f9   :  { %v7305_v33 = vpop.eup %7304  ;;  %vm4074_vm4 = vcmp.eq.f32.partialorder %v15036_v17, inf  ;;  %v4077_v42 = vand.u32 2147483648, %v15036_v17  ;;  %v4012_v27 = vsel %vm4011_vm7, %v14975_v40, %v4010_v61  ;;  %v4019_v34 = vsel %vm4018_vm1, %v14982_v52, %v4017_v56 }
 0x3fa   :  { %v7307_v41 = vpop.eup %7306  ;;  %v4038_v25 = vmul.f32 %v7303_v14, %v15001_v4  ;;  %v4045_v51 = vmul.f32 %v7305_v33, %v15006_v28  ;;  %vm4076_vm13 = vcmp.eq.f32.partialorder %v15036_v17, 0.0  ;;  %vm4081_vm2 = vcmp.eq.f32.partialorder %v15056_v46, inf }
 0x3fb   :  { %v7309_v35 = vpop.eup %7308  ;;  %v19375_v18 = vand.u32 2147483648, %v14952_v59  ;;  %v19376_v61 = vand.u32 2147483648, %v14959_v26  ;;  %v19377_v56 = vand.u32 2147483648, %v14967_v49  ;;  %v4091_v14 = vand.u32 2147483648, %v15064_v63 }
 0x3fc   :  { %v7311_v16 = vpop.eup %7310  ;;  %v4026_v32 = vsel %vm4025_vm3, %v14987_v37, %v4024_v13  ;;  %v4033_v59 = vsel %vm4032_vm0, %v14995_v21, %v4031_v39  ;;  %v4059_v26 = vmul.f32 %v7309_v35, %v15024_v22  ;;  %v4098_v39 = vand.u32 2147483648, %v15068_v53 }
 0x3fd   :  { %v7313_v44 = vpop.eup %7312  ;;  %v3994_v6 = vsel %vm3992_vm5, %v19375_v18, %v3991_v38  ;;  %v4001_v36 = vsel %vm3999_vm9, %v19376_v61, %v3998_v55  ;;  %v4008_v33 = vsel %vm4006_vm6, %v19377_v56, %v4005_v23  ;;  %v4052_v18 = vmul.f32 %v7307_v41, %v15014_v30 }
 0x3fe   :  { %vm4088_vm5 = vcmp.eq.f32.partialorder %v15064_v63, inf  ;;  %v19378_v38 = vand.u32 2147483648, %v14975_v40  ;;  %v19379_v23 = vand.u32 2147483648, %v14982_v52  ;;  %vm19380_vm9 = vcmp.eq.f32.partialorder %v14982_v52, 0.0 }
 0x3ff   :  { %v4066_v55 = vmul.f32 %v7311_v16, %v15030_v62  ;;  %vm4083_vm6 = vcmp.eq.f32.partialorder %v15056_v46, 0.0  ;;  %vm19381_vm7 = vcmp.eq.f32.partialorder %v15001_v4, inf  ;;  %vm19382_vm1 = vcmp.eq.f32.partialorder %v15006_v28, inf }
 0x400   :  { %v4015_v49 = vsel %vm4013_vm12, %v19378_v38, %v4012_v27  ;;  %v4022_v13 = vsel %vm19380_vm9, %v19379_v23, %v4019_v34  ;;  %v7315_v41 = vpop.eup %7314  ;;  %v4040_v35 = vsel %vm19381_vm7, %v15001_v4, %v4038_v25  ;;  %v4047_v40 = vsel %vm19382_vm1, %v15006_v28, %v4045_v51 }
 0x401   :  { %v4073_v27 = vmul.f32 %v7313_v44, %v15036_v17  ;;  %vm4095_vm12 = vcmp.eq.f32.partialorder %v15068_v53, inf  ;;  %v4100_v52 = vadd.f32 %v14972_v54, %v3994_v6  ;;  %v19383_v16 = vand.u32 2147483648, %v14987_v37  ;;  %v7317_v44 = vpop.eup %7316 }
 0x402   :  { %vm19384_vm3 = vcmp.eq.f32.partialorder %v14987_v37, 0.0  ;;  %vm19385_vm0 = vcmp.eq.f32.partialorder %v14995_v21, 0.0  ;;  %vm4090_vm9 = vcmp.eq.f32.partialorder %v15064_v63, 0.0  ;;  %v4101_v25 = vadd.f32 %v14998_v58, %v4001_v36 }
 0x403   :  { %v4029_v34 = vsel %vm19384_vm3, %v19383_v16, %v4026_v32  ;;  %v4036_v61 = vsel %vm19385_vm0, %v4035_v57, %v4033_v59  ;;  %v15189_v51 = vadd.f32 %v15011_v3, %v4008_v33  ;;  %v4054_v54 = vsel %vm4053_vm14, %v15014_v30, %v4052_v18 }
 0x404   :  { %v4061_v37 = vsel %vm4060_vm15, %v15024_v22, %v4059_v26  ;;  %v15198_v6 = vadd.f32 %v15018_v20, %v4015_v49  ;;  %v15201_v21 = vadd.f32 %v15021_v60, %v4022_v13  ;;  %v19386_v58 = vand.u32 2147483648, %v15001_v4  ;;  %v7319_v60 = vpop.eup %7318 }
 0x405   :  { %vm19387_vm7 = vcmp.eq.f32.partialorder %v15001_v4, 0.0  ;;  %v19388_v36 = vand.u32 2147483648, %v15006_v28  ;;  %vm19389_vm1 = vcmp.eq.f32.partialorder %v15006_v28, 0.0  ;;  %vm19390_vm14 = vcmp.eq.f32.partialorder %v15030_v62, inf }
 0x406   :  { %v4043_v3 = vsel %vm19387_vm7, %v19386_v58, %v4040_v35  ;;  %v4068_v57 = vsel %vm19390_vm14, %v15030_v62, %v4066_v55  ;;  %v4080_v20 = vmul.f32 %v7315_v41, %v15056_v46  ;;  %vm4097_vm15 = vcmp.eq.f32.partialorder %v15068_v53, 0.0 }
 0x407   :  { %v4050_v32 = vsel %vm19389_vm1, %v19388_v36, %v4047_v40  ;;  %v4075_v56 = vsel %vm4074_vm4, %v15036_v17, %v4073_v27  ;;  %v4105_v4 = vadd.f32 %v15027_v5, %v4029_v34  ;;  %v4106_v33 = vadd.f32 %v15033_v9, %v4036_v61 }
 0x408   :  { %v4132_v59 = vmul.f32 %v4100_v52, %v4100_v52  ;;  %v19391_v28 = vand.u32 2147483648, %v15014_v30  ;;  %v19392_v26 = vand.u32 2147483648, %v15024_v22  ;;  %v4087_v49 = vmul.f32 %v7317_v44, %v15064_v63 }
 0x409   :  { %v4133_v23 = vmul.f32 %v4101_v25, %v4101_v25  ;;  %v4071_v13 = vsel %vm4069_vm11, %v4070_v12, %v4068_v57  ;;  %v4107_v5 = vadd.f32 %v15039_v1, %v4043_v3  ;;  %v4108_v9 = vadd.f32 %v15041_v10, %v4050_v32 }
 0x40a   :  { %v4057_v18 = vsel %vm4055_vm10, %v19391_v28, %v4054_v54  ;;  %v4064_v38 = vsel %vm4062_vm8, %v19392_v26, %v4061_v37  ;;  %v4134_v55 = vmul.f32 %v15189_v51, %v15189_v51  ;;  %v4078_v30 = vsel %vm4076_vm13, %v4077_v42, %v4075_v56  ;;  %v19398_v28 = vld [vmem:[#allocation13_spill] sm:$0xff] }
 0x40b   :  { %v4082_v22 = vsel %vm4081_vm2, %v15056_v46, %v4080_v20  ;;  %v4094_v41 = vmul.f32 %v7319_v60, %v15068_v53  ;;  %v4135_v62 = vmul.f32 %v15198_v6, %v15198_v6  ;;  %v4109_v12 = vadd.f32 %v15044_v47, %v4057_v18  ;;  %v19397_v60 = vld [vmem:[#allocation12_spill] sm:$0xff] }
 0x40c   :  { %v4110_v1 = vadd.f32 %v15046_v8, %v4064_v38  ;;  %v4136_v10 = vmul.f32 %v15201_v21, %v15201_v21  ;;  %v15249_v35 = vadd.f32 %v14598_v50, %v4132_v59  ;;  %v4089_v17 = vsel %vm4088_vm5, %v15064_v63, %v4087_v49 }
 0x40d   :  { %v4111_v42 = vadd.f32 %v15048_v15, %v4071_v13  ;;  %v4137_v40 = vmul.f32 %v4105_v4, %v4105_v4  ;;  %v15256_v27 = vadd.f32 %v14611_v31, %v4133_v23  ;;  %v19393_v47 = vand.u32 2147483648, %v15056_v46 }
 0x40e   :  { %v4112_v16 = vadd.f32 %v15051_v45, %v4078_v30  ;;  %v4138_v34 = vmul.f32 %v4106_v33, %v4106_v33  ;;  %v15264_v50 = vadd.f32 %v14623_v0, %v4134_v55  ;;  %v4096_v61 = vsel %vm4095_vm12, %v15068_v53, %v4094_v41  ;;  %v19399_v55 = vld [vmem:[#allocation14_spill] sm:$0xff] }
 0x40f   :  { %v4085_v8 = vsel %vm4083_vm6, %v19393_v47, %v4082_v22  ;;  %v15269_v15 = vadd.f32 -0.5, %v4100_v52  ;;  %v4139_v44 = vmul.f32 %v4107_v5, %v4107_v5  ;;  %v15272_v31 = vadd.f32 %v14635_v43, %v4135_v62  ;;  %v19400_v22 = vld [vmem:[#allocation16_spill] sm:$0xff] }
 0x410   :  { %v4092_v46 = vsel %vm4090_vm9, %v4091_v14, %v4089_v17  ;;  %v4140_v45 = vmul.f32 %v4108_v9, %v4108_v9  ;;  %v15279_v54 = vadd.f32 %v14646_v29, %v4136_v10  ;;  %7320 = vrsqrt.f32 %v15249_v35 }
 0x411   :  { %v4113_v0 = vadd.f32 %v15053_v7, %v4085_v8  ;;  %v4141_v37 = vmul.f32 %v4109_v12, %v4109_v12  ;;  %v15284_v52 = vadd.f32 %v14655_v19, %v4137_v40  ;;  %7322 = vrsqrt.f32 %v15256_v27 }
 0x412   :  { %v4099_v43 = vsel %vm4097_vm15, %v4098_v39, %v4096_v61  ;;  %v4142_v63 = vmul.f32 %v4110_v1, %v4110_v1  ;;  %v15292_v14 = vadd.f32 %v14667_v2, %v4138_v34  ;;  %7324 = vrsqrt.f32 %v15264_v50  ;;  %v19394_v2 = vld [vmem:[#allocation15_spill] sm:$0xff] }
 0x413   :  { %v15295_v29 = vadd.f32 -0.5, %v4101_v25  ;;  %v4143_v7 = vmul.f32 %v4111_v42, %v4111_v42  ;;  %v15298_v58 = vadd.f32 %v14678_v11, %v4139_v44  ;;  %7326 = vrsqrt.f32 %v15272_v31  ;;  %v19395_v25 = vld [vmem:[#allocation18_spill] sm:$0xff] }
 0x414   :  { %v4114_v19 = vadd.f32 %v15059_v48, %v4092_v46  ;;  %v4144_v3 = vmul.f32 %v4112_v16, %v4112_v16  ;;  %v15303_v53 = vadd.f32 %v14685_v24, %v4140_v45  ;;  %7328 = vrsqrt.f32 %v15279_v54  ;;  %v19396_v24 = vld [vmem:[#allocation11_spill] sm:$0xff] }
 0x415   :  { %v4115_v39 = vadd.f32 %v19394_v2, %v4099_v43  ;;  %v15308_v36 = vadd.f32 -0.5, %v15189_v51  ;;  %v15311_v32 = vadd.f32 %v19395_v25, %v4141_v37  ;;  %7330 = vrsqrt.f32 %v15284_v52 }
 0x416   :  { %v15315_v11 = vadd.f32 -0.5, %v15198_v6  ;;  %v15318_v48 = vadd.f32 -0.5, %v15201_v21  ;;  %v15321_v57 = vadd.f32 %v19396_v24, %v4142_v63  ;;  %7332 = vrsqrt.f32 %v15292_v14 }
 0x417   :  { %v15324_v20 = vadd.f32 -0.5, %v4105_v4  ;;  %v4145_v51 = vmul.f32 %v4113_v0, %v4113_v0  ;;  %v15327_v56 = vadd.f32 %v19397_v60, %v4143_v7  ;;  %7334 = vrsqrt.f32 %v15298_v58 }
 0x418   :  { %v15330_v59 = vadd.f32 -0.5, %v4106_v33  ;;  %v4146_v6 = vmul.f32 %v4114_v19, %v4114_v19  ;;  %v15333_v18 = vadd.f32 %v19398_v28, %v4144_v3  ;;  %7336 = vrsqrt.f32 %v15303_v53 }
 0x419   :  { %v15336_v21 = vadd.f32 -0.5, %v4107_v5  ;;  %v15338_v26 = vadd.f32 -0.5, %v4108_v9  ;;  %v4147_v4 = vmul.f32 %v4115_v39, %v4115_v39  ;;  %7338 = vrsqrt.f32 %v15311_v32 }
 0x41a   :  { %v15341_v38 = vadd.f32 -0.5, %v4109_v12  ;;  %v15343_v49 = vadd.f32 -0.5, %v4110_v1  ;;  %v15345_v23 = vadd.f32 -0.5, %v4111_v42  ;;  %7340 = vrsqrt.f32 %v15321_v57  ;;  %v19401_v12 = vld [vmem:[#allocation17_spill] sm:$0xff] }
 0x41b   :  { %v15348_v33 = vadd.f32 -0.5, %v4112_v16  ;;  %v15350_v13 = vadd.f32 -0.5, %v4113_v0  ;;  %v15353_v5 = vadd.f32 %v19399_v55, %v4145_v51  ;;  %7342 = vrsqrt.f32 %v15327_v56 }
 0x41c   :  { %v15356_v9 = vadd.f32 -0.5, %v4114_v19  ;;  %v15358_v30 = vadd.f32 -0.5, %v4115_v39  ;;  %v15361_v41 = vadd.f32 %v19400_v22, %v4146_v6  ;;  %7344 = vrsqrt.f32 %v15333_v18 }
 0x41d   :  { %v7321_v62 = vpop.eup %7320  ;;  %v15365_v1 = vadd.f32 %v19401_v12, %v4147_v4  ;;  %vm4166_vm11 = vcmp.eq.f32.partialorder %v15249_v35, inf  ;;  %v4169_v10 = vand.u32 2147483648, %v15249_v35  ;;  %vm4173_vm8 = vcmp.eq.f32.partialorder %v15256_v27, inf }
 0x41e   :  { %v7323_v17 = vpop.eup %7322  ;;  %vm4168_vm4 = vcmp.eq.f32.partialorder %v15249_v35, 0.0  ;;  %vm4175_vm10 = vcmp.eq.f32.partialorder %v15256_v27, 0.0  ;;  %v4176_v42 = vand.u32 2147483648, %v15256_v27  ;;  %vm4180_vm13 = vcmp.eq.f32.partialorder %v15264_v50, inf }
 0x41f   :  { %vm4182_vm2 = vcmp.eq.f32.partialorder %v15264_v50, 0.0  ;;  %v7325_v40 = vpop.eup %7324  ;;  %v4183_v47 = vand.u32 2147483648, %v15264_v50  ;;  %vm4187_vm5 = vcmp.eq.f32.partialorder %v15272_v31, inf  ;;  %v4190_v8 = vand.u32 2147483648, %v15272_v31 }
 0x420   :  { %7346 = vrsqrt.f32 %v15353_v5  ;;  %v7327_v16 = vpop.eup %7326  ;;  %vm4189_vm6 = vcmp.eq.f32.partialorder %v15272_v31, 0.0  ;;  %vm4194_vm12 = vcmp.eq.f32.partialorder %v15279_v54, inf  ;;  %v4197_v34 = vand.u32 2147483648, %v15279_v54 }
 0x421   :  { %vm4201_vm0 = vcmp.eq.f32.partialorder %v15284_v52, inf  ;;  %v7329_v61 = vpop.eup %7328  ;;  %v4165_v44 = vmul.f32 %v7321_v62, %v15249_v35  ;;  %v4204_v46 = vand.u32 2147483648, %v15284_v52  ;;  %vm4208_vm9 = vcmp.eq.f32.partialorder %v15292_v14, inf }
 0x422   :  { %7348 = vrsqrt.f32 %v15361_v41  ;;  %v7331_v45 = vpop.eup %7330  ;;  %v4172_v0 = vmul.f32 %v7323_v17, %v15256_v27  ;;  %v4179_v37 = vmul.f32 %v7325_v40, %v15264_v50  ;;  %v4211_v43 = vand.u32 2147483648, %v15292_v14 }
 0x423   :  { %v7333_v63 = vpop.eup %7332  ;;  %v4218_v7 = vand.u32 2147483648, %v15298_v58  ;;  %v4225_v19 = vand.u32 2147483648, %v15303_v53  ;;  %7350 = vrsqrt.f32 %v15365_v1  ;;  %v4186_v2 = vmul.f32 %v7327_v16, %v15272_v31 }
 0x424   :  { %v7335_v3 = vpop.eup %7334  ;;  %v4193_v39 = vmul.f32 %v7329_v61, %v15279_v54  ;;  %vm4229_vm14 = vcmp.eq.f32.partialorder %v15311_v32, inf  ;;  %v4232_v25 = vand.u32 2147483648, %v15311_v32  ;;  %v4167_v51 = vsel %vm4166_vm11, %v15249_v35, %v4165_v44 }
 0x425   :  { %v7337_v24 = vpop.eup %7336  ;;  %vm4236_vm15 = vcmp.eq.f32.partialorder %v15321_v57, inf  ;;  %v4239_v60 = vand.u32 2147483648, %v15321_v57  ;;  %v4174_v28 = vsel %vm4173_vm8, %v15256_v27, %v4172_v0  ;;  %v4181_v4 = vsel %vm4180_vm13, %v15264_v50, %v4179_v37 }
 0x426   :  { %v7339_v6 = vpop.eup %7338  ;;  %v4200_v55 = vmul.f32 %v7331_v45, %v15284_v52  ;;  %v4207_v22 = vmul.f32 %v7333_v63, %v15292_v14  ;;  %vm4231_vm11 = vcmp.eq.f32.partialorder %v15311_v32, 0.0  ;;  %vm4238_vm7 = vcmp.eq.f32.partialorder %v15321_v57, 0.0 }
 0x427   :  { %v7341_v62 = vpop.eup %7340  ;;  %vm4245_vm3 = vcmp.eq.f32.partialorder %v15327_v56, 0.0  ;;  %v4246_v12 = vand.u32 2147483648, %v15327_v56  ;;  %vm4250_vm1 = vcmp.eq.f32.partialorder %v15333_v18, inf  ;;  %v4253_v17 = vand.u32 2147483648, %v15333_v18 }
 0x428   :  { %v4260_v40 = vand.u32 2147483648, %v15353_v5  ;;  %v7343_v16 = vpop.eup %7342  ;;  %v4188_v61 = vsel %vm4187_vm5, %v15272_v31, %v4186_v2  ;;  %v4195_v44 = vsel %vm4194_vm12, %v15279_v54, %v4193_v39  ;;  %v4214_v45 = vmul.f32 %v7335_v3, %v15298_v58 }
 0x429   :  { %v4221_v0 = vmul.f32 %v7337_v24, %v15303_v53  ;;  %vm4252_vm8 = vcmp.eq.f32.partialorder %v15333_v18, 0.0  ;;  %vm4257_vm13 = vcmp.eq.f32.partialorder %v15353_v5, inf  ;;  %v7345_v37 = vpop.eup %7344  ;;  %v4170_v63 = vsel %vm4168_vm4, %v4169_v10, %v4167_v51 }
 0x42a   :  { %v4177_v2 = vsel %vm4175_vm10, %v4176_v42, %v4174_v28  ;;  %v4184_v3 = vsel %vm4182_vm2, %v4183_v47, %v4181_v4  ;;  %v4267_v39 = vand.u32 2147483648, %v15361_v41  ;;  %v4202_v24 = vsel %vm4201_vm0, %v15284_v52, %v4200_v55 }
 0x42b   :  { %v4209_v35 = vsel %vm4208_vm9, %v15292_v14, %v4207_v22  ;;  %v4228_v10 = vmul.f32 %v7339_v6, %v15311_v32  ;;  %v4235_v27 = vmul.f32 %v7341_v62, %v15321_v57  ;;  %vm4264_vm4 = vcmp.eq.f32.partialorder %v15361_v41, inf }
 0x42c   :  { %v4191_v50 = vsel %vm4189_vm6, %v4190_v8, %v4188_v61  ;;  %vm19402_vm10 = vcmp.eq.f32.partialorder %v15279_v54, 0.0  ;;  %v4242_v47 = vmul.f32 %v7343_v16, %v15327_v56  ;;  %vm4259_vm2 = vcmp.eq.f32.partialorder %v15353_v5, 0.0 }
 0x42d   :  { %v4198_v42 = vsel %vm19402_vm10, %v4197_v34, %v4195_v44  ;;  %v4274_v51 = vand.u32 2147483648, %v15365_v1  ;;  %v7347_v6 = vpop.eup %7346  ;;  %vm19403_vm5 = vcmp.eq.f32.partialorder %v15298_v58, inf  ;;  %vm19404_vm12 = vcmp.eq.f32.partialorder %v15303_v53, inf }
 0x42e   :  { %v4216_v28 = vsel %vm19403_vm5, %v15298_v58, %v4214_v45  ;;  %v4223_v31 = vsel %vm19404_vm12, %v15303_v53, %v4221_v0  ;;  %v4249_v8 = vmul.f32 %v7345_v37, %v15333_v18  ;;  %vm4271_vm6 = vcmp.eq.f32.partialorder %v15365_v1, inf }
 0x42f   :  { %v4276_v54 = vadd.f32 %v15269_v15, %v4170_v63  ;;  %vm19405_vm0 = vcmp.eq.f32.partialorder %v15284_v52, 0.0  ;;  %vm19406_vm9 = vcmp.eq.f32.partialorder %v15292_v14, 0.0  ;;  %vm4266_vm10 = vcmp.eq.f32.partialorder %v15361_v41, 0.0  ;;  %v7349_v62 = vpop.eup %7348 }
 0x430   :  { %v4205_v34 = vsel %vm19405_vm0, %v4204_v46, %v4202_v24  ;;  %v4212_v4 = vsel %vm19406_vm9, %v4211_v43, %v4209_v35  ;;  %v15485_v55 = vadd.f32 %v15295_v29, %v4177_v2  ;;  %v15488_v22 = vadd.f32 %v15308_v36, %v4184_v3  ;;  %v15588_v35 = vld [vmem:[#allocation5 + $0x10] sm:$0xff] }
 0x431   :  { %v4230_v15 = vsel %vm4229_vm14, %v15311_v32, %v4228_v10  ;;  %v4237_v52 = vsel %vm4236_vm15, %v15321_v57, %v4235_v27  ;;  %v15497_v14 = vadd.f32 %v15315_v11, %v4191_v50  ;;  %v15500_v46 = vadd.f32 %v15318_v48, %v4198_v42  ;;  %v7351_v48 = vpop.eup %7350 }
 0x432   :  { %vm19407_vm5 = vcmp.eq.f32.partialorder %v15298_v58, 0.0  ;;  %vm19408_vm12 = vcmp.eq.f32.partialorder %v15303_v53, 0.0  ;;  %vm19409_vm14 = vcmp.eq.f32.partialorder %v15327_v56, inf  ;;  %v4256_v11 = vmul.f32 %v7347_v6, %v15353_v5  ;;  %v15611_v6 = vld [vmem:[#allocation5 + $0x20] sm:$0xff] }
 0x433   :  { %v4219_v29 = vsel %vm19407_vm5, %v4218_v7, %v4216_v28  ;;  %v4226_v36 = vsel %vm19408_vm12, %v4225_v19, %v4223_v31  ;;  %v4244_v43 = vsel %vm19409_vm14, %v15327_v56, %v4242_v47  ;;  %vm4273_vm15 = vcmp.eq.f32.partialorder %v15365_v1, 0.0 }
 0x434   :  { %v4251_v16 = vsel %vm4250_vm1, %v15333_v18, %v4249_v8  ;;  %v15519_v58 = vadd.f32 %v15324_v20, %v4205_v34  ;;  %v15522_v7 = vadd.f32 %v15330_v59, %v4212_v4  ;;  %v4308_v53 = vmul.f32 %v4276_v54, %v4276_v54  ;;  %v15561_v18 = vld [vmem:[#allocation5] sm:$0xff]  ;;  %v15632_v4 = vld [vmem:[#allocation5 + $0x30] sm:$0xff] }
 0x435   :  { %v4233_v19 = vsel %vm4231_vm11, %v4232_v25, %v4230_v15  ;;  %v4240_v61 = vsel %vm4238_vm7, %v4239_v60, %v4237_v52  ;;  %v4263_v44 = vmul.f32 %v7349_v62, %v15361_v41  ;;  %v4309_v20 = vmul.f32 %v15485_v55, %v15485_v55  ;;  %v15643_v52 = vld [vmem:[#allocation5 + $0x38] sm:$0xff] }
 0x436   :  { %v4247_v59 = vsel %vm4245_vm3, %v4246_v12, %v4244_v43  ;;  %v15538_v45 = vadd.f32 %v15336_v21, %v4219_v29  ;;  %v15541_v0 = vadd.f32 %v15338_v26, %v4226_v36  ;;  %v4310_v32 = vmul.f32 %v15488_v22, %v15488_v22  ;;  %v15652_v36 = vld [vmem:[#allocation5 + $0x40] sm:$0xff] }
 0x437   :  { %v4254_v57 = vsel %vm4252_vm8, %v4253_v17, %v4251_v16  ;;  %v4258_v25 = vsel %vm4257_vm13, %v15353_v5, %v4256_v11  ;;  %v4270_v60 = vmul.f32 %v7351_v48, %v15365_v1  ;;  %v4311_v56 = vmul.f32 %v15497_v14, %v15497_v14  ;;  %19410 = vst [vmem:[#allocation15_spill] sm:$0xff] %v15652_v36  ;;  %v15662_v48 = vld [vmem:[#allocation5 + $0x48] sm:$0xff] }
 0x438   :  { %v15554_v21 = vadd.f32 %v15341_v38, %v4233_v19  ;;  %v15557_v26 = vadd.f32 %v15343_v49, %v4240_v61  ;;  %v4312_v12 = vmul.f32 %v15500_v46, %v15500_v46  ;;  %v15564_v17 = vadd.f32 %v15561_v18, %v4308_v53  ;;  %v15574_v49 = vld [vmem:[#allocation5 + $0x8] sm:$0xff]  ;;  %19411 = vst [vmem:[#allocation18_spill] sm:$0xff] %v15662_v48  ;;  %v15671_v19 = vld [vmem:[#allocation5 + $0x50] sm:$0xff] }
 0x439   :  { %v4265_v37 = vsel %vm4264_vm4, %v15361_v41, %v4263_v44  ;;  %v15570_v63 = vadd.f32 %v15345_v23, %v4247_v59  ;;  %v4313_v38 = vmul.f32 %v15519_v58, %v15519_v58  ;;  %v15577_v2 = vadd.f32 %v15574_v49, %v4309_v20  ;;  %19412 = vst [vmem:[#allocation11_spill] sm:$0xff] %v15671_v19  ;;  %v15683_v44 = vld [vmem:[#allocation5 + $0x58] sm:$0xff] }
 0x43a   :  { %v4261_v3 = vsel %vm4259_vm2, %v4260_v40, %v4258_v25  ;;  %v15584_v24 = vadd.f32 %v15348_v33, %v4254_v57  ;;  %v4314_v23 = vmul.f32 %v15522_v7, %v15522_v7  ;;  %v15591_v10 = vadd.f32 %v15588_v35, %v4310_v32  ;;  %v15600_v40 = vld [vmem:[#allocation5 + $0x18] sm:$0xff]  ;;  %19413 = vst [vmem:[#allocation12_spill] sm:$0xff] %v15683_v44  ;;  %v15692_v32 = vld [vmem:[#allocation5 + $0x60] sm:$0xff] }
 0x43b   :  { %v4272_v27 = vsel %vm4271_vm6, %v15365_v1, %v4270_v60  ;;  %v15596_v50 = vadd.f32 -0.5, %v4276_v54  ;;  %v4315_v5 = vmul.f32 %v15538_v45, %v15538_v45  ;;  %v15603_v33 = vadd.f32 %v15600_v40, %v4311_v56  ;;  %v15620_v54 = vld [vmem:[#allocation5 + $0x28] sm:$0xff]  ;;  %19414 = vst [vmem:[#allocation13_spill] sm:$0xff] %v15692_v32 }
 0x43c   :  { %v4268_v42 = vsel %vm4266_vm10, %v4267_v39, %v4265_v37  ;;  %v4316_v47 = vmul.f32 %v15541_v0, %v15541_v0  ;;  %v15614_v28 = vadd.f32 %v15611_v6, %v4312_v12  ;;  %7352 = vrsqrt.f32 %v15564_v17  ;;  %v15711_v56 = vld [vmem:[#allocation5 + $0x68] sm:$0xff] }
 0x43d   :  { %v4289_v31 = vadd.f32 %v15350_v13, %v4261_v3  ;;  %v4317_v8 = vmul.f32 %v15554_v21, %v15554_v21  ;;  %v15623_v41 = vadd.f32 %v15620_v54, %v4313_v38  ;;  %7354 = vrsqrt.f32 %v15577_v2  ;;  %19415 = vst [vmem:[#allocation14_spill] sm:$0xff] %v15711_v56  ;;  %v15730_v38 = vld [vmem:[#allocation5 + $0x70] sm:$0xff] }
 0x43e   :  { %v4275_v39 = vsel %vm4273_vm15, %v4274_v51, %v4272_v27  ;;  %v4318_v34 = vmul.f32 %v15557_v26, %v15557_v26  ;;  %v15635_v13 = vadd.f32 %v15632_v4, %v4314_v23  ;;  %7356 = vrsqrt.f32 %v15591_v10  ;;  %19416 = vst [vmem:[#allocation16_spill] sm:$0xff] %v15730_v38  ;;  %v15736_v23 = vld [vmem:[#allocation5 + $0x78] sm:$0xff] }
 0x43f   :  { %v15639_v62 = vadd.f32 -0.5, %v15485_v55  ;;  %v4319_v15 = vmul.f32 %v15570_v63, %v15570_v63  ;;  %v15646_v1 = vadd.f32 %v15643_v52, %v4315_v5  ;;  %7358 = vrsqrt.f32 %v15603_v33  ;;  %19417 = vst [vmem:[#allocation17_spill] sm:$0xff] %v15736_v23 }
 0x440   :  { %v4290_v51 = vadd.f32 %v15356_v9, %v4268_v42  ;;  %v4320_v29 = vmul.f32 %v15584_v24, %v15584_v24  ;;  %v15655_v55 = vadd.f32 %v15652_v36, %v4316_v47  ;;  %7360 = vrsqrt.f32 %v15614_v28 }
 0x441   :  { %v4291_v43 = vadd.f32 %v15358_v30, %v4275_v39  ;;  %v15660_v11 = vadd.f32 -0.5, %v15488_v22  ;;  %v15665_v16 = vadd.f32 %v15662_v48, %v4317_v8  ;;  %7362 = vrsqrt.f32 %v15623_v41 }
 0x442   :  { %v15669_v9 = vadd.f32 -0.5, %v15497_v14  ;;  %v4321_v53 = vmul.f32 %v4289_v31, %v4289_v31  ;;  %v15674_v61 = vadd.f32 %v15671_v19, %v4318_v34  ;;  %7364 = vrsqrt.f32 %v15635_v13 }
 0x443   :  { %v15678_v30 = vadd.f32 -0.5, %v15500_v46  ;;  %v15681_v22 = vadd.f32 -0.5, %v15519_v58  ;;  %v15686_v20 = vadd.f32 %v15683_v44, %v4319_v15  ;;  %7366 = vrsqrt.f32 %v15646_v1 }
 0x444   :  { %v15690_v14 = vadd.f32 -0.5, %v15522_v7  ;;  %v4322_v59 = vmul.f32 %v4290_v51, %v4290_v51  ;;  %v15695_v57 = vadd.f32 %v15692_v32, %v4320_v29  ;;  %7368 = vrsqrt.f32 %v15655_v55 }
 0x445   :  { %v15699_v46 = vadd.f32 -0.5, %v15538_v45  ;;  %v15702_v58 = vadd.f32 -0.5, %v15541_v0  ;;  %v4323_v25 = vmul.f32 %v4291_v43, %v4291_v43  ;;  %7370 = vrsqrt.f32 %v15665_v16 }
 0x446   :  { %v15706_v7 = vadd.f32 -0.5, %v15554_v21  ;;  %v15709_v60 = vadd.f32 -0.5, %v15557_v26  ;;  %v15714_v12 = vadd.f32 %v15711_v56, %v4321_v53  ;;  %7372 = vrsqrt.f32 %v15674_v61 }
 0x447   :  { %v15718_v45 = vadd.f32 -0.5, %v15570_v63  ;;  %v15721_v0 = vadd.f32 -0.5, %v15584_v24  ;;  %v15723_v37 = vadd.f32 -0.5, %v4289_v31  ;;  %7374 = vrsqrt.f32 %v15686_v20 }
 0x448   :  { %v15726_v21 = vadd.f32 -0.5, %v4290_v51  ;;  %v15728_v26 = vadd.f32 -0.5, %v4291_v43  ;;  %v15733_v3 = vadd.f32 %v15730_v38, %v4322_v59  ;;  %7376 = vrsqrt.f32 %v15695_v57 }
 0x449   :  { %v7353_v63 = vpop.eup %7352  ;;  %v15739_v24 = vadd.f32 %v15736_v23, %v4323_v25  ;;  %vm4342_vm3 = vcmp.eq.f32.partialorder %v15564_v17, inf  ;;  %vm4344_vm7 = vcmp.eq.f32.partialorder %v15564_v17, 0.0  ;;  %vm4349_vm1 = vcmp.eq.f32.partialorder %v15577_v2, inf }
 0x44a   :  { %v7355_v5 = vpop.eup %7354  ;;  %vm4356_vm11 = vcmp.eq.f32.partialorder %v15591_v10, inf  ;;  %7378 = vrsqrt.f32 %v15714_v12  ;;  %vm4351_vm8 = vcmp.eq.f32.partialorder %v15577_v2, 0.0  ;;  %vm4358_vm13 = vcmp.eq.f32.partialorder %v15591_v10, 0.0 }
 0x44b   :  { %v7357_v47 = vpop.eup %7356  ;;  %vm4363_vm4 = vcmp.eq.f32.partialorder %v15603_v33, inf  ;;  %vm4365_vm2 = vcmp.eq.f32.partialorder %v15603_v33, 0.0  ;;  %vm4370_vm6 = vcmp.eq.f32.partialorder %v15614_v28, inf  ;;  %vm4377_vm0 = vcmp.eq.f32.partialorder %v15623_v41, inf }
 0x44c   :  { %v7359_v39 = vpop.eup %7358  ;;  %7380 = vrsqrt.f32 %v15733_v3  ;;  %v4341_v51 = vmul.f32 %v7353_v63, %v15564_v17  ;;  %v4348_v59 = vmul.f32 %v7355_v5, %v15577_v2  ;;  %v4355_v34 = vmul.f32 %v7357_v47, %v15591_v10 }
 0x44d   :  { %v7361_v15 = vpop.eup %7360  ;;  %7382 = vrsqrt.f32 %v15739_v24  ;;  %v4362_v8 = vmul.f32 %v7359_v39, %v15603_v33  ;;  %vm4398_vm10 = vcmp.eq.f32.partialorder %v15655_v55, inf  ;;  %vm4405_vm12 = vcmp.eq.f32.partialorder %v15665_v16, inf }
 0x44e   :  { %v7363_v53 = vpop.eup %7362  ;;  %v4343_v29 = vsel %vm4342_vm3, %v15564_v17, %v4341_v51  ;;  %v4369_v31 = vmul.f32 %v7361_v15, %v15614_v28  ;;  %vm4407_vm15 = vcmp.eq.f32.partialorder %v15665_v16, 0.0  ;;  %vm4419_vm9 = vcmp.eq.f32.partialorder %v15686_v20, inf }
 0x44f   :  { %v7365_v63 = vpop.eup %7364  ;;  %v4376_v43 = vmul.f32 %v7363_v53, %v15623_v41  ;;  %v4350_v25 = vsel %vm4349_vm1, %v15577_v2, %v4348_v59  ;;  %vm4414_vm5 = vcmp.eq.f32.partialorder %v15674_v61, 0.0  ;;  %v4422_v47 = vand.u32 2147483648, %v15686_v20 }
 0x450   :  { %v7367_v5 = vpop.eup %7366  ;;  %vm4426_vm14 = vcmp.eq.f32.partialorder %v15695_v57, inf  ;;  %v4357_v53 = vsel %vm4356_vm11, %v15591_v10, %v4355_v34  ;;  %v4364_v27 = vsel %vm4363_vm4, %v15603_v33, %v4362_v8  ;;  %v4383_v23 = vmul.f32 %v7365_v63, %v15635_v13 }
 0x451   :  { %v7369_v39 = vpop.eup %7368  ;;  %v4390_v59 = vmul.f32 %v7367_v5, %v15646_v1  ;;  %vm4421_vm3 = vcmp.eq.f32.partialorder %v15686_v20, 0.0  ;;  %vm4433_vm1 = vcmp.eq.f32.partialorder %v15714_v12, inf  ;;  %v19418_v51 = vand.u32 2147483648, %v15564_v17 }
 0x452   :  { %v7371_v42 = vpop.eup %7370  ;;  %v4397_v34 = vmul.f32 %v7369_v39, %v15655_v55  ;;  %vm4428_vm11 = vcmp.eq.f32.partialorder %v15695_v57, 0.0  ;;  %v4436_v8 = vand.u32 2147483648, %v15714_v12  ;;  %v4371_v5 = vsel %vm4370_vm6, %v15614_v28, %v4369_v31 }
 0x453   :  { %v7373_v15 = vpop.eup %7372  ;;  %v4346_v56 = vsel %vm4344_vm7, %v19418_v51, %v4343_v29  ;;  %v4378_v44 = vsel %vm4377_vm0, %v15623_v41, %v4376_v43  ;;  %v4404_v17 = vmul.f32 %v7371_v42, %v15665_v16  ;;  %vm4440_vm7 = vcmp.eq.f32.partialorder %v15733_v3, inf }
 0x454   :  { %v7375_v38 = vpop.eup %7374  ;;  %v19419_v39 = vand.u32 2147483648, %v15577_v2  ;;  %v19420_v63 = vand.u32 2147483648, %v15591_v10  ;;  %v19421_v19 = vand.u32 2147483648, %v15603_v33  ;;  %v4411_v42 = vmul.f32 %v7373_v15, %v15674_v61 }
 0x455   :  { %v7377_v32 = vpop.eup %7376  ;;  %vm4435_vm4 = vcmp.eq.f32.partialorder %v15714_v12, 0.0  ;;  %vm19422_vm6 = vcmp.eq.f32.partialorder %v15635_v13, inf  ;;  %v4418_v10 = vmul.f32 %v7375_v38, %v15686_v20  ;;  %v4452_v33 = vadd.f32 %v15596_v50, %v4346_v56 }
 0x456   :  { %v4353_v51 = vsel %vm4351_vm8, %v19419_v39, %v4350_v25  ;;  %v4360_v31 = vsel %vm4358_vm13, %v19420_v63, %v4357_v53  ;;  %v4367_v43 = vsel %vm4365_vm2, %v19421_v19, %v4364_v27  ;;  %v4385_v2 = vsel %vm19422_vm6, %v15635_v13, %v4383_v23 }
 0x457   :  { %v7379_v29 = vpop.eup %7378  ;;  %vm19423_vm8 = vcmp.eq.f32.partialorder %v15646_v1, inf  ;;  %vm4447_vm13 = vcmp.eq.f32.partialorder %v15739_v24, inf  ;;  %v19424_v19 = vand.u32 2147483648, %v15614_v28  ;;  %vm19425_vm2 = vcmp.eq.f32.partialorder %v15614_v28, 0.0 }
 0x458   :  { %v4392_v25 = vsel %vm19423_vm8, %v15646_v1, %v4390_v59  ;;  %v19426_v15 = vand.u32 2147483648, %v15623_v41  ;;  %vm19427_vm0 = vcmp.eq.f32.partialorder %v15623_v41, 0.0  ;;  %v4399_v53 = vsel %vm4398_vm10, %v15655_v55, %v4397_v34 }
 0x459   :  { %v4374_v27 = vsel %vm19425_vm2, %v19424_v19, %v4371_v5  ;;  %v4425_v38 = vmul.f32 %v7377_v32, %v15695_v57  ;;  %vm4442_vm6 = vcmp.eq.f32.partialorder %v15733_v3, 0.0  ;;  %v7381_v59 = vpop.eup %7380  ;;  %v4406_v50 = vsel %vm4405_vm12, %v15665_v16, %v4404_v17 }
 0x45a   :  { %v4381_v23 = vsel %vm19427_vm0, %v19426_v15, %v4378_v44  ;;  %v4453_v28 = vadd.f32 %v15639_v62, %v4353_v51  ;;  %v4454_v56 = vadd.f32 %v15660_v11, %v4360_v31  ;;  %v4455_v41 = vadd.f32 %v15669_v9, %v4367_v43  ;;  %v7383_v11 = vpop.eup %7382 }
 0x45b   :  { %v19428_v44 = vand.u32 2147483648, %v15635_v13  ;;  %vm19429_vm8 = vcmp.eq.f32.partialorder %v15635_v13, 0.0  ;;  %v19430_v32 = vand.u32 2147483648, %v15646_v1  ;;  %vm19431_vm10 = vcmp.eq.f32.partialorder %v15646_v1, 0.0 }
 0x45c   :  { %vm19432_vm2 = vcmp.eq.f32.partialorder %v15674_v61, inf  ;;  %v4432_v62 = vmul.f32 %v7379_v29, %v15714_v12  ;;  %vm4449_vm12 = vcmp.eq.f32.partialorder %v15739_v24, 0.0  ;;  %v19433_v9 = vand.u32 2147483648, %v15655_v55 }
 0x45d   :  { %v4388_v34 = vsel %vm19429_vm8, %v19428_v44, %v4385_v2  ;;  %v4395_v63 = vsel %vm19431_vm10, %v19430_v32, %v4392_v25  ;;  %v4413_v5 = vsel %vm19432_vm2, %v15674_v61, %v4411_v42  ;;  %vm19434_vm0 = vcmp.eq.f32.partialorder %v15655_v55, 0.0 }
 0x45e   :  { %v4402_v13 = vsel %vm19434_vm0, %v19433_v9, %v4399_v53  ;;  %v4420_v17 = vsel %vm4419_vm9, %v15686_v20, %v4418_v10  ;;  %v4456_v1 = vadd.f32 %v15678_v30, %v4374_v27  ;;  %v4457_v39 = vadd.f32 %v15681_v22, %v4381_v23 }
 0x45f   :  { %v19435_v51 = vand.u32 2147483648, %v15665_v16  ;;  %v4427_v31 = vsel %vm4426_vm14, %v15695_v57, %v4425_v38  ;;  %v4439_v55 = vmul.f32 %v7381_v59, %v15733_v3  ;;  %v4484_v43 = vmul.f32 %v4452_v33, %v4452_v33 }
 0x460   :  { %v19436_v42 = vand.u32 2147483648, %v15674_v61  ;;  %v4458_v30 = vadd.f32 %v15690_v14, %v4388_v34  ;;  %v4459_v22 = vadd.f32 %v15699_v46, %v4395_v63  ;;  %v4485_v25 = vmul.f32 %v4453_v28, %v4453_v28 }
 0x461   :  { %v4409_v29 = vsel %vm4407_vm15, %v19435_v51, %v4406_v50  ;;  %v4423_v16 = vsel %vm4421_vm3, %v4422_v47, %v4420_v17  ;;  %v4434_v10 = vsel %vm4433_vm1, %v15714_v12, %v4432_v62  ;;  %v4446_v19 = vmul.f32 %v7383_v11, %v15739_v24 }
 0x462   :  { %v4416_v2 = vsel %vm4414_vm5, %v19436_v42, %v4413_v5  ;;  %v4486_v27 = vmul.f32 %v4454_v56, %v4454_v56  ;;  %v19437_v15 = vand.u32 2147483648, %v15695_v57  ;;  %v4460_v14 = vadd.f32 %v15702_v58, %v4402_v13 }
 0x463   :  { %v4461_v46 = vadd.f32 %v15706_v7, %v4409_v29  ;;  %v4487_v23 = vmul.f32 %v4455_v41, %v4455_v41  ;;  %v4441_v20 = vsel %vm4440_vm7, %v15733_v3, %v4439_v55  ;;  %v4462_v47 = vadd.f32 %v15709_v60, %v4416_v2 }
 0x464   :  { %v4430_v61 = vsel %vm4428_vm11, %v19437_v15, %v4427_v31  ;;  %v4488_v53 = vmul.f32 %v4456_v1, %v4456_v1  ;;  %v15915_v38 = vadd.f32 %v15561_v18, %v4484_v43  ;;  %v4437_v59 = vsel %vm4435_vm4, %v4436_v8, %v4434_v10 }
 0x465   :  { %v4463_v57 = vadd.f32 %v15718_v45, %v4423_v16  ;;  %v4489_v50 = vmul.f32 %v4457_v39, %v4457_v39  ;;  %v15921_v58 = vadd.f32 %v15574_v49, %v4485_v25  ;;  %v4448_v7 = vsel %vm4447_vm13, %v15739_v24, %v4446_v19 }
 0x466   :  { %v4464_v44 = vadd.f32 %v15721_v0, %v4430_v61  ;;  %v4490_v60 = vmul.f32 %v4458_v30, %v4458_v30  ;;  %v15928_v34 = vadd.f32 %v15588_v35, %v4486_v27  ;;  %v19438_v32 = vand.u32 2147483648, %v15733_v3 }
 0x467   :  { %v15934_v45 = vadd.f32 -0.5, %v4452_v33  ;;  %v4491_v8 = vmul.f32 %v4459_v22, %v4459_v22  ;;  %v15937_v63 = vadd.f32 %v15600_v40, %v4487_v23  ;;  %v4465_v5 = vadd.f32 %v15723_v37, %v4437_v59  ;;  %v19442_v23 = vld [vmem:[#allocation13_spill] sm:$0xff] }
 0x468   :  { %v4444_v12 = vsel %vm4442_vm6, %v19438_v32, %v4441_v20  ;;  %v4492_v62 = vmul.f32 %v4460_v14, %v4460_v14  ;;  %v15941_v0 = vadd.f32 %v15611_v6, %v4488_v53  ;;  %7384 = vrsqrt.f32 %v15915_v38 }
 0x469   :  { %v19439_v11 = vand.u32 2147483648, %v15739_v24  ;;  %v4493_v9 = vmul.f32 %v4461_v46, %v4461_v46  ;;  %v15949_v33 = vadd.f32 %v15620_v54, %v4489_v50  ;;  %7386 = vrsqrt.f32 %v15921_v58 }
 0x46a   :  { %v15952_v13 = vadd.f32 -0.5, %v4453_v28  ;;  %v4494_v37 = vmul.f32 %v4462_v47, %v4462_v47  ;;  %v15955_v17 = vadd.f32 %v15632_v4, %v4490_v60  ;;  %7388 = vrsqrt.f32 %v15928_v34  ;;  %v19444_v60 = vld [vmem:[#allocation16_spill] sm:$0xff] }
 0x46b   :  { %v4451_v3 = vsel %vm4449_vm12, %v19439_v11, %v4448_v7  ;;  %v4466_v51 = vadd.f32 %v15726_v21, %v4444_v12  ;;  %v4495_v29 = vmul.f32 %v4463_v57, %v4463_v57  ;;  %v15960_v24 = vadd.f32 %v15643_v52, %v4491_v8 }
 0x46c   :  { %7390 = vrsqrt.f32 %v15937_v63  ;;  %v4467_v31 = vadd.f32 %v15728_v26, %v4451_v3  ;;  %v15964_v55 = vadd.f32 -0.5, %v4454_v56  ;;  %v15967_v28 = vadd.f32 %v15652_v36, %v4492_v62  ;;  %v19440_v26 = vld [vmem:[#allocation11_spill] sm:$0xff] }
 0x46d   :  { %7392 = vrsqrt.f32 %v15941_v0  ;;  %v15970_v43 = vadd.f32 -0.5, %v4455_v41  ;;  %v4496_v42 = vmul.f32 %v4464_v44, %v4464_v44  ;;  %v15973_v21 = vadd.f32 %v15662_v48, %v4493_v9  ;;  %v19441_v41 = vld [vmem:[#allocation12_spill] sm:$0xff] }
 0x46e   :  { %7394 = vrsqrt.f32 %v15949_v33  ;;  %v15976_v2 = vadd.f32 -0.5, %v4456_v1  ;;  %v15978_v25 = vadd.f32 -0.5, %v4457_v39  ;;  %v15981_v56 = vadd.f32 %v19440_v26, %v4494_v37 }
 0x46f   :  { %7396 = vrsqrt.f32 %v15955_v17  ;;  %v15984_v16 = vadd.f32 -0.5, %v4458_v30  ;;  %v4497_v10 = vmul.f32 %v4465_v5, %v4465_v5  ;;  %v15987_v19 = vadd.f32 %v19441_v41, %v4495_v29 }
 0x470   :  { %7398 = vrsqrt.f32 %v15960_v24  ;;  %v15990_v27 = vadd.f32 -0.5, %v4459_v22  ;;  %v4498_v15 = vmul.f32 %v4466_v51, %v4466_v51  ;;  %v4499_v1 = vmul.f32 %v4467_v31, %v4467_v31 }
 0x471   :  { %7400 = vrsqrt.f32 %v15967_v28  ;;  %v15993_v39 = vadd.f32 -0.5, %v4460_v14  ;;  %v15995_v61 = vadd.f32 -0.5, %v4461_v46  ;;  %v15998_v20 = vadd.f32 %v19442_v23, %v4496_v42  ;;  %v19443_v14 = vld [vmem:[#allocation14_spill] sm:$0xff] }
 0x472   :  { %7402 = vrsqrt.f32 %v15973_v21  ;;  %v16001_v30 = vadd.f32 -0.5, %v4462_v47  ;;  %v16003_v53 = vadd.f32 -0.5, %v4463_v57  ;;  %v16005_v59 = vadd.f32 -0.5, %v4464_v44  ;;  %v19445_v57 = vld [vmem:[#allocation17_spill] sm:$0xff] }
 0x473   :  { %7404 = vrsqrt.f32 %v15981_v56  ;;  %v16008_v22 = vadd.f32 -0.5, %v4465_v5  ;;  %v16010_v50 = vadd.f32 -0.5, %v4466_v51  ;;  %v16013_v46 = vadd.f32 %v19443_v14, %v4497_v10 }
 0x474   :  { %7406 = vrsqrt.f32 %v15987_v19  ;;  %v16016_v7 = vadd.f32 -0.5, %v4467_v31  ;;  %v16019_v47 = vadd.f32 %v19444_v60, %v4498_v15  ;;  %v16022_v32 = vadd.f32 %v19445_v57, %v4499_v1 }
 0x475   :  { %vm4518_vm9 = vcmp.eq.f32.partialorder %v15915_v38, inf  ;;  %v7385_v44 = vpop.eup %7384  ;;  %vm4520_vm5 = vcmp.eq.f32.partialorder %v15915_v38, 0.0  ;;  %v4521_v12 = vand.u32 2147483648, %v15915_v38  ;;  %vm4525_vm14 = vcmp.eq.f32.partialorder %v15921_v58, inf }
 0x476   :  { %7408 = vrsqrt.f32 %v15998_v20  ;;  %v7387_v8 = vpop.eup %7386  ;;  %vm4527_vm15 = vcmp.eq.f32.partialorder %v15921_v58, 0.0  ;;  %vm4532_vm3 = vcmp.eq.f32.partialorder %v15928_v34, inf  ;;  %vm4539_vm1 = vcmp.eq.f32.partialorder %v15937_v63, inf }
 0x477   :  { %v7389_v11 = vpop.eup %7388  ;;  %vm4546_vm11 = vcmp.eq.f32.partialorder %v15941_v0, inf  ;;  %7410 = vrsqrt.f32 %v16013_v46  ;;  %v4517_v37 = vmul.f32 %v7385_v44, %v15915_v38  ;;  %vm4534_vm7 = vcmp.eq.f32.partialorder %v15928_v34, 0.0 }
 0x478   :  { %vm4541_vm4 = vcmp.eq.f32.partialorder %v15937_v63, 0.0  ;;  %vm4548_vm13 = vcmp.eq.f32.partialorder %v15941_v0, 0.0  ;;  %vm4553_vm6 = vcmp.eq.f32.partialorder %v15949_v33, inf  ;;  %vm4560_vm10 = vcmp.eq.f32.partialorder %v15955_v17, inf }
 0x479   :  { %v7391_v9 = vpop.eup %7390  ;;  %7412 = vrsqrt.f32 %v16019_v47  ;;  %v4524_v10 = vmul.f32 %v7387_v8, %v15921_v58  ;;  %v4563_v15 = vand.u32 2147483648, %v15955_v17  ;;  %v4519_v8 = vsel %vm4518_vm9, %v15915_v38, %v4517_v37 }
 0x47a   :  { %v7393_v29 = vpop.eup %7392  ;;  %7414 = vrsqrt.f32 %v16022_v32  ;;  %v4531_v3 = vmul.f32 %v7389_v11, %v15928_v34  ;;  %v4538_v62 = vmul.f32 %v7391_v9, %v15937_v63  ;;  %v4584_v31 = vand.u32 2147483648, %v15973_v21 }
 0x47b   :  { %v7395_v42 = vpop.eup %7394  ;;  %v4545_v5 = vmul.f32 %v7393_v29, %v15941_v0  ;;  %vm4588_vm12 = vcmp.eq.f32.partialorder %v15981_v56, inf  ;;  %v4591_v37 = vand.u32 2147483648, %v15981_v56  ;;  %v4526_v9 = vsel %vm4525_vm14, %v15921_v58, %v4524_v10 }
 0x47c   :  { %v7397_v1 = vpop.eup %7396  ;;  %v4552_v57 = vmul.f32 %v7395_v42, %v15949_v33  ;;  %vm4590_vm9 = vcmp.eq.f32.partialorder %v15981_v56, 0.0  ;;  %vm4595_vm2 = vcmp.eq.f32.partialorder %v15987_v19, inf  ;;  %v4598_v42 = vand.u32 2147483648, %v15987_v19 }
 0x47d   :  { %v7399_v51 = vpop.eup %7398  ;;  %v4559_v29 = vmul.f32 %v7397_v1, %v15955_v17  ;;  %v4522_v14 = vsel %vm4520_vm5, %v4521_v12, %v4519_v8  ;;  %vm4597_vm8 = vcmp.eq.f32.partialorder %v15987_v19, 0.0  ;;  %vm4602_vm0 = vcmp.eq.f32.partialorder %v15998_v20, inf }
 0x47e   :  { %v7401_v44 = vpop.eup %7400  ;;  %v4533_v1 = vsel %vm4532_vm3, %v15928_v34, %v4531_v3  ;;  %v4540_v26 = vsel %vm4539_vm1, %v15937_v63, %v4538_v62  ;;  %v4547_v38 = vsel %vm4546_vm11, %v15941_v0, %v4545_v5  ;;  %v4566_v12 = vmul.f32 %v7399_v51, %v15960_v24 }
 0x47f   :  { %v7403_v11 = vpop.eup %7402  ;;  %vm4609_vm5 = vcmp.eq.f32.partialorder %v16013_v46, inf  ;;  %v19446_v8 = vand.u32 2147483648, %v15921_v58  ;;  %v4554_v3 = vsel %vm4553_vm6, %v15949_v33, %v4552_v57  ;;  %v4573_v23 = vmul.f32 %v7401_v44, %v15967_v28 }
 0x480   :  { %v7405_v60 = vpop.eup %7404  ;;  %v4580_v62 = vmul.f32 %v7403_v11, %v15973_v21  ;;  %vm4604_vm14 = vcmp.eq.f32.partialorder %v15998_v20, 0.0  ;;  %v4561_v51 = vsel %vm4560_vm10, %v15955_v17, %v4559_v29  ;;  %vm4616_vm3 = vcmp.eq.f32.partialorder %v16019_v47, inf }
 0x481   :  { %v7407_v41 = vpop.eup %7406  ;;  %v4529_v10 = vsel %vm4527_vm15, %v19446_v8, %v4526_v9  ;;  %v4587_v48 = vmul.f32 %v7405_v60, %v15981_v56  ;;  %v4619_v58 = vand.u32 2147483648, %v16019_v47  ;;  %v19447_v57 = vand.u32 2147483648, %v15928_v34 }
 0x482   :  { %v19448_v11 = vand.u32 2147483648, %v15937_v63  ;;  %v19449_v29 = vand.u32 2147483648, %v15941_v0  ;;  %v4594_v36 = vmul.f32 %v7407_v41, %v15987_v19  ;;  %vm4611_vm15 = vcmp.eq.f32.partialorder %v16013_v46, 0.0 }
 0x483   :  { %v7409_v5 = vpop.eup %7408  ;;  %v4536_v44 = vsel %vm4534_vm7, %v19447_v57, %v4533_v1  ;;  %vm4623_vm1 = vcmp.eq.f32.partialorder %v16022_v32, inf  ;;  %v19450_v34 = vand.u32 2147483648, %v15949_v33  ;;  %vm19451_vm11 = vcmp.eq.f32.partialorder %v15949_v33, 0.0 }
 0x484   :  { %v4543_v8 = vsel %vm4541_vm4, %v19448_v11, %v4540_v26  ;;  %v4550_v60 = vsel %vm4548_vm13, %v19449_v29, %v4547_v38  ;;  %v7411_v9 = vpop.eup %7410  ;;  %vm19452_vm7 = vcmp.eq.f32.partialorder %v15960_v24, inf  ;;  %v4628_v26 = vadd.f32 %v15934_v45, %v4522_v14 }
 0x485   :  { %v4557_v1 = vsel %vm19451_vm11, %v19450_v34, %v4554_v3  ;;  %v4568_v63 = vsel %vm19452_vm7, %v15960_v24, %v4566_v12  ;;  %v4629_v0 = vadd.f32 %v15952_v13, %v4529_v10  ;;  %vm19453_vm4 = vcmp.eq.f32.partialorder %v15955_v17, 0.0 }
 0x486   :  { %v4564_v41 = vsel %vm19453_vm4, %v4563_v15, %v4561_v51  ;;  %vm19454_vm13 = vcmp.eq.f32.partialorder %v15967_v28, inf  ;;  %vm19455_vm6 = vcmp.eq.f32.partialorder %v15973_v21, inf  ;;  %v4601_v3 = vmul.f32 %v7409_v5, %v15998_v20  ;;  %v7413_v12 = vpop.eup %7412 }
 0x487   :  { %v4575_v38 = vsel %vm19454_vm13, %v15967_v28, %v4573_v23  ;;  %v4582_v33 = vsel %vm19455_vm6, %v15973_v21, %v4580_v62  ;;  %vm4618_vm10 = vcmp.eq.f32.partialorder %v16019_v47, 0.0  ;;  %v4589_v45 = vsel %vm4588_vm12, %v15981_v56, %v4587_v48  ;;  %v7415_v14 = vpop.eup %7414 }
 0x488   :  { %vm4625_vm11 = vcmp.eq.f32.partialorder %v16022_v32, 0.0  ;;  %v4630_v13 = vadd.f32 %v15964_v55, %v4536_v44  ;;  %v4631_v17 = vadd.f32 %v15970_v43, %v4543_v8  ;;  %v4632_v23 = vadd.f32 %v15976_v2, %v4550_v60 }
 0x489   :  { %v19456_v15 = vand.u32 2147483648, %v15960_v24  ;;  %vm19457_vm7 = vcmp.eq.f32.partialorder %v15960_v24, 0.0  ;;  %v4596_v62 = vsel %vm4595_vm2, %v15987_v19, %v4594_v36  ;;  %v4608_v48 = vmul.f32 %v7411_v9, %v16013_v46 }
 0x48a   :  { %v4633_v5 = vadd.f32 %v15978_v25, %v4557_v1  ;;  %v19458_v55 = vand.u32 2147483648, %v15967_v28  ;;  %vm19459_vm12 = vcmp.eq.f32.partialorder %v15967_v28, 0.0  ;;  %vm19460_vm4 = vcmp.eq.f32.partialorder %v15973_v21, 0.0 }
 0x48b   :  { %v4571_v10 = vsel %vm19457_vm7, %v19456_v15, %v4568_v63  ;;  %v4585_v2 = vsel %vm19460_vm4, %v4584_v31, %v4582_v33  ;;  %v4634_v51 = vadd.f32 %v15984_v16, %v4564_v41  ;;  %v4660_v24 = vmul.f32 %v4628_v26, %v4628_v26  ;;  %v19464_v15 = vld [vmem:[#allocation15_spill] sm:$0xff] }
 0x48c   :  { %v4578_v43 = vsel %vm19459_vm12, %v19458_v55, %v4575_v38  ;;  %v4592_v57 = vsel %vm4590_vm9, %v4591_v37, %v4589_v45  ;;  %v4603_v36 = vsel %vm4602_vm0, %v15998_v20, %v4601_v3  ;;  %v4615_v25 = vmul.f32 %v7413_v12, %v16019_v47 }
 0x48d   :  { %v4661_v9 = vmul.f32 %v4629_v0, %v4629_v0  ;;  %v4599_v28 = vsel %vm4597_vm8, %v4598_v42, %v4596_v62  ;;  %v4622_v44 = vmul.f32 %v7415_v14, %v16022_v32  ;;  %v4635_v21 = vadd.f32 %v15990_v27, %v4571_v10 }
 0x48e   :  { %v4662_v31 = vmul.f32 %v4630_v13, %v4630_v13  ;;  %v4610_v56 = vsel %vm4609_vm5, %v16013_v46, %v4608_v48  ;;  %v4636_v16 = vadd.f32 %v15993_v39, %v4578_v43  ;;  %v4637_v37 = vadd.f32 %v15995_v61, %v4585_v2 }
 0x48f   :  { %v4663_v11 = vmul.f32 %v4631_v17, %v4631_v17  ;;  %v19461_v8 = vand.u32 2147483648, %v15998_v20  ;;  %v4638_v42 = vadd.f32 %v16001_v30, %v4592_v57  ;;  %v4664_v29 = vmul.f32 %v4632_v23, %v4632_v23 }
 0x490   :  { %v16188_v27 = vadd.f32 %v15561_v18, %v4660_v24  ;;  %v4617_v60 = vsel %vm4616_vm3, %v16019_v47, %v4615_v25  ;;  %v4639_v39 = vadd.f32 %v16003_v53, %v4599_v28  ;;  %v4665_v34 = vmul.f32 %v4633_v5, %v4633_v5  ;;  %v19468_v28 = vld [vmem:[#allocation13_spill] sm:$0xff] }
 0x491   :  { %v4606_v19 = vsel %vm4604_vm14, %v19461_v8, %v4603_v36  ;;  %v16195_v61 = vadd.f32 %v15574_v49, %v4661_v9  ;;  %v19462_v1 = vand.u32 2147483648, %v16013_v46  ;;  %v4624_v18 = vsel %vm4623_vm1, %v16022_v32, %v4622_v44 }
 0x492   :  { %v4666_v30 = vmul.f32 %v4634_v51, %v4634_v51  ;;  %v16205_v63 = vadd.f32 %v15588_v35, %v4662_v31  ;;  %v4640_v41 = vadd.f32 %v16005_v59, %v4606_v19  ;;  %v16208_v53 = vadd.f32 -0.5, %v4628_v26  ;;  %v19471_v19 = vld [vmem:[#allocation17_spill] sm:$0xff] }
 0x493   :  { %v4613_v20 = vsel %vm4611_vm15, %v19462_v1, %v4610_v56  ;;  %v4667_v38 = vmul.f32 %v4635_v21, %v4635_v21  ;;  %v16211_v49 = vadd.f32 %v15600_v40, %v4663_v11  ;;  %v4620_v46 = vsel %vm4618_vm10, %v4619_v58, %v4617_v60  ;;  %v19470_v11 = vld [vmem:[#allocation16_spill] sm:$0xff] }
 0x494   :  { %v4668_v33 = vmul.f32 %v4636_v16, %v4636_v16  ;;  %v16216_v3 = vadd.f32 %v15611_v6, %v4664_v29  ;;  %7416 = vrsqrt.f32 %v16188_v27  ;;  %v19463_v35 = vand.u32 2147483648, %v16022_v32 }
 0x495   :  { %v4669_v26 = vmul.f32 %v4637_v37, %v4637_v37  ;;  %v16224_v12 = vadd.f32 %v15620_v54, %v4665_v34  ;;  %7418 = vrsqrt.f32 %v16195_v61  ;;  %v4641_v40 = vadd.f32 %v16008_v22, %v4613_v20 }
 0x496   :  { %v4627_v59 = vsel %vm4625_vm11, %v19463_v35, %v4624_v18  ;;  %v4670_v47 = vmul.f32 %v4638_v42, %v4638_v42  ;;  %v16229_v58 = vadd.f32 %v15632_v4, %v4666_v30  ;;  %7420 = vrsqrt.f32 %v16205_v63 }
 0x497   :  { %v16232_v6 = vadd.f32 -0.5, %v4629_v0  ;;  %v4671_v45 = vmul.f32 %v4639_v39, %v4639_v39  ;;  %v16235_v32 = vadd.f32 %v15643_v52, %v4667_v38  ;;  %7422 = vrsqrt.f32 %v16211_v49  ;;  %v19465_v0 = vld [vmem:[#allocation18_spill] sm:$0xff] }
 0x498   :  { %v4642_v54 = vadd.f32 %v16010_v50, %v4620_v46  ;;  %v4643_v14 = vadd.f32 %v16016_v7, %v4627_v59  ;;  %v16241_v22 = vadd.f32 %v19464_v15, %v4668_v33  ;;  %7424 = vrsqrt.f32 %v16216_v3  ;;  %v19466_v50 = vld [vmem:[#allocation11_spill] sm:$0xff] }
 0x499   :  { %v16244_v4 = vadd.f32 -0.5, %v4630_v13  ;;  %v16246_v10 = vadd.f32 -0.5, %v4631_v17  ;;  %v16249_v62 = vadd.f32 %v19465_v0, %v4669_v26  ;;  %7426 = vrsqrt.f32 %v16224_v12  ;;  %v19467_v13 = vld [vmem:[#allocation12_spill] sm:$0xff] }
 0x49a   :  { %v16252_v52 = vadd.f32 -0.5, %v4632_v23  ;;  %v4672_v48 = vmul.f32 %v4640_v41, %v4640_v41  ;;  %v16255_v55 = vadd.f32 %v19466_v50, %v4670_v47  ;;  %7428 = vrsqrt.f32 %v16229_v58 }
 0x49b   :  { %v16258_v7 = vadd.f32 -0.5, %v4633_v5  ;;  %v4673_v43 = vmul.f32 %v4641_v40, %v4641_v40  ;;  %v16261_v2 = vadd.f32 %v19467_v13, %v4671_v45  ;;  %7430 = vrsqrt.f32 %v16235_v32 }
 0x49c   :  { %v16264_v17 = vadd.f32 -0.5, %v4634_v51  ;;  %v4674_v24 = vmul.f32 %v4642_v54, %v4642_v54  ;;  %v4675_v57 = vmul.f32 %v4643_v14, %v4643_v14  ;;  %7432 = vrsqrt.f32 %v16241_v22 }
 0x49d   :  { %v16267_v23 = vadd.f32 -0.5, %v4635_v21  ;;  %v16269_v36 = vadd.f32 -0.5, %v4636_v16  ;;  %v16271_v25 = vadd.f32 -0.5, %v4637_v37  ;;  %7434 = vrsqrt.f32 %v16249_v62  ;;  %v19469_v21 = vld [vmem:[#allocation14_spill] sm:$0xff] }
 0x49e   :  { %v16274_v5 = vadd.f32 -0.5, %v4638_v42  ;;  %v16276_v9 = vadd.f32 -0.5, %v4639_v39  ;;  %v16279_v44 = vadd.f32 %v19468_v28, %v4672_v48  ;;  %7436 = vrsqrt.f32 %v16255_v55 }
 0x49f   :  { %v16282_v51 = vadd.f32 -0.5, %v4640_v41  ;;  %v16284_v31 = vadd.f32 -0.5, %v4641_v40  ;;  %v16287_v56 = vadd.f32 %v19469_v21, %v4673_v43  ;;  %7438 = vrsqrt.f32 %v16261_v2 }
 0x4a0   :  { %v16290_v16 = vadd.f32 -0.5, %v4642_v54  ;;  %v16292_v37 = vadd.f32 -0.5, %v4643_v14  ;;  %v16295_v8 = vadd.f32 %v19470_v11, %v4674_v24  ;;  %v16298_v42 = vadd.f32 %v19471_v19, %v4675_v57 }
 0x4a1   :  { %v7417_v29 = vpop.eup %7416  ;;  %vm4694_vm8 = vcmp.eq.f32.partialorder %v16188_v27, inf  ;;  %vm4696_vm2 = vcmp.eq.f32.partialorder %v16188_v27, 0.0  ;;  %v4697_v60 = vand.u32 2147483648, %v16188_v27  ;;  %vm4701_vm0 = vcmp.eq.f32.partialorder %v16195_v61, inf }
 0x4a2   :  { %v7419_v39 = vpop.eup %7418  ;;  %vm4703_vm9 = vcmp.eq.f32.partialorder %v16195_v61, 0.0  ;;  %v4704_v34 = vand.u32 2147483648, %v16195_v61  ;;  %vm4708_vm5 = vcmp.eq.f32.partialorder %v16205_v63, inf  ;;  %7440 = vrsqrt.f32 %v16279_v44 }
 0x4a3   :  { %v7421_v1 = vpop.eup %7420  ;;  %vm4710_vm14 = vcmp.eq.f32.partialorder %v16205_v63, 0.0  ;;  %v4711_v20 = vand.u32 2147483648, %v16205_v63  ;;  %vm4715_vm3 = vcmp.eq.f32.partialorder %v16211_v49, inf  ;;  %7442 = vrsqrt.f32 %v16287_v56 }
 0x4a4   :  { %v7423_v18 = vpop.eup %7422  ;;  %vm4717_vm15 = vcmp.eq.f32.partialorder %v16211_v49, 0.0  ;;  %v4718_v30 = vand.u32 2147483648, %v16211_v49  ;;  %vm4722_vm1 = vcmp.eq.f32.partialorder %v16216_v3, inf  ;;  %v4725_v41 = vand.u32 2147483648, %v16216_v3 }
 0x4a5   :  { %vm4729_vm13 = vcmp.eq.f32.partialorder %v16224_v12, inf  ;;  %v7425_v38 = vpop.eup %7424  ;;  %v4693_v46 = vmul.f32 %v7417_v29, %v16188_v27  ;;  %v4732_v33 = vand.u32 2147483648, %v16224_v12  ;;  %vm4736_vm6 = vcmp.eq.f32.partialorder %v16229_v58, inf }
 0x4a6   :  { %7444 = vrsqrt.f32 %v16295_v8  ;;  %v7427_v35 = vpop.eup %7426  ;;  %v4700_v59 = vmul.f32 %v7419_v39, %v16195_v61  ;;  %v4707_v26 = vmul.f32 %v7421_v1, %v16205_v63  ;;  %v4739_v40 = vand.u32 2147483648, %v16229_v58 }
 0x4a7   :  { %v7429_v47 = vpop.eup %7428  ;;  %v4746_v45 = vand.u32 2147483648, %v16235_v32  ;;  %v4753_v54 = vand.u32 2147483648, %v16241_v22  ;;  %7446 = vrsqrt.f32 %v16298_v42  ;;  %v4714_v15 = vmul.f32 %v7423_v18, %v16211_v49 }
 0x4a8   :  { %v7431_v14 = vpop.eup %7430  ;;  %vm4757_vm7 = vcmp.eq.f32.partialorder %v16249_v62, inf  ;;  %v4760_v0 = vand.u32 2147483648, %v16249_v62  ;;  %vm4764_vm10 = vcmp.eq.f32.partialorder %v16255_v55, inf  ;;  %v4695_v50 = vsel %vm4694_vm8, %v16188_v27, %v4693_v46 }
 0x4a9   :  { %v7433_v48 = vpop.eup %7432  ;;  %v4721_v43 = vmul.f32 %v7425_v38, %v16216_v3  ;;  %v4767_v13 = vand.u32 2147483648, %v16255_v55  ;;  %v4702_v57 = vsel %vm4701_vm0, %v16195_v61, %v4700_v59  ;;  %v4709_v28 = vsel %vm4708_vm5, %v16205_v63, %v4707_v26 }
 0x4aa   :  { %v7435_v24 = vpop.eup %7434  ;;  %v4728_v21 = vmul.f32 %v7427_v35, %v16224_v12  ;;  %v4735_v11 = vmul.f32 %v7429_v47, %v16229_v58  ;;  %vm4759_vm8 = vcmp.eq.f32.partialorder %v16249_v62, 0.0  ;;  %vm4766_vm4 = vcmp.eq.f32.partialorder %v16255_v55, 0.0 }
 0x4ab   :  { %v7437_v19 = vpop.eup %7436  ;;  %vm4773_vm12 = vcmp.eq.f32.partialorder %v16261_v2, 0.0  ;;  %v4774_v29 = vand.u32 2147483648, %v16261_v2  ;;  %vm4778_vm11 = vcmp.eq.f32.partialorder %v16279_v44, inf  ;;  %v4781_v39 = vand.u32 2147483648, %v16279_v44 }
 0x4ac   :  { %v7439_v1 = vpop.eup %7438  ;;  %v4698_v18 = vsel %vm4696_vm2, %v4697_v60, %v4695_v50  ;;  %v4716_v38 = vsel %vm4715_vm3, %v16211_v49, %v4714_v15  ;;  %v4742_v46 = vmul.f32 %v7431_v14, %v16235_v32  ;;  %vm4785_vm0 = vcmp.eq.f32.partialorder %v16287_v56, inf }
 0x4ad   :  { %v4788_v35 = vand.u32 2147483648, %v16287_v56  ;;  %v4705_v59 = vsel %vm4703_vm9, %v4704_v34, %v4702_v57  ;;  %v4712_v26 = vsel %vm4710_vm14, %v4711_v20, %v4709_v28  ;;  %v4723_v27 = vsel %vm4722_vm1, %v16216_v3, %v4721_v43 }
 0x4ae   :  { %v4749_v60 = vmul.f32 %v7433_v48, %v16241_v22  ;;  %v4730_v47 = vsel %vm4729_vm13, %v16224_v12, %v4728_v21  ;;  %v4737_v14 = vsel %vm4736_vm6, %v16229_v58, %v4735_v11  ;;  %v4756_v61 = vmul.f32 %v7435_v24, %v16249_v62 }
 0x4af   :  { %v4763_v34 = vmul.f32 %v7437_v19, %v16255_v55  ;;  %vm4780_vm2 = vcmp.eq.f32.partialorder %v16279_v44, 0.0  ;;  %vm4792_vm9 = vcmp.eq.f32.partialorder %v16295_v8, inf  ;;  %v7441_v63 = vpop.eup %7440  ;;  %v4719_v20 = vsel %vm4717_vm15, %v4718_v30, %v4716_v38 }
 0x4b0   :  { %v4770_v15 = vmul.f32 %v7439_v1, %v16261_v2  ;;  %vm4787_vm5 = vcmp.eq.f32.partialorder %v16287_v56, 0.0  ;;  %v4795_v48 = vand.u32 2147483648, %v16295_v8  ;;  %v4804_v50 = vadd.f32 %v16208_v53, %v4698_v18  ;;  %v7443_v43 = vpop.eup %7442 }
 0x4b1   :  { %vm19472_vm14 = vcmp.eq.f32.partialorder %v16235_v32, inf  ;;  %vm4799_vm3 = vcmp.eq.f32.partialorder %v16298_v42, inf  ;;  %v4802_v57 = vand.u32 2147483648, %v16298_v42  ;;  %v16400_v49 = vadd.f32 %v16232_v6, %v4705_v59 }
 0x4b2   :  { %v4744_v24 = vsel %vm19472_vm14, %v16235_v32, %v4742_v46  ;;  %v16403_v30 = vadd.f32 %v16244_v4, %v4712_v26  ;;  %vm19473_vm15 = vcmp.eq.f32.partialorder %v16216_v3, 0.0  ;;  %vm19474_vm1 = vcmp.eq.f32.partialorder %v16224_v12, 0.0 }
 0x4b3   :  { %v4726_v53 = vsel %vm19473_vm15, %v4725_v41, %v4723_v27  ;;  %v4733_v28 = vsel %vm19474_vm1, %v4732_v33, %v4730_v47  ;;  %vm19475_vm13 = vcmp.eq.f32.partialorder %v16229_v58, 0.0  ;;  %vm19476_vm6 = vcmp.eq.f32.partialorder %v16241_v22, inf  ;;  %v7445_v4 = vpop.eup %7444 }
 0x4b4   :  { %v4740_v21 = vsel %vm19475_vm13, %v4739_v40, %v4737_v14  ;;  %v4751_v6 = vsel %vm19476_vm6, %v16241_v22, %v4749_v60  ;;  %vm4794_vm14 = vcmp.eq.f32.partialorder %v16295_v8, 0.0  ;;  %v4758_v3 = vsel %vm4757_vm7, %v16249_v62, %v4756_v61  ;;  %v7447_v1 = vpop.eup %7446  ;;  %v16501_v14 = vld [vmem:[#allocation5 + $0x8] sm:$0xff]  ;;  %v16513_v61 = vld [vmem:[#allocation5 + $0x10] sm:$0xff] }
 0x4b5   :  { %v4765_v41 = vsel %vm4764_vm10, %v16255_v55, %v4763_v34  ;;  %v4777_v12 = vmul.f32 %v7441_v63, %v16279_v44  ;;  %v16427_v58 = vadd.f32 %v16246_v10, %v4719_v20  ;;  %vm19477_vm15 = vcmp.eq.f32.partialorder %v16235_v32, 0.0 }
 0x4b6   :  { %v4747_v33 = vsel %vm19477_vm15, %v4746_v45, %v4744_v24  ;;  %vm19478_vm1 = vcmp.eq.f32.partialorder %v16261_v2, inf  ;;  %v4784_v11 = vmul.f32 %v7443_v43, %v16287_v56  ;;  %vm4801_vm7 = vcmp.eq.f32.partialorder %v16298_v42, 0.0  ;;  %v16534_v24 = vld [vmem:[#allocation5 + $0x20] sm:$0xff] }
 0x4b7   :  { %v4772_v40 = vsel %vm19478_vm1, %v16261_v2, %v4770_v15  ;;  %v4836_v19 = vmul.f32 %v4804_v50, %v4804_v50  ;;  %vm19479_vm10 = vcmp.eq.f32.partialorder %v16241_v22, 0.0  ;;  %v16443_v18 = vadd.f32 %v16252_v52, %v4726_v53  ;;  %v16523_v15 = vld [vmem:[#allocation5 + $0x18] sm:$0xff] }
 0x4b8   :  { %v4754_v10 = vsel %vm19479_vm10, %v4753_v54, %v4751_v6  ;;  %v16446_v32 = vadd.f32 %v16258_v7, %v4733_v28  ;;  %v16449_v45 = vadd.f32 %v16264_v17, %v4740_v21  ;;  %v4761_v38 = vsel %vm4759_vm8, %v4760_v0, %v4758_v3  ;;  %v16542_v6 = vld [vmem:[#allocation5 + $0x28] sm:$0xff] }
 0x4b9   :  { %v4768_v22 = vsel %vm4766_vm4, %v4767_v13, %v4765_v41  ;;  %v4791_v54 = vmul.f32 %v7445_v4, %v16295_v8  ;;  %v4837_v52 = vmul.f32 %v16400_v49, %v16400_v49  ;;  %v4775_v7 = vsel %vm4773_vm12, %v4774_v29, %v4772_v40  ;;  %v16478_v29 = vld [vmem:[#allocation5] sm:$0xff]  ;;  %v16563_v41 = vld [vmem:[#allocation5 + $0x38] sm:$0xff] }
 0x4ba   :  { %v4779_v17 = vsel %vm4778_vm11, %v16279_v44, %v4777_v12  ;;  %v16468_v62 = vadd.f32 %v16267_v23, %v4747_v33  ;;  %v4838_v0 = vmul.f32 %v16403_v30, %v16403_v30  ;;  %v4786_v55 = vsel %vm4785_vm0, %v16287_v56, %v4784_v11  ;;  %19480 = vst [vmem:[#allocation15_spill] sm:$0xff] %v16563_v41  ;;  %v16578_v11 = vld [vmem:[#allocation5 + $0x40] sm:$0xff] }
 0x4bb   :  { %v4798_v13 = vmul.f32 %v7447_v1, %v16298_v42  ;;  %v4839_v2 = vmul.f32 %v16427_v58, %v16427_v58  ;;  %v16481_v46 = vadd.f32 %v16478_v29, %v4836_v19  ;;  %v16484_v23 = vadd.f32 %v16269_v36, %v4754_v10  ;;  %19481 = vst [vmem:[#allocation18_spill] sm:$0xff] %v16578_v11  ;;  %v16587_v1 = vld [vmem:[#allocation5 + $0x48] sm:$0xff] }
 0x4bc   :  { %v4813_v59 = vadd.f32 %v16271_v25, %v4761_v38  ;;  %v16488_v26 = vadd.f32 %v16274_v5, %v4768_v22  ;;  %v4840_v27 = vmul.f32 %v16443_v18, %v16443_v18  ;;  %v4782_v60 = vsel %vm4780_vm2, %v4781_v39, %v4779_v17  ;;  %19482 = vst [vmem:[#allocation11_spill] sm:$0xff] %v16587_v1  ;;  %v16599_v38 = vld [vmem:[#allocation5 + $0x50] sm:$0xff] }
 0x4bd   :  { %v4793_v47 = vsel %vm4792_vm9, %v16295_v8, %v4791_v54  ;;  %v4841_v36 = vmul.f32 %v16446_v32, %v16446_v32  ;;  %v16504_v25 = vadd.f32 %v16501_v14, %v4837_v52  ;;  %v4789_v5 = vsel %vm4787_vm5, %v4788_v35, %v4786_v55  ;;  %19483 = vst [vmem:[#allocation12_spill] sm:$0xff] %v16599_v38 }
 0x4be   :  { %v4815_v44 = vadd.f32 %v16276_v9, %v4775_v7  ;;  %v4842_v39 = vmul.f32 %v16449_v45, %v16449_v45  ;;  %v16516_v34 = vadd.f32 %v16513_v61, %v4838_v0  ;;  %v4800_v63 = vsel %vm4799_vm3, %v16298_v42, %v4798_v13  ;;  %v16608_v7 = vld [vmem:[#allocation5 + $0x58] sm:$0xff]  ;;  %v16624_v13 = vld [vmem:[#allocation5 + $0x60] sm:$0xff] }
 0x4bf   :  { %v4843_v20 = vmul.f32 %v16468_v62, %v16468_v62  ;;  %v16526_v56 = vadd.f32 %v16523_v15, %v4839_v2  ;;  %7448 = vrsqrt.f32 %v16481_v46  ;;  %v4796_v9 = vsel %vm4794_vm14, %v4795_v48, %v4793_v47  ;;  %v16552_v48 = vld [vmem:[#allocation5 + $0x30] sm:$0xff]  ;;  %19484 = vst [vmem:[#allocation13_spill] sm:$0xff] %v16608_v7  ;;  %19485 = vst [vmem:[#allocation14_spill] sm:$0xff] %v16624_v13  ;;  %v16639_v47 = vld [vmem:[#allocation5 + $0x68] sm:$0xff] }
 0x4c0   :  { %v4816_v35 = vadd.f32 %v16282_v51, %v4782_v60  ;;  %v16532_v43 = vadd.f32 -0.5, %v4804_v50  ;;  %v16537_v53 = vadd.f32 %v16534_v24, %v4840_v27  ;;  %v4817_v28 = vadd.f32 %v16284_v31, %v4789_v5  ;;  %19487 = vst [vmem:[#allocation17_spill] sm:$0xff] %v16639_v47  ;;  %v16644_v5 = vld [vmem:[#allocation5 + $0x70] sm:$0xff] }
 0x4c1   :  { %v4844_v21 = vmul.f32 %v16484_v23, %v16484_v23  ;;  %v16545_v4 = vadd.f32 %v16542_v6, %v4841_v36  ;;  %7450 = vrsqrt.f32 %v16504_v25  ;;  %v4803_v51 = vsel %vm4801_vm7, %v4802_v57, %v4800_v63  ;;  %19488 = vst [vmem:[#allocation19_spill] sm:$0xff] %v16644_v5 }
 0x4c2   :  { %v4845_v8 = vmul.f32 %v4813_v59, %v4813_v59  ;;  %v16555_v31 = vadd.f32 %v16552_v48, %v4842_v39  ;;  %7452 = vrsqrt.f32 %v16516_v34  ;;  %v16559_v50 = vadd.f32 -0.5, %v16400_v49  ;;  %v16650_v39 = vld [vmem:[#allocation5 + $0x78] sm:$0xff] }
 0x4c3   :  { %v4846_v3 = vmul.f32 %v16488_v26, %v16488_v26  ;;  %v16566_v12 = vadd.f32 %v16563_v41, %v4843_v20  ;;  %7454 = vrsqrt.f32 %v16526_v56  ;;  %v4818_v42 = vadd.f32 %v16290_v16, %v4796_v9  ;;  %19489 = vst [vmem:[#allocation20_spill] sm:$0xff] %v16650_v39 }
 0x4c4   :  { %v16571_v57 = vadd.f32 -0.5, %v16403_v30  ;;  %v4847_v33 = vmul.f32 %v4815_v44, %v4815_v44  ;;  %7456 = vrsqrt.f32 %v16537_v53  ;;  %v4819_v49 = vadd.f32 %v16292_v37, %v4803_v51 }
 0x4c5   :  { %v16576_v40 = vadd.f32 -0.5, %v16427_v58  ;;  %v16581_v19 = vadd.f32 %v16578_v11, %v4844_v21  ;;  %7458 = vrsqrt.f32 %v16545_v4  ;;  %v16585_v16 = vadd.f32 -0.5, %v16443_v18 }
 0x4c6   :  { %v4848_v30 = vmul.f32 %v4816_v35, %v4816_v35  ;;  %v16590_v10 = vadd.f32 %v16587_v1, %v4845_v8  ;;  %7460 = vrsqrt.f32 %v16555_v31  ;;  %v16594_v37 = vadd.f32 -0.5, %v16446_v32 }
 0x4c7   :  { %v16597_v58 = vadd.f32 -0.5, %v16449_v45  ;;  %v16602_v22 = vadd.f32 %v16599_v38, %v4846_v3  ;;  %7462 = vrsqrt.f32 %v16566_v12  ;;  %v16606_v18 = vadd.f32 -0.5, %v16468_v62 }
 0x4c8   :  { %v4849_v54 = vmul.f32 %v4817_v28, %v4817_v28  ;;  %v4850_v52 = vmul.f32 %v4818_v42, %v4818_v42  ;;  %v16611_v32 = vadd.f32 %v16608_v7, %v4847_v33  ;;  %v16614_v45 = vadd.f32 -0.5, %v16484_v23 }
 0x4c9   :  { %v16616_v17 = vadd.f32 -0.5, %v4813_v59  ;;  %v4851_v0 = vmul.f32 %v4819_v49, %v4819_v49  ;;  %7464 = vrsqrt.f32 %v16581_v19  ;;  %v16620_v55 = vadd.f32 -0.5, %v16488_v26 }
 0x4ca   :  { %v16622_v62 = vadd.f32 -0.5, %v4815_v44  ;;  %v16627_v2 = vadd.f32 %v16624_v13, %v4848_v30  ;;  %7466 = vrsqrt.f32 %v16590_v10  ;;  %v16630_v27 = vadd.f32 -0.5, %v4816_v35 }
 0x4cb   :  { %v16632_v23 = vadd.f32 -0.5, %v4817_v28  ;;  %v16634_v59 = vadd.f32 -0.5, %v4818_v42  ;;  %7468 = vrsqrt.f32 %v16602_v22  ;;  %v16637_v26 = vadd.f32 -0.5, %v4819_v49 }
 0x4cc   :  { %v7449_v60 = vpop.eup %7448  ;;  %v16642_v36 = vadd.f32 %v16639_v47, %v4849_v54  ;;  %v16647_v44 = vadd.f32 %v16644_v5, %v4850_v52  ;;  %7470 = vrsqrt.f32 %v16611_v32  ;;  %v16653_v63 = vadd.f32 %v16650_v39, %v4851_v0 }
 0x4cd   :  { %19486 = vst [vmem:[#allocation16_spill] sm:$0xff] %v16637_v26  ;;  %vm4870_vm11 = vcmp.eq.f32.partialorder %v16481_v46, inf  ;;  %vm4872_vm12 = vcmp.eq.f32.partialorder %v16481_v46, 0.0  ;;  %v4873_v20 = vand.u32 2147483648, %v16481_v46  ;;  %vm4877_vm4 = vcmp.eq.f32.partialorder %v16504_v25, inf }
 0x4ce   :  { %v7451_v9 = vpop.eup %7450  ;;  %vm4884_vm8 = vcmp.eq.f32.partialorder %v16516_v34, inf  ;;  %7472 = vrsqrt.f32 %v16627_v2  ;;  %v4869_v21 = vmul.f32 %v7449_v60, %v16481_v46  ;;  %vm4879_vm0 = vcmp.eq.f32.partialorder %v16504_v25, 0.0 }
 0x4cf   :  { %v7453_v28 = vpop.eup %7452  ;;  %vm4886_vm2 = vcmp.eq.f32.partialorder %v16516_v34, 0.0  ;;  %v4887_v51 = vand.u32 2147483648, %v16516_v34  ;;  %vm4891_vm9 = vcmp.eq.f32.partialorder %v16526_v56, inf  ;;  %vm4893_vm5 = vcmp.eq.f32.partialorder %v16526_v56, 0.0 }
 0x4d0   :  { %v7455_v8 = vpop.eup %7454  ;;  %v4894_v3 = vand.u32 2147483648, %v16526_v56  ;;  %vm4898_vm3 = vcmp.eq.f32.partialorder %v16537_v53, inf  ;;  %7474 = vrsqrt.f32 %v16642_v36  ;;  %vm4900_vm13 = vcmp.eq.f32.partialorder %v16537_v53, 0.0 }
 0x4d1   :  { %v7457_v42 = vpop.eup %7456  ;;  %v4901_v33 = vand.u32 2147483648, %v16537_v53  ;;  %vm4905_vm6 = vcmp.eq.f32.partialorder %v16545_v4, inf  ;;  %v4908_v49 = vand.u32 2147483648, %v16545_v4  ;;  %vm4912_vm15 = vcmp.eq.f32.partialorder %v16555_v31, inf }
 0x4d2   :  { %v7459_v30 = vpop.eup %7458  ;;  %vm4919_vm1 = vcmp.eq.f32.partialorder %v16566_v12, inf  ;;  %7476 = vrsqrt.f32 %v16647_v44  ;;  %v4871_v0 = vsel %vm4870_vm11, %v16481_v46, %v4869_v21  ;;  %v4876_v60 = vmul.f32 %v7451_v9, %v16504_v25 }
 0x4d3   :  { %v7461_v52 = vpop.eup %7460  ;;  %v4883_v35 = vmul.f32 %v7453_v28, %v16516_v34  ;;  %7478 = vrsqrt.f32 %v16653_v63  ;;  %v4890_v39 = vmul.f32 %v7455_v8, %v16526_v56  ;;  %v4922_v5 = vand.u32 2147483648, %v16566_v12 }
 0x4d4   :  { %v7463_v54 = vpop.eup %7462  ;;  %v4897_v21 = vmul.f32 %v7457_v42, %v16537_v53  ;;  %v4904_v9 = vmul.f32 %v7459_v30, %v16545_v4  ;;  %vm4933_vm11 = vcmp.eq.f32.partialorder %v16590_v10, inf  ;;  %v4874_v7 = vsel %vm4872_vm12, %v4873_v20, %v4871_v0 }
 0x4d5   :  { %vm4940_vm7 = vcmp.eq.f32.partialorder %v16602_v22, inf  ;;  %v4878_v42 = vsel %vm4877_vm4, %v16504_v25, %v4876_v60  ;;  %v4885_v30 = vsel %vm4884_vm8, %v16516_v34, %v4883_v35  ;;  %v4911_v46 = vmul.f32 %v7461_v52, %v16555_v31 }
 0x4d6   :  { %v7465_v13 = vpop.eup %7464  ;;  %v4918_v20 = vmul.f32 %v7463_v54, %v16566_v12  ;;  %vm4935_vm12 = vcmp.eq.f32.partialorder %v16590_v10, 0.0  ;;  %v4892_v8 = vsel %vm4891_vm9, %v16526_v56, %v4890_v39  ;;  %vm4942_vm10 = vcmp.eq.f32.partialorder %v16602_v22, 0.0 }
 0x4d7   :  { %v7467_v47 = vpop.eup %7466  ;;  %vm4949_vm14 = vcmp.eq.f32.partialorder %v16611_v32, 0.0  ;;  %v4950_v60 = vand.u32 2147483648, %v16611_v32  ;;  %vm4954_vm4 = vcmp.eq.f32.partialorder %v16627_v2, inf  ;;  %v4957_v35 = vand.u32 2147483648, %v16627_v2 }
 0x4d8   :  { %v7469_v0 = vpop.eup %7468  ;;  %v4899_v54 = vsel %vm4898_vm3, %v16537_v53, %v4897_v21  ;;  %v4906_v28 = vsel %vm4905_vm6, %v16545_v4, %v4904_v9  ;;  %vm4961_vm8 = vcmp.eq.f32.partialorder %v16642_v36, inf  ;;  %v19490_v1 = vand.u32 2147483648, %v16504_v25 }
 0x4d9   :  { %v7471_v52 = vpop.eup %7470  ;;  %v4888_v26 = vsel %vm4886_vm2, %v4887_v51, %v4885_v30  ;;  %v4925_v21 = vmul.f32 %v7465_v13, %v16581_v19  ;;  %vm4956_vm9 = vcmp.eq.f32.partialorder %v16627_v2, 0.0  ;;  %v16737_v9 = vadd.f32 %v16532_v43, %v4874_v7 }
 0x4da   :  { %v4881_v11 = vsel %vm4879_vm0, %v19490_v1, %v4878_v42  ;;  %v4895_v39 = vsel %vm4893_vm5, %v4894_v3, %v4892_v8  ;;  %v4913_v38 = vsel %vm4912_vm15, %v16555_v31, %v4911_v46  ;;  %v4920_v25 = vsel %vm4919_vm1, %v16566_v12, %v4918_v20 }
 0x4db   :  { %v7473_v41 = vpop.eup %7472  ;;  %v4932_v34 = vmul.f32 %v7467_v47, %v16590_v10  ;;  %vm4968_vm0 = vcmp.eq.f32.partialorder %v16647_v44, inf  ;;  %v4902_v43 = vsel %vm4900_vm13, %v4901_v33, %v4899_v54  ;;  %vm19491_vm2 = vcmp.eq.f32.partialorder %v16545_v4, 0.0 }
 0x4dc   :  { %v4909_v1 = vsel %vm19491_vm2, %v4908_v49, %v4906_v28  ;;  %v4939_v56 = vmul.f32 %v7469_v0, %v16602_v22  ;;  %v4946_v7 = vmul.f32 %v7471_v52, %v16611_v32  ;;  %vm4963_vm5 = vcmp.eq.f32.partialorder %v16642_v36, 0.0 }
 0x4dd   :  { %v7475_v13 = vpop.eup %7474  ;;  %vm4975_vm3 = vcmp.eq.f32.partialorder %v16653_v63, inf  ;;  %v4978_v51 = vand.u32 2147483648, %v16653_v63  ;;  %v4981_v47 = vadd.f32 %v16559_v50, %v4881_v11  ;;  %v16760_v3 = vadd.f32 %v16571_v57, %v4888_v26 }
 0x4de   :  { %v19492_v53 = vand.u32 2147483648, %v16555_v31  ;;  %vm19493_vm13 = vcmp.eq.f32.partialorder %v16555_v31, 0.0  ;;  %vm19494_vm6 = vcmp.eq.f32.partialorder %v16566_v12, 0.0  ;;  %vm19495_vm15 = vcmp.eq.f32.partialorder %v16581_v19, inf }
 0x4df   :  { %v4923_v33 = vsel %vm19494_vm6, %v4922_v5, %v4920_v25  ;;  %v4927_v49 = vsel %vm19495_vm15, %v16581_v19, %v4925_v21  ;;  %v4953_v28 = vmul.f32 %v7473_v41, %v16627_v2  ;;  %vm4970_vm1 = vcmp.eq.f32.partialorder %v16647_v44, 0.0  ;;  %v7477_v50 = vpop.eup %7476 }
 0x4e0   :  { %v4916_v4 = vsel %vm19493_vm13, %v19492_v53, %v4913_v38  ;;  %v4934_v57 = vsel %vm4933_vm11, %v16590_v10, %v4932_v34  ;;  %vm4977_vm2 = vcmp.eq.f32.partialorder %v16653_v63, 0.0  ;;  %v4983_v31 = vadd.f32 %v16576_v40, %v4895_v39  ;;  %v7479_v38 = vpop.eup %7478 }
 0x4e1   :  { %v4984_v12 = vadd.f32 %v16585_v16, %v4902_v43  ;;  %v4985_v11 = vadd.f32 %v16594_v37, %v4909_v1  ;;  %v4941_v41 = vsel %vm4940_vm7, %v16602_v22, %v4939_v56  ;;  %vm19496_vm13 = vcmp.eq.f32.partialorder %v16611_v32, inf }
 0x4e2   :  { %v4948_v26 = vsel %vm19496_vm13, %v16611_v32, %v4946_v7  ;;  %v4960_v5 = vmul.f32 %v7475_v13, %v16642_v36  ;;  %v5012_v8 = vmul.f32 %v16737_v9, %v16737_v9  ;;  %v19497_v40 = vand.u32 2147483648, %v16581_v19 }
 0x4e3   :  { %vm19498_vm11 = vcmp.eq.f32.partialorder %v16581_v19, 0.0  ;;  %v4986_v37 = vadd.f32 %v16597_v58, %v4916_v4  ;;  %v4987_v42 = vadd.f32 %v16606_v18, %v4923_v33  ;;  %v5013_v30 = vmul.f32 %v4981_v47, %v4981_v47 }
 0x4e4   :  { %v4930_v16 = vsel %vm19498_vm11, %v19497_v40, %v4927_v49  ;;  %v19499_v46 = vand.u32 2147483648, %v16590_v10  ;;  %v4955_v0 = vsel %vm4954_vm4, %v16627_v2, %v4953_v28  ;;  %v4967_v52 = vmul.f32 %v7477_v50, %v16647_v44 }
 0x4e5   :  { %v5014_v19 = vmul.f32 %v16760_v3, %v16760_v3  ;;  %v19500_v54 = vand.u32 2147483648, %v16602_v22  ;;  %v4951_v18 = vsel %vm4949_vm14, %v4950_v60, %v4948_v26  ;;  %v4974_v10 = vmul.f32 %v7479_v38, %v16653_v63 }
 0x4e6   :  { %v4937_v20 = vsel %vm4935_vm12, %v19499_v46, %v4934_v57  ;;  %v5015_v39 = vmul.f32 %v4983_v31, %v4983_v31  ;;  %v4962_v21 = vsel %vm4961_vm8, %v16642_v36, %v4960_v5  ;;  %v4988_v25 = vadd.f32 %v16614_v45, %v4930_v16  ;;  %v19505_v16 = vld [vmem:[#allocation18_spill] sm:$0xff] }
 0x4e7   :  { %v4944_v58 = vsel %vm4942_vm10, %v19500_v54, %v4941_v41  ;;  %v5016_v34 = vmul.f32 %v4984_v12, %v4984_v12  ;;  %v16817_v43 = vadd.f32 %v16478_v29, %v5012_v8  ;;  %v4958_v22 = vsel %vm4956_vm9, %v4957_v35, %v4955_v0 }
 0x4e8   :  { %v4989_v1 = vadd.f32 %v16616_v17, %v4937_v20  ;;  %v5017_v32 = vmul.f32 %v4985_v11, %v4985_v11  ;;  %v16823_v60 = vadd.f32 %v16501_v14, %v5013_v30  ;;  %v4969_v56 = vsel %vm4968_vm0, %v16647_v44, %v4967_v52 }
 0x4e9   :  { %v4990_v7 = vadd.f32 %v16620_v55, %v4944_v58  ;;  %v4991_v45 = vadd.f32 %v16622_v62, %v4951_v18  ;;  %v16831_v13 = vadd.f32 %v16513_v61, %v5014_v19  ;;  %v19501_v2 = vand.u32 2147483648, %v16642_v36  ;;  %v19506_v19 = vld [vmem:[#allocation11_spill] sm:$0xff] }
 0x4ea   :  { %v4976_v35 = vsel %vm4975_vm3, %v16653_v63, %v4974_v10  ;;  %v5018_v53 = vmul.f32 %v4986_v37, %v4986_v37  ;;  %v16841_v4 = vadd.f32 %v16523_v15, %v5015_v39  ;;  %v4992_v55 = vadd.f32 %v16630_v27, %v4958_v22  ;;  %v19503_v63 = vld [vmem:[#allocation15_spill] sm:$0xff]  ;;  %v19507_v10 = vld [vmem:[#allocation12_spill] sm:$0xff]  ;;  %v19508_v39 = vld [vmem:[#allocation13_spill] sm:$0xff] }
 0x4eb   :  { %v4965_v17 = vsel %vm4963_vm5, %v19501_v2, %v4962_v21  ;;  %v5019_v33 = vmul.f32 %v4987_v42, %v4987_v42  ;;  %v16845_v62 = vadd.f32 %v16534_v24, %v5016_v34  ;;  %7480 = vrsqrt.f32 %v16817_v43 }
 0x4ec   :  { %v19502_v49 = vand.u32 2147483648, %v16647_v44  ;;  %v5020_v28 = vmul.f32 %v4988_v25, %v4988_v25  ;;  %v16853_v50 = vadd.f32 %v16542_v6, %v5017_v32  ;;  %7482 = vrsqrt.f32 %v16823_v60 }
 0x4ed   :  { %v4979_v27 = vsel %vm4977_vm2, %v4978_v51, %v4976_v35  ;;  %v4993_v57 = vadd.f32 %v16632_v23, %v4965_v17  ;;  %v16860_v38 = vadd.f32 -0.5, %v16737_v9  ;;  %7484 = vrsqrt.f32 %v16831_v13  ;;  %v19504_v23 = vld [vmem:[#allocation16_spill] sm:$0xff] }
 0x4ee   :  { %v4972_v36 = vsel %vm4970_vm1, %v19502_v49, %v4969_v56  ;;  %v16863_v41 = vadd.f32 -0.5, %v4981_v47  ;;  %v5021_v44 = vmul.f32 %v4989_v1, %v4989_v1  ;;  %v16866_v26 = vadd.f32 %v16552_v48, %v5018_v53  ;;  %v19512_v53 = vld [vmem:[#allocation19_spill] sm:$0xff] }
 0x4ef   :  { %7486 = vrsqrt.f32 %v16841_v4  ;;  %v4994_v5 = vadd.f32 %v16634_v59, %v4972_v36  ;;  %v5022_v8 = vmul.f32 %v4990_v7, %v4990_v7  ;;  %v16871_v51 = vadd.f32 %v19503_v63, %v5019_v33 }
 0x4f0   :  { %7488 = vrsqrt.f32 %v16845_v62  ;;  %v4995_v9 = vadd.f32 %v19504_v23, %v4979_v27  ;;  %v5023_v40 = vmul.f32 %v4991_v45, %v4991_v45  ;;  %v16876_v47 = vadd.f32 %v19505_v16, %v5020_v28 }
 0x4f1   :  { %7490 = vrsqrt.f32 %v16853_v50  ;;  %v16880_v30 = vadd.f32 -0.5, %v16760_v3  ;;  %v16882_v46 = vadd.f32 -0.5, %v4983_v31  ;;  %v16884_v59 = vadd.f32 -0.5, %v4984_v12 }
 0x4f2   :  { %v5024_v20 = vmul.f32 %v4992_v55, %v4992_v55  ;;  %v16886_v0 = vadd.f32 -0.5, %v4985_v11  ;;  %v16888_v52 = vadd.f32 -0.5, %v4986_v37  ;;  %v16891_v54 = vadd.f32 %v19506_v19, %v5021_v44 }
 0x4f3   :  { %7492 = vrsqrt.f32 %v16866_v26  ;;  %v16894_v58 = vadd.f32 -0.5, %v4987_v42  ;;  %v5025_v18 = vmul.f32 %v4993_v57, %v4993_v57  ;;  %v16897_v3 = vadd.f32 %v19507_v10, %v5022_v8  ;;  %v19509_v42 = vld [vmem:[#allocation14_spill] sm:$0xff] }
 0x4f4   :  { %7494 = vrsqrt.f32 %v16871_v51  ;;  %v5026_v31 = vmul.f32 %v4994_v5, %v4994_v5  ;;  %v5027_v12 = vmul.f32 %v4995_v9, %v4995_v9  ;;  %v16901_v11 = vadd.f32 %v19508_v39, %v5023_v40 }
 0x4f5   :  { %7496 = vrsqrt.f32 %v16876_v47  ;;  %v16904_v37 = vadd.f32 -0.5, %v4988_v25  ;;  %v16906_v21 = vadd.f32 -0.5, %v4989_v1  ;;  %v16908_v34 = vadd.f32 -0.5, %v4990_v7  ;;  %v19511_v25 = vld [vmem:[#allocation17_spill] sm:$0xff] }
 0x4f6   :  { %v16911_v22 = vadd.f32 %v19509_v42, %v5024_v20  ;;  %v16913_v32 = vadd.f32 -0.5, %v4991_v45  ;;  %v16915_v56 = vadd.f32 -0.5, %v4992_v55  ;;  %v16917_v2 = vadd.f32 -0.5, %v4993_v57  ;;  %v19513_v45 = vld [vmem:[#allocation20_spill] sm:$0xff] }
 0x4f7   :  { %7498 = vrsqrt.f32 %v16891_v54  ;;  %v16920_v17 = vadd.f32 -0.5, %v4994_v5  ;;  %v16922_v35 = vadd.f32 -0.5, %v4995_v9  ;;  %v16925_v1 = vadd.f32 %v19511_v25, %v5025_v18 }
 0x4f8   :  { %7500 = vrsqrt.f32 %v16897_v3  ;;  %v7481_v7 = vpop.eup %7480  ;;  %v16929_v33 = vadd.f32 %v19512_v53, %v5026_v31  ;;  %v16932_v55 = vadd.f32 %v19513_v45, %v5027_v12  ;;  %vm5046_vm14 = vcmp.eq.f32.partialorder %v16817_v43, inf }
 0x4f9   :  { %19510 = vst [vmem:[#allocation15_spill] sm:$0xff] %v16922_v35  ;;  %7502 = vrsqrt.f32 %v16901_v11  ;;  %v7483_v49 = vpop.eup %7482  ;;  %vm5048_vm7 = vcmp.eq.f32.partialorder %v16817_v43, 0.0  ;;  %v5049_v36 = vand.u32 2147483648, %v16817_v43  ;;  %vm5053_vm10 = vcmp.eq.f32.partialorder %v16823_v60, inf }
 0x4fa   :  { %7504 = vrsqrt.f32 %v16911_v22  ;;  %v7485_v28 = vpop.eup %7484  ;;  %vm5060_vm12 = vcmp.eq.f32.partialorder %v16831_v13, inf  ;;  %vm5067_vm4 = vcmp.eq.f32.partialorder %v16841_v4, inf  ;;  %v5045_v5 = vmul.f32 %v7481_v7, %v16817_v43 }
 0x4fb   :  { %vm5055_vm8 = vcmp.eq.f32.partialorder %v16823_v60, 0.0  ;;  %vm5062_vm9 = vcmp.eq.f32.partialorder %v16831_v13, 0.0  ;;  %vm5069_vm0 = vcmp.eq.f32.partialorder %v16841_v4, 0.0  ;;  %v5070_v8 = vand.u32 2147483648, %v16841_v4 }
 0x4fc   :  { %v7487_v44 = vpop.eup %7486  ;;  %vm5074_vm5 = vcmp.eq.f32.partialorder %v16845_v62, inf  ;;  %vm5076_vm3 = vcmp.eq.f32.partialorder %v16845_v62, 0.0  ;;  %v5077_v9 = vand.u32 2147483648, %v16845_v62  ;;  %vm5081_vm6 = vcmp.eq.f32.partialorder %v16853_v50, inf }
 0x4fd   :  { %v7489_v23 = vpop.eup %7488  ;;  %vm5083_vm15 = vcmp.eq.f32.partialorder %v16853_v50, 0.0  ;;  %7506 = vrsqrt.f32 %v16925_v1  ;;  %v5084_v20 = vand.u32 2147483648, %v16853_v50  ;;  %v5052_v31 = vmul.f32 %v7483_v49, %v16823_v60 }
 0x4fe   :  { %v7491_v40 = vpop.eup %7490  ;;  %7508 = vrsqrt.f32 %v16929_v33  ;;  %v5047_v57 = vsel %vm5046_vm14, %v16817_v43, %v5045_v5  ;;  %v5059_v27 = vmul.f32 %v7485_v28, %v16831_v13  ;;  %v5066_v45 = vmul.f32 %v7487_v44, %v16841_v4 }
 0x4ff   :  { %7510 = vrsqrt.f32 %v16932_v55  ;;  %v5073_v18 = vmul.f32 %v7489_v23, %v16845_v62  ;;  %v5080_v12 = vmul.f32 %v7491_v40, %v16853_v50  ;;  %vm5097_vm13 = vcmp.eq.f32.partialorder %v16871_v51, 0.0 }
 0x500   :  { %v7493_v7 = vpop.eup %7492  ;;  %v5105_v53 = vand.u32 2147483648, %v16876_v47  ;;  %vm5109_vm14 = vcmp.eq.f32.partialorder %v16891_v54, inf  ;;  %vm5116_vm11 = vcmp.eq.f32.partialorder %v16897_v3, inf  ;;  %v5050_v23 = vsel %vm5048_vm7, %v5049_v36, %v5047_v57 }
 0x501   :  { %v7495_v49 = vpop.eup %7494  ;;  %vm5123_vm1 = vcmp.eq.f32.partialorder %v16901_v11, inf  ;;  %vm5130_vm2 = vcmp.eq.f32.partialorder %v16911_v22, inf  ;;  %v5054_v42 = vsel %vm5053_vm10, %v16823_v60, %v5052_v31  ;;  %v5061_v28 = vsel %vm5060_vm12, %v16831_v13, %v5059_v27 }
 0x502   :  { %v7497_v5 = vpop.eup %7496  ;;  %v5068_v43 = vsel %vm5067_vm4, %v16841_v4, %v5066_v45  ;;  %v5087_v36 = vmul.f32 %v7493_v7, %v16866_v26  ;;  %v5075_v40 = vsel %vm5074_vm5, %v16845_v62, %v5073_v18  ;;  %v5082_v31 = vsel %vm5081_vm6, %v16853_v50, %v5080_v12 }
 0x503   :  { %v5094_v44 = vmul.f32 %v7495_v49, %v16871_v51  ;;  %v5101_v27 = vmul.f32 %v7497_v5, %v16876_v47  ;;  %vm5118_vm10 = vcmp.eq.f32.partialorder %v16897_v3, 0.0  ;;  %vm5125_vm12 = vcmp.eq.f32.partialorder %v16901_v11, 0.0 }
 0x504   :  { %v7499_v25 = vpop.eup %7498  ;;  %vm5132_vm4 = vcmp.eq.f32.partialorder %v16911_v22, 0.0  ;;  %v5133_v7 = vand.u32 2147483648, %v16911_v22  ;;  %vm5137_vm7 = vcmp.eq.f32.partialorder %v16925_v1, inf  ;;  %v19514_v49 = vand.u32 2147483648, %v16823_v60 }
 0x505   :  { %v7501_v57 = vpop.eup %7500  ;;  %v19515_v10 = vand.u32 2147483648, %v16831_v13  ;;  %v5071_v16 = vsel %vm5069_vm0, %v5070_v8, %v5068_v43  ;;  %vm5144_vm5 = vcmp.eq.f32.partialorder %v16929_v33, inf  ;;  %v5156_v18 = vadd.f32 %v16860_v38, %v5050_v23 }
 0x506   :  { %v7503_v45 = vpop.eup %7502  ;;  %v5057_v5 = vsel %vm5055_vm8, %v19514_v49, %v5054_v42  ;;  %v5078_v39 = vsel %vm5076_vm3, %v5077_v9, %v5075_v40  ;;  %v5085_v35 = vsel %vm5083_vm15, %v5084_v20, %v5082_v31  ;;  %vm19516_vm8 = vcmp.eq.f32.partialorder %v16866_v26, inf }
 0x507   :  { %v7505_v12 = vpop.eup %7504  ;;  %v5064_v19 = vsel %vm5062_vm9, %v19515_v10, %v5061_v28  ;;  %v5089_v60 = vsel %vm19516_vm8, %v16866_v26, %v5087_v36  ;;  %v5108_v13 = vmul.f32 %v7499_v25, %v16891_v54  ;;  %vm19517_vm9 = vcmp.eq.f32.partialorder %v16871_v51, inf }
 0x508   :  { %v5096_v4 = vsel %vm19517_vm9, %v16871_v51, %v5094_v44  ;;  %vm19518_vm0 = vcmp.eq.f32.partialorder %v16876_v47, inf  ;;  %v5115_v62 = vmul.f32 %v7501_v57, %v16897_v3  ;;  %v5122_v10 = vmul.f32 %v7503_v45, %v16901_v11 }
 0x509   :  { %v5103_v38 = vsel %vm19518_vm0, %v16876_v47, %v5101_v27  ;;  %vm5139_vm3 = vcmp.eq.f32.partialorder %v16925_v1, 0.0  ;;  %v5129_v42 = vmul.f32 %v7505_v12, %v16911_v22  ;;  %vm5146_vm6 = vcmp.eq.f32.partialorder %v16929_v33, 0.0 }
 0x50a   :  { %v7507_v50 = vpop.eup %7506  ;;  %vm5151_vm15 = vcmp.eq.f32.partialorder %v16932_v55, inf  ;;  %v5154_v25 = vand.u32 2147483648, %v16932_v55  ;;  %v5157_v8 = vadd.f32 %v16863_v41, %v5057_v5  ;;  %v19519_v20 = vand.u32 2147483648, %v16866_v26 }
 0x50b   :  { %v7509_v9 = vpop.eup %7508  ;;  %vm19520_vm8 = vcmp.eq.f32.partialorder %v16866_v26, 0.0  ;;  %v5158_v44 = vadd.f32 %v16880_v30, %v5064_v19  ;;  %v17050_v23 = vadd.f32 %v16882_v46, %v5071_v16  ;;  %v17053_v40 = vadd.f32 %v16884_v59, %v5078_v39 }
 0x50c   :  { %v5092_v28 = vsel %vm19520_vm8, %v19519_v20, %v5089_v60  ;;  %v19521_v43 = vand.u32 2147483648, %v16871_v51  ;;  %vm19522_vm9 = vcmp.eq.f32.partialorder %v16876_v47, 0.0  ;;  %v5110_v26 = vsel %vm5109_vm14, %v16891_v54, %v5108_v13  ;;  %v7511_v30 = vpop.eup %7510 }
 0x50d   :  { %v5106_v41 = vsel %vm19522_vm9, %v5105_v53, %v5103_v38  ;;  %vm5153_vm0 = vcmp.eq.f32.partialorder %v16932_v55, 0.0  ;;  %v5161_v16 = vadd.f32 %v16886_v0, %v5085_v35  ;;  %v5117_v46 = vsel %vm5116_vm11, %v16897_v3, %v5115_v62 }
 0x50e   :  { %v5099_v36 = vsel %vm5097_vm13, %v19521_v43, %v5096_v4  ;;  %v5124_v51 = vsel %vm5123_vm1, %v16901_v11, %v5122_v10  ;;  %v5136_v47 = vmul.f32 %v7507_v50, %v16925_v1  ;;  %v5188_v59 = vmul.f32 %v5156_v18, %v5156_v18 }
 0x50f   :  { %v5131_v19 = vsel %vm5130_vm2, %v16911_v22, %v5129_v42  ;;  %v5143_v39 = vmul.f32 %v7509_v9, %v16929_v33  ;;  %v5162_v0 = vadd.f32 %v16888_v52, %v5092_v28  ;;  %v5189_v35 = vmul.f32 %v5157_v8, %v5157_v8 }
 0x510   :  { %v19523_v53 = vand.u32 2147483648, %v16891_v54  ;;  %vm19524_vm13 = vcmp.eq.f32.partialorder %v16891_v54, 0.0  ;;  %v5163_v31 = vadd.f32 %v16894_v58, %v5099_v36  ;;  %v5164_v27 = vadd.f32 %v16904_v37, %v5106_v41 }
 0x511   :  { %v5190_v45 = vmul.f32 %v5158_v44, %v5158_v44  ;;  %v19525_v12 = vand.u32 2147483648, %v16897_v3  ;;  %v19526_v5 = vand.u32 2147483648, %v16901_v11  ;;  %v5150_v60 = vmul.f32 %v7511_v30, %v16932_v55 }
 0x512   :  { %v5113_v57 = vsel %vm19524_vm13, %v19523_v53, %v5110_v26  ;;  %v5191_v54 = vmul.f32 %v17050_v23, %v17050_v23  ;;  %v5134_v58 = vsel %vm5132_vm4, %v5133_v7, %v5131_v19  ;;  %v5138_v37 = vsel %vm5137_vm7, %v16925_v1, %v5136_v47  ;;  %v19530_v26 = vld [vmem:[#allocation18_spill] sm:$0xff]  ;;  %v19531_v47 = vld [vmem:[#allocation11_spill] sm:$0xff]  ;;  %v19533_v53 = vld [vmem:[#allocation13_spill] sm:$0xff] }
 0x513   :  { %v5120_v49 = vsel %vm5118_vm10, %v19525_v12, %v5117_v46  ;;  %v5127_v52 = vsel %vm5125_vm12, %v19526_v5, %v5124_v51  ;;  %v5192_v3 = vmul.f32 %v17053_v40, %v17053_v40  ;;  %v17103_v13 = vadd.f32 %v16478_v29, %v5188_v59 }
 0x514   :  { %v5145_v11 = vsel %vm5144_vm5, %v16929_v33, %v5143_v39  ;;  %v5165_v4 = vadd.f32 %v16906_v21, %v5113_v57  ;;  %v5193_v38 = vmul.f32 %v5161_v16, %v5161_v16  ;;  %v17110_v22 = vadd.f32 %v16501_v14, %v5189_v35  ;;  %v19532_v35 = vld [vmem:[#allocation12_spill] sm:$0xff] }
 0x515   :  { %v5166_v7 = vadd.f32 %v16908_v34, %v5120_v49  ;;  %v5167_v62 = vadd.f32 %v16913_v32, %v5127_v52  ;;  %v5194_v10 = vmul.f32 %v5162_v0, %v5162_v0  ;;  %v17115_v50 = vadd.f32 %v16513_v61, %v5190_v45 }
 0x516   :  { %v19527_v29 = vand.u32 2147483648, %v16925_v1  ;;  %v5152_v21 = vsel %vm5151_vm15, %v16932_v55, %v5150_v60  ;;  %v5168_v14 = vadd.f32 %v16915_v56, %v5134_v58  ;;  %v17126_v9 = vadd.f32 %v16523_v15, %v5191_v54  ;;  %v19535_v54 = vld [vmem:[#allocation17_spill] sm:$0xff] }
 0x517   :  { %v19528_v34 = vand.u32 2147483648, %v16929_v33  ;;  %v5195_v32 = vmul.f32 %v5163_v31, %v5163_v31  ;;  %v17133_v20 = vadd.f32 %v16534_v24, %v5192_v3  ;;  %7512 = vrsqrt.f32 %v17103_v13 }
 0x518   :  { %v5141_v42 = vsel %vm5139_vm3, %v19527_v29, %v5138_v37  ;;  %v17136_v1 = vadd.f32 -0.5, %v5156_v18  ;;  %v5196_v28 = vmul.f32 %v5164_v27, %v5164_v27  ;;  %v17139_v43 = vadd.f32 %v16542_v6, %v5193_v38  ;;  %v19536_v37 = vld [vmem:[#allocation19_spill] sm:$0xff] }
 0x519   :  { %v5148_v61 = vsel %vm5146_vm6, %v19528_v34, %v5145_v11  ;;  %7514 = vrsqrt.f32 %v17110_v22  ;;  %v5155_v15 = vsel %vm5153_vm0, %v5154_v25, %v5152_v21  ;;  %v5169_v56 = vadd.f32 %v16917_v2, %v5141_v42  ;;  %v19529_v2 = vld [vmem:[#allocation15_spill] sm:$0xff] }
 0x51a   :  { %v17146_v33 = vadd.f32 %v16552_v48, %v5194_v10  ;;  %7516 = vrsqrt.f32 %v17115_v50  ;;  %v5170_v24 = vadd.f32 %v16920_v17, %v5148_v61  ;;  %v17150_v18 = vadd.f32 -0.5, %v5157_v8 }
 0x51b   :  { %v5197_v36 = vmul.f32 %v5165_v4, %v5165_v4  ;;  %7518 = vrsqrt.f32 %v17126_v9  ;;  %v17153_v6 = vadd.f32 -0.5, %v5158_v44  ;;  %v5198_v41 = vmul.f32 %v5166_v7, %v5166_v7 }
 0x51c   :  { %v17156_v55 = vadd.f32 %v19503_v63, %v5195_v32  ;;  %7520 = vrsqrt.f32 %v17133_v20  ;;  %v5171_v48 = vadd.f32 %v19529_v2, %v5155_v15  ;;  %v5199_v25 = vmul.f32 %v5167_v62, %v5167_v62 }
 0x51d   :  { %v17161_v30 = vadd.f32 %v19530_v26, %v5196_v28  ;;  %7522 = vrsqrt.f32 %v17139_v43  ;;  %v17165_v17 = vadd.f32 -0.5, %v17050_v23  ;;  %v17168_v8 = vadd.f32 -0.5, %v17053_v40 }
 0x51e   :  { %v17170_v44 = vadd.f32 -0.5, %v5161_v16  ;;  %7524 = vrsqrt.f32 %v17146_v33  ;;  %v17173_v63 = vadd.f32 -0.5, %v5162_v0  ;;  %v17175_v46 = vadd.f32 -0.5, %v5163_v31 }
 0x51f   :  { %v5200_v51 = vmul.f32 %v5168_v14, %v5168_v14  ;;  %v17178_v59 = vadd.f32 %v19531_v47, %v5197_v36  ;;  %v5201_v19 = vmul.f32 %v5169_v56, %v5169_v56  ;;  %v5202_v39 = vmul.f32 %v5170_v24, %v5170_v24 }
 0x520   :  { %v17181_v23 = vadd.f32 %v19532_v35, %v5198_v41  ;;  %7526 = vrsqrt.f32 %v17156_v55  ;;  %v17184_v40 = vadd.f32 -0.5, %v5164_v27  ;;  %v5203_v16 = vmul.f32 %v5171_v48, %v5171_v48  ;;  %v19534_v27 = vld [vmem:[#allocation14_spill] sm:$0xff] }
 0x521   :  { %v17187_v57 = vadd.f32 %v19533_v53, %v5199_v25  ;;  %7528 = vrsqrt.f32 %v17161_v30  ;;  %v17190_v0 = vadd.f32 -0.5, %v5165_v4  ;;  %v17192_v31 = vadd.f32 -0.5, %v5166_v7  ;;  %v19537_v4 = vld [vmem:[#allocation20_spill] sm:$0xff] }
 0x522   :  { %v17194_v45 = vadd.f32 -0.5, %v5167_v62  ;;  %v17196_v12 = vadd.f32 -0.5, %v5168_v14  ;;  %v17198_v49 = vadd.f32 -0.5, %v5169_v56  ;;  %v17200_v5 = vadd.f32 -0.5, %v5170_v24 }
 0x523   :  { %v17203_v52 = vadd.f32 %v19534_v27, %v5200_v51  ;;  %7530 = vrsqrt.f32 %v17178_v59  ;;  %v17206_v60 = vadd.f32 -0.5, %v5171_v48  ;;  %v17209_v58 = vadd.f32 %v19535_v54, %v5201_v19 }
 0x524   :  { %v17212_v3 = vadd.f32 %v19536_v37, %v5202_v39  ;;  %7532 = vrsqrt.f32 %v17181_v23  ;;  %v7513_v11 = vpop.eup %7512  ;;  %v17216_v38 = vadd.f32 %v19537_v4, %v5203_v16  ;;  %vm5222_vm1 = vcmp.eq.f32.partialorder %v17103_v13, inf }
 0x525   :  { %vm5224_vm2 = vcmp.eq.f32.partialorder %v17103_v13, 0.0  ;;  %7534 = vrsqrt.f32 %v17187_v57  ;;  %v5225_v62 = vand.u32 2147483648, %v17103_v13  ;;  %vm5229_vm11 = vcmp.eq.f32.partialorder %v17110_v22, inf }
 0x526   :  { %v7515_v7 = vpop.eup %7514  ;;  %vm5231_vm14 = vcmp.eq.f32.partialorder %v17110_v22, 0.0  ;;  %v5232_v10 = vand.u32 2147483648, %v17110_v22  ;;  %vm5236_vm7 = vcmp.eq.f32.partialorder %v17115_v50, inf  ;;  %v5239_v42 = vand.u32 2147483648, %v17115_v50 }
 0x527   :  { %v7517_v29 = vpop.eup %7516  ;;  %vm5243_vm10 = vcmp.eq.f32.partialorder %v17126_v9, inf  ;;  %7536 = vrsqrt.f32 %v17203_v52  ;;  %vm5238_vm12 = vcmp.eq.f32.partialorder %v17115_v50, 0.0  ;;  %vm5245_vm4 = vcmp.eq.f32.partialorder %v17126_v9, 0.0 }
 0x528   :  { %v7519_v21 = vpop.eup %7518  ;;  %v5246_v14 = vand.u32 2147483648, %v17126_v9  ;;  %vm5250_vm5 = vcmp.eq.f32.partialorder %v17133_v20, inf  ;;  %v5253_v34 = vand.u32 2147483648, %v17133_v20  ;;  %vm5257_vm3 = vcmp.eq.f32.partialorder %v17139_v43, inf }
 0x529   :  { %v7521_v61 = vpop.eup %7520  ;;  %v5221_v32 = vmul.f32 %v7513_v11, %v17103_v13  ;;  %vm5252_vm6 = vcmp.eq.f32.partialorder %v17133_v20, 0.0  ;;  %v5260_v28 = vand.u32 2147483648, %v17139_v43  ;;  %7538 = vrsqrt.f32 %v17209_v58 }
 0x52a   :  { %v7523_v15 = vpop.eup %7522  ;;  %v5228_v56 = vmul.f32 %v7515_v7, %v17110_v22  ;;  %vm5264_vm8 = vcmp.eq.f32.partialorder %v17146_v33, inf  ;;  %7540 = vrsqrt.f32 %v17212_v3  ;;  %v5267_v36 = vand.u32 2147483648, %v17146_v33 }
 0x52b   :  { %v7525_v24 = vpop.eup %7524  ;;  %v5274_v41 = vand.u32 2147483648, %v17156_v55  ;;  %7542 = vrsqrt.f32 %v17216_v38  ;;  %v5235_v2 = vmul.f32 %v7517_v29, %v17115_v50  ;;  %v5242_v48 = vmul.f32 %v7519_v21, %v17126_v9 }
 0x52c   :  { %v5281_v25 = vand.u32 2147483648, %v17161_v30  ;;  %v5223_v51 = vsel %vm5222_vm1, %v17103_v13, %v5221_v32  ;;  %v5249_v47 = vmul.f32 %v7521_v61, %v17133_v20  ;;  %v5256_v19 = vmul.f32 %v7523_v15, %v17139_v43 }
 0x52d   :  { %v7527_v26 = vpop.eup %7526  ;;  %vm5280_vm9 = vcmp.eq.f32.partialorder %v17161_v30, 0.0  ;;  %vm5285_vm0 = vcmp.eq.f32.partialorder %v17178_v59, inf  ;;  %v5230_v35 = vsel %vm5229_vm11, %v17110_v22, %v5228_v56  ;;  %v5263_v16 = vmul.f32 %v7525_v24, %v17146_v33 }
 0x52e   :  { %v7529_v39 = vpop.eup %7528  ;;  %v5288_v53 = vand.u32 2147483648, %v17178_v59  ;;  %vm5292_vm13 = vcmp.eq.f32.partialorder %v17181_v23, inf  ;;  %vm5287_vm1 = vcmp.eq.f32.partialorder %v17178_v59, 0.0  ;;  %v5295_v27 = vand.u32 2147483648, %v17181_v23 }
 0x52f   :  { %vm5299_vm15 = vcmp.eq.f32.partialorder %v17187_v57, inf  ;;  %v5302_v54 = vand.u32 2147483648, %v17187_v57  ;;  %v5309_v37 = vand.u32 2147483648, %v17203_v52  ;;  %v5226_v4 = vsel %vm5224_vm2, %v5225_v62, %v5223_v51 }
 0x530   :  { %v7531_v11 = vpop.eup %7530  ;;  %v5237_v7 = vsel %vm5236_vm7, %v17115_v50, %v5235_v2  ;;  %v5244_v29 = vsel %vm5243_vm10, %v17126_v9, %v5242_v48  ;;  %v5270_v21 = vmul.f32 %v7527_v26, %v17156_v55  ;;  %vm5306_vm11 = vcmp.eq.f32.partialorder %v17203_v52, inf }
 0x531   :  { %v7533_v61 = vpop.eup %7532  ;;  %v5233_v32 = vsel %vm5231_vm14, %v5232_v10, %v5230_v35  ;;  %v5251_v13 = vsel %vm5250_vm5, %v17133_v20, %v5249_v47  ;;  %v5258_v62 = vsel %vm5257_vm3, %v17139_v43, %v5256_v19  ;;  %v5277_v15 = vmul.f32 %v7529_v39, %v17161_v30 }
 0x532   :  { %vm5294_vm2 = vcmp.eq.f32.partialorder %v17181_v23, 0.0  ;;  %vm5301_vm7 = vcmp.eq.f32.partialorder %v17187_v57, 0.0  ;;  %v7535_v56 = vpop.eup %7534  ;;  %v5265_v22 = vsel %vm5264_vm8, %v17146_v33, %v5263_v16  ;;  %vm5313_vm14 = vcmp.eq.f32.partialorder %v17209_v58, inf }
 0x533   :  { %v5316_v10 = vand.u32 2147483648, %v17209_v58  ;;  %v5323_v24 = vand.u32 2147483648, %v17212_v3  ;;  %v5240_v2 = vsel %vm5238_vm12, %v5239_v42, %v5237_v7  ;;  %v5247_v48 = vsel %vm5245_vm4, %v5246_v14, %v5244_v29 }
 0x534   :  { %v5284_v26 = vmul.f32 %v7531_v11, %v17178_v59  ;;  %vm5308_vm10 = vcmp.eq.f32.partialorder %v17203_v52, 0.0  ;;  %vm5320_vm5 = vcmp.eq.f32.partialorder %v17212_v3, inf  ;;  %v17308_v51 = vadd.f32 %v17136_v1, %v5226_v4  ;;  %v7537_v47 = vpop.eup %7536 }
 0x535   :  { %v5254_v19 = vsel %vm5252_vm6, %v5253_v34, %v5251_v13  ;;  %vm19538_vm12 = vcmp.eq.f32.partialorder %v17139_v43, 0.0  ;;  %vm19539_vm4 = vcmp.eq.f32.partialorder %v17156_v55, inf  ;;  %v17320_v42 = vadd.f32 %v17150_v18, %v5233_v32 }
 0x536   :  { %v5261_v50 = vsel %vm19538_vm12, %v5260_v28, %v5258_v62  ;;  %v5272_v9 = vsel %vm19539_vm4, %v17156_v55, %v5270_v21  ;;  %vm19540_vm3 = vcmp.eq.f32.partialorder %v17146_v33, 0.0  ;;  %vm19541_vm8 = vcmp.eq.f32.partialorder %v17161_v30, inf  ;;  %v7539_v43 = vpop.eup %7538 }
 0x537   :  { %v5268_v1 = vsel %vm19540_vm3, %v5267_v36, %v5265_v22  ;;  %v5279_v14 = vsel %vm19541_vm8, %v17161_v30, %v5277_v15  ;;  %v5291_v20 = vmul.f32 %v7533_v61, %v17181_v23  ;;  %v5298_v34 = vmul.f32 %v7535_v56, %v17187_v57  ;;  %v7541_v36 = vpop.eup %7540  ;;  %v17401_v15 = vld [vmem:[#allocation5] sm:$0xff]  ;;  %v17412_v22 = vld [vmem:[#allocation5 + $0x8] sm:$0xff] }
 0x538   :  { %vm5315_vm6 = vcmp.eq.f32.partialorder %v17209_v58, 0.0  ;;  %vm5322_vm12 = vcmp.eq.f32.partialorder %v17212_v3, 0.0  ;;  %vm5327_vm4 = vcmp.eq.f32.partialorder %v17216_v38, inf  ;;  %v5330_v18 = vand.u32 2147483648, %v17216_v38  ;;  %v7543_v11 = vpop.eup %7542 }
 0x539   :  { %v17334_v33 = vadd.f32 %v17153_v6, %v5240_v2  ;;  %v17337_v28 = vadd.f32 %v17165_v17, %v5247_v48  ;;  %vm19542_vm3 = vcmp.eq.f32.partialorder %v17156_v55, 0.0  ;;  %v5286_v35 = vsel %vm5285_vm0, %v17178_v59, %v5284_v26  ;;  %v17426_v48 = vld [vmem:[#allocation5 + $0x10] sm:$0xff] }
 0x53a   :  { %v5275_v39 = vsel %vm19542_vm3, %v5274_v41, %v5272_v9  ;;  %v5305_v16 = vmul.f32 %v7537_v47, %v17203_v52  ;;  %vm5329_vm8 = vcmp.eq.f32.partialorder %v17216_v38, 0.0  ;;  %v17349_v6 = vadd.f32 %v17168_v8, %v5254_v19 }
 0x53b   :  { %v5282_v17 = vsel %vm5280_vm9, %v5281_v25, %v5279_v14  ;;  %v17356_v55 = vadd.f32 %v17170_v44, %v5261_v50  ;;  %v17359_v41 = vadd.f32 %v17173_v63, %v5268_v1  ;;  %v5364_v4 = vmul.f32 %v17308_v51, %v17308_v51  ;;  %v17447_v14 = vld [vmem:[#allocation5 + $0x20] sm:$0xff] }
 0x53c   :  { %v5293_v8 = vsel %vm5292_vm13, %v17181_v23, %v5291_v20  ;;  %v5300_v7 = vsel %vm5299_vm15, %v17187_v57, %v5298_v34  ;;  %v5312_v30 = vmul.f32 %v7539_v43, %v17209_v58  ;;  %v5365_v44 = vmul.f32 %v17320_v42, %v17320_v42  ;;  %v17458_v34 = vld [vmem:[#allocation5 + $0x28] sm:$0xff] }
 0x53d   :  { %v5289_v63 = vsel %vm5287_vm1, %v5288_v53, %v5286_v35  ;;  %v5319_v25 = vmul.f32 %v7541_v36, %v17212_v3  ;;  %v17378_v29 = vadd.f32 %v17175_v46, %v5275_v39  ;;  %v5366_v21 = vmul.f32 %v17334_v33, %v17334_v33  ;;  %v17468_v36 = vld [vmem:[#allocation5 + $0x30] sm:$0xff]  ;;  %v17482_v35 = vld [vmem:[#allocation5 + $0x38] sm:$0xff] }
 0x53e   :  { %v5307_v61 = vsel %vm5306_vm11, %v17203_v52, %v5305_v16  ;;  %v5326_v32 = vmul.f32 %v7543_v11, %v17216_v38  ;;  %v17387_v13 = vadd.f32 %v17184_v40, %v5282_v17  ;;  %v5367_v59 = vmul.f32 %v17337_v28, %v17337_v28 }
 0x53f   :  { %v5296_v46 = vsel %vm5294_vm2, %v5295_v27, %v5293_v8  ;;  %v5303_v53 = vsel %vm5301_vm7, %v5302_v54, %v5300_v7  ;;  %v5368_v62 = vmul.f32 %v17349_v6, %v17349_v6  ;;  %v17404_v40 = vadd.f32 %v17401_v15, %v5364_v4  ;;  %v17497_v4 = vld [vmem:[#allocation5 + $0x40] sm:$0xff] }
 0x540   :  { %v5314_v56 = vsel %vm5313_vm14, %v17209_v58, %v5312_v30  ;;  %v5341_v23 = vadd.f32 %v17190_v0, %v5289_v63  ;;  %v5369_v27 = vmul.f32 %v17356_v55, %v17356_v55  ;;  %v17415_v57 = vadd.f32 %v17412_v22, %v5365_v44  ;;  %19543 = vst [vmem:[#allocation16_spill] sm:$0xff] %v17497_v4  ;;  %v17509_v30 = vld [vmem:[#allocation5 + $0x48] sm:$0xff]  ;;  %v17520_v63 = vld [vmem:[#allocation5 + $0x50] sm:$0xff] }
 0x541   :  { %v5310_v54 = vsel %vm5308_vm10, %v5309_v37, %v5307_v61  ;;  %v5321_v2 = vsel %vm5320_vm5, %v17212_v3, %v5319_v25  ;;  %v5370_v0 = vmul.f32 %v17359_v41, %v17359_v41  ;;  %v17429_v26 = vadd.f32 %v17426_v48, %v5366_v21  ;;  %v17436_v37 = vld [vmem:[#allocation5 + $0x18] sm:$0xff]  ;;  %19544 = vst [vmem:[#allocation15_spill] sm:$0xff] %v17509_v30 }
 0x542   :  { %v5328_v47 = vsel %vm5327_vm4, %v17216_v38, %v5326_v32  ;;  %v5342_v19 = vadd.f32 %v17192_v31, %v5296_v46  ;;  %v5343_v52 = vadd.f32 %v17194_v45, %v5303_v53  ;;  %v17439_v50 = vadd.f32 %v17436_v37, %v5367_v59  ;;  %19545 = vst [vmem:[#allocation18_spill] sm:$0xff] %v17520_v63  ;;  %v17526_v61 = vld [vmem:[#allocation5 + $0x58] sm:$0xff] }
 0x543   :  { %v5317_v9 = vsel %vm5315_vm6, %v5316_v10, %v5314_v56  ;;  %v5371_v1 = vmul.f32 %v17378_v29, %v17378_v29  ;;  %v17450_v20 = vadd.f32 %v17447_v14, %v5368_v62  ;;  %7544 = vrsqrt.f32 %v17404_v40  ;;  %19546 = vst [vmem:[#allocation11_spill] sm:$0xff] %v17526_v61  ;;  %v17543_v62 = vld [vmem:[#allocation5 + $0x60] sm:$0xff] }
 0x544   :  { %v5324_v31 = vsel %vm5322_vm12, %v5323_v24, %v5321_v2  ;;  %v5344_v45 = vadd.f32 %v17196_v12, %v5310_v54  ;;  %v17461_v58 = vadd.f32 %v17458_v34, %v5369_v27  ;;  %7546 = vrsqrt.f32 %v17415_v57  ;;  %19547 = vst [vmem:[#allocation12_spill] sm:$0xff] %v17543_v62  ;;  %v17556_v2 = vld [vmem:[#allocation5 + $0x68] sm:$0xff] }
 0x545   :  { %v5331_v10 = vsel %vm5329_vm8, %v5330_v18, %v5328_v47  ;;  %v5372_v43 = vmul.f32 %v17387_v13, %v17387_v13  ;;  %v17471_v3 = vadd.f32 %v17468_v36, %v5370_v0  ;;  %7548 = vrsqrt.f32 %v17429_v26  ;;  %19548 = vst [vmem:[#allocation13_spill] sm:$0xff] %v17556_v2  ;;  %v17561_v47 = vld [vmem:[#allocation5 + $0x70] sm:$0xff] }
 0x546   :  { %v5345_v12 = vadd.f32 %v17198_v49, %v5317_v9  ;;  %v17476_v24 = vadd.f32 -0.5, %v17308_v51  ;;  %v5373_v39 = vmul.f32 %v5341_v23, %v5341_v23  ;;  %7550 = vrsqrt.f32 %v17439_v50  ;;  %19549 = vst [vmem:[#allocation14_spill] sm:$0xff] %v17561_v47 }
 0x547   :  { %v17480_v38 = vadd.f32 -0.5, %v17320_v42  ;;  %v5374_v18 = vmul.f32 %v5342_v19, %v5342_v19  ;;  %v17485_v16 = vadd.f32 %v17482_v35, %v5371_v1  ;;  %7552 = vrsqrt.f32 %v17450_v20 }
 0x548   :  { %v5346_v11 = vadd.f32 %v17200_v5, %v5324_v31  ;;  %v5347_v49 = vadd.f32 %v17206_v60, %v5331_v10  ;;  %v5375_v51 = vmul.f32 %v5343_v52, %v5343_v52  ;;  %7554 = vrsqrt.f32 %v17461_v58 }
 0x549   :  { %v17492_v17 = vadd.f32 -0.5, %v17334_v33  ;;  %v17495_v42 = vadd.f32 -0.5, %v17337_v28  ;;  %v17500_v8 = vadd.f32 %v17497_v4, %v5372_v43  ;;  %7556 = vrsqrt.f32 %v17471_v3 }
 0x54a   :  { %v17504_v5 = vadd.f32 -0.5, %v17349_v6  ;;  %v17507_v60 = vadd.f32 -0.5, %v17356_v55  ;;  %v5376_v7 = vmul.f32 %v5344_v45, %v5344_v45  ;;  %v17512_v33 = vadd.f32 %v17509_v30, %v5373_v39 }
 0x54b   :  { %v17515_v28 = vadd.f32 -0.5, %v17359_v41  ;;  %v17518_v44 = vadd.f32 -0.5, %v17378_v29  ;;  %v17523_v6 = vadd.f32 %v17520_v63, %v5374_v18  ;;  %7558 = vrsqrt.f32 %v17485_v16 }
 0x54c   :  { %v5377_v55 = vmul.f32 %v5345_v12, %v5345_v12  ;;  %v5378_v25 = vmul.f32 %v5346_v11, %v5346_v11  ;;  %v5379_v21 = vmul.f32 %v5347_v49, %v5347_v49  ;;  %v17529_v32 = vadd.f32 %v17526_v61, %v5375_v51 }
 0x54d   :  { %v17532_v41 = vadd.f32 -0.5, %v17387_v13  ;;  %v17534_v29 = vadd.f32 -0.5, %v5341_v23  ;;  %v17536_v59 = vadd.f32 -0.5, %v5342_v19  ;;  %7560 = vrsqrt.f32 %v17500_v8 }
 0x54e   :  { %v17539_v46 = vadd.f32 -0.5, %v5343_v52  ;;  %v17541_v53 = vadd.f32 -0.5, %v5344_v45  ;;  %v17546_v56 = vadd.f32 %v17543_v62, %v5376_v7  ;;  %7562 = vrsqrt.f32 %v17512_v33  ;;  %v17566_v52 = vld [vmem:[#allocation5 + $0x78] sm:$0xff] }
 0x54f   :  { %v17549_v27 = vadd.f32 -0.5, %v5345_v12  ;;  %v17551_v13 = vadd.f32 -0.5, %v5346_v11  ;;  %v17553_v23 = vadd.f32 -0.5, %v5347_v49  ;;  %7564 = vrsqrt.f32 %v17523_v6  ;;  %19550 = vst [vmem:[#allocation17_spill] sm:$0xff] %v17566_v52 }
 0x550   :  { %v7545_v54 = vpop.eup %7544  ;;  %v17559_v0 = vadd.f32 %v17556_v2, %v5377_v55  ;;  %v17564_v19 = vadd.f32 %v17561_v47, %v5378_v25  ;;  %v17569_v9 = vadd.f32 %v17566_v52, %v5379_v21  ;;  %7566 = vrsqrt.f32 %v17529_v32 }
 0x551   :  { %v7547_v1 = vpop.eup %7546  ;;  %vm5398_vm15 = vcmp.eq.f32.partialorder %v17404_v40, inf  ;;  %vm5400_vm9 = vcmp.eq.f32.partialorder %v17404_v40, 0.0  ;;  %v5401_v31 = vand.u32 2147483648, %v17404_v40  ;;  %vm5405_vm0 = vcmp.eq.f32.partialorder %v17415_v57, inf }
 0x552   :  { %v7549_v45 = vpop.eup %7548  ;;  %vm5407_vm13 = vcmp.eq.f32.partialorder %v17415_v57, 0.0  ;;  %v5408_v10 = vand.u32 2147483648, %v17415_v57  ;;  %vm5412_vm1 = vcmp.eq.f32.partialorder %v17429_v26, inf  ;;  %7568 = vrsqrt.f32 %v17546_v56 }
 0x553   :  { %v7551_v12 = vpop.eup %7550  ;;  %vm5414_vm11 = vcmp.eq.f32.partialorder %v17429_v26, 0.0  ;;  %vm5419_vm2 = vcmp.eq.f32.partialorder %v17439_v50, inf  ;;  %vm5421_vm7 = vcmp.eq.f32.partialorder %v17439_v50, 0.0  ;;  %v5422_v39 = vand.u32 2147483648, %v17439_v50 }
 0x554   :  { %vm5426_vm14 = vcmp.eq.f32.partialorder %v17450_v20, inf  ;;  %v7553_v18 = vpop.eup %7552  ;;  %vm5428_vm10 = vcmp.eq.f32.partialorder %v17450_v20, 0.0  ;;  %v5429_v11 = vand.u32 2147483648, %v17450_v20  ;;  %vm5433_vm5 = vcmp.eq.f32.partialorder %v17461_v58, inf }
 0x555   :  { %7570 = vrsqrt.f32 %v17559_v0  ;;  %v7555_v51 = vpop.eup %7554  ;;  %v5397_v7 = vmul.f32 %v7545_v54, %v17404_v40  ;;  %vm5440_vm12 = vcmp.eq.f32.partialorder %v17471_v3, inf  ;;  %v5404_v25 = vmul.f32 %v7547_v1, %v17415_v57 }
 0x556   :  { %7572 = vrsqrt.f32 %v17564_v19  ;;  %v7557_v55 = vpop.eup %7556  ;;  %v5443_v21 = vand.u32 2147483648, %v17471_v3  ;;  %v5411_v49 = vmul.f32 %v7549_v45, %v17429_v26  ;;  %v5418_v54 = vmul.f32 %v7551_v12, %v17439_v50 }
 0x557   :  { %7574 = vrsqrt.f32 %v17569_v9  ;;  %v5450_v43 = vand.u32 2147483648, %v17485_v16  ;;  %v5425_v47 = vmul.f32 %v7553_v18, %v17450_v20  ;;  %v5399_v45 = vsel %vm5398_vm15, %v17404_v40, %v5397_v7 }
 0x558   :  { %v7559_v52 = vpop.eup %7558  ;;  %v5432_v12 = vmul.f32 %v7555_v51, %v17461_v58  ;;  %v5439_v62 = vmul.f32 %v7557_v55, %v17471_v3  ;;  %vm5456_vm8 = vcmp.eq.f32.partialorder %v17500_v8, 0.0  ;;  %vm5468_vm4 = vcmp.eq.f32.partialorder %v17523_v6, inf }
 0x559   :  { %v5406_v18 = vsel %vm5405_vm0, %v17415_v57, %v5404_v25  ;;  %vm5463_vm6 = vcmp.eq.f32.partialorder %v17512_v33, 0.0  ;;  %vm5475_vm3 = vcmp.eq.f32.partialorder %v17529_v32, inf  ;;  %v5413_v55 = vsel %vm5412_vm1, %v17429_v26, %v5411_v49 }
 0x55a   :  { %v7561_v61 = vpop.eup %7560  ;;  %v5420_v1 = vsel %vm5419_vm2, %v17439_v50, %v5418_v54  ;;  %v5446_v63 = vmul.f32 %v7559_v52, %v17485_v16  ;;  %vm5470_vm15 = vcmp.eq.f32.partialorder %v17523_v6, 0.0  ;;  %vm5482_vm0 = vcmp.eq.f32.partialorder %v17546_v56, inf }
 0x55b   :  { %v7563_v51 = vpop.eup %7562  ;;  %v5402_v2 = vsel %vm5400_vm9, %v5401_v31, %v5399_v45  ;;  %v5427_v7 = vsel %vm5426_vm14, %v17450_v20, %v5425_v47  ;;  %vm5477_vm1 = vcmp.eq.f32.partialorder %v17529_v32, 0.0  ;;  %v5485_v49 = vand.u32 2147483648, %v17546_v56 }
 0x55c   :  { %v7565_v25 = vpop.eup %7564  ;;  %v5492_v54 = vand.u32 2147483648, %v17559_v0  ;;  %v5409_v52 = vsel %vm5407_vm13, %v5408_v10, %v5406_v18  ;;  %v5434_v4 = vsel %vm5433_vm5, %v17461_v58, %v5432_v12  ;;  %v5441_v40 = vsel %vm5440_vm12, %v17471_v3, %v5439_v62 }
 0x55d   :  { %v7567_v30 = vpop.eup %7566  ;;  %v5453_v47 = vmul.f32 %v7561_v61, %v17500_v8  ;;  %vm5489_vm9 = vcmp.eq.f32.partialorder %v17559_v0, inf  ;;  %v19551_v31 = vand.u32 2147483648, %v17429_v26  ;;  %v5423_v57 = vsel %vm5421_vm7, %v5422_v39, %v5420_v1 }
 0x55e   :  { %v5460_v10 = vmul.f32 %v7563_v51, %v17512_v33  ;;  %vm5484_vm13 = vcmp.eq.f32.partialorder %v17546_v56, 0.0  ;;  %vm5496_vm2 = vcmp.eq.f32.partialorder %v17564_v19, inf  ;;  %v5499_v62 = vand.u32 2147483648, %v17564_v19 }
 0x55f   :  { %v5416_v45 = vsel %vm5414_vm11, %v19551_v31, %v5413_v55  ;;  %v7569_v12 = vpop.eup %7568  ;;  %v5430_v61 = vsel %vm5428_vm10, %v5429_v11, %v5427_v7  ;;  %vm19552_vm14 = vcmp.eq.f32.partialorder %v17485_v16, inf  ;;  %v5467_v18 = vmul.f32 %v7565_v25, %v17523_v6 }
 0x560   :  { %v5448_v26 = vsel %vm19552_vm14, %v17485_v16, %v5446_v63  ;;  %vm5503_vm11 = vcmp.eq.f32.partialorder %v17569_v9, inf  ;;  %v17668_v50 = vadd.f32 %v17476_v24, %v5402_v2  ;;  %v19553_v39 = vand.u32 2147483648, %v17461_v58 }
 0x561   :  { %vm19554_vm7 = vcmp.eq.f32.partialorder %v17461_v58, 0.0  ;;  %vm19555_vm5 = vcmp.eq.f32.partialorder %v17471_v3, 0.0  ;;  %v5474_v11 = vmul.f32 %v7567_v30, %v17529_v32  ;;  %vm5491_vm10 = vcmp.eq.f32.partialorder %v17559_v0, 0.0 }
 0x562   :  { %v5437_v1 = vsel %vm19554_vm7, %v19553_v39, %v5434_v4  ;;  %v5444_v20 = vsel %vm19555_vm5, %v5443_v21, %v5441_v40  ;;  %v17679_v63 = vadd.f32 %v17480_v38, %v5409_v52  ;;  %v7571_v7 = vpop.eup %7570  ;;  %vm19556_vm12 = vcmp.eq.f32.partialorder %v17500_v8, inf }
 0x563   :  { %v5455_v24 = vsel %vm19556_vm12, %v17500_v8, %v5453_v47  ;;  %vm5498_vm14 = vcmp.eq.f32.partialorder %v17564_v19, 0.0  ;;  %v5506_v58 = vand.u32 2147483648, %v17569_v9  ;;  %v17687_v4 = vadd.f32 %v17492_v17, %v5416_v45  ;;  %v7573_v30 = vpop.eup %7572 }
 0x564   :  { %v17690_v3 = vadd.f32 %v17495_v42, %v5423_v57  ;;  %vm19557_vm7 = vcmp.eq.f32.partialorder %v17485_v16, 0.0  ;;  %vm19558_vm5 = vcmp.eq.f32.partialorder %v17512_v33, inf  ;;  %v5481_v21 = vmul.f32 %v7569_v12, %v17546_v56  ;;  %v7575_v55 = vpop.eup %7574 }
 0x565   :  { %v5451_v38 = vsel %vm19557_vm7, %v5450_v43, %v5448_v26  ;;  %v5462_v2 = vsel %vm19558_vm5, %v17512_v33, %v5460_v10  ;;  %vm5505_vm12 = vcmp.eq.f32.partialorder %v17569_v9, 0.0  ;;  %v5512_v51 = vadd.f32 %v17504_v5, %v5430_v61 }
 0x566   :  { %v5469_v17 = vsel %vm5468_vm4, %v17523_v6, %v5467_v18  ;;  %v5513_v42 = vadd.f32 %v17507_v60, %v5437_v1  ;;  %v5514_v16 = vadd.f32 %v17515_v28, %v5444_v20  ;;  %v5540_v43 = vmul.f32 %v17668_v50, %v17668_v50 }
 0x567   :  { %v19559_v25 = vand.u32 2147483648, %v17500_v8  ;;  %v5476_v5 = vsel %vm5475_vm3, %v17529_v32, %v5474_v11  ;;  %v5488_v40 = vmul.f32 %v7571_v7, %v17559_v0  ;;  %v5541_v47 = vmul.f32 %v17679_v63, %v17679_v63 }
 0x568   :  { %v19560_v60 = vand.u32 2147483648, %v17512_v33  ;;  %v5495_v31 = vmul.f32 %v7573_v30, %v17564_v19  ;;  %v5515_v45 = vadd.f32 %v17518_v44, %v5451_v38  ;;  %v5542_v8 = vmul.f32 %v17687_v4, %v17687_v4 }
 0x569   :  { %v5458_v52 = vsel %vm5456_vm8, %v19559_v25, %v5455_v24  ;;  %v19561_v57 = vand.u32 2147483648, %v17523_v6  ;;  %v5483_v12 = vsel %vm5482_vm0, %v17546_v56, %v5481_v21  ;;  %v5502_v61 = vmul.f32 %v7575_v55, %v17569_v9 }
 0x56a   :  { %v5465_v28 = vsel %vm5463_vm6, %v19560_v60, %v5462_v2  ;;  %v5543_v33 = vmul.f32 %v17690_v3, %v17690_v3  ;;  %v19562_v26 = vand.u32 2147483648, %v17529_v32  ;;  %v5516_v18 = vadd.f32 %v17532_v41, %v5458_v52  ;;  %v19564_v60 = vld [vmem:[#allocation15_spill] sm:$0xff] }
 0x56b   :  { %v5472_v10 = vsel %vm5470_vm15, %v19561_v57, %v5469_v17  ;;  %v5544_v39 = vmul.f32 %v5512_v51, %v5512_v51  ;;  %v17741_v6 = vadd.f32 %v17401_v15, %v5540_v43  ;;  %v5490_v1 = vsel %vm5489_vm9, %v17559_v0, %v5488_v40 }
 0x56c   :  { %v5479_v44 = vsel %vm5477_vm1, %v19562_v26, %v5476_v5  ;;  %v5517_v20 = vadd.f32 %v17534_v29, %v5465_v28  ;;  %v5545_v11 = vmul.f32 %v5513_v42, %v5513_v42  ;;  %v17748_v7 = vadd.f32 %v17412_v22, %v5541_v47 }
 0x56d   :  { %v5486_v32 = vsel %vm5484_vm13, %v5485_v49, %v5483_v12  ;;  %v5497_v41 = vsel %vm5496_vm2, %v17564_v19, %v5495_v31  ;;  %v5518_v24 = vadd.f32 %v17536_v59, %v5472_v10  ;;  %v17759_v30 = vadd.f32 %v17426_v48, %v5542_v8  ;;  %v19565_v10 = vld [vmem:[#allocation18_spill] sm:$0xff] }
 0x56e   :  { %v5504_v29 = vsel %vm5503_vm11, %v17569_v9, %v5502_v61  ;;  %v5519_v38 = vadd.f32 %v17539_v46, %v5479_v44  ;;  %v5546_v2 = vmul.f32 %v5514_v16, %v5514_v16  ;;  %v17766_v21 = vadd.f32 %v17436_v37, %v5543_v33  ;;  %v19566_v33 = vld [vmem:[#allocation11_spill] sm:$0xff] }
 0x56f   :  { %v5493_v56 = vsel %vm5491_vm10, %v5492_v54, %v5490_v1  ;;  %v5547_v49 = vmul.f32 %v5515_v45, %v5515_v45  ;;  %v17773_v59 = vadd.f32 %v17447_v14, %v5544_v39  ;;  %7576 = vrsqrt.f32 %v17741_v6 }
 0x570   :  { %v5500_v55 = vsel %vm5498_vm14, %v5499_v62, %v5497_v41  ;;  %v5548_v17 = vmul.f32 %v5516_v18, %v5516_v18  ;;  %v17779_v46 = vadd.f32 %v17458_v34, %v5545_v11  ;;  %7578 = vrsqrt.f32 %v17748_v7 }
 0x571   :  { %v5507_v43 = vsel %vm5505_vm12, %v5506_v58, %v5504_v29  ;;  %v5520_v0 = vadd.f32 %v17541_v53, %v5486_v32  ;;  %v5549_v54 = vmul.f32 %v5517_v20, %v5517_v20  ;;  %7580 = vrsqrt.f32 %v17759_v30 }
 0x572   :  { %v5521_v25 = vadd.f32 %v17549_v27, %v5493_v56  ;;  %v17788_v52 = vadd.f32 -0.5, %v17668_v50  ;;  %v17791_v19 = vadd.f32 %v17468_v36, %v5546_v2  ;;  %7582 = vrsqrt.f32 %v17766_v21  ;;  %v19563_v27 = vld [vmem:[#allocation16_spill] sm:$0xff] }
 0x573   :  { %v5522_v62 = vadd.f32 %v17551_v13, %v5500_v55  ;;  %v5550_v5 = vmul.f32 %v5518_v24, %v5518_v24  ;;  %v17796_v9 = vadd.f32 %v17482_v35, %v5547_v49  ;;  %7584 = vrsqrt.f32 %v17773_v59 }
 0x574   :  { %v5523_v53 = vadd.f32 %v17553_v23, %v5507_v43  ;;  %v5551_v58 = vmul.f32 %v5519_v38, %v5519_v38  ;;  %v17801_v40 = vadd.f32 %v19563_v27, %v5548_v17  ;;  %7586 = vrsqrt.f32 %v17779_v46 }
 0x575   :  { %v17805_v50 = vadd.f32 -0.5, %v17679_v63  ;;  %v17808_v47 = vadd.f32 -0.5, %v17687_v4  ;;  %v5552_v13 = vmul.f32 %v5520_v0, %v5520_v0  ;;  %v17811_v28 = vadd.f32 %v19564_v60, %v5549_v54 }
 0x576   :  { %v17814_v31 = vadd.f32 -0.5, %v17690_v3  ;;  %v17816_v23 = vadd.f32 -0.5, %v5512_v51  ;;  %v17818_v8 = vadd.f32 -0.5, %v5513_v42  ;;  %7588 = vrsqrt.f32 %v17791_v19  ;;  %v19567_v42 = vld [vmem:[#allocation12_spill] sm:$0xff] }
 0x577   :  { %v17821_v57 = vadd.f32 -0.5, %v5514_v16  ;;  %v5553_v63 = vmul.f32 %v5521_v25, %v5521_v25  ;;  %v17824_v12 = vadd.f32 %v19565_v10, %v5550_v5  ;;  %7590 = vrsqrt.f32 %v17796_v9 }
 0x578   :  { %v5554_v4 = vmul.f32 %v5522_v62, %v5522_v62  ;;  %v5555_v61 = vmul.f32 %v5523_v53, %v5523_v53  ;;  %v17828_v26 = vadd.f32 %v19566_v33, %v5551_v58  ;;  %7592 = vrsqrt.f32 %v17801_v40 }
 0x579   :  { %v17831_v3 = vadd.f32 -0.5, %v5515_v45  ;;  %v17833_v51 = vadd.f32 -0.5, %v5516_v18  ;;  %v17836_v16 = vadd.f32 %v19567_v42, %v5552_v13  ;;  %7594 = vrsqrt.f32 %v17811_v28  ;;  %v19568_v45 = vld [vmem:[#allocation13_spill] sm:$0xff] }
 0x57a   :  { %v17839_v44 = vadd.f32 -0.5, %v5517_v20  ;;  %v17841_v39 = vadd.f32 -0.5, %v5518_v24  ;;  %v17843_v1 = vadd.f32 -0.5, %v5519_v38  ;;  %v17845_v11 = vadd.f32 -0.5, %v5520_v0  ;;  %v19569_v20 = vld [vmem:[#allocation14_spill] sm:$0xff]  ;;  %v19570_v24 = vld [vmem:[#allocation17_spill] sm:$0xff] }
 0x57b   :  { %v17847_v32 = vadd.f32 -0.5, %v5521_v25  ;;  %v17849_v41 = vadd.f32 -0.5, %v5522_v62  ;;  %v17852_v18 = vadd.f32 %v19568_v45, %v5553_v63  ;;  %7596 = vrsqrt.f32 %v17824_v12 }
 0x57c   :  { %v7577_v29 = vpop.eup %7576  ;;  %v17855_v2 = vadd.f32 -0.5, %v5523_v53  ;;  %v17858_v56 = vadd.f32 %v19569_v20, %v5554_v4  ;;  %v17861_v38 = vadd.f32 %v19570_v24, %v5555_v61  ;;  %7598 = vrsqrt.f32 %v17828_v26 }
 0x57d   :  { %v7579_v49 = vpop.eup %7578  ;;  %vm5574_vm6 = vcmp.eq.f32.partialorder %v17741_v6, inf  ;;  %vm5581_vm4 = vcmp.eq.f32.partialorder %v17748_v7, inf  ;;  %7600 = vrsqrt.f32 %v17836_v16  ;;  %vm5576_vm3 = vcmp.eq.f32.partialorder %v17741_v6, 0.0 }
 0x57e   :  { %v7581_v17 = vpop.eup %7580  ;;  %vm5588_vm8 = vcmp.eq.f32.partialorder %v17759_v30, inf  ;;  %vm5595_vm15 = vcmp.eq.f32.partialorder %v17766_v21, inf  ;;  %vm5583_vm0 = vcmp.eq.f32.partialorder %v17748_v7, 0.0  ;;  %vm5590_vm1 = vcmp.eq.f32.partialorder %v17759_v30, 0.0 }
 0x57f   :  { %v7583_v54 = vpop.eup %7582  ;;  %vm5597_vm9 = vcmp.eq.f32.partialorder %v17766_v21, 0.0  ;;  %vm5602_vm13 = vcmp.eq.f32.partialorder %v17773_v59, inf  ;;  %7602 = vrsqrt.f32 %v17852_v18  ;;  %v5605_v5 = vand.u32 2147483648, %v17773_v59 }
 0x580   :  { %v7585_v62 = vpop.eup %7584  ;;  %vm5609_vm11 = vcmp.eq.f32.partialorder %v17779_v46, inf  ;;  %7604 = vrsqrt.f32 %v17858_v56  ;;  %v5612_v58 = vand.u32 2147483648, %v17779_v46  ;;  %v5573_v63 = vmul.f32 %v7577_v29, %v17741_v6 }
 0x581   :  { %v7587_v53 = vpop.eup %7586  ;;  %7606 = vrsqrt.f32 %v17861_v38  ;;  %v5580_v25 = vmul.f32 %v7579_v49, %v17748_v7  ;;  %v5587_v0 = vmul.f32 %v7581_v17, %v17759_v30  ;;  %v5594_v43 = vmul.f32 %v7583_v54, %v17766_v21 }
 0x582   :  { %v5601_v29 = vmul.f32 %v7585_v62, %v17773_v59  ;;  %v5608_v24 = vmul.f32 %v7587_v53, %v17779_v46  ;;  %vm5625_vm7 = vcmp.eq.f32.partialorder %v17796_v9, 0.0  ;;  %vm5637_vm14 = vcmp.eq.f32.partialorder %v17811_v28, inf }
 0x583   :  { %v7589_v61 = vpop.eup %7588  ;;  %vm5639_vm10 = vcmp.eq.f32.partialorder %v17811_v28, 0.0  ;;  %vm5644_vm12 = vcmp.eq.f32.partialorder %v17824_v12, inf  ;;  %vm5651_vm2 = vcmp.eq.f32.partialorder %v17828_v26, inf  ;;  %v5575_v13 = vsel %vm5574_vm6, %v17741_v6, %v5573_v63 }
 0x584   :  { %v7591_v55 = vpop.eup %7590  ;;  %vm5658_vm5 = vcmp.eq.f32.partialorder %v17836_v16, inf  ;;  %v5582_v20 = vsel %vm5581_vm4, %v17748_v7, %v5580_v25  ;;  %v5589_v54 = vsel %vm5588_vm8, %v17759_v30, %v5587_v0  ;;  %v5596_v62 = vsel %vm5595_vm15, %v17766_v21, %v5594_v43 }
 0x585   :  { %v7593_v17 = vpop.eup %7592  ;;  %v5615_v63 = vmul.f32 %v7589_v61, %v17791_v19  ;;  %vm5646_vm6 = vcmp.eq.f32.partialorder %v17824_v12, 0.0  ;;  %v5603_v4 = vsel %vm5602_vm13, %v17773_v59, %v5601_v29  ;;  %v5610_v25 = vsel %vm5609_vm11, %v17779_v46, %v5608_v24 }
 0x586   :  { %v7595_v53 = vpop.eup %7594  ;;  %v5622_v49 = vmul.f32 %v7591_v55, %v17796_v9  ;;  %v5629_v0 = vmul.f32 %v7593_v17, %v17801_v40  ;;  %vm5653_vm4 = vcmp.eq.f32.partialorder %v17828_v26, 0.0  ;;  %vm5665_vm8 = vcmp.eq.f32.partialorder %v17852_v18, inf }
 0x587   :  { %v19571_v61 = vand.u32 2147483648, %v17741_v6  ;;  %v5636_v29 = vmul.f32 %v7595_v53, %v17811_v28  ;;  %vm5660_vm15 = vcmp.eq.f32.partialorder %v17836_v16, 0.0  ;;  %v5675_v24 = vand.u32 2147483648, %v17858_v56 }
 0x588   :  { %v7597_v45 = vpop.eup %7596  ;;  %v19572_v17 = vand.u32 2147483648, %v17748_v7  ;;  %v19573_v10 = vand.u32 2147483648, %v17759_v30  ;;  %vm19575_vm11 = vcmp.eq.f32.partialorder %v17773_v59, 0.0  ;;  %vm19576_vm13 = vcmp.eq.f32.partialorder %v17779_v46, 0.0 }
 0x589   :  { %v7599_v43 = vpop.eup %7598  ;;  %v5578_v42 = vsel %vm5576_vm3, %v19571_v61, %v5575_v13  ;;  %v19574_v13 = vand.u32 2147483648, %v17766_v21  ;;  %v5682_v61 = vand.u32 2147483648, %v17861_v38  ;;  %v5606_v60 = vsel %vm19575_vm11, %v5605_v5, %v5603_v4 }
 0x58a   :  { %v7601_v55 = vpop.eup %7600  ;;  %v5585_v33 = vsel %vm5583_vm0, %v19572_v17, %v5582_v20  ;;  %v5592_v6 = vsel %vm5590_vm1, %v19573_v10, %v5589_v54  ;;  %v5613_v7 = vsel %vm19576_vm13, %v5612_v58, %v5610_v25  ;;  %vm19577_vm0 = vcmp.eq.f32.partialorder %v17791_v19, inf }
 0x58b   :  { %v5599_v53 = vsel %vm5597_vm9, %v19574_v13, %v5596_v62  ;;  %v5617_v30 = vsel %vm19577_vm0, %v17791_v19, %v5615_v63  ;;  %v5643_v10 = vmul.f32 %v7597_v45, %v17824_v12  ;;  %vm5667_vm1 = vcmp.eq.f32.partialorder %v17852_v18, 0.0 }
 0x58c   :  { %v7603_v21 = vpop.eup %7602  ;;  %vm19578_vm9 = vcmp.eq.f32.partialorder %v17796_v9, inf  ;;  %vm19579_vm3 = vcmp.eq.f32.partialorder %v17801_v40, inf  ;;  %v5650_v46 = vmul.f32 %v7599_v43, %v17828_v26  ;;  %vm5674_vm13 = vcmp.eq.f32.partialorder %v17858_v56, 0.0 }
 0x58d   :  { %v5624_v20 = vsel %vm19578_vm9, %v17796_v9, %v5622_v49  ;;  %v5631_v59 = vsel %vm19579_vm3, %v17801_v40, %v5629_v0  ;;  %v17975_v5 = vadd.f32 %v17788_v52, %v5578_v42  ;;  %v7605_v58 = vpop.eup %7604  ;;  %v5638_v45 = vsel %vm5637_vm14, %v17811_v28, %v5636_v29 }
 0x58e   :  { %v5657_v4 = vmul.f32 %v7601_v55, %v17836_v16  ;;  %vm5681_vm11 = vcmp.eq.f32.partialorder %v17861_v38, 0.0  ;;  %v17983_v49 = vadd.f32 %v17805_v50, %v5585_v33  ;;  %v17986_v54 = vadd.f32 %v17808_v47, %v5592_v6  ;;  %v7607_v62 = vpop.eup %7606 }
 0x58f   :  { %v19580_v63 = vand.u32 2147483648, %v17791_v19  ;;  %vm19581_vm3 = vcmp.eq.f32.partialorder %v17791_v19, 0.0  ;;  %v17993_v42 = vadd.f32 %v17814_v31, %v5599_v53  ;;  %v17996_v25 = vadd.f32 %v17816_v23, %v5606_v60 }
 0x590   :  { %v17999_v0 = vadd.f32 %v17818_v8, %v5613_v7  ;;  %v19582_v50 = vand.u32 2147483648, %v17796_v9  ;;  %v19583_v33 = vand.u32 2147483648, %v17801_v40  ;;  %vm19584_vm14 = vcmp.eq.f32.partialorder %v17801_v40, 0.0 }
 0x591   :  { %v5620_v52 = vsel %vm19581_vm3, %v19580_v63, %v5617_v30  ;;  %v5645_v31 = vsel %vm5644_vm12, %v17824_v12, %v5643_v10  ;;  %v5664_v60 = vmul.f32 %v7603_v21, %v17852_v18  ;;  %v19585_v23 = vand.u32 2147483648, %v17811_v28 }
 0x592   :  { %v5627_v47 = vsel %vm5625_vm7, %v19582_v50, %v5624_v20  ;;  %v5634_v19 = vsel %vm19584_vm14, %v19583_v33, %v5631_v59  ;;  %v5652_v9 = vsel %vm5651_vm2, %v17828_v26, %v5650_v46  ;;  %v5671_v43 = vmul.f32 %v7605_v58, %v17858_v56 }
 0x593   :  { %v5641_v8 = vsel %vm5639_vm10, %v19585_v23, %v5638_v45  ;;  %v5700_v40 = vmul.f32 %v17975_v5, %v17975_v5  ;;  %v5659_v29 = vsel %vm5658_vm5, %v17836_v16, %v5657_v4  ;;  %v5678_v55 = vmul.f32 %v7607_v62, %v17861_v38  ;;  %v19594_v23 = vld [vmem:[#allocation11_spill] sm:$0xff] }
 0x594   :  { %v18028_v17 = vadd.f32 %v17821_v57, %v5620_v52  ;;  %v5701_v28 = vmul.f32 %v17983_v49, %v17983_v49  ;;  %v19586_v6 = vand.u32 2147483648, %v17824_v12  ;;  %v18037_v53 = vadd.f32 %v17831_v3, %v5627_v47 }
 0x595   :  { %v18040_v7 = vadd.f32 %v17833_v51, %v5634_v19  ;;  %v5702_v30 = vmul.f32 %v17986_v54, %v17986_v54  ;;  %v19587_v57 = vand.u32 2147483648, %v17828_v26  ;;  %v5666_v21 = vsel %vm5665_vm8, %v17852_v18, %v5664_v60 }
 0x596   :  { %v5648_v13 = vsel %vm5646_vm6, %v19586_v6, %v5645_v31  ;;  %v18052_v12 = vadd.f32 %v17839_v44, %v5641_v8  ;;  %v5703_v3 = vmul.f32 %v17993_v42, %v17993_v42  ;;  %v19588_v51 = vand.u32 2147483648, %v17836_v16  ;;  %v19593_v31 = vld [vmem:[#allocation18_spill] sm:$0xff]  ;;  %v19598_v6 = vld [vmem:[#allocation17_spill] sm:$0xff] }
 0x597   :  { %v5655_v10 = vsel %vm5653_vm4, %v19587_v57, %v5652_v9  ;;  %vm19589_vm2 = vcmp.eq.f32.partialorder %v17858_v56, inf  ;;  %v5704_v59 = vmul.f32 %v17996_v25, %v17996_v25  ;;  %v18066_v46 = vadd.f32 %v17401_v15, %v5700_v40  ;;  %v19595_v9 = vld [vmem:[#allocation12_spill] sm:$0xff]  ;;  %v19596_v40 = vld [vmem:[#allocation13_spill] sm:$0xff] }
 0x598   :  { %v5662_v20 = vsel %vm5660_vm15, %v19588_v51, %v5659_v29  ;;  %v5673_v26 = vsel %vm19589_vm2, %v17858_v56, %v5671_v43  ;;  %vm19590_vm10 = vcmp.eq.f32.partialorder %v17861_v38, inf  ;;  %v18072_v58 = vadd.f32 %v17841_v39, %v5648_v13 }
 0x599   :  { %v5680_v44 = vsel %vm19590_vm10, %v17861_v38, %v5678_v55  ;;  %v5705_v16 = vmul.f32 %v17999_v0, %v17999_v0  ;;  %v18077_v45 = vadd.f32 %v17412_v22, %v5701_v28  ;;  %v19591_v4 = vand.u32 2147483648, %v17852_v18  ;;  %v19597_v55 = vld [vmem:[#allocation14_spill] sm:$0xff] }
 0x59a   :  { %v18084_v15 = vadd.f32 %v17843_v1, %v5655_v10  ;;  %v5706_v63 = vmul.f32 %v18028_v17, %v18028_v17  ;;  %v18089_v39 = vadd.f32 %v17426_v48, %v5702_v30  ;;  %v5676_v52 = vsel %vm5674_vm13, %v5675_v24, %v5673_v26 }
 0x59b   :  { %v5669_v62 = vsel %vm5667_vm1, %v19591_v4, %v5666_v21  ;;  %v18094_v22 = vadd.f32 %v17845_v11, %v5662_v20  ;;  %v5707_v50 = vmul.f32 %v18037_v53, %v18037_v53  ;;  %v18099_v18 = vadd.f32 %v17436_v37, %v5703_v3 }
 0x59c   :  { %v5683_v1 = vsel %vm5681_vm11, %v5682_v61, %v5680_v44  ;;  %v5708_v47 = vmul.f32 %v18040_v7, %v18040_v7  ;;  %v18106_v48 = vadd.f32 %v17447_v14, %v5704_v59  ;;  %7608 = vrsqrt.f32 %v18066_v46 }
 0x59d   :  { %v18110_v11 = vadd.f32 %v17847_v32, %v5669_v62  ;;  %v5709_v56 = vmul.f32 %v18052_v12, %v18052_v12  ;;  %v18115_v37 = vadd.f32 %v17458_v34, %v5705_v16  ;;  %7610 = vrsqrt.f32 %v18077_v45 }
 0x59e   :  { %v18119_v38 = vadd.f32 %v17849_v41, %v5676_v52  ;;  %v5710_v14 = vmul.f32 %v18072_v58, %v18072_v58  ;;  %v18124_v24 = vadd.f32 %v17468_v36, %v5706_v63  ;;  %7612 = vrsqrt.f32 %v18089_v39 }
 0x59f   :  { %v18128_v32 = vadd.f32 %v17855_v2, %v5683_v1  ;;  %v5711_v34 = vmul.f32 %v18084_v15, %v18084_v15  ;;  %v18133_v61 = vadd.f32 %v17482_v35, %v5707_v50  ;;  %7614 = vrsqrt.f32 %v18099_v18  ;;  %v19592_v2 = vld [vmem:[#allocation15_spill] sm:$0xff] }
 0x5a0   :  { %v5712_v41 = vmul.f32 %v18094_v22, %v18094_v22  ;;  %v18139_v33 = vadd.f32 %v19563_v27, %v5708_v47  ;;  %7616 = vrsqrt.f32 %v18106_v48  ;;  %v5713_v36 = vmul.f32 %v18110_v11, %v18110_v11 }
 0x5a1   :  { %v18145_v19 = vadd.f32 %v19592_v2, %v5709_v56  ;;  %7618 = vrsqrt.f32 %v18115_v37  ;;  %v5714_v35 = vmul.f32 %v18119_v38, %v18119_v38  ;;  %v18151_v60 = vadd.f32 %v19593_v31, %v5710_v14 }
 0x5a2   :  { %7620 = vrsqrt.f32 %v18124_v24  ;;  %v5715_v27 = vmul.f32 %v18128_v32, %v18128_v32  ;;  %v18157_v8 = vadd.f32 %v19594_v23, %v5711_v34  ;;  %v18161_v43 = vadd.f32 %v19595_v9, %v5712_v41 }
 0x5a3   :  { %7622 = vrsqrt.f32 %v18133_v61  ;;  %v18165_v29 = vadd.f32 %v19596_v40, %v5713_v36  ;;  %v18169_v28 = vadd.f32 %v19597_v55, %v5714_v35  ;;  %vm5734_vm7 = vcmp.eq.f32.partialorder %v18066_v46, inf }
 0x5a4   :  { %7624 = vrsqrt.f32 %v18139_v33  ;;  %v18173_v13 = vadd.f32 %v19598_v6, %v5715_v27  ;;  %vm5736_vm5 = vcmp.eq.f32.partialorder %v18066_v46, 0.0  ;;  %v5737_v21 = vand.u32 2147483648, %v18066_v46 }
 0x5a5   :  { %7626 = vrsqrt.f32 %v18145_v19  ;;  %vm5741_vm12 = vcmp.eq.f32.partialorder %v18077_v45, inf  ;;  %vm5743_vm6 = vcmp.eq.f32.partialorder %v18077_v45, 0.0  ;;  %v5744_v51 = vand.u32 2147483648, %v18077_v45 }
 0x5a6   :  { %7628 = vrsqrt.f32 %v18151_v60  ;;  %vm5748_vm4 = vcmp.eq.f32.partialorder %v18089_v39, inf  ;;  %v5751_v20 = vand.u32 2147483648, %v18089_v39  ;;  %vm5750_vm8 = vcmp.eq.f32.partialorder %v18089_v39, 0.0 }
 0x5a7   :  { %7630 = vrsqrt.f32 %v18157_v8  ;;  %vm5755_vm15 = vcmp.eq.f32.partialorder %v18099_v18, inf  ;;  %vm5757_vm0 = vcmp.eq.f32.partialorder %v18099_v18, 0.0  ;;  %v5758_v4 = vand.u32 2147483648, %v18099_v18 }
 0x5a8   :  { %7632 = vrsqrt.f32 %v18161_v43  ;;  %vm5762_vm1 = vcmp.eq.f32.partialorder %v18106_v48, inf  ;;  %v5765_v62 = vand.u32 2147483648, %v18106_v48  ;;  %vm5769_vm9 = vcmp.eq.f32.partialorder %v18115_v37, inf }
 0x5a9   :  { %v7609_v30 = vpop.eup %7608  ;;  %7634 = vrsqrt.f32 %v18165_v29  ;;  %v5772_v52 = vand.u32 2147483648, %v18115_v37  ;;  %vm5776_vm13 = vcmp.eq.f32.partialorder %v18124_v24, inf  ;;  %v5779_v50 = vand.u32 2147483648, %v18124_v24 }
 0x5aa   :  { %v7611_v57 = vpop.eup %7610  ;;  %7636 = vrsqrt.f32 %v18169_v28  ;;  %v5733_v59 = vmul.f32 %v7609_v30, %v18066_v46  ;;  %v5786_v47 = vand.u32 2147483648, %v18133_v61  ;;  %v5793_v56 = vand.u32 2147483648, %v18139_v33 }
 0x5ab   :  { %v7613_v10 = vpop.eup %7612  ;;  %7638 = vrsqrt.f32 %v18173_v13  ;;  %v5740_v44 = vmul.f32 %v7611_v57, %v18077_v45  ;;  %vm5778_vm14 = vcmp.eq.f32.partialorder %v18124_v24, 0.0  ;;  %v5800_v31 = vand.u32 2147483648, %v18145_v19 }
 0x5ac   :  { %v7615_v3 = vpop.eup %7614  ;;  %v5735_v34 = vsel %vm5734_vm7, %v18066_v46, %v5733_v59  ;;  %v5747_v36 = vmul.f32 %v7613_v10, %v18089_v39  ;;  %vm5804_vm7 = vcmp.eq.f32.partialorder %v18151_v60, inf  ;;  %v5807_v27 = vand.u32 2147483648, %v18151_v60 }
 0x5ad   :  { %v7617_v26 = vpop.eup %7616  ;;  %v5742_v41 = vsel %vm5741_vm12, %v18077_v45, %v5740_v44  ;;  %v5754_v2 = vmul.f32 %v7615_v3, %v18099_v18  ;;  %vm5792_vm11 = vcmp.eq.f32.partialorder %v18139_v33, 0.0  ;;  %vm5818_vm10 = vcmp.eq.f32.partialorder %v18161_v43, inf }
 0x5ae   :  { %v7619_v16 = vpop.eup %7618  ;;  %vm5825_vm3 = vcmp.eq.f32.partialorder %v18165_v29, inf  ;;  %v5738_v6 = vsel %vm5736_vm5, %v5737_v21, %v5735_v34  ;;  %v5745_v30 = vsel %vm5743_vm6, %v5744_v51, %v5742_v41  ;;  %v5828_v57 = vand.u32 2147483648, %v18165_v29 }
 0x5af   :  { %v7621_v63 = vpop.eup %7620  ;;  %vm5832_vm2 = vcmp.eq.f32.partialorder %v18169_v28, inf  ;;  %v5749_v3 = vsel %vm5748_vm4, %v18089_v39, %v5747_v36  ;;  %v5756_v59 = vsel %vm5755_vm15, %v18099_v18, %v5754_v2  ;;  %v5761_v46 = vmul.f32 %v7617_v26, %v18106_v48 }
 0x5b0   :  { %v7623_v1 = vpop.eup %7622  ;;  %v5768_v45 = vmul.f32 %v7619_v16, %v18115_v37  ;;  %vm5813_vm5 = vcmp.eq.f32.partialorder %v18157_v8, 0.0  ;;  %v5775_v51 = vmul.f32 %v7621_v63, %v18124_v24  ;;  %vm5827_vm12 = vcmp.eq.f32.partialorder %v18165_v29, 0.0 }
 0x5b1   :  { %v7625_v14 = vpop.eup %7624  ;;  %v5782_v44 = vmul.f32 %v7623_v1, %v18133_v61  ;;  %vm5834_vm4 = vcmp.eq.f32.partialorder %v18169_v28, 0.0  ;;  %v5835_v34 = vand.u32 2147483648, %v18169_v28  ;;  %vm5839_vm15 = vcmp.eq.f32.partialorder %v18173_v13, inf }
 0x5b2   :  { %v7627_v35 = vpop.eup %7626  ;;  %v5789_v16 = vmul.f32 %v7625_v14, %v18139_v33  ;;  %vm5841_vm6 = vcmp.eq.f32.partialorder %v18173_v13, 0.0  ;;  %v5842_v36 = vand.u32 2147483648, %v18173_v13  ;;  %v18254_v63 = vadd.f32 -0.5, %v5738_v6 }
 0x5b3   :  { %v7629_v23 = vpop.eup %7628  ;;  %v5796_v41 = vmul.f32 %v7627_v35, %v18145_v19  ;;  %v5752_v2 = vsel %vm5750_vm8, %v5751_v20, %v5749_v3  ;;  %v5759_v40 = vsel %vm5757_vm0, %v5758_v4, %v5756_v59  ;;  %v18265_v35 = vadd.f32 -0.5, %v5745_v30 }
 0x5b4   :  { %v7631_v55 = vpop.eup %7630  ;;  %v5803_v14 = vmul.f32 %v7629_v23, %v18151_v60  ;;  %v5763_v6 = vsel %vm5762_vm1, %v18106_v48, %v5761_v46  ;;  %v5770_v9 = vsel %vm5769_vm9, %v18115_v37, %v5768_v45  ;;  %v5777_v18 = vsel %vm5776_vm13, %v18124_v24, %v5775_v51 }
 0x5b5   :  { %v7633_v10 = vpop.eup %7632  ;;  %v5810_v39 = vmul.f32 %v7631_v55, %v18157_v8  ;;  %vm19599_vm8 = vcmp.eq.f32.partialorder %v18133_v61, inf  ;;  %vm19600_vm0 = vcmp.eq.f32.partialorder %v18139_v33, inf  ;;  %vm19601_vm1 = vcmp.eq.f32.partialorder %v18145_v19, inf }
 0x5b6   :  { %v7635_v21 = vpop.eup %7634  ;;  %v5817_v20 = vmul.f32 %v7633_v10, %v18161_v43  ;;  %v5784_v4 = vsel %vm19599_vm8, %v18133_v61, %v5782_v44  ;;  %v5791_v3 = vsel %vm19600_vm0, %v18139_v33, %v5789_v16  ;;  %v5798_v55 = vsel %vm19601_vm1, %v18145_v19, %v5796_v41 }
 0x5b7   :  { %v7637_v26 = vpop.eup %7636  ;;  %v5824_v23 = vmul.f32 %v7635_v21, %v18165_v29  ;;  %v6550_v59 = vadd.f32 -0.5, %v5752_v2  ;;  %vm19602_vm9 = vcmp.eq.f32.partialorder %v18106_v48, 0.0  ;;  %vm19603_vm13 = vcmp.eq.f32.partialorder %v18115_v37, 0.0 }
 0x5b8   :  { %v7639_v1 = vpop.eup %7638  ;;  %v5831_v30 = vmul.f32 %v7637_v26, %v18169_v28  ;;  %v5766_v46 = vsel %vm19602_vm9, %v5765_v62, %v5763_v6  ;;  %v5773_v45 = vsel %vm19603_vm13, %v5772_v52, %v5770_v9  ;;  %v5805_v21 = vsel %vm5804_vm7, %v18151_v60, %v5803_v14 }
 0x5b9   :  { %v5838_v10 = vmul.f32 %v7639_v1, %v18173_v13  ;;  %v6551_v51 = vadd.f32 -0.5, %v5759_v40  ;;  %v5780_v44 = vsel %vm5778_vm14, %v5779_v50, %v5777_v18  ;;  %vm19604_vm8 = vcmp.eq.f32.partialorder %v18133_v61, 0.0  ;;  %v7802_v18 = vld [vmem:[#allocation2 + $0x10] sm:$0xff] }
 0x5ba   :  { %v5787_v48 = vsel %vm19604_vm8, %v5786_v47, %v5784_v4  ;;  %vm19605_vm0 = vcmp.eq.f32.partialorder %v18157_v8, inf  ;;  %v5819_v62 = vsel %vm5818_vm10, %v18161_v43, %v5817_v20  ;;  %v5794_v52 = vsel %vm5792_vm11, %v5793_v56, %v5791_v3  ;;  %v7804_v3 = vld [vmem:[#allocation2 + $0x20] sm:$0xff] }
 0x5bb   :  { %v5812_v37 = vsel %vm19605_vm0, %v18157_v8, %v5810_v39  ;;  %vm19606_vm14 = vcmp.eq.f32.partialorder %v18145_v19, 0.0  ;;  %v5826_v61 = vsel %vm5825_vm3, %v18165_v29, %v5824_v23  ;;  %v5833_v50 = vsel %vm5832_vm2, %v18169_v28, %v5831_v30  ;;  %v7801_v28 = vld [vmem:[#allocation2 + $0x8] sm:$0xff]  ;;  %v7803_v23 = vld [vmem:[#allocation2 + $0x18] sm:$0xff] }
 0x5bc   :  { %v5801_v24 = vsel %vm19606_vm14, %v5800_v31, %v5798_v55  ;;  %vm19607_vm10 = vcmp.eq.f32.partialorder %v18151_v60, 0.0  ;;  %v5840_v33 = vsel %vm5839_vm15, %v18173_v13, %v5838_v10  ;;  %v6552_v56 = vadd.f32 -0.5, %v5766_v46  ;;  %v7805_v55 = vld [vmem:[#allocation2 + $0x28] sm:$0xff] }
 0x5bd   :  { %v5808_v47 = vsel %vm19607_vm10, %v5807_v27, %v5805_v21  ;;  %v6553_v19 = vadd.f32 -0.5, %v5773_v45  ;;  %v19608_v31 = vand.u32 2147483648, %v18157_v8  ;;  %v19609_v40 = vand.u32 2147483648, %v18161_v43 }
 0x5be   :  { %vm19610_vm11 = vcmp.eq.f32.partialorder %v18161_v43, 0.0  ;;  %v18344_v16 = vadd.f32 -0.5, %v5780_v44  ;;  %v18346_v60 = vadd.f32 -0.5, %v5787_v48  ;;  %v5829_v27 = vsel %vm5827_vm12, %v5828_v57, %v5826_v61  ;;  %v7800_v43 = vld [vmem:[#allocation2] sm:$0xff] }
 0x5bf   :  { %v5815_v9 = vsel %vm5813_vm5, %v19608_v31, %v5812_v37  ;;  %v5822_v26 = vsel %vm19610_vm11, %v19609_v40, %v5819_v62  ;;  %v5836_v41 = vsel %vm5834_vm4, %v5835_v34, %v5833_v50  ;;  %v18352_v1 = vadd.f32 -0.5, %v5794_v52  ;;  %v7809_v52 = vld [vmem:[#allocation2 + $0x48] sm:$0xff]  ;;  %v7811_v31 = vld [vmem:[#allocation2 + $0x58] sm:$0xff] }
 0x5c0   :  { %v18354_v2 = vadd.f32 -0.5, %v5801_v24  ;;  %v5843_v8 = vsel %vm5841_vm6, %v5842_v36, %v5840_v33  ;;  %v18358_v14 = vadd.f32 -0.5, %v5808_v47  ;;  %v18361_v6 = vsub.f32 %v17975_v5, %v7800_v43  ;;  %v7810_v47 = vld [vmem:[#allocation2 + $0x50] sm:$0xff] }
 0x5c1   :  { %v5876_v39 = vand.u32 2147483647, %v18254_v63  ;;  %v18364_v29 = vadd.f32 -0.5, %v5815_v9  ;;  %v18366_v57 = vadd.f32 -0.5, %v5822_v26  ;;  %v18369_v34 = vsub.f32 %v17983_v49, %v7801_v28  ;;  %v7814_v43 = vld [vmem:[#allocation2 + $0x70] sm:$0xff]  ;;  %v7815_v28 = vld [vmem:[#allocation2 + $0x78] sm:$0xff] }
 0x5c2   :  { %v5877_v20 = vand.u32 2147483647, %v18265_v35  ;;  %v18372_v13 = vadd.f32 -0.5, %v5829_v27  ;;  %v18374_v36 = vadd.f32 -0.5, %v5836_v41  ;;  %v18377_v5 = vsub.f32 %v17986_v54, %v7802_v18 }
 0x5c3   :  { %v5878_v4 = vand.u32 2147483647, %v6550_v59  ;;  %v18379_v63 = vadd.f32 -0.5, %v5843_v8  ;;  %v18382_v30 = vsub.f32 %v17993_v42, %v7803_v23  ;;  %v18385_v49 = vsub.f32 %v17996_v25, %v7804_v3  ;;  %v7806_v59 = vld [vmem:[#allocation2 + $0x30] sm:$0xff] }
 0x5c4   :  { %v5879_v35 = vand.u32 2147483647, %v6551_v51  ;;  %v18388_v10 = vsub.f32 %v17999_v0, %v7805_v55  ;;  %v5880_v46 = vand.u32 2147483647, %v6552_v56  ;;  %vm18390_vm3 = vcmp.lt.f32.partialorder %v5876_v39, 5e-05 }
 0x5c5   :  { %vm5908_vm2 = vcmp.ge.f32.partialorder %v18361_v6, 0.0  ;;  %v18396_v42 = vsub.f32 %v18028_v17, %v7806_v59  ;;  %v5881_v45 = vand.u32 2147483647, %v6553_v19  ;;  %vm18398_vm7 = vcmp.lt.f32.partialorder %v5877_v20, 5e-05  ;;  %v7807_v0 = vld [vmem:[#allocation2 + $0x38] sm:$0xff] }
 0x5c6   :  { %vm5909_vm12 = vcmp.ge.f32.partialorder %v18369_v34, 0.0  ;;  %v18404_v21 = vsub.f32 %v18037_v53, %v7807_v0  ;;  %v5882_v51 = vand.u32 2147483647, %v18344_v16  ;;  %vm18407_vm5 = vcmp.lt.f32.partialorder %v5878_v4, 5e-05  ;;  %v7808_v17 = vld [vmem:[#allocation2 + $0x40] sm:$0xff]  ;;  %vm18425_vm1 = vmand %vm18390_vm3, %vm5908_vm2 }
 0x5c7   :  { %vm5910_vm6 = vcmp.ge.f32.partialorder %v18377_v5, 0.0  ;;  %v18413_v48 = vsub.f32 %v18040_v7, %v7808_v17  ;;  %v5883_v37 = vand.u32 2147483647, %v18346_v60  ;;  %vm18416_vm4 = vcmp.lt.f32.partialorder %v5879_v35, 5e-05  ;;  %vm18442_vm8 = vmand %vm18398_vm7, %vm5909_vm12  ;;  %v7812_v16 = vld [vmem:[#allocation2 + $0x60] sm:$0xff] }
 0x5c8   :  { %vm5911_vm15 = vcmp.ge.f32.partialorder %v18382_v30, 0.0  ;;  %v18430_v7 = vsub.f32 %v18052_v12, %v7809_v52  ;;  %v5884_v24 = vand.u32 2147483647, %v18352_v1  ;;  %vm18433_vm9 = vcmp.lt.f32.partialorder %v5880_v46, 5e-05  ;;  %vm18459_vm10 = vmand %vm18407_vm5, %vm5910_vm6  ;;  %v7813_v1 = vld [vmem:[#allocation2 + $0x68] sm:$0xff] }
 0x5c9   :  { %vm5912_vm13 = vcmp.ge.f32.partialorder %v18385_v49, 0.0  ;;  %v18447_v12 = vsub.f32 %v18072_v58, %v7810_v47  ;;  %v5885_v33 = vand.u32 2147483647, %v18354_v2  ;;  %vm18450_vm0 = vcmp.lt.f32.partialorder %v5881_v45, 5e-05  ;;  %vm18476_vm2 = vmand %vm18416_vm4, %vm5911_vm15 }
 0x5ca   :  { %vm5913_vm14 = vcmp.ge.f32.partialorder %v18388_v10, 0.0  ;;  %v19627_v19 = vmov 0  ;;  %v18464_v58 = vsub.f32 %v18084_v15, %v7811_v31  ;;  %v5886_v9 = vand.u32 2147483647, %v18358_v14  ;;  %vm18493_vm5 = vmand %vm18433_vm9, %vm5912_vm13 }
 0x5cb   :  { %v19628_v19 = vsel %vm18459_vm10, 4294967295, %v19627_v19  ;;  %vm18467_vm11 = vcmp.lt.f32.partialorder %v5882_v51, 5e-05  ;;  %vm5914_vm3 = vcmp.ge.f32.partialorder %v18396_v42, 0.0  ;;  %v19631_v26 = vmov 0  ;;  %vm18510_vm15 = vmand %vm18450_vm0, %vm5913_vm14 }
 0x5cc   :  { %v19632_v26 = vsel %vm18476_vm2, 4294967295, %v19631_v26  ;;  %v18481_v15 = vsub.f32 %v18094_v22, %v7812_v16  ;;  %v5887_v60 = vand.u32 2147483647, %v18364_v29  ;;  %vm18484_vm7 = vcmp.lt.f32.partialorder %v5883_v37, 5e-05  ;;  %vm18527_vm0 = vmand %vm18467_vm11, %vm5914_vm3 }
 0x5cd   :  { %vm5915_vm12 = vcmp.ge.f32.partialorder %v18404_v21, 0.0  ;;  %v19635_v41 = vmov 0  ;;  %v18498_v22 = vsub.f32 %v18110_v11, %v7813_v1  ;;  %v5888_v2 = vand.u32 2147483647, %v18366_v57 }
 0x5ce   :  { %v19636_v41 = vsel %vm18493_vm5, 4294967295, %v19635_v41  ;;  %vm18501_vm6 = vcmp.lt.f32.partialorder %v5884_v24, 5e-05  ;;  %v19639_v14 = vmov 0  ;;  %v18515_v11 = vsub.f32 %v18119_v38, %v7814_v43  ;;  %vm18540_vm13 = vmand %vm18484_vm7, %vm5915_vm12 }
 0x5cf   :  { %v19640_v14 = vsel %vm18510_vm15, 4294967295, %v19639_v14  ;;  %v5889_v39 = vand.u32 2147483647, %v18372_v13  ;;  %vm18518_vm9 = vcmp.lt.f32.partialorder %v5885_v33, 5e-05  ;;  %v19643_v57 = vmov 0 }
 0x5d0   :  { %v19644_v57 = vsel %vm18527_vm0, 4294967295, %v19643_v57  ;;  %v18532_v38 = vsub.f32 %v18128_v32, %v7815_v28  ;;  %v5890_v20 = vand.u32 2147483647, %v18374_v36  ;;  %vm5902_vm14 = vcmp.lt.f32.partialorder %v5886_v9, 5e-05 }
 0x5d1   :  { %vm5918_vm4 = vcmp.ge.f32.partialorder %v18447_v12, 0.0  ;;  %v19645_v13 = vmov 0  ;;  %v5891_v18 = vand.u32 2147483647, %v18379_v63  ;;  %vm5903_vm11 = vcmp.lt.f32.partialorder %v5887_v60, 5e-05 }
 0x5d2   :  { %v19646_v13 = vsel %vm18540_vm13, 4294967295, %v19645_v13  ;;  %vm5919_vm3 = vcmp.ge.f32.partialorder %v18464_v58, 0.0  ;;  %vm19647_vm0 = vcmp.ge.f32.partialorder %v18413_v48, 0.0  ;;  %v19648_v32 = vmov 0  ;;  %vm18574_vm10 = vmand %vm5902_vm14, %vm5918_vm4 }
 0x5d3   :  { %vm18550_vm15 = vmand %vm18501_vm6, %vm19647_vm0  ;;  %vm5940_vm5 = vcmp.le.f32.partialorder %v18361_v6, 4.0  ;;  %vm18555_vm2 = vcmp.lt.f32.partialorder %v5888_v2, 5e-05  ;;  %v19650_v36 = vmov 0  ;;  %vm5920_vm7 = vcmp.ge.f32.partialorder %v18481_v15, 0.0 }
 0x5d4   :  { %v19649_v32 = vsel %vm18550_vm15, 4294967295, %v19648_v32  ;;  %v19651_v36 = vsel %vm18555_vm2, 4294967295, %v19650_v36  ;;  %vm19652_vm12 = vcmp.ge.f32.partialorder %v18430_v7, 0.0  ;;  %v19653_v4 = vmov 0  ;;  %vm5956_vm4 = vmand %vm18425_vm1, %vm5940_vm5 }
 0x5d5   :  { %vm18564_vm13 = vmand %vm18518_vm9, %vm19652_vm12  ;;  %vm5941_vm6 = vcmp.le.f32.partialorder %v18369_v34, 4.0  ;;  %vm18569_vm0 = vcmp.lt.f32.partialorder %v5889_v39, 5e-05  ;;  %v19657_v6 = vmov 0  ;;  %vm18579_vm2 = vcmp.lt.f32.partialorder %v5890_v20, 5e-05 }
 0x5d6   :  { %v19654_v4 = vsel %vm18564_vm13, 4294967295, %v19653_v4  ;;  %v19658_v6 = vsel %vm18574_vm10, 4294967295, %v19657_v6  ;;  %vm5922_vm9 = vcmp.ge.f32.partialorder %v18515_v11, 0.0  ;;  %vm18584_vm12 = vmand %vm5903_vm11, %vm5919_vm3  ;;  %vm18591_vm14 = vcmp.lt.f32.partialorder %v5891_v18, 5e-05 }
 0x5d7   :  { %vm19665_vm15 = vnez %v19651_v36  ;;  %vm19668_vm3 = vmmov %vm18442_vm8  ;;  %v7884_v55 = vmov 0.0   ;;  %vm19669_vm1 = vcmp.ge.f32.partialorder %v18498_v22, 0.0  ;;  %v19670_v54 = vmov 0 }
 0x5d8   :  { %vm18598_vm10 = vmand %vm19665_vm15, %vm5920_vm7  ;;  %v6564_v46 = vsel %vm5956_vm4, 1.0, %v7884_v55  ;;  %vm19672_vm7 = vcmp.le.f32.partialorder %v18377_v5, 4.0  ;;  %vm19673_vm8 = vnez %v19628_v19  ;;  %v19674_v45 = vmov 0 }
 0x5d9   :  { %vm5957_vm13 = vmand %vm19668_vm3, %vm5941_vm6  ;;  %6004 = vst [vmem:[#allocation7] sm:$0xff] %v6564_v46  ;;  %vm19676_vm4 = vcmp.le.f32.partialorder %v18382_v30, 4.0  ;;  %vm19677_vm3 = vnez %v19632_v26  ;;  %v19679_v25 = vmov 0 }
 0x5da   :  { %vm18609_vm5 = vmand %vm18569_vm0, %vm19669_vm1  ;;  %v6565_v59 = vsel %vm5957_vm13, 1.0, %v7884_v55  ;;  %vm5946_vm0 = vcmp.le.f32.partialorder %v18396_v42, 4.0 }
 0x5db   :  { %v19671_v54 = vsel %vm18609_vm5, 4294967295, %v19670_v54  ;;  %vm5958_vm11 = vmand %vm19673_vm8, %vm19672_vm7  ;;  %6005 = vst [vmem:[#allocation7 + $0x8] sm:$0xff] %v6565_v59  ;;  %vm19678_vm8 = vcmp.ge.f32.partialorder %v18532_v38, 0.0  ;;  %vm19682_vm7 = vnez %v19636_v41  ;;  %vm5951_vm5 = vcmp.le.f32.partialorder %v18464_v58, 4.0 }
 0x5dc   :  { %vm18622_vm6 = vmand %vm18579_vm2, %vm5922_vm9  ;;  %v6566_v5 = vsel %vm5958_vm11, 1.0, %v7884_v55  ;;  %vm5947_vm2 = vcmp.le.f32.partialorder %v18404_v21, 4.0  ;;  %vm19681_vm9 = vcmp.le.f32.partialorder %v18385_v49, 4.0  ;;  %vm5948_vm11 = vcmp.le.f32.partialorder %v18413_v48, 4.0 }
 0x5dd   :  { %v19675_v45 = vsel %vm18622_vm6, 4294967295, %v19674_v45  ;;  %vm5959_vm1 = vmand %vm19677_vm3, %vm19676_vm4  ;;  %6006 = vst [vmem:[#allocation7 + $0x10] sm:$0xff] %v6566_v5  ;;  %vm19683_vm4 = vcmp.le.f32.partialorder %v18388_v10, 4.0  ;;  %vm19684_vm3 = vnez %v19640_v14 }
 0x5de   :  { %vm18635_vm13 = vmand %vm18591_vm14, %vm19678_vm8  ;;  %v6567_v30 = vsel %vm5959_vm1, 1.0, %v7884_v55  ;;  %vm5949_vm14 = vcmp.le.f32.partialorder %v18430_v7, 4.0  ;;  %vm19685_vm8 = vnez %v19644_v57  ;;  %vm19686_vm1 = vnez %v19646_v13 }
 0x5df   :  { %v19680_v25 = vsel %vm18635_vm13, 4294967295, %v19679_v25  ;;  %vm5960_vm15 = vmand %vm19682_vm7, %vm19681_vm9  ;;  %6007 = vst [vmem:[#allocation7 + $0x18] sm:$0xff] %v6567_v30  ;;  %vm5950_vm9 = vcmp.le.f32.partialorder %v18447_v12, 4.0 }
 0x5e0   :  { %vm5961_vm6 = vmand %vm19684_vm3, %vm19683_vm4  ;;  %v6568_v42 = vsel %vm5960_vm15, 1.0, %v7884_v55  ;;  %vm19687_vm4 = vnez %v19649_v32  ;;  %vm5952_vm3 = vcmp.le.f32.partialorder %v18481_v15, 4.0 }
 0x5e1   :  { %vm5962_vm13 = vmand %vm19685_vm8, %vm5946_vm0  ;;  %v6569_v49 = vsel %vm5961_vm6, 1.0, %v7884_v55  ;;  %6008 = vst [vmem:[#allocation7 + $0x20] sm:$0xff] %v6568_v42  ;;  %vm19688_vm0 = vnez %v19654_v4  ;;  %vm5953_vm8 = vcmp.le.f32.partialorder %v18498_v22, 4.0 }
 0x5e2   :  { %vm5963_vm7 = vmand %vm19686_vm1, %vm5947_vm2  ;;  %v6570_v0 = vsel %vm5962_vm13, 1.0, %v7884_v55  ;;  %6009 = vst [vmem:[#allocation7 + $0x28] sm:$0xff] %v6569_v49  ;;  %vm19689_vm2 = vnez %v19658_v6  ;;  %vm5954_vm1 = vcmp.le.f32.partialorder %v18515_v11, 4.0 }
 0x5e3   :  { %vm5964_vm15 = vmand %vm19687_vm4, %vm5948_vm11  ;;  %v6571_v10 = vsel %vm5963_vm7, 1.0, %v7884_v55  ;;  %6010 = vst [vmem:[#allocation7 + $0x30] sm:$0xff] %v6570_v0  ;;  %vm5955_vm7 = vcmp.le.f32.partialorder %v18532_v38, 4.0 }
 0x5e4   :  { %vm5965_vm6 = vmand %vm19688_vm0, %vm5949_vm14  ;;  %v6572_v21 = vsel %vm5964_vm15, 1.0, %v7884_v55  ;;  %6011 = vst [vmem:[#allocation7 + $0x38] sm:$0xff] %v6571_v10  ;;  %vm19691_vm15 = vnez %v19675_v45 }
 0x5e5   :  { %vm5966_vm13 = vmand %vm19689_vm2, %vm5950_vm9  ;;  %v6573_v51 = vsel %vm5965_vm6, 1.0, %v7884_v55  ;;  %6012 = vst [vmem:[#allocation7 + $0x40] sm:$0xff] %v6572_v21  ;;  %vm19690_vm9 = vnez %v19671_v54 }
 0x5e6   :  { %vm5967_vm11 = vmand %vm18584_vm12, %vm5951_vm5  ;;  %v6574_v44 = vsel %vm5966_vm13, 1.0, %v7884_v55  ;;  %6013 = vst [vmem:[#allocation7 + $0x48] sm:$0xff] %v6573_v51  ;;  %vm19692_vm12 = vnez %v19680_v25 }
 0x5e7   :  { %vm5968_vm14 = vmand %vm18598_vm10, %vm5952_vm3  ;;  %v6575_v17 = vsel %vm5967_vm11, 1.0, %v7884_v55  ;;  %6014 = vst [vmem:[#allocation7 + $0x50] sm:$0xff] %v6574_v44 }
 0x5e8   :  { %vm5969_vm4 = vmand %vm19690_vm9, %vm5953_vm8  ;;  %v6576_v48 = vsel %vm5968_vm14, 1.0, %v7884_v55  ;;  %6015 = vst [vmem:[#allocation7 + $0x58] sm:$0xff] %v6575_v17 }
 0x5e9   :  { %vm5970_vm0 = vmand %vm19691_vm15, %vm5954_vm1  ;;  %v6577_v37 = vsel %vm5969_vm4, 1.0, %v7884_v55  ;;  %6016 = vst [vmem:[#allocation7 + $0x60] sm:$0xff] %v6576_v48 }
 0x5ea   :  { %vm5971_vm5 = vmand %vm19692_vm12, %vm5955_vm7  ;;  %v6578_v62 = vsel %vm5970_vm0, 1.0, %v7884_v55  ;;  %6017 = vst [vmem:[#allocation7 + $0x68] sm:$0xff] %v6577_v37 }
 0x5eb   :  { %v6579_v53 = vsel %vm5971_vm5, 1.0, %v7884_v55  ;;  %6018 = vst [vmem:[#allocation7 + $0x70] sm:$0xff] %v6578_v62 }
 0x5ec   :  { %6019 = vst [vmem:[#allocation7 + $0x78] sm:$0xff] %v6579_v53 }
 0x5ed   :  { %7867 = shalt.err (!%p7864_p0)
}
 0x5ee   :  { %6029 = dma.vmem_to_hbm [thread:$0]  %s6027_s1, 2048, %s18681_s2, [#allocation4]  }
 0x5ef   :  { %7880 = dma.done.wait [#allocation4], 2048  }
 0x5f0   :  { %7881 = vsyncadd [#allocation4], 4294965248 }
 0x5f1   :  { %6033 = vsyncpa [#allocation3], 1 }
 0x5f2   :  { %6034 = vsyncpa [#allocation6], 1 }
 0x5f3   :  { %6035 = vsyncpa [#allocation4], 1 }

</bundles_post_ra>
